<compile_context>
chip_gen: v7x
topology: tpu7x:2x2x1
jax: 0.10.0
libtpu: 0.0.40
codegen_flags: <defaults>
</compile_context>

<pallas_src>
import functools
import math

import jax
import jax.numpy as jnp
from jax.experimental import pallas as pl
from jax.experimental.pallas import tpu as pltpu


def _softplus(x):
    # matches torch.nn.functional.softplus(beta=1, threshold=20)
    return jnp.where(x > 20.0, x, jnp.log1p(jnp.exp(x)))


def _silu(x):
    return x * jax.nn.sigmoid(x)


def _largest_divisor_leq(n, cap, multiple):
    cap = min(cap, n)
    for d in range(cap, 0, -1):
        if n % d == 0 and d % multiple == 0:
            return d
    return None


def _pick_seq_tile(L, target):
    # prefer MXU-friendly tile edges (256 for v6e/v7x, 128 for v5e), then 8.
    for m in (256, 128, 8, 1):
        d = _largest_divisor_leq(L, target, m)
        if d is not None:
            return d
    return L


def _pick_di_block(d_inner, target):
    d = _largest_divisor_leq(d_inner, target, 128)
    if d is None:
        d = _largest_divisor_leq(d_inner, target, 1)
    return d


# ----------------------------- Pallas kernel ------------------------------ #
def _mamba_block_kernel(
    x_ref, rmsw_ref, w_in_ref, convw_ref, convb_ref, w_bc_ref, w_dtin_ref,
    w_dt_ref, b_dt_ref, a_t_ref, d_param_ref, w_out_ref,
    o_ref,
    h_ref, tail_ref, pad_ref, u_ref, z_ref, delta_ref, bc_ref, y_ref,
    *, Lt, d_inner, d_state, d_conv, eps, chunk, di_blk,
):
    tile = pl.program_id(1)

    # --- reset cross-tile carries at the start of every batch row ---
    @pl.when(tile == 0)
    def _():
        h_ref[...] = jnp.zeros_like(h_ref)
        tail_ref[...] = jnp.zeros_like(tail_ref)

    x = x_ref[0]                                                   # (Lt, D)

    # --- RMSNorm (eps = f32 machine eps; matches torch nn.RMSNorm(eps=None)) ---
    ms = jnp.mean(x * x, axis=-1, keepdims=True)
    xn = x * jax.lax.rsqrt(ms + eps) * rmsw_ref[...]

    # --- fused in_proj (bias=False); bf16 operands feed the MXU ---
    xz = jnp.dot(xn.astype(w_in_ref.dtype), w_in_ref[...],
                 preferred_element_type=jnp.float32)               # (Lt, 2*d_inner)
    xi = xz[:, :d_inner]                                           # conv branch
    z_ref[...] = xz[:, d_inner:]                                   # gate (used after scan)

    # --- causal depthwise Conv1d with cross-tile tail carry, then SiLU ---
    pad_ref[pl.ds(0, d_conv - 1), :] = tail_ref[...]
    pad_ref[pl.ds(d_conv - 1, Lt), :] = xi
    tail_ref[...] = pad_ref[pl.ds(Lt, d_conv - 1), :]              # xi tail for next tile
    conv = jnp.zeros((Lt, d_inner), jnp.float32)
    for k in range(d_conv):
        conv = conv + pad_ref[pl.ds(k, Lt), :] * convw_ref[k:k + 1, :]
    u_ref[...] = _silu(conv + convb_ref[...])

    # --- x_proj: lane-aligned [B | C] slab (2*d_state = 128 cols), f32 ---
    u = u_ref[...]
    bc_ref[...] = jnp.dot(u, w_bc_ref[...], preferred_element_type=jnp.float32)

    # --- dt path (narrow): low-rank proj -> dt_proj -> softplus ---
    dt_low = jnp.dot(u, w_dtin_ref[...], preferred_element_type=jnp.float32)
    delta_ref[...] = _softplus(
        jnp.dot(dt_low, w_dt_ref[...], preferred_element_type=jnp.float32)
        + b_dt_ref[...])

    # --- selective scan: blocked over d_inner slabs, chunked over rows ---
    # state layout (d_state, d_inner): d_inner on the lane axis.
    n_chunks = Lt // chunk
    for j in range(d_inner // di_blk):
        j0 = j * di_blk
        a_slab = a_t_ref[:, pl.ds(j0, di_blk)]                     # (d_state, di_blk)

        def chunk_body(ci, h):                                     # h: (d_state, di_blk)
            off = pl.multiple_of(ci * chunk, chunk)
            delta_c = delta_ref[pl.ds(off, chunk), pl.ds(j0, di_blk)]   # (chunk, di_blk)
            u_c = u_ref[pl.ds(off, chunk), pl.ds(j0, di_blk)]           # (chunk, di_blk)
            b_cols = bc_ref[pl.ds(off, chunk), pl.ds(0, d_state)][:, :, None]
            c_cols = bc_ref[pl.ds(off, chunk), pl.ds(d_state, d_state)][:, :, None]
            dA_c = jnp.exp(delta_c[:, None, :] * a_slab[None, :, :])    # (chunk, d_state, di_blk)
            dBu_c = (delta_c * u_c)[:, None, :] * b_cols                # (chunk, d_state, di_blk)
            ys = []
            for t in range(chunk):                                      # short unrolled loop
                h = dA_c[t] * h + dBu_c[t]
                # fold the C-reduction into the recurrence: y_t = sum_s h[s,:]*C_t[s]
                ys.append(jnp.sum(h * c_cols[t], axis=0, keepdims=True))
            # one lane-dense store per chunk (not per row)
            y_ref[pl.ds(off, chunk), pl.ds(j0, di_blk)] = jnp.concatenate(ys, axis=0)
            return h

        h_slab = jax.lax.fori_loop(0, n_chunks, chunk_body,
                                   h_ref[:, pl.ds(j0, di_blk)])
        h_ref[:, pl.ds(j0, di_blk)] = h_slab                        # carry to next L tile

    # --- skip term, output gate, out_proj (bf16 operands), residual ---
    y = y_ref[...] + u_ref[...] * d_param_ref[...]
    y = y * _silu(z_ref[...])
    out = jnp.dot(y.astype(w_out_ref.dtype), w_out_ref[...],
                  preferred_element_type=jnp.float32)               # (Lt, D)
    o_ref[0] = out + x


# ------------------------------- wrapper ----------------------------------- #
def mamba_block_forward(x, params, *, seq_tile=256, chunk=8, di_block=512,
                        use_bf16_matmul=True):
    B, L, D = x.shape
    d_inner = params["w_in_x"].shape[1]
    d_state = params["w_b"].shape[1]
    d_conv = params["conv_w"].shape[0]
    eps = float(jnp.finfo(jnp.float32).eps)

    Lt = _pick_seq_tile(L, seq_tile)
    if Lt < d_conv - 1:                   # conv tail carry needs >= d_conv-1 rows
        Lt = L
    ck = min(chunk, Lt)
    while Lt % ck:
        ck -= 1
    di_blk = _pick_di_block(d_inner, min(di_block, d_inner))

    mx_dtype = jnp.bfloat16 if use_bf16_matmul else jnp.float32

    # one-time weight prep (fusion / transpose / cast) outside the kernel.
    w_in = jnp.concatenate([params["w_in_x"], params["w_in_z"]],
                           axis=1).astype(mx_dtype)                 # (D, 2*d_inner)
    w_bc = jnp.concatenate([params["w_b"], params["w_c"]], axis=1)  # (d_inner, 2*d_state)
    a_t = (-jnp.exp(params["a_log"])).T                             # (d_state, d_inner)
    w_out = params["w_out"].astype(mx_dtype)                        # (d_inner, D)

    weights = [params["rms_w"], w_in, params["conv_w"], params["conv_b"],
               w_bc, params["w_dtin"], params["w_dt"], params["b_dt"],
               a_t, params["d_param"], w_out]

    kern = functools.partial(
        _mamba_block_kernel,
        Lt=Lt, d_inner=d_inner, d_state=d_state, d_conv=d_conv,
        eps=eps, chunk=ck, di_blk=di_blk,
    )

    def const_map(ndim):
        return lambda b, t, _nd=ndim: (0,) * _nd

    x_spec = pl.BlockSpec((1, Lt, D), lambda b, t: (b, t, 0))
    out_spec = pl.BlockSpec((1, Lt, D), lambda b, t: (b, t, 0))

    scratch = [
        pltpu.VMEM((d_state, d_inner), jnp.float32),           # h (carried across L tiles)
        pltpu.VMEM((d_conv - 1, d_inner), jnp.float32),        # conv tail carry
        pltpu.VMEM((Lt + d_conv - 1, d_inner), jnp.float32),   # padded conv input
        pltpu.VMEM((Lt, d_inner), jnp.float32),                # u (post-conv SiLU)
        pltpu.VMEM((Lt, d_inner), jnp.float32),                # z gate
        pltpu.VMEM((Lt, d_inner), jnp.float32),                # delta
        pltpu.VMEM((Lt, 2 * d_state), jnp.float32),            # [B | C]
        pltpu.VMEM((Lt, d_inner), jnp.float32),                # y (scan output)
    ]

    def build(weight_pipeline_mode):
        def wspec(w):
            if weight_pipeline_mode is None:
                return pl.BlockSpec(w.shape, const_map(w.ndim))
            return pl.BlockSpec(w.shape, const_map(w.ndim),
                                pipeline_mode=weight_pipeline_mode)
        return pl.pallas_call(
            kern,
            out_shape=jax.ShapeDtypeStruct((B, L, D), jnp.float32),
            grid_spec=pltpu.PrefetchScalarGridSpec(
                num_scalar_prefetch=0,
                grid=(B, L // Lt),
                in_specs=[x_spec] + [wspec(w) for w in weights],
                out_specs=out_spec,
                scratch_shapes=scratch,
            ),
            compiler_params=pltpu.CompilerParams(
                dimension_semantics=("parallel", "arbitrary"),
                vmem_limit_bytes=64 * 1024 * 1024,
            ),
        )

    try:
        # Weight index maps are constant -> single-buffer them (halves weight VMEM).
        return build(pl.Buffered(1))(x, *weights)
    except Exception:
        # Fallback for jax versions where Buffered(1) is rejected by the pipeliner.
        return build(None)(x, *weights)


# --------------------------- parameter init -------------------------------- #
def init_params(key, embed_dim, d_state=64, d_conv=4, expand=2):
    d_inner = expand * embed_dim
    dt_rank = math.ceil(embed_dim / 16)
    ks = jax.random.split(key, 7)
    s = 0.05
    w_in = jax.random.normal(ks[0], (embed_dim, 2 * d_inner), jnp.float32) * s
    conv_w = jax.random.normal(ks[1], (d_conv, d_inner), jnp.float32) * s     # depthwise taps
    conv_b = jax.random.normal(ks[2], (1, d_inner), jnp.float32) * s
    w_x = jax.random.normal(ks[3], (d_inner, dt_rank + 2 * d_state), jnp.float32) * s
    w_dt = jax.random.normal(ks[4], (dt_rank, d_inner), jnp.float32) * (dt_rank ** -0.5)
    # mamba-style dt bias: inverse softplus of dt ~ Uniform(log 1e-3, log 1e-1)
    dt0 = jnp.exp(jax.random.uniform(ks[5], (d_inner,), jnp.float32)
                  * (math.log(0.1) - math.log(0.001)) + math.log(0.001))
    b_dt = (dt0 + jnp.log(-jnp.expm1(-dt0)))[None, :]
    a_log = jnp.log(jnp.tile(jnp.arange(1, d_state + 1, dtype=jnp.float32)[None, :],
                             (d_inner, 1)))
    w_out = jax.random.normal(ks[6], (d_inner, embed_dim), jnp.float32) * s
    return dict(
        rms_w=jnp.ones((1, embed_dim), jnp.float32),
        w_in_x=w_in[:, :d_inner],
        w_in_z=w_in[:, d_inner:],
        conv_w=conv_w,
        conv_b=conv_b,
        w_dtin=w_x[:, :dt_rank],
        w_b=w_x[:, dt_rank:dt_rank + d_state],
        w_c=w_x[:, dt_rank + d_state:],
        w_dt=w_dt,
        b_dt=b_dt,
        a_log=a_log,
        d_param=jnp.ones((1, d_inner), jnp.float32),
        w_out=w_out,
    )


# --------------------------- pure-JAX reference ----------------------------- #
def reference(x, params):
    eps = float(jnp.finfo(jnp.float32).eps)
    B, L, D = x.shape
    d_conv = params["conv_w"].shape[0]

    ms = jnp.mean(x * x, axis=-1, keepdims=True)
    xn = x * jax.lax.rsqrt(ms + eps) * params["rms_w"][0]
    xi = xn @ params["w_in_x"]
    z = xn @ params["w_in_z"]

    conv = jnp.zeros_like(xi)
    for k in range(d_conv):
        shift = d_conv - 1 - k
        xs = jnp.pad(xi, ((0, 0), (shift, 0), (0, 0)))[:, :L, :]
        conv = conv + xs * params["conv_w"][k]
    conv = conv + params["conv_b"][0]
    u = _silu(conv)

    dt_low = u @ params["w_dtin"]
    Bm = u @ params["w_b"]
    Cm = u @ params["w_c"]
    delta = _softplus(dt_low @ params["w_dt"] + params["b_dt"][0])

    A = -jnp.exp(params["a_log"])
    dA = jnp.exp(delta[..., None] * A)                      # (B, L, d_inner, d_state)
    dBu = (delta * u)[..., None] * Bm[:, :, None, :]

    def step(h, inp):
        dA_t, dBu_t, C_t = inp
        h = dA_t * h + dBu_t
        y = jnp.sum(h * C_t[:, None, :], axis=-1)
        return h, y

    d_inner = params["w_in_x"].shape[1]
    h0 = jnp.zeros((B, d_inner, params["w_b"].shape[1]), jnp.float32)
    _, ys = jax.lax.scan(step, h0, (dA.transpose(1, 0, 2, 3),
                                    dBu.transpose(1, 0, 2, 3),
                                    Cm.transpose(1, 0, 2)))
    y = ys.transpose(1, 0, 2)
    y = y + u * params["d_param"][0]
    y = y * _silu(z)
    return y @ params["w_out"] + x


if __name__ == "__main__":
    key = jax.random.PRNGKey(0)
    B, L, D = 2, 16, 32      # batch, seq, embed_dim -> d_inner=64, d_state=64
    kx, kp = jax.random.split(key)
    x = jax.random.normal(kx, (B, L, D), jnp.float32)
    params = init_params(kp, D)
    ref = reference(x, params)

    # 1) structural validation: f32 matmuls, forced L-tiling (2 tiles) and
    #    d_inner slab blocking (2 slabs) to exercise the cross-tile carries.
    out_f32 = jax.block_until_ready(
        mamba_block_forward(x, params, seq_tile=8, di_block=32,
                            use_bf16_matmul=False))
    err = float(jnp.max(jnp.abs(out_f32 - ref)))
    assert out_f32.shape == (B, L, D)
    assert err < 1e-3, f"f32 max abs err {err}"

    # 2) default (perf) configuration: bf16 MXU operands for in/out projections.
    #    Tolerance widened only because bf16 operands feed the MXU.
    out = jax.block_until_ready(mamba_block_forward(x, params))
    err_bf16 = float(jnp.max(jnp.abs(out - ref)))
    assert out.shape == (B, L, D)
    assert err_bf16 < 2e-2, f"bf16 max abs err {err_bf16}"

    print("KERNEL_OK")
</pallas_src>

<mosaic_0001>
module attributes {stable_mosaic.version = 11 : i64} {
  func.func @_mamba_block_kernel(%arg0: i32, %arg1: i32, %arg2: memref<1x8x32xf32, #tpu.memory_space<vmem>>, %arg3: memref<1x32xf32, #tpu.memory_space<vmem>>, %arg4: memref<32x128xf32, #tpu.memory_space<vmem>>, %arg5: memref<4x64xf32, #tpu.memory_space<vmem>>, %arg6: memref<1x64xf32, #tpu.memory_space<vmem>>, %arg7: memref<64x128xf32, #tpu.memory_space<vmem>>, %arg8: memref<64x2xf32, #tpu.memory_space<vmem>>, %arg9: memref<2x64xf32, #tpu.memory_space<vmem>>, %arg10: memref<1x64xf32, #tpu.memory_space<vmem>>, %arg11: memref<64x64xf32, #tpu.memory_space<vmem>>, %arg12: memref<1x64xf32, #tpu.memory_space<vmem>>, %arg13: memref<64x32xf32, #tpu.memory_space<vmem>>, %arg14: memref<1x8x32xf32, #tpu.memory_space<vmem>>, %arg15: memref<64x64xf32, #tpu.memory_space<vmem>>, %arg16: memref<3x64xf32, #tpu.memory_space<vmem>>, %arg17: memref<11x64xf32, #tpu.memory_space<vmem>>, %arg18: memref<8x64xf32, #tpu.memory_space<vmem>>, %arg19: memref<8x64xf32, #tpu.memory_space<vmem>>, %arg20: memref<8x64xf32, #tpu.memory_space<vmem>>, %arg21: memref<8x128xf32, #tpu.memory_space<vmem>>, %arg22: memref<8x64xf32, #tpu.memory_space<vmem>>) attributes {dimension_semantics = [#tpu.dimension_semantics<parallel>, #tpu.dimension_semantics<arbitrary>], iteration_bounds = array<i64: 2, 2>, scalar_prefetch = 0 : i64, scratch_operands = 8 : i64, tpu.core_type = #tpu.core_type<tc>, window_params = [{transform_indices = @transform_0, window_bounds = array<i64: 1, 8, 32>}, {pipeline_mode = #tpu.pipeline_mode<synchronous>, transform_indices = @transform_1, window_bounds = array<i64: 1, 32>}, {pipeline_mode = #tpu.pipeline_mode<synchronous>, transform_indices = @transform_2, window_bounds = array<i64: 32, 128>}, {pipeline_mode = #tpu.pipeline_mode<synchronous>, transform_indices = @transform_3, window_bounds = array<i64: 4, 64>}, {pipeline_mode = #tpu.pipeline_mode<synchronous>, transform_indices = @transform_4, window_bounds = array<i64: 1, 64>}, {pipeline_mode = #tpu.pipeline_mode<synchronous>, transform_indices = @transform_5, window_bounds = array<i64: 64, 128>}, {pipeline_mode = #tpu.pipeline_mode<synchronous>, transform_indices = @transform_6, window_bounds = array<i64: 64, 2>}, {pipeline_mode = #tpu.pipeline_mode<synchronous>, transform_indices = @transform_7, window_bounds = array<i64: 2, 64>}, {pipeline_mode = #tpu.pipeline_mode<synchronous>, transform_indices = @transform_8, window_bounds = array<i64: 1, 64>}, {pipeline_mode = #tpu.pipeline_mode<synchronous>, transform_indices = @transform_9, window_bounds = array<i64: 64, 64>}, {pipeline_mode = #tpu.pipeline_mode<synchronous>, transform_indices = @transform_10, window_bounds = array<i64: 1, 64>}, {pipeline_mode = #tpu.pipeline_mode<synchronous>, transform_indices = @transform_11, window_bounds = array<i64: 64, 32>}, {transform_indices = @transform_12, window_bounds = array<i64: 1, 8, 32>}]} {
    %c0_i32 = arith.constant 0 : i32
    %0 = arith.cmpi eq, %arg1, %c0_i32 : i32
    %1 = arith.extui %0 : i1 to i32
    %c0_i32_0 = arith.constant 0 : i32
    %2 = arith.cmpi ne, %1, %c0_i32_0 : i32
    scf.if %2 {
      %cst_113 = arith.constant 0.000000e+00 : f32
      %346 = vector.broadcast %cst_113 : f32 to vector<64x64xf32>
      %c0_114 = arith.constant 0 : index
      %c0_115 = arith.constant 0 : index
      %347 = vector.load %arg15[%c0_114, %c0_115] : memref<64x64xf32, #tpu.memory_space<vmem>>, vector<64x64xf32>
      tpu.vector_store %arg15[%c0_114, %c0_115], %346 {strides = array<i32>} : memref<64x64xf32, #tpu.memory_space<vmem>>, vector<64x64xf32>,
      %cst_116 = arith.constant 0.000000e+00 : f32
      %348 = vector.broadcast %cst_116 : f32 to vector<3x64xf32>
      %c0_117 = arith.constant 0 : index
      %c0_118 = arith.constant 0 : index
      %349 = vector.load %arg16[%c0_117, %c0_118] : memref<3x64xf32, #tpu.memory_space<vmem>>, vector<3x64xf32>
      tpu.vector_store %arg16[%c0_117, %c0_118], %348 {strides = array<i32>} : memref<3x64xf32, #tpu.memory_space<vmem>>, vector<3x64xf32>,
    } else {
    }
    %c0 = arith.constant 0 : index
    %c0_1 = arith.constant 0 : index
    %c0_2 = arith.constant 0 : index
    %3 = vector.load %arg2[%c0, %c0_1, %c0_2] : memref<1x8x32xf32, #tpu.memory_space<vmem>>, vector<1x8x32xf32>
    %4 = vector.shape_cast %3 : vector<1x8x32xf32> to vector<8x32xf32>
    %5 = arith.mulf %4, %4 : vector<8x32xf32>
    %cst = arith.constant dense<0.000000e+00> : vector<8xf32>
    %6 = vector.multi_reduction <add>, %5, %cst [1] : vector<8x32xf32> to vector<8xf32>
    %7 = vector.shape_cast %6 : vector<8xf32> to vector<8x1xf32>
    %cst_3 = arith.constant 3.200000e+01 : f32
    %8 = vector.broadcast %cst_3 : f32 to vector<8x1xf32>
    %9 = arith.divf %7, %8 : vector<8x1xf32>
    %cst_4 = arith.constant 1.1920929E-7 : f32
    %10 = vector.broadcast %cst_4 : f32 to vector<8x1xf32>
    %11 = arith.addf %9, %10 : vector<8x1xf32>
    %12 = math.rsqrt %11 : vector<8x1xf32>
    %13 = vector.broadcast %12 : vector<8x1xf32> to vector<8x32xf32>
    %14 = arith.mulf %4, %13 : vector<8x32xf32>
    %c0_5 = arith.constant 0 : index
    %c0_6 = arith.constant 0 : index
    %15 = vector.load %arg3[%c0_5, %c0_6] : memref<1x32xf32, #tpu.memory_space<vmem>>, vector<1x32xf32>
    %16 = vector.broadcast %15 : vector<1x32xf32> to vector<8x32xf32>
    %17 = arith.mulf %14, %16 : vector<8x32xf32>
    %c0_7 = arith.constant 0 : index
    %c0_8 = arith.constant 0 : index
    %18 = vector.load %arg4[%c0_7, %c0_8] : memref<32x128xf32, #tpu.memory_space<vmem>>, vector<32x128xf32>
    %cst_9 = arith.constant dense<0.000000e+00> : vector<8x128xf32>
    %19 = tpu.matmul %17, %18, %cst_9 {dimension_numbers = #tpu.dot_dimension_numbers<[1], [0], [0], [1], [0, 0, 1, 1], [], []>} : vector<8x32xf32>, vector<32x128xf32>, vector<8x128xf32> -> vector<8x128xf32>
    %20 = vector.extract_strided_slice %19 {offsets = [0, 0], sizes = [8, 64], strides = [1, 1]} : vector<8x128xf32> to vector<8x64xf32>
    %21 = vector.extract_strided_slice %19 {offsets = [0, 64], sizes = [8, 64], strides = [1, 1]} : vector<8x128xf32> to vector<8x64xf32>
    %c0_10 = arith.constant 0 : index
    %c0_11 = arith.constant 0 : index
    %22 = vector.load %arg19[%c0_10, %c0_11] : memref<8x64xf32, #tpu.memory_space<vmem>>, vector<8x64xf32>
    tpu.vector_store %arg19[%c0_10, %c0_11], %21 {strides = array<i32>} : memref<8x64xf32, #tpu.memory_space<vmem>>, vector<8x64xf32>,
    %c0_12 = arith.constant 0 : index
    %c0_13 = arith.constant 0 : index
    %23 = vector.load %arg16[%c0_12, %c0_13] : memref<3x64xf32, #tpu.memory_space<vmem>>, vector<3x64xf32>
    %c0_14 = arith.constant 0 : index
    %c0_15 = arith.constant 0 : index
    %24 = vector.load %arg17[%c0_14, %c0_15] : memref<11x64xf32, #tpu.memory_space<vmem>>, vector<3x64xf32>
    tpu.vector_store %arg17[%c0_14, %c0_15], %23 {strides = array<i32>} : memref<11x64xf32, #tpu.memory_space<vmem>>, vector<3x64xf32>,
    %c3 = arith.constant 3 : index
    %c0_16 = arith.constant 0 : index
    %25 = vector.load %arg17[%c3, %c0_16] : memref<11x64xf32, #tpu.memory_space<vmem>>, vector<8x64xf32>
    tpu.vector_store %arg17[%c3, %c0_16], %20 {strides = array<i32>} : memref<11x64xf32, #tpu.memory_space<vmem>>, vector<8x64xf32>,
    %c8 = arith.constant 8 : index
    %c0_17 = arith.constant 0 : index
    %26 = vector.load %arg17[%c8, %c0_17] : memref<11x64xf32, #tpu.memory_space<vmem>>, vector<3x64xf32>
    %c0_18 = arith.constant 0 : index
    %c0_19 = arith.constant 0 : index
    %27 = vector.load %arg16[%c0_18, %c0_19] : memref<3x64xf32, #tpu.memory_space<vmem>>, vector<3x64xf32>
    tpu.vector_store %arg16[%c0_18, %c0_19], %26 {strides = array<i32>} : memref<3x64xf32, #tpu.memory_space<vmem>>, vector<3x64xf32>,
    %cst_20 = arith.constant 0.000000e+00 : f32
    %28 = vector.broadcast %cst_20 : f32 to vector<8x64xf32>
    %c0_21 = arith.constant 0 : index
    %c0_22 = arith.constant 0 : index
    %29 = vector.load %arg17[%c0_21, %c0_22] : memref<11x64xf32, #tpu.memory_space<vmem>>, vector<8x64xf32>
    %c0_23 = arith.constant 0 : index
    %c0_24 = arith.constant 0 : index
    %30 = vector.load %arg5[%c0_23, %c0_24] : memref<4x64xf32, #tpu.memory_space<vmem>>, vector<1x64xf32>
    %31 = vector.broadcast %30 : vector<1x64xf32> to vector<8x64xf32>
    %32 = arith.mulf %29, %31 : vector<8x64xf32>
    %33 = arith.addf %28, %32 : vector<8x64xf32>
    %c1 = arith.constant 1 : index
    %c0_25 = arith.constant 0 : index
    %34 = vector.load %arg17[%c1, %c0_25] : memref<11x64xf32, #tpu.memory_space<vmem>>, vector<8x64xf32>
    %c1_26 = arith.constant 1 : index
    %c0_27 = arith.constant 0 : index
    %35 = vector.load %arg5[%c1_26, %c0_27] : memref<4x64xf32, #tpu.memory_space<vmem>>, vector<1x64xf32>
    %36 = vector.broadcast %35 : vector<1x64xf32> to vector<8x64xf32>
    %37 = arith.mulf %34, %36 : vector<8x64xf32>
    %38 = arith.addf %33, %37 : vector<8x64xf32>
    %c2 = arith.constant 2 : index
    %c0_28 = arith.constant 0 : index
    %39 = vector.load %arg17[%c2, %c0_28] : memref<11x64xf32, #tpu.memory_space<vmem>>, vector<8x64xf32>
    %c2_29 = arith.constant 2 : index
    %c0_30 = arith.constant 0 : index
    %40 = vector.load %arg5[%c2_29, %c0_30] : memref<4x64xf32, #tpu.memory_space<vmem>>, vector<1x64xf32>
    %41 = vector.broadcast %40 : vector<1x64xf32> to vector<8x64xf32>
    %42 = arith.mulf %39, %41 : vector<8x64xf32>
    %43 = arith.addf %38, %42 : vector<8x64xf32>
    %c3_31 = arith.constant 3 : index
    %c0_32 = arith.constant 0 : index
    %44 = vector.load %arg17[%c3_31, %c0_32] : memref<11x64xf32, #tpu.memory_space<vmem>>, vector<8x64xf32>
    %c3_33 = arith.constant 3 : index
    %c0_34 = arith.constant 0 : index
    %45 = vector.load %arg5[%c3_33, %c0_34] : memref<4x64xf32, #tpu.memory_space<vmem>>, vector<1x64xf32>
    %46 = vector.broadcast %45 : vector<1x64xf32> to vector<8x64xf32>
    %47 = arith.mulf %44, %46 : vector<8x64xf32>
    %48 = arith.addf %43, %47 : vector<8x64xf32>
    %c0_35 = arith.constant 0 : index
    %c0_36 = arith.constant 0 : index
    %49 = vector.load %arg6[%c0_35, %c0_36] : memref<1x64xf32, #tpu.memory_space<vmem>>, vector<1x64xf32>
    %50 = vector.broadcast %49 : vector<1x64xf32> to vector<8x64xf32>
    %51 = arith.addf %48, %50 : vector<8x64xf32>
    %52 = arith.negf %51 : vector<8x64xf32>
    %53 = math.exp %52 : vector<8x64xf32>
    %cst_37 = arith.constant 1.000000e+00 : f32
    %54 = vector.broadcast %cst_37 : f32 to vector<8x64xf32>
    %55 = arith.addf %54, %53 : vector<8x64xf32>
    %56 = arith.divf %54, %55 : vector<8x64xf32>
    %57 = arith.mulf %51, %56 : vector<8x64xf32>
    %c0_38 = arith.constant 0 : index
    %c0_39 = arith.constant 0 : index
    %58 = vector.load %arg18[%c0_38, %c0_39] : memref<8x64xf32, #tpu.memory_space<vmem>>, vector<8x64xf32>
    tpu.vector_store %arg18[%c0_38, %c0_39], %57 {strides = array<i32>} : memref<8x64xf32, #tpu.memory_space<vmem>>, vector<8x64xf32>,
    %c0_40 = arith.constant 0 : index
    %c0_41 = arith.constant 0 : index
    %59 = vector.load %arg18[%c0_40, %c0_41] : memref<8x64xf32, #tpu.memory_space<vmem>>, vector<8x64xf32>
    %c0_42 = arith.constant 0 : index
    %c0_43 = arith.constant 0 : index
    %60 = vector.load %arg7[%c0_42, %c0_43] : memref<64x128xf32, #tpu.memory_space<vmem>>, vector<64x128xf32>
    %cst_44 = arith.constant dense<0.000000e+00> : vector<8x128xf32>
    %61 = tpu.matmul %59, %60, %cst_44 {dimension_numbers = #tpu.dot_dimension_numbers<[1], [0], [0], [1], [0, 0, 1, 1], [], []>} : vector<8x64xf32>, vector<64x128xf32>, vector<8x128xf32> -> vector<8x128xf32>
    %c0_45 = arith.constant 0 : index
    %c0_46 = arith.constant 0 : index
    %62 = vector.load %arg21[%c0_45, %c0_46] : memref<8x128xf32, #tpu.memory_space<vmem>>, vector<8x128xf32>
    tpu.vector_store %arg21[%c0_45, %c0_46], %61 {strides = array<i32>} : memref<8x128xf32, #tpu.memory_space<vmem>>, vector<8x128xf32>,
    %c0_47 = arith.constant 0 : index
    %c0_48 = arith.constant 0 : index
    %63 = vector.load %arg8[%c0_47, %c0_48] : memref<64x2xf32, #tpu.memory_space<vmem>>, vector<64x2xf32>
    %cst_49 = arith.constant dense<0.000000e+00> : vector<8x2xf32>
    %64 = tpu.matmul %59, %63, %cst_49 {dimension_numbers = #tpu.dot_dimension_numbers<[1], [0], [0], [1], [0, 0, 1, 1], [], []>} : vector<8x64xf32>, vector<64x2xf32>, vector<8x2xf32> -> vector<8x2xf32>
    %c0_50 = arith.constant 0 : index
    %c0_51 = arith.constant 0 : index
    %65 = vector.load %arg9[%c0_50, %c0_51] : memref<2x64xf32, #tpu.memory_space<vmem>>, vector<2x64xf32>
    %cst_52 = arith.constant dense<0.000000e+00> : vector<8x64xf32>
    %66 = tpu.matmul %64, %65, %cst_52 {dimension_numbers = #tpu.dot_dimension_numbers<[1], [0], [0], [1], [0, 0, 1, 1], [], []>} : vector<8x2xf32>, vector<2x64xf32>, vector<8x64xf32> -> vector<8x64xf32>
    %c0_53 = arith.constant 0 : index
    %c0_54 = arith.constant 0 : index
    %67 = vector.load %arg10[%c0_53, %c0_54] : memref<1x64xf32, #tpu.memory_space<vmem>>, vector<1x64xf32>
    %68 = vector.broadcast %67 : vector<1x64xf32> to vector<8x64xf32>
    %69 = arith.addf %66, %68 : vector<8x64xf32>
    %cst_55 = arith.constant 2.000000e+01 : f32
    %70 = vector.broadcast %cst_55 : f32 to vector<8x64xf32>
    %71 = arith.cmpf ogt, %69, %70 : vector<8x64xf32>
    %72 = math.exp %69 : vector<8x64xf32>
    %73 = math.log1p %72 : vector<8x64xf32>
    %74 = arith.select %71, %69, %73 : vector<8x64xi1>, vector<8x64xf32>
    %c0_56 = arith.constant 0 : index
    %c0_57 = arith.constant 0 : index
    %75 = vector.load %arg20[%c0_56, %c0_57] : memref<8x64xf32, #tpu.memory_space<vmem>>, vector<8x64xf32>
    tpu.vector_store %arg20[%c0_56, %c0_57], %74 {strides = array<i32>} : memref<8x64xf32, #tpu.memory_space<vmem>>, vector<8x64xf32>,
    %c0_58 = arith.constant 0 : index
    %c0_59 = arith.constant 0 : index
    %76 = vector.load %arg11[%c0_58, %c0_59] : memref<64x64xf32, #tpu.memory_space<vmem>>, vector<64x32xf32>
    %c0_60 = arith.constant 0 : index
    %c0_61 = arith.constant 0 : index
    %77 = vector.load %arg15[%c0_60, %c0_61] : memref<64x64xf32, #tpu.memory_space<vmem>>, vector<64x32xf32>
    %c0_i32_62 = arith.constant 0 : i32
    %c8_i32 = arith.constant 8 : i32
    %78 = arith.muli %c0_i32_62, %c8_i32 : i32
    %79 = tpu.assume_multiple %78, 8 : i32
    %80 = arith.index_cast %79 : i32 to index
    %c0_63 = arith.constant 0 : index
    %81 = vector.load %arg20[%80, %c0_63] : memref<8x64xf32, #tpu.memory_space<vmem>>, vector<8x32xf32>
    %82 = arith.index_cast %79 : i32 to index
    %c0_64 = arith.constant 0 : index
    %83 = vector.load %arg18[%82, %c0_64] : memref<8x64xf32, #tpu.memory_space<vmem>>, vector<8x32xf32>
    %84 = arith.index_cast %79 : i32 to index
    %c0_65 = arith.constant 0 : index
    %85 = vector.load %arg21[%84, %c0_65] : memref<8x128xf32, #tpu.memory_space<vmem>>, vector<8x64xf32>
    %86 = vector.shape_cast %85 : vector<8x64xf32> to vector<8x64x1xf32>
    %87 = arith.index_cast %79 : i32 to index
    %c64 = arith.constant 64 : index
    %88 = vector.load %arg21[%87, %c64] : memref<8x128xf32, #tpu.memory_space<vmem>>, vector<8x64xf32>
    %89 = vector.shape_cast %88 : vector<8x64xf32> to vector<8x64x1xf32>
    %90 = vector.shape_cast %81 : vector<8x32xf32> to vector<8x1x32xf32>
    %91 = vector.shape_cast %76 : vector<64x32xf32> to vector<1x64x32xf32>
    %92 = vector.broadcast %90 : vector<8x1x32xf32> to vector<8x64x32xf32>
    %93 = vector.broadcast %91 : vector<1x64x32xf32> to vector<8x64x32xf32>
    %94 = arith.mulf %92, %93 : vector<8x64x32xf32>
    %95 = math.exp %94 : vector<8x64x32xf32>
    %96 = arith.mulf %81, %83 : vector<8x32xf32>
    %97 = vector.shape_cast %96 : vector<8x32xf32> to vector<8x1x32xf32>
    %98 = vector.broadcast %97 : vector<8x1x32xf32> to vector<8x64x32xf32>
    %99 = vector.broadcast %86 : vector<8x64x1xf32> to vector<8x64x32xf32>
    %100 = arith.mulf %98, %99 : vector<8x64x32xf32>
    %101 = vector.extract_strided_slice %95 {offsets = [0, 0, 0], sizes = [1, 64, 32], strides = [1, 1, 1]} : vector<8x64x32xf32> to vector<1x64x32xf32>
    %102 = vector.shape_cast %101 : vector<1x64x32xf32> to vector<64x32xf32>
    %103 = arith.mulf %102, %77 : vector<64x32xf32>
    %104 = vector.extract_strided_slice %100 {offsets = [0, 0, 0], sizes = [1, 64, 32], strides = [1, 1, 1]} : vector<8x64x32xf32> to vector<1x64x32xf32>
    %105 = vector.shape_cast %104 : vector<1x64x32xf32> to vector<64x32xf32>
    %106 = arith.addf %103, %105 : vector<64x32xf32>
    %107 = vector.extract_strided_slice %89 {offsets = [0, 0, 0], sizes = [1, 64, 1], strides = [1, 1, 1]} : vector<8x64x1xf32> to vector<1x64x1xf32>
    %108 = vector.shape_cast %107 : vector<1x64x1xf32> to vector<64x1xf32>
    %109 = vector.broadcast %108 : vector<64x1xf32> to vector<64x32xf32>
    %110 = arith.mulf %106, %109 : vector<64x32xf32>
    %cst_66 = arith.constant dense<0.000000e+00> : vector<32xf32>
    %111 = vector.multi_reduction <add>, %110, %cst_66 [0] : vector<64x32xf32> to vector<32xf32>
    %112 = vector.shape_cast %111 : vector<32xf32> to vector<1x32xf32>
    %113 = vector.extract_strided_slice %95 {offsets = [1, 0, 0], sizes = [1, 64, 32], strides = [1, 1, 1]} : vector<8x64x32xf32> to vector<1x64x32xf32>
    %114 = vector.shape_cast %113 : vector<1x64x32xf32> to vector<64x32xf32>
    %115 = arith.mulf %114, %106 : vector<64x32xf32>
    %116 = vector.extract_strided_slice %100 {offsets = [1, 0, 0], sizes = [1, 64, 32], strides = [1, 1, 1]} : vector<8x64x32xf32> to vector<1x64x32xf32>
    %117 = vector.shape_cast %116 : vector<1x64x32xf32> to vector<64x32xf32>
    %118 = arith.addf %115, %117 : vector<64x32xf32>
    %119 = vector.extract_strided_slice %89 {offsets = [1, 0, 0], sizes = [1, 64, 1], strides = [1, 1, 1]} : vector<8x64x1xf32> to vector<1x64x1xf32>
    %120 = vector.shape_cast %119 : vector<1x64x1xf32> to vector<64x1xf32>
    %121 = vector.broadcast %120 : vector<64x1xf32> to vector<64x32xf32>
    %122 = arith.mulf %118, %121 : vector<64x32xf32>
    %cst_67 = arith.constant dense<0.000000e+00> : vector<32xf32>
    %123 = vector.multi_reduction <add>, %122, %cst_67 [0] : vector<64x32xf32> to vector<32xf32>
    %124 = vector.shape_cast %123 : vector<32xf32> to vector<1x32xf32>
    %125 = vector.extract_strided_slice %95 {offsets = [2, 0, 0], sizes = [1, 64, 32], strides = [1, 1, 1]} : vector<8x64x32xf32> to vector<1x64x32xf32>
    %126 = vector.shape_cast %125 : vector<1x64x32xf32> to vector<64x32xf32>
    %127 = arith.mulf %126, %118 : vector<64x32xf32>
    %128 = vector.extract_strided_slice %100 {offsets = [2, 0, 0], sizes = [1, 64, 32], strides = [1, 1, 1]} : vector<8x64x32xf32> to vector<1x64x32xf32>
    %129 = vector.shape_cast %128 : vector<1x64x32xf32> to vector<64x32xf32>
    %130 = arith.addf %127, %129 : vector<64x32xf32>
    %131 = vector.extract_strided_slice %89 {offsets = [2, 0, 0], sizes = [1, 64, 1], strides = [1, 1, 1]} : vector<8x64x1xf32> to vector<1x64x1xf32>
    %132 = vector.shape_cast %131 : vector<1x64x1xf32> to vector<64x1xf32>
    %133 = vector.broadcast %132 : vector<64x1xf32> to vector<64x32xf32>
    %134 = arith.mulf %130, %133 : vector<64x32xf32>
    %cst_68 = arith.constant dense<0.000000e+00> : vector<32xf32>
    %135 = vector.multi_reduction <add>, %134, %cst_68 [0] : vector<64x32xf32> to vector<32xf32>
    %136 = vector.shape_cast %135 : vector<32xf32> to vector<1x32xf32>
    %137 = vector.extract_strided_slice %95 {offsets = [3, 0, 0], sizes = [1, 64, 32], strides = [1, 1, 1]} : vector<8x64x32xf32> to vector<1x64x32xf32>
    %138 = vector.shape_cast %137 : vector<1x64x32xf32> to vector<64x32xf32>
    %139 = arith.mulf %138, %130 : vector<64x32xf32>
    %140 = vector.extract_strided_slice %100 {offsets = [3, 0, 0], sizes = [1, 64, 32], strides = [1, 1, 1]} : vector<8x64x32xf32> to vector<1x64x32xf32>
    %141 = vector.shape_cast %140 : vector<1x64x32xf32> to vector<64x32xf32>
    %142 = arith.addf %139, %141 : vector<64x32xf32>
    %143 = vector.extract_strided_slice %89 {offsets = [3, 0, 0], sizes = [1, 64, 1], strides = [1, 1, 1]} : vector<8x64x1xf32> to vector<1x64x1xf32>
    %144 = vector.shape_cast %143 : vector<1x64x1xf32> to vector<64x1xf32>
    %145 = vector.broadcast %144 : vector<64x1xf32> to vector<64x32xf32>
    %146 = arith.mulf %142, %145 : vector<64x32xf32>
    %cst_69 = arith.constant dense<0.000000e+00> : vector<32xf32>
    %147 = vector.multi_reduction <add>, %146, %cst_69 [0] : vector<64x32xf32> to vector<32xf32>
    %148 = vector.shape_cast %147 : vector<32xf32> to vector<1x32xf32>
    %149 = vector.extract_strided_slice %95 {offsets = [4, 0, 0], sizes = [1, 64, 32], strides = [1, 1, 1]} : vector<8x64x32xf32> to vector<1x64x32xf32>
    %150 = vector.shape_cast %149 : vector<1x64x32xf32> to vector<64x32xf32>
    %151 = arith.mulf %150, %142 : vector<64x32xf32>
    %152 = vector.extract_strided_slice %100 {offsets = [4, 0, 0], sizes = [1, 64, 32], strides = [1, 1, 1]} : vector<8x64x32xf32> to vector<1x64x32xf32>
    %153 = vector.shape_cast %152 : vector<1x64x32xf32> to vector<64x32xf32>
    %154 = arith.addf %151, %153 : vector<64x32xf32>
    %155 = vector.extract_strided_slice %89 {offsets = [4, 0, 0], sizes = [1, 64, 1], strides = [1, 1, 1]} : vector<8x64x1xf32> to vector<1x64x1xf32>
    %156 = vector.shape_cast %155 : vector<1x64x1xf32> to vector<64x1xf32>
    %157 = vector.broadcast %156 : vector<64x1xf32> to vector<64x32xf32>
    %158 = arith.mulf %154, %157 : vector<64x32xf32>
    %cst_70 = arith.constant dense<0.000000e+00> : vector<32xf32>
    %159 = vector.multi_reduction <add>, %158, %cst_70 [0] : vector<64x32xf32> to vector<32xf32>
    %160 = vector.shape_cast %159 : vector<32xf32> to vector<1x32xf32>
    %161 = vector.extract_strided_slice %95 {offsets = [5, 0, 0], sizes = [1, 64, 32], strides = [1, 1, 1]} : vector<8x64x32xf32> to vector<1x64x32xf32>
    %162 = vector.shape_cast %161 : vector<1x64x32xf32> to vector<64x32xf32>
    %163 = arith.mulf %162, %154 : vector<64x32xf32>
    %164 = vector.extract_strided_slice %100 {offsets = [5, 0, 0], sizes = [1, 64, 32], strides = [1, 1, 1]} : vector<8x64x32xf32> to vector<1x64x32xf32>
    %165 = vector.shape_cast %164 : vector<1x64x32xf32> to vector<64x32xf32>
    %166 = arith.addf %163, %165 : vector<64x32xf32>
    %167 = vector.extract_strided_slice %89 {offsets = [5, 0, 0], sizes = [1, 64, 1], strides = [1, 1, 1]} : vector<8x64x1xf32> to vector<1x64x1xf32>
    %168 = vector.shape_cast %167 : vector<1x64x1xf32> to vector<64x1xf32>
    %169 = vector.broadcast %168 : vector<64x1xf32> to vector<64x32xf32>
    %170 = arith.mulf %166, %169 : vector<64x32xf32>
    %cst_71 = arith.constant dense<0.000000e+00> : vector<32xf32>
    %171 = vector.multi_reduction <add>, %170, %cst_71 [0] : vector<64x32xf32> to vector<32xf32>
    %172 = vector.shape_cast %171 : vector<32xf32> to vector<1x32xf32>
    %173 = vector.extract_strided_slice %95 {offsets = [6, 0, 0], sizes = [1, 64, 32], strides = [1, 1, 1]} : vector<8x64x32xf32> to vector<1x64x32xf32>
    %174 = vector.shape_cast %173 : vector<1x64x32xf32> to vector<64x32xf32>
    %175 = arith.mulf %174, %166 : vector<64x32xf32>
    %176 = vector.extract_strided_slice %100 {offsets = [6, 0, 0], sizes = [1, 64, 32], strides = [1, 1, 1]} : vector<8x64x32xf32> to vector<1x64x32xf32>
    %177 = vector.shape_cast %176 : vector<1x64x32xf32> to vector<64x32xf32>
    %178 = arith.addf %175, %177 : vector<64x32xf32>
    %179 = vector.extract_strided_slice %89 {offsets = [6, 0, 0], sizes = [1, 64, 1], strides = [1, 1, 1]} : vector<8x64x1xf32> to vector<1x64x1xf32>
    %180 = vector.shape_cast %179 : vector<1x64x1xf32> to vector<64x1xf32>
    %181 = vector.broadcast %180 : vector<64x1xf32> to vector<64x32xf32>
    %182 = arith.mulf %178, %181 : vector<64x32xf32>
    %cst_72 = arith.constant dense<0.000000e+00> : vector<32xf32>
    %183 = vector.multi_reduction <add>, %182, %cst_72 [0] : vector<64x32xf32> to vector<32xf32>
    %184 = vector.shape_cast %183 : vector<32xf32> to vector<1x32xf32>
    %185 = vector.extract_strided_slice %95 {offsets = [7, 0, 0], sizes = [1, 64, 32], strides = [1, 1, 1]} : vector<8x64x32xf32> to vector<1x64x32xf32>
    %186 = vector.shape_cast %185 : vector<1x64x32xf32> to vector<64x32xf32>
    %187 = arith.mulf %186, %178 : vector<64x32xf32>
    %188 = vector.extract_strided_slice %100 {offsets = [7, 0, 0], sizes = [1, 64, 32], strides = [1, 1, 1]} : vector<8x64x32xf32> to vector<1x64x32xf32>
    %189 = vector.shape_cast %188 : vector<1x64x32xf32> to vector<64x32xf32>
    %190 = arith.addf %187, %189 : vector<64x32xf32>
    %191 = vector.extract_strided_slice %89 {offsets = [7, 0, 0], sizes = [1, 64, 1], strides = [1, 1, 1]} : vector<8x64x1xf32> to vector<1x64x1xf32>
    %192 = vector.shape_cast %191 : vector<1x64x1xf32> to vector<64x1xf32>
    %193 = vector.broadcast %192 : vector<64x1xf32> to vector<64x32xf32>
    %194 = arith.mulf %190, %193 : vector<64x32xf32>
    %cst_73 = arith.constant dense<0.000000e+00> : vector<32xf32>
    %195 = vector.multi_reduction <add>, %194, %cst_73 [0] : vector<64x32xf32> to vector<32xf32>
    %196 = vector.shape_cast %195 : vector<32xf32> to vector<1x32xf32>
    %197 = tpu.concatenate %112, %124, %136, %148, %160, %172, %184, %196 in 0 : vector<1x32xf32>, vector<1x32xf32>, vector<1x32xf32>, vector<1x32xf32>, vector<1x32xf32>, vector<1x32xf32>, vector<1x32xf32>, vector<1x32xf32> -> vector<8x32xf32>
    %198 = arith.index_cast %79 : i32 to index
    %c0_74 = arith.constant 0 : index
    %199 = vector.load %arg22[%198, %c0_74] : memref<8x64xf32, #tpu.memory_space<vmem>>, vector<8x32xf32>
    tpu.vector_store %arg22[%198, %c0_74], %197 {strides = array<i32>} : memref<8x64xf32, #tpu.memory_space<vmem>>, vector<8x32xf32>,
    %c1_i32 = arith.constant 1 : i32
    %c0_75 = arith.constant 0 : index
    %c0_76 = arith.constant 0 : index
    %200 = vector.load %arg15[%c0_75, %c0_76] : memref<64x64xf32, #tpu.memory_space<vmem>>, vector<64x32xf32>
    tpu.vector_store %arg15[%c0_75, %c0_76], %190 {strides = array<i32>} : memref<64x64xf32, #tpu.memory_space<vmem>>, vector<64x32xf32>,
    %c0_77 = arith.constant 0 : index
    %c32 = arith.constant 32 : index
    %201 = vector.load %arg11[%c0_77, %c32] : memref<64x64xf32, #tpu.memory_space<vmem>>, vector<64x32xf32>
    %c0_78 = arith.constant 0 : index
    %c32_79 = arith.constant 32 : index
    %202 = vector.load %arg15[%c0_78, %c32_79] : memref<64x64xf32, #tpu.memory_space<vmem>>, vector<64x32xf32>
    %c0_i32_80 = arith.constant 0 : i32
    %c8_i32_81 = arith.constant 8 : i32
    %203 = arith.muli %c0_i32_80, %c8_i32_81 : i32
    %204 = tpu.assume_multiple %203, 8 : i32
    %205 = arith.index_cast %204 : i32 to index
    %c32_82 = arith.constant 32 : index
    %206 = vector.load %arg20[%205, %c32_82] : memref<8x64xf32, #tpu.memory_space<vmem>>, vector<8x32xf32>
    %207 = arith.index_cast %204 : i32 to index
    %c32_83 = arith.constant 32 : index
    %208 = vector.load %arg18[%207, %c32_83] : memref<8x64xf32, #tpu.memory_space<vmem>>, vector<8x32xf32>
    %209 = arith.index_cast %204 : i32 to index
    %c0_84 = arith.constant 0 : index
    %210 = vector.load %arg21[%209, %c0_84] : memref<8x128xf32, #tpu.memory_space<vmem>>, vector<8x64xf32>
    %211 = vector.shape_cast %210 : vector<8x64xf32> to vector<8x64x1xf32>
    %212 = arith.index_cast %204 : i32 to index
    %c64_85 = arith.constant 64 : index
    %213 = vector.load %arg21[%212, %c64_85] : memref<8x128xf32, #tpu.memory_space<vmem>>, vector<8x64xf32>
    %214 = vector.shape_cast %213 : vector<8x64xf32> to vector<8x64x1xf32>
    %215 = vector.shape_cast %206 : vector<8x32xf32> to vector<8x1x32xf32>
    %216 = vector.shape_cast %201 : vector<64x32xf32> to vector<1x64x32xf32>
    %217 = vector.broadcast %215 : vector<8x1x32xf32> to vector<8x64x32xf32>
    %218 = vector.broadcast %216 : vector<1x64x32xf32> to vector<8x64x32xf32>
    %219 = arith.mulf %217, %218 : vector<8x64x32xf32>
    %220 = math.exp %219 : vector<8x64x32xf32>
    %221 = arith.mulf %206, %208 : vector<8x32xf32>
    %222 = vector.shape_cast %221 : vector<8x32xf32> to vector<8x1x32xf32>
    %223 = vector.broadcast %222 : vector<8x1x32xf32> to vector<8x64x32xf32>
    %224 = vector.broadcast %211 : vector<8x64x1xf32> to vector<8x64x32xf32>
    %225 = arith.mulf %223, %224 : vector<8x64x32xf32>
    %226 = vector.extract_strided_slice %220 {offsets = [0, 0, 0], sizes = [1, 64, 32], strides = [1, 1, 1]} : vector<8x64x32xf32> to vector<1x64x32xf32>
    %227 = vector.shape_cast %226 : vector<1x64x32xf32> to vector<64x32xf32>
    %228 = arith.mulf %227, %202 : vector<64x32xf32>
    %229 = vector.extract_strided_slice %225 {offsets = [0, 0, 0], sizes = [1, 64, 32], strides = [1, 1, 1]} : vector<8x64x32xf32> to vector<1x64x32xf32>
    %230 = vector.shape_cast %229 : vector<1x64x32xf32> to vector<64x32xf32>
    %231 = arith.addf %228, %230 : vector<64x32xf32>
    %232 = vector.extract_strided_slice %214 {offsets = [0, 0, 0], sizes = [1, 64, 1], strides = [1, 1, 1]} : vector<8x64x1xf32> to vector<1x64x1xf32>
    %233 = vector.shape_cast %232 : vector<1x64x1xf32> to vector<64x1xf32>
    %234 = vector.broadcast %233 : vector<64x1xf32> to vector<64x32xf32>
    %235 = arith.mulf %231, %234 : vector<64x32xf32>
    %cst_86 = arith.constant dense<0.000000e+00> : vector<32xf32>
    %236 = vector.multi_reduction <add>, %235, %cst_86 [0] : vector<64x32xf32> to vector<32xf32>
    %237 = vector.shape_cast %236 : vector<32xf32> to vector<1x32xf32>
    %238 = vector.extract_strided_slice %220 {offsets = [1, 0, 0], sizes = [1, 64, 32], strides = [1, 1, 1]} : vector<8x64x32xf32> to vector<1x64x32xf32>
    %239 = vector.shape_cast %238 : vector<1x64x32xf32> to vector<64x32xf32>
    %240 = arith.mulf %239, %231 : vector<64x32xf32>
    %241 = vector.extract_strided_slice %225 {offsets = [1, 0, 0], sizes = [1, 64, 32], strides = [1, 1, 1]} : vector<8x64x32xf32> to vector<1x64x32xf32>
    %242 = vector.shape_cast %241 : vector<1x64x32xf32> to vector<64x32xf32>
    %243 = arith.addf %240, %242 : vector<64x32xf32>
    %244 = vector.extract_strided_slice %214 {offsets = [1, 0, 0], sizes = [1, 64, 1], strides = [1, 1, 1]} : vector<8x64x1xf32> to vector<1x64x1xf32>
    %245 = vector.shape_cast %244 : vector<1x64x1xf32> to vector<64x1xf32>
    %246 = vector.broadcast %245 : vector<64x1xf32> to vector<64x32xf32>
    %247 = arith.mulf %243, %246 : vector<64x32xf32>
    %cst_87 = arith.constant dense<0.000000e+00> : vector<32xf32>
    %248 = vector.multi_reduction <add>, %247, %cst_87 [0] : vector<64x32xf32> to vector<32xf32>
    %249 = vector.shape_cast %248 : vector<32xf32> to vector<1x32xf32>
    %250 = vector.extract_strided_slice %220 {offsets = [2, 0, 0], sizes = [1, 64, 32], strides = [1, 1, 1]} : vector<8x64x32xf32> to vector<1x64x32xf32>
    %251 = vector.shape_cast %250 : vector<1x64x32xf32> to vector<64x32xf32>
    %252 = arith.mulf %251, %243 : vector<64x32xf32>
    %253 = vector.extract_strided_slice %225 {offsets = [2, 0, 0], sizes = [1, 64, 32], strides = [1, 1, 1]} : vector<8x64x32xf32> to vector<1x64x32xf32>
    %254 = vector.shape_cast %253 : vector<1x64x32xf32> to vector<64x32xf32>
    %255 = arith.addf %252, %254 : vector<64x32xf32>
    %256 = vector.extract_strided_slice %214 {offsets = [2, 0, 0], sizes = [1, 64, 1], strides = [1, 1, 1]} : vector<8x64x1xf32> to vector<1x64x1xf32>
    %257 = vector.shape_cast %256 : vector<1x64x1xf32> to vector<64x1xf32>
    %258 = vector.broadcast %257 : vector<64x1xf32> to vector<64x32xf32>
    %259 = arith.mulf %255, %258 : vector<64x32xf32>
    %cst_88 = arith.constant dense<0.000000e+00> : vector<32xf32>
    %260 = vector.multi_reduction <add>, %259, %cst_88 [0] : vector<64x32xf32> to vector<32xf32>
    %261 = vector.shape_cast %260 : vector<32xf32> to vector<1x32xf32>
    %262 = vector.extract_strided_slice %220 {offsets = [3, 0, 0], sizes = [1, 64, 32], strides = [1, 1, 1]} : vector<8x64x32xf32> to vector<1x64x32xf32>
    %263 = vector.shape_cast %262 : vector<1x64x32xf32> to vector<64x32xf32>
    %264 = arith.mulf %263, %255 : vector<64x32xf32>
    %265 = vector.extract_strided_slice %225 {offsets = [3, 0, 0], sizes = [1, 64, 32], strides = [1, 1, 1]} : vector<8x64x32xf32> to vector<1x64x32xf32>
    %266 = vector.shape_cast %265 : vector<1x64x32xf32> to vector<64x32xf32>
    %267 = arith.addf %264, %266 : vector<64x32xf32>
    %268 = vector.extract_strided_slice %214 {offsets = [3, 0, 0], sizes = [1, 64, 1], strides = [1, 1, 1]} : vector<8x64x1xf32> to vector<1x64x1xf32>
    %269 = vector.shape_cast %268 : vector<1x64x1xf32> to vector<64x1xf32>
    %270 = vector.broadcast %269 : vector<64x1xf32> to vector<64x32xf32>
    %271 = arith.mulf %267, %270 : vector<64x32xf32>
    %cst_89 = arith.constant dense<0.000000e+00> : vector<32xf32>
    %272 = vector.multi_reduction <add>, %271, %cst_89 [0] : vector<64x32xf32> to vector<32xf32>
    %273 = vector.shape_cast %272 : vector<32xf32> to vector<1x32xf32>
    %274 = vector.extract_strided_slice %220 {offsets = [4, 0, 0], sizes = [1, 64, 32], strides = [1, 1, 1]} : vector<8x64x32xf32> to vector<1x64x32xf32>
    %275 = vector.shape_cast %274 : vector<1x64x32xf32> to vector<64x32xf32>
    %276 = arith.mulf %275, %267 : vector<64x32xf32>
    %277 = vector.extract_strided_slice %225 {offsets = [4, 0, 0], sizes = [1, 64, 32], strides = [1, 1, 1]} : vector<8x64x32xf32> to vector<1x64x32xf32>
    %278 = vector.shape_cast %277 : vector<1x64x32xf32> to vector<64x32xf32>
    %279 = arith.addf %276, %278 : vector<64x32xf32>
    %280 = vector.extract_strided_slice %214 {offsets = [4, 0, 0], sizes = [1, 64, 1], strides = [1, 1, 1]} : vector<8x64x1xf32> to vector<1x64x1xf32>
    %281 = vector.shape_cast %280 : vector<1x64x1xf32> to vector<64x1xf32>
    %282 = vector.broadcast %281 : vector<64x1xf32> to vector<64x32xf32>
    %283 = arith.mulf %279, %282 : vector<64x32xf32>
    %cst_90 = arith.constant dense<0.000000e+00> : vector<32xf32>
    %284 = vector.multi_reduction <add>, %283, %cst_90 [0] : vector<64x32xf32> to vector<32xf32>
    %285 = vector.shape_cast %284 : vector<32xf32> to vector<1x32xf32>
    %286 = vector.extract_strided_slice %220 {offsets = [5, 0, 0], sizes = [1, 64, 32], strides = [1, 1, 1]} : vector<8x64x32xf32> to vector<1x64x32xf32>
    %287 = vector.shape_cast %286 : vector<1x64x32xf32> to vector<64x32xf32>
    %288 = arith.mulf %287, %279 : vector<64x32xf32>
    %289 = vector.extract_strided_slice %225 {offsets = [5, 0, 0], sizes = [1, 64, 32], strides = [1, 1, 1]} : vector<8x64x32xf32> to vector<1x64x32xf32>
    %290 = vector.shape_cast %289 : vector<1x64x32xf32> to vector<64x32xf32>
    %291 = arith.addf %288, %290 : vector<64x32xf32>
    %292 = vector.extract_strided_slice %214 {offsets = [5, 0, 0], sizes = [1, 64, 1], strides = [1, 1, 1]} : vector<8x64x1xf32> to vector<1x64x1xf32>
    %293 = vector.shape_cast %292 : vector<1x64x1xf32> to vector<64x1xf32>
    %294 = vector.broadcast %293 : vector<64x1xf32> to vector<64x32xf32>
    %295 = arith.mulf %291, %294 : vector<64x32xf32>
    %cst_91 = arith.constant dense<0.000000e+00> : vector<32xf32>
    %296 = vector.multi_reduction <add>, %295, %cst_91 [0] : vector<64x32xf32> to vector<32xf32>
    %297 = vector.shape_cast %296 : vector<32xf32> to vector<1x32xf32>
    %298 = vector.extract_strided_slice %220 {offsets = [6, 0, 0], sizes = [1, 64, 32], strides = [1, 1, 1]} : vector<8x64x32xf32> to vector<1x64x32xf32>
    %299 = vector.shape_cast %298 : vector<1x64x32xf32> to vector<64x32xf32>
    %300 = arith.mulf %299, %291 : vector<64x32xf32>
    %301 = vector.extract_strided_slice %225 {offsets = [6, 0, 0], sizes = [1, 64, 32], strides = [1, 1, 1]} : vector<8x64x32xf32> to vector<1x64x32xf32>
    %302 = vector.shape_cast %301 : vector<1x64x32xf32> to vector<64x32xf32>
    %303 = arith.addf %300, %302 : vector<64x32xf32>
    %304 = vector.extract_strided_slice %214 {offsets = [6, 0, 0], sizes = [1, 64, 1], strides = [1, 1, 1]} : vector<8x64x1xf32> to vector<1x64x1xf32>
    %305 = vector.shape_cast %304 : vector<1x64x1xf32> to vector<64x1xf32>
    %306 = vector.broadcast %305 : vector<64x1xf32> to vector<64x32xf32>
    %307 = arith.mulf %303, %306 : vector<64x32xf32>
    %cst_92 = arith.constant dense<0.000000e+00> : vector<32xf32>
    %308 = vector.multi_reduction <add>, %307, %cst_92 [0] : vector<64x32xf32> to vector<32xf32>
    %309 = vector.shape_cast %308 : vector<32xf32> to vector<1x32xf32>
    %310 = vector.extract_strided_slice %220 {offsets = [7, 0, 0], sizes = [1, 64, 32], strides = [1, 1, 1]} : vector<8x64x32xf32> to vector<1x64x32xf32>
    %311 = vector.shape_cast %310 : vector<1x64x32xf32> to vector<64x32xf32>
    %312 = arith.mulf %311, %303 : vector<64x32xf32>
    %313 = vector.extract_strided_slice %225 {offsets = [7, 0, 0], sizes = [1, 64, 32], strides = [1, 1, 1]} : vector<8x64x32xf32> to vector<1x64x32xf32>
    %314 = vector.shape_cast %313 : vector<1x64x32xf32> to vector<64x32xf32>
    %315 = arith.addf %312, %314 : vector<64x32xf32>
    %316 = vector.extract_strided_slice %214 {offsets = [7, 0, 0], sizes = [1, 64, 1], strides = [1, 1, 1]} : vector<8x64x1xf32> to vector<1x64x1xf32>
    %317 = vector.shape_cast %316 : vector<1x64x1xf32> to vector<64x1xf32>
    %318 = vector.broadcast %317 : vector<64x1xf32> to vector<64x32xf32>
    %319 = arith.mulf %315, %318 : vector<64x32xf32>
    %cst_93 = arith.constant dense<0.000000e+00> : vector<32xf32>
    %320 = vector.multi_reduction <add>, %319, %cst_93 [0] : vector<64x32xf32> to vector<32xf32>
    %321 = vector.shape_cast %320 : vector<32xf32> to vector<1x32xf32>
    %322 = tpu.concatenate %237, %249, %261, %273, %285, %297, %309, %321 in 0 : vector<1x32xf32>, vector<1x32xf32>, vector<1x32xf32>, vector<1x32xf32>, vector<1x32xf32>, vector<1x32xf32>, vector<1x32xf32>, vector<1x32xf32> -> vector<8x32xf32>
    %323 = arith.index_cast %204 : i32 to index
    %c32_94 = arith.constant 32 : index
    %324 = vector.load %arg22[%323, %c32_94] : memref<8x64xf32, #tpu.memory_space<vmem>>, vector<8x32xf32>
    tpu.vector_store %arg22[%323, %c32_94], %322 {strides = array<i32>} : memref<8x64xf32, #tpu.memory_space<vmem>>, vector<8x32xf32>,
    %c1_i32_95 = arith.constant 1 : i32
    %c0_96 = arith.constant 0 : index
    %c32_97 = arith.constant 32 : index
    %325 = vector.load %arg15[%c0_96, %c32_97] : memref<64x64xf32, #tpu.memory_space<vmem>>, vector<64x32xf32>
    tpu.vector_store %arg15[%c0_96, %c32_97], %315 {strides = array<i32>} : memref<64x64xf32, #tpu.memory_space<vmem>>, vector<64x32xf32>,
    %c0_98 = arith.constant 0 : index
    %c0_99 = arith.constant 0 : index
    %326 = vector.load %arg22[%c0_98, %c0_99] : memref<8x64xf32, #tpu.memory_space<vmem>>, vector<8x64xf32>
    %c0_100 = arith.constant 0 : index
    %c0_101 = arith.constant 0 : index
    %327 = vector.load %arg18[%c0_100, %c0_101] : memref<8x64xf32, #tpu.memory_space<vmem>>, vector<8x64xf32>
    %c0_102 = arith.constant 0 : index
    %c0_103 = arith.constant 0 : index
    %328 = vector.load %arg12[%c0_102, %c0_103] : memref<1x64xf32, #tpu.memory_space<vmem>>, vector<1x64xf32>
    %329 = vector.broadcast %328 : vector<1x64xf32> to vector<8x64xf32>
    %330 = arith.mulf %327, %329 : vector<8x64xf32>
    %331 = arith.addf %326, %330 : vector<8x64xf32>
    %c0_104 = arith.constant 0 : index
    %c0_105 = arith.constant 0 : index
    %332 = vector.load %arg19[%c0_104, %c0_105] : memref<8x64xf32, #tpu.memory_space<vmem>>, vector<8x64xf32>
    %333 = arith.negf %332 : vector<8x64xf32>
    %334 = math.exp %333 : vector<8x64xf32>
    %cst_106 = arith.constant 1.000000e+00 : f32
    %335 = vector.broadcast %cst_106 : f32 to vector<8x64xf32>
    %336 = arith.addf %335, %334 : vector<8x64xf32>
    %337 = arith.divf %335, %336 : vector<8x64xf32>
    %338 = arith.mulf %332, %337 : vector<8x64xf32>
    %339 = arith.mulf %331, %338 : vector<8x64xf32>
    %c0_107 = arith.constant 0 : index
    %c0_108 = arith.constant 0 : index
    %340 = vector.load %arg13[%c0_107, %c0_108] : memref<64x32xf32, #tpu.memory_space<vmem>>, vector<64x32xf32>
    %cst_109 = arith.constant dense<0.000000e+00> : vector<8x32xf32>
    %341 = tpu.matmul %339, %340, %cst_109 {dimension_numbers = #tpu.dot_dimension_numbers<[1], [0], [0], [1], [0, 0, 1, 1], [], []>} : vector<8x64xf32>, vector<64x32xf32>, vector<8x32xf32> -> vector<8x32xf32>
    %342 = arith.addf %341, %4 : vector<8x32xf32>
    %c0_110 = arith.constant 0 : index
    %c0_111 = arith.constant 0 : index
    %c0_112 = arith.constant 0 : index
    %343 = vector.load %arg14[%c0_110, %c0_111, %c0_112] : memref<1x8x32xf32, #tpu.memory_space<vmem>>, vector<1x8x32xf32>
    %344 = vector.shape_cast %343 : vector<1x8x32xf32> to vector<8x32xf32>
    %345 = vector.shape_cast %342 : vector<8x32xf32> to vector<1x8x32xf32>
    tpu.vector_store %arg14[%c0_110, %c0_111, %c0_112], %345 {strides = array<i32>} : memref<1x8x32xf32, #tpu.memory_space<vmem>>, vector<1x8x32xf32>,
    return
  }
  func.func @transform_0(%arg0: i32, %arg1: i32) -> (i32, i32, i32) {
    %c0_i32 = arith.constant 0 : i32
    %c0_i32_0 = arith.constant 0 : i32
    return %arg0, %arg1, %c0_i32 : i32, i32, i32
  }
  func.func @transform_1(%arg0: i32, %arg1: i32) -> (i32, i32) {
    %c0_i32 = arith.constant 0 : i32
    %c0_i32_0 = arith.constant 0 : i32
    %c0_i32_1 = arith.constant 0 : i32
    return %c0_i32, %c0_i32_0 : i32, i32
  }
  func.func @transform_2(%arg0: i32, %arg1: i32) -> (i32, i32) {
    %c0_i32 = arith.constant 0 : i32
    %c0_i32_0 = arith.constant 0 : i32
    %c0_i32_1 = arith.constant 0 : i32
    return %c0_i32, %c0_i32_0 : i32, i32
  }
  func.func @transform_3(%arg0: i32, %arg1: i32) -> (i32, i32) {
    %c0_i32 = arith.constant 0 : i32
    %c0_i32_0 = arith.constant 0 : i32
    %c0_i32_1 = arith.constant 0 : i32
    return %c0_i32, %c0_i32_0 : i32, i32
  }
  func.func @transform_4(%arg0: i32, %arg1: i32) -> (i32, i32) {
    %c0_i32 = arith.constant 0 : i32
    %c0_i32_0 = arith.constant 0 : i32
    %c0_i32_1 = arith.constant 0 : i32
    return %c0_i32, %c0_i32_0 : i32, i32
  }
  func.func @transform_5(%arg0: i32, %arg1: i32) -> (i32, i32) {
    %c0_i32 = arith.constant 0 : i32
    %c0_i32_0 = arith.constant 0 : i32
    %c0_i32_1 = arith.constant 0 : i32
    return %c0_i32, %c0_i32_0 : i32, i32
  }
  func.func @transform_6(%arg0: i32, %arg1: i32) -> (i32, i32) {
    %c0_i32 = arith.constant 0 : i32
    %c0_i32_0 = arith.constant 0 : i32
    %c0_i32_1 = arith.constant 0 : i32
    return %c0_i32, %c0_i32_0 : i32, i32
  }
  func.func @transform_7(%arg0: i32, %arg1: i32) -> (i32, i32) {
    %c0_i32 = arith.constant 0 : i32
    %c0_i32_0 = arith.constant 0 : i32
    %c0_i32_1 = arith.constant 0 : i32
    return %c0_i32, %c0_i32_0 : i32, i32
  }
  func.func @transform_8(%arg0: i32, %arg1: i32) -> (i32, i32) {
    %c0_i32 = arith.constant 0 : i32
    %c0_i32_0 = arith.constant 0 : i32
    %c0_i32_1 = arith.constant 0 : i32
    return %c0_i32, %c0_i32_0 : i32, i32
  }
  func.func @transform_9(%arg0: i32, %arg1: i32) -> (i32, i32) {
    %c0_i32 = arith.constant 0 : i32
    %c0_i32_0 = arith.constant 0 : i32
    %c0_i32_1 = arith.constant 0 : i32
    return %c0_i32, %c0_i32_0 : i32, i32
  }
  func.func @transform_10(%arg0: i32, %arg1: i32) -> (i32, i32) {
    %c0_i32 = arith.constant 0 : i32
    %c0_i32_0 = arith.constant 0 : i32
    %c0_i32_1 = arith.constant 0 : i32
    return %c0_i32, %c0_i32_0 : i32, i32
  }
  func.func @transform_11(%arg0: i32, %arg1: i32) -> (i32, i32) {
    %c0_i32 = arith.constant 0 : i32
    %c0_i32_0 = arith.constant 0 : i32
    %c0_i32_1 = arith.constant 0 : i32
    return %c0_i32, %c0_i32_0 : i32, i32
  }
  func.func @transform_12(%arg0: i32, %arg1: i32) -> (i32, i32, i32) {
    %c0_i32 = arith.constant 0 : i32
    %c0_i32_0 = arith.constant 0 : i32
    return %arg0, %arg1, %c0_i32 : i32, i32, i32
  }
}

module attributes {stable_mosaic.version = 11 : i64} {
  func.func @_mamba_block_kernel(%arg0: i32, %arg1: i32, %arg2: memref<1x8x32xf32, #tpu.memory_space<vmem>>, %arg3: memref<1x32xf32, #tpu.memory_space<vmem>>, %arg4: memref<32x128xf32, #tpu.memory_space<vmem>>, %arg5: memref<4x64xf32, #tpu.memory_space<vmem>>, %arg6: memref<1x64xf32, #tpu.memory_space<vmem>>, %arg7: memref<64x128xf32, #tpu.memory_space<vmem>>, %arg8: memref<64x2xf32, #tpu.memory_space<vmem>>, %arg9: memref<2x64xf32, #tpu.memory_space<vmem>>, %arg10: memref<1x64xf32, #tpu.memory_space<vmem>>, %arg11: memref<64x64xf32, #tpu.memory_space<vmem>>, %arg12: memref<1x64xf32, #tpu.memory_space<vmem>>, %arg13: memref<64x32xf32, #tpu.memory_space<vmem>>, %arg14: memref<1x8x32xf32, #tpu.memory_space<vmem>>, %arg15: memref<64x64xf32, #tpu.memory_space<vmem>>, %arg16: memref<3x64xf32, #tpu.memory_space<vmem>>, %arg17: memref<11x64xf32, #tpu.memory_space<vmem>>, %arg18: memref<8x64xf32, #tpu.memory_space<vmem>>, %arg19: memref<8x64xf32, #tpu.memory_space<vmem>>, %arg20: memref<8x64xf32, #tpu.memory_space<vmem>>, %arg21: memref<8x128xf32, #tpu.memory_space<vmem>>, %arg22: memref<8x64xf32, #tpu.memory_space<vmem>>) attributes {dimension_semantics = [#tpu.dimension_semantics<parallel>, #tpu.dimension_semantics<arbitrary>], iteration_bounds = array<i64: 2, 2>, scalar_prefetch = 0 : i64, scratch_operands = 8 : i64, tpu.core_type = #tpu.core_type<tc>, window_params = [{transform_indices = @transform_0, window_bounds = array<i64: 1, 8, 32>}, {pipeline_mode = #tpu.pipeline_mode<synchronous>, transform_indices = @transform_1, window_bounds = array<i64: 1, 32>}, {pipeline_mode = #tpu.pipeline_mode<synchronous>, transform_indices = @transform_2, window_bounds = array<i64: 32, 128>}, {pipeline_mode = #tpu.pipeline_mode<synchronous>, transform_indices = @transform_3, window_bounds = array<i64: 4, 64>}, {pipeline_mode = #tpu.pipeline_mode<synchronous>, transform_indices = @transform_4, window_bounds = array<i64: 1, 64>}, {pipeline_mode = #tpu.pipeline_mode<synchronous>, transform_indices = @transform_5, window_bounds = array<i64: 64, 128>}, {pipeline_mode = #tpu.pipeline_mode<synchronous>, transform_indices = @transform_6, window_bounds = array<i64: 64, 2>}, {pipeline_mode = #tpu.pipeline_mode<synchronous>, transform_indices = @transform_7, window_bounds = array<i64: 2, 64>}, {pipeline_mode = #tpu.pipeline_mode<synchronous>, transform_indices = @transform_8, window_bounds = array<i64: 1, 64>}, {pipeline_mode = #tpu.pipeline_mode<synchronous>, transform_indices = @transform_9, window_bounds = array<i64: 64, 64>}, {pipeline_mode = #tpu.pipeline_mode<synchronous>, transform_indices = @transform_10, window_bounds = array<i64: 1, 64>}, {pipeline_mode = #tpu.pipeline_mode<synchronous>, transform_indices = @transform_11, window_bounds = array<i64: 64, 32>}, {transform_indices = @transform_12, window_bounds = array<i64: 1, 8, 32>}]} {
    %c0_i32 = arith.constant 0 : i32
    %0 = arith.cmpi eq, %arg1, %c0_i32 : i32
    %1 = arith.extui %0 : i1 to i32
    %c0_i32_0 = arith.constant 0 : i32
    %2 = arith.cmpi ne, %1, %c0_i32_0 : i32
    scf.if %2 {
      %cst_113 = arith.constant 0.000000e+00 : f32
      %346 = vector.broadcast %cst_113 : f32 to vector<64x64xf32>
      %c0_114 = arith.constant 0 : index
      %c0_115 = arith.constant 0 : index
      %347 = vector.load %arg15[%c0_114, %c0_115] : memref<64x64xf32, #tpu.memory_space<vmem>>, vector<64x64xf32>
      tpu.vector_store %arg15[%c0_114, %c0_115], %346 {strides = array<i32>} : memref<64x64xf32, #tpu.memory_space<vmem>>, vector<64x64xf32>,
      %cst_116 = arith.constant 0.000000e+00 : f32
      %348 = vector.broadcast %cst_116 : f32 to vector<3x64xf32>
      %c0_117 = arith.constant 0 : index
      %c0_118 = arith.constant 0 : index
      %349 = vector.load %arg16[%c0_117, %c0_118] : memref<3x64xf32, #tpu.memory_space<vmem>>, vector<3x64xf32>
      tpu.vector_store %arg16[%c0_117, %c0_118], %348 {strides = array<i32>} : memref<3x64xf32, #tpu.memory_space<vmem>>, vector<3x64xf32>,
    } else {
    }
    %c0 = arith.constant 0 : index
    %c0_1 = arith.constant 0 : index
    %c0_2 = arith.constant 0 : index
    %3 = vector.load %arg2[%c0, %c0_1, %c0_2] : memref<1x8x32xf32, #tpu.memory_space<vmem>>, vector<1x8x32xf32>
    %4 = vector.shape_cast %3 : vector<1x8x32xf32> to vector<8x32xf32>
    %5 = arith.mulf %4, %4 : vector<8x32xf32>
    %cst = arith.constant dense<0.000000e+00> : vector<8xf32>
    %6 = vector.multi_reduction <add>, %5, %cst [1] : vector<8x32xf32> to vector<8xf32>
    %7 = vector.shape_cast %6 : vector<8xf32> to vector<8x1xf32>
    %cst_3 = arith.constant 3.200000e+01 : f32
    %8 = vector.broadcast %cst_3 : f32 to vector<8x1xf32>
    %9 = arith.divf %7, %8 : vector<8x1xf32>
    %cst_4 = arith.constant 1.1920929E-7 : f32
    %10 = vector.broadcast %cst_4 : f32 to vector<8x1xf32>
    %11 = arith.addf %9, %10 : vector<8x1xf32>
    %12 = math.rsqrt %11 : vector<8x1xf32>
    %13 = vector.broadcast %12 : vector<8x1xf32> to vector<8x32xf32>
    %14 = arith.mulf %4, %13 : vector<8x32xf32>
    %c0_5 = arith.constant 0 : index
    %c0_6 = arith.constant 0 : index
    %15 = vector.load %arg3[%c0_5, %c0_6] : memref<1x32xf32, #tpu.memory_space<vmem>>, vector<1x32xf32>
    %16 = vector.broadcast %15 : vector<1x32xf32> to vector<8x32xf32>
    %17 = arith.mulf %14, %16 : vector<8x32xf32>
    %c0_7 = arith.constant 0 : index
    %c0_8 = arith.constant 0 : index
    %18 = vector.load %arg4[%c0_7, %c0_8] : memref<32x128xf32, #tpu.memory_space<vmem>>, vector<32x128xf32>
    %cst_9 = arith.constant dense<0.000000e+00> : vector<8x128xf32>
    %19 = tpu.matmul %17, %18, %cst_9 {dimension_numbers = #tpu.dot_dimension_numbers<[1], [0], [0], [1], [0, 0, 1, 1], [], []>} : vector<8x32xf32>, vector<32x128xf32>, vector<8x128xf32> -> vector<8x128xf32>
    %20 = vector.extract_strided_slice %19 {offsets = [0, 0], sizes = [8, 64], strides = [1, 1]} : vector<8x128xf32> to vector<8x64xf32>
    %21 = vector.extract_strided_slice %19 {offsets = [0, 64], sizes = [8, 64], strides = [1, 1]} : vector<8x128xf32> to vector<8x64xf32>
    %c0_10 = arith.constant 0 : index
    %c0_11 = arith.constant 0 : index
    %22 = vector.load %arg19[%c0_10, %c0_11] : memref<8x64xf32, #tpu.memory_space<vmem>>, vector<8x64xf32>
    tpu.vector_store %arg19[%c0_10, %c0_11], %21 {strides = array<i32>} : memref<8x64xf32, #tpu.memory_space<vmem>>, vector<8x64xf32>,
    %c0_12 = arith.constant 0 : index
    %c0_13 = arith.constant 0 : index
    %23 = vector.load %arg16[%c0_12, %c0_13] : memref<3x64xf32, #tpu.memory_space<vmem>>, vector<3x64xf32>
    %c0_14 = arith.constant 0 : index
    %c0_15 = arith.constant 0 : index
    %24 = vector.load %arg17[%c0_14, %c0_15] : memref<11x64xf32, #tpu.memory_space<vmem>>, vector<3x64xf32>
    tpu.vector_store %arg17[%c0_14, %c0_15], %23 {strides = array<i32>} : memref<11x64xf32, #tpu.memory_space<vmem>>, vector<3x64xf32>,
    %c3 = arith.constant 3 : index
    %c0_16 = arith.constant 0 : index
    %25 = vector.load %arg17[%c3, %c0_16] : memref<11x64xf32, #tpu.memory_space<vmem>>, vector<8x64xf32>
    tpu.vector_store %arg17[%c3, %c0_16], %20 {strides = array<i32>} : memref<11x64xf32, #tpu.memory_space<vmem>>, vector<8x64xf32>,
    %c8 = arith.constant 8 : index
    %c0_17 = arith.constant 0 : index
    %26 = vector.load %arg17[%c8, %c0_17] : memref<11x64xf32, #tpu.memory_space<vmem>>, vector<3x64xf32>
    %c0_18 = arith.constant 0 : index
    %c0_19 = arith.constant 0 : index
    %27 = vector.load %arg16[%c0_18, %c0_19] : memref<3x64xf32, #tpu.memory_space<vmem>>, vector<3x64xf32>
    tpu.vector_store %arg16[%c0_18, %c0_19], %26 {strides = array<i32>} : memref<3x64xf32, #tpu.memory_space<vmem>>, vector<3x64xf32>,
    %cst_20 = arith.constant 0.000000e+00 : f32
    %28 = vector.broadcast %cst_20 : f32 to vector<8x64xf32>
    %c0_21 = arith.constant 0 : index
    %c0_22 = arith.constant 0 : index
    %29 = vector.load %arg17[%c0_21, %c0_22] : memref<11x64xf32, #tpu.memory_space<vmem>>, vector<8x64xf32>
    %c0_23 = arith.constant 0 : index
    %c0_24 = arith.constant 0 : index
    %30 = vector.load %arg5[%c0_23, %c0_24] : memref<4x64xf32, #tpu.memory_space<vmem>>, vector<1x64xf32>
    %31 = vector.broadcast %30 : vector<1x64xf32> to vector<8x64xf32>
    %32 = arith.mulf %29, %31 : vector<8x64xf32>
    %33 = arith.addf %28, %32 : vector<8x64xf32>
    %c1 = arith.constant 1 : index
    %c0_25 = arith.constant 0 : index
    %34 = vector.load %arg17[%c1, %c0_25] : memref<11x64xf32, #tpu.memory_space<vmem>>, vector<8x64xf32>
    %c1_26 = arith.constant 1 : index
    %c0_27 = arith.constant 0 : index
    %35 = vector.load %arg5[%c1_26, %c0_27] : memref<4x64xf32, #tpu.memory_space<vmem>>, vector<1x64xf32>
    %36 = vector.broadcast %35 : vector<1x64xf32> to vector<8x64xf32>
    %37 = arith.mulf %34, %36 : vector<8x64xf32>
    %38 = arith.addf %33, %37 : vector<8x64xf32>
    %c2 = arith.constant 2 : index
    %c0_28 = arith.constant 0 : index
    %39 = vector.load %arg17[%c2, %c0_28] : memref<11x64xf32, #tpu.memory_space<vmem>>, vector<8x64xf32>
    %c2_29 = arith.constant 2 : index
    %c0_30 = arith.constant 0 : index
    %40 = vector.load %arg5[%c2_29, %c0_30] : memref<4x64xf32, #tpu.memory_space<vmem>>, vector<1x64xf32>
    %41 = vector.broadcast %40 : vector<1x64xf32> to vector<8x64xf32>
    %42 = arith.mulf %39, %41 : vector<8x64xf32>
    %43 = arith.addf %38, %42 : vector<8x64xf32>
    %c3_31 = arith.constant 3 : index
    %c0_32 = arith.constant 0 : index
    %44 = vector.load %arg17[%c3_31, %c0_32] : memref<11x64xf32, #tpu.memory_space<vmem>>, vector<8x64xf32>
    %c3_33 = arith.constant 3 : index
    %c0_34 = arith.constant 0 : index
    %45 = vector.load %arg5[%c3_33, %c0_34] : memref<4x64xf32, #tpu.memory_space<vmem>>, vector<1x64xf32>
    %46 = vector.broadcast %45 : vector<1x64xf32> to vector<8x64xf32>
    %47 = arith.mulf %44, %46 : vector<8x64xf32>
    %48 = arith.addf %43, %47 : vector<8x64xf32>
    %c0_35 = arith.constant 0 : index
    %c0_36 = arith.constant 0 : index
    %49 = vector.load %arg6[%c0_35, %c0_36] : memref<1x64xf32, #tpu.memory_space<vmem>>, vector<1x64xf32>
    %50 = vector.broadcast %49 : vector<1x64xf32> to vector<8x64xf32>
    %51 = arith.addf %48, %50 : vector<8x64xf32>
    %52 = arith.negf %51 : vector<8x64xf32>
    %53 = math.exp %52 : vector<8x64xf32>
    %cst_37 = arith.constant 1.000000e+00 : f32
    %54 = vector.broadcast %cst_37 : f32 to vector<8x64xf32>
    %55 = arith.addf %54, %53 : vector<8x64xf32>
    %56 = arith.divf %54, %55 : vector<8x64xf32>
    %57 = arith.mulf %51, %56 : vector<8x64xf32>
    %c0_38 = arith.constant 0 : index
    %c0_39 = arith.constant 0 : index
    %58 = vector.load %arg18[%c0_38, %c0_39] : memref<8x64xf32, #tpu.memory_space<vmem>>, vector<8x64xf32>
    tpu.vector_store %arg18[%c0_38, %c0_39], %57 {strides = array<i32>} : memref<8x64xf32, #tpu.memory_space<vmem>>, vector<8x64xf32>,
    %c0_40 = arith.constant 0 : index
    %c0_41 = arith.constant 0 : index
    %59 = vector.load %arg18[%c0_40, %c0_41] : memref<8x64xf32, #tpu.memory_space<vmem>>, vector<8x64xf32>
    %c0_42 = arith.constant 0 : index
    %c0_43 = arith.constant 0 : index
    %60 = vector.load %arg7[%c0_42, %c0_43] : memref<64x128xf32, #tpu.memory_space<vmem>>, vector<64x128xf32>
    %cst_44 = arith.constant dense<0.000000e+00> : vector<8x128xf32>
    %61 = tpu.matmul %59, %60, %cst_44 {dimension_numbers = #tpu.dot_dimension_numbers<[1], [0], [0], [1], [0, 0, 1, 1], [], []>} : vector<8x64xf32>, vector<64x128xf32>, vector<8x128xf32> -> vector<8x128xf32>
    %c0_45 = arith.constant 0 : index
    %c0_46 = arith.constant 0 : index
    %62 = vector.load %arg21[%c0_45, %c0_46] : memref<8x128xf32, #tpu.memory_space<vmem>>, vector<8x128xf32>
    tpu.vector_store %arg21[%c0_45, %c0_46], %61 {strides = array<i32>} : memref<8x128xf32, #tpu.memory_space<vmem>>, vector<8x128xf32>,
    %c0_47 = arith.constant 0 : index
    %c0_48 = arith.constant 0 : index
    %63 = vector.load %arg8[%c0_47, %c0_48] : memref<64x2xf32, #tpu.memory_space<vmem>>, vector<64x2xf32>
    %cst_49 = arith.constant dense<0.000000e+00> : vector<8x2xf32>
    %64 = tpu.matmul %59, %63, %cst_49 {dimension_numbers = #tpu.dot_dimension_numbers<[1], [0], [0], [1], [0, 0, 1, 1], [], []>} : vector<8x64xf32>, vector<64x2xf32>, vector<8x2xf32> -> vector<8x2xf32>
    %c0_50 = arith.constant 0 : index
    %c0_51 = arith.constant 0 : index
    %65 = vector.load %arg9[%c0_50, %c0_51] : memref<2x64xf32, #tpu.memory_space<vmem>>, vector<2x64xf32>
    %cst_52 = arith.constant dense<0.000000e+00> : vector<8x64xf32>
    %66 = tpu.matmul %64, %65, %cst_52 {dimension_numbers = #tpu.dot_dimension_numbers<[1], [0], [0], [1], [0, 0, 1, 1], [], []>} : vector<8x2xf32>, vector<2x64xf32>, vector<8x64xf32> -> vector<8x64xf32>
    %c0_53 = arith.constant 0 : index
    %c0_54 = arith.constant 0 : index
    %67 = vector.load %arg10[%c0_53, %c0_54] : memref<1x64xf32, #tpu.memory_space<vmem>>, vector<1x64xf32>
    %68 = vector.broadcast %67 : vector<1x64xf32> to vector<8x64xf32>
    %69 = arith.addf %66, %68 : vector<8x64xf32>
    %cst_55 = arith.constant 2.000000e+01 : f32
    %70 = vector.broadcast %cst_55 : f32 to vector<8x64xf32>
    %71 = arith.cmpf ogt, %69, %70 : vector<8x64xf32>
    %72 = math.exp %69 : vector<8x64xf32>
    %73 = math.log1p %72 : vector<8x64xf32>
    %74 = arith.select %71, %69, %73 : vector<8x64xi1>, vector<8x64xf32>
    %c0_56 = arith.constant 0 : index
    %c0_57 = arith.constant 0 : index
    %75 = vector.load %arg20[%c0_56, %c0_57] : memref<8x64xf32, #tpu.memory_space<vmem>>, vector<8x64xf32>
    tpu.vector_store %arg20[%c0_56, %c0_57], %74 {strides = array<i32>} : memref<8x64xf32, #tpu.memory_space<vmem>>, vector<8x64xf32>,
    %c0_58 = arith.constant 0 : index
    %c0_59 = arith.constant 0 : index
    %76 = vector.load %arg11[%c0_58, %c0_59] : memref<64x64xf32, #tpu.memory_space<vmem>>, vector<64x32xf32>
    %c0_60 = arith.constant 0 : index
    %c0_61 = arith.constant 0 : index
    %77 = vector.load %arg15[%c0_60, %c0_61] : memref<64x64xf32, #tpu.memory_space<vmem>>, vector<64x32xf32>
    %c0_i32_62 = arith.constant 0 : i32
    %c8_i32 = arith.constant 8 : i32
    %78 = arith.muli %c0_i32_62, %c8_i32 : i32
    %79 = tpu.assume_multiple %78, 8 : i32
    %80 = arith.index_cast %79 : i32 to index
    %c0_63 = arith.constant 0 : index
    %81 = vector.load %arg20[%80, %c0_63] : memref<8x64xf32, #tpu.memory_space<vmem>>, vector<8x32xf32>
    %82 = arith.index_cast %79 : i32 to index
    %c0_64 = arith.constant 0 : index
    %83 = vector.load %arg18[%82, %c0_64] : memref<8x64xf32, #tpu.memory_space<vmem>>, vector<8x32xf32>
    %84 = arith.index_cast %79 : i32 to index
    %c0_65 = arith.constant 0 : index
    %85 = vector.load %arg21[%84, %c0_65] : memref<8x128xf32, #tpu.memory_space<vmem>>, vector<8x64xf32>
    %86 = vector.shape_cast %85 : vector<8x64xf32> to vector<8x64x1xf32>
    %87 = arith.index_cast %79 : i32 to index
    %c64 = arith.constant 64 : index
    %88 = vector.load %arg21[%87, %c64] : memref<8x128xf32, #tpu.memory_space<vmem>>, vector<8x64xf32>
    %89 = vector.shape_cast %88 : vector<8x64xf32> to vector<8x64x1xf32>
    %90 = vector.shape_cast %81 : vector<8x32xf32> to vector<8x1x32xf32>
    %91 = vector.shape_cast %76 : vector<64x32xf32> to vector<1x64x32xf32>
    %92 = vector.broadcast %90 : vector<8x1x32xf32> to vector<8x64x32xf32>
    %93 = vector.broadcast %91 : vector<1x64x32xf32> to vector<8x64x32xf32>
    %94 = arith.mulf %92, %93 : vector<8x64x32xf32>
    %95 = math.exp %94 : vector<8x64x32xf32>
    %96 = arith.mulf %81, %83 : vector<8x32xf32>
    %97 = vector.shape_cast %96 : vector<8x32xf32> to vector<8x1x32xf32>
    %98 = vector.broadcast %97 : vector<8x1x32xf32> to vector<8x64x32xf32>
    %99 = vector.broadcast %86 : vector<8x64x1xf32> to vector<8x64x32xf32>
    %100 = arith.mulf %98, %99 : vector<8x64x32xf32>
    %101 = vector.extract_strided_slice %95 {offsets = [0, 0, 0], sizes = [1, 64, 32], strides = [1, 1, 1]} : vector<8x64x32xf32> to vector<1x64x32xf32>
    %102 = vector.shape_cast %101 : vector<1x64x32xf32> to vector<64x32xf32>
    %103 = arith.mulf %102, %77 : vector<64x32xf32>
    %104 = vector.extract_strided_slice %100 {offsets = [0, 0, 0], sizes = [1, 64, 32], strides = [1, 1, 1]} : vector<8x64x32xf32> to vector<1x64x32xf32>
    %105 = vector.shape_cast %104 : vector<1x64x32xf32> to vector<64x32xf32>
    %106 = arith.addf %103, %105 : vector<64x32xf32>
    %107 = vector.extract_strided_slice %89 {offsets = [0, 0, 0], sizes = [1, 64, 1], strides = [1, 1, 1]} : vector<8x64x1xf32> to vector<1x64x1xf32>
    %108 = vector.shape_cast %107 : vector<1x64x1xf32> to vector<64x1xf32>
    %109 = vector.broadcast %108 : vector<64x1xf32> to vector<64x32xf32>
    %110 = arith.mulf %106, %109 : vector<64x32xf32>
    %cst_66 = arith.constant dense<0.000000e+00> : vector<32xf32>
    %111 = vector.multi_reduction <add>, %110, %cst_66 [0] : vector<64x32xf32> to vector<32xf32>
    %112 = vector.shape_cast %111 : vector<32xf32> to vector<1x32xf32>
    %113 = vector.extract_strided_slice %95 {offsets = [1, 0, 0], sizes = [1, 64, 32], strides = [1, 1, 1]} : vector<8x64x32xf32> to vector<1x64x32xf32>
    %114 = vector.shape_cast %113 : vector<1x64x32xf32> to vector<64x32xf32>
    %115 = arith.mulf %114, %106 : vector<64x32xf32>
    %116 = vector.extract_strided_slice %100 {offsets = [1, 0, 0], sizes = [1, 64, 32], strides = [1, 1, 1]} : vector<8x64x32xf32> to vector<1x64x32xf32>
    %117 = vector.shape_cast %116 : vector<1x64x32xf32> to vector<64x32xf32>
    %118 = arith.addf %115, %117 : vector<64x32xf32>
    %119 = vector.extract_strided_slice %89 {offsets = [1, 0, 0], sizes = [1, 64, 1], strides = [1, 1, 1]} : vector<8x64x1xf32> to vector<1x64x1xf32>
    %120 = vector.shape_cast %119 : vector<1x64x1xf32> to vector<64x1xf32>
    %121 = vector.broadcast %120 : vector<64x1xf32> to vector<64x32xf32>
    %122 = arith.mulf %118, %121 : vector<64x32xf32>
    %cst_67 = arith.constant dense<0.000000e+00> : vector<32xf32>
    %123 = vector.multi_reduction <add>, %122, %cst_67 [0] : vector<64x32xf32> to vector<32xf32>
    %124 = vector.shape_cast %123 : vector<32xf32> to vector<1x32xf32>
    %125 = vector.extract_strided_slice %95 {offsets = [2, 0, 0], sizes = [1, 64, 32], strides = [1, 1, 1]} : vector<8x64x32xf32> to vector<1x64x32xf32>
    %126 = vector.shape_cast %125 : vector<1x64x32xf32> to vector<64x32xf32>
    %127 = arith.mulf %126, %118 : vector<64x32xf32>
    %128 = vector.extract_strided_slice %100 {offsets = [2, 0, 0], sizes = [1, 64, 32], strides = [1, 1, 1]} : vector<8x64x32xf32> to vector<1x64x32xf32>
    %129 = vector.shape_cast %128 : vector<1x64x32xf32> to vector<64x32xf32>
    %130 = arith.addf %127, %129 : vector<64x32xf32>
    %131 = vector.extract_strided_slice %89 {offsets = [2, 0, 0], sizes = [1, 64, 1], strides = [1, 1, 1]} : vector<8x64x1xf32> to vector<1x64x1xf32>
    %132 = vector.shape_cast %131 : vector<1x64x1xf32> to vector<64x1xf32>
    %133 = vector.broadcast %132 : vector<64x1xf32> to vector<64x32xf32>
    %134 = arith.mulf %130, %133 : vector<64x32xf32>
    %cst_68 = arith.constant dense<0.000000e+00> : vector<32xf32>
    %135 = vector.multi_reduction <add>, %134, %cst_68 [0] : vector<64x32xf32> to vector<32xf32>
    %136 = vector.shape_cast %135 : vector<32xf32> to vector<1x32xf32>
    %137 = vector.extract_strided_slice %95 {offsets = [3, 0, 0], sizes = [1, 64, 32], strides = [1, 1, 1]} : vector<8x64x32xf32> to vector<1x64x32xf32>
    %138 = vector.shape_cast %137 : vector<1x64x32xf32> to vector<64x32xf32>
    %139 = arith.mulf %138, %130 : vector<64x32xf32>
    %140 = vector.extract_strided_slice %100 {offsets = [3, 0, 0], sizes = [1, 64, 32], strides = [1, 1, 1]} : vector<8x64x32xf32> to vector<1x64x32xf32>
    %141 = vector.shape_cast %140 : vector<1x64x32xf32> to vector<64x32xf32>
    %142 = arith.addf %139, %141 : vector<64x32xf32>
    %143 = vector.extract_strided_slice %89 {offsets = [3, 0, 0], sizes = [1, 64, 1], strides = [1, 1, 1]} : vector<8x64x1xf32> to vector<1x64x1xf32>
    %144 = vector.shape_cast %143 : vector<1x64x1xf32> to vector<64x1xf32>
    %145 = vector.broadcast %144 : vector<64x1xf32> to vector<64x32xf32>
    %146 = arith.mulf %142, %145 : vector<64x32xf32>
    %cst_69 = arith.constant dense<0.000000e+00> : vector<32xf32>
    %147 = vector.multi_reduction <add>, %146, %cst_69 [0] : vector<64x32xf32> to vector<32xf32>
    %148 = vector.shape_cast %147 : vector<32xf32> to vector<1x32xf32>
    %149 = vector.extract_strided_slice %95 {offsets = [4, 0, 0], sizes = [1, 64, 32], strides = [1, 1, 1]} : vector<8x64x32xf32> to vector<1x64x32xf32>
    %150 = vector.shape_cast %149 : vector<1x64x32xf32> to vector<64x32xf32>
    %151 = arith.mulf %150, %142 : vector<64x32xf32>
    %152 = vector.extract_strided_slice %100 {offsets = [4, 0, 0], sizes = [1, 64, 32], strides = [1, 1, 1]} : vector<8x64x32xf32> to vector<1x64x32xf32>
    %153 = vector.shape_cast %152 : vector<1x64x32xf32> to vector<64x32xf32>
    %154 = arith.addf %151, %153 : vector<64x32xf32>
    %155 = vector.extract_strided_slice %89 {offsets = [4, 0, 0], sizes = [1, 64, 1], strides = [1, 1, 1]} : vector<8x64x1xf32> to vector<1x64x1xf32>
    %156 = vector.shape_cast %155 : vector<1x64x1xf32> to vector<64x1xf32>
    %157 = vector.broadcast %156 : vector<64x1xf32> to vector<64x32xf32>
    %158 = arith.mulf %154, %157 : vector<64x32xf32>
    %cst_70 = arith.constant dense<0.000000e+00> : vector<32xf32>
    %159 = vector.multi_reduction <add>, %158, %cst_70 [0] : vector<64x32xf32> to vector<32xf32>
    %160 = vector.shape_cast %159 : vector<32xf32> to vector<1x32xf32>
    %161 = vector.extract_strided_slice %95 {offsets = [5, 0, 0], sizes = [1, 64, 32], strides = [1, 1, 1]} : vector<8x64x32xf32> to vector<1x64x32xf32>
    %162 = vector.shape_cast %161 : vector<1x64x32xf32> to vector<64x32xf32>
    %163 = arith.mulf %162, %154 : vector<64x32xf32>
    %164 = vector.extract_strided_slice %100 {offsets = [5, 0, 0], sizes = [1, 64, 32], strides = [1, 1, 1]} : vector<8x64x32xf32> to vector<1x64x32xf32>
    %165 = vector.shape_cast %164 : vector<1x64x32xf32> to vector<64x32xf32>
    %166 = arith.addf %163, %165 : vector<64x32xf32>
    %167 = vector.extract_strided_slice %89 {offsets = [5, 0, 0], sizes = [1, 64, 1], strides = [1, 1, 1]} : vector<8x64x1xf32> to vector<1x64x1xf32>
    %168 = vector.shape_cast %167 : vector<1x64x1xf32> to vector<64x1xf32>
    %169 = vector.broadcast %168 : vector<64x1xf32> to vector<64x32xf32>
    %170 = arith.mulf %166, %169 : vector<64x32xf32>
    %cst_71 = arith.constant dense<0.000000e+00> : vector<32xf32>
    %171 = vector.multi_reduction <add>, %170, %cst_71 [0] : vector<64x32xf32> to vector<32xf32>
    %172 = vector.shape_cast %171 : vector<32xf32> to vector<1x32xf32>
    %173 = vector.extract_strided_slice %95 {offsets = [6, 0, 0], sizes = [1, 64, 32], strides = [1, 1, 1]} : vector<8x64x32xf32> to vector<1x64x32xf32>
    %174 = vector.shape_cast %173 : vector<1x64x32xf32> to vector<64x32xf32>
    %175 = arith.mulf %174, %166 : vector<64x32xf32>
    %176 = vector.extract_strided_slice %100 {offsets = [6, 0, 0], sizes = [1, 64, 32], strides = [1, 1, 1]} : vector<8x64x32xf32> to vector<1x64x32xf32>
    %177 = vector.shape_cast %176 : vector<1x64x32xf32> to vector<64x32xf32>
    %178 = arith.addf %175, %177 : vector<64x32xf32>
    %179 = vector.extract_strided_slice %89 {offsets = [6, 0, 0], sizes = [1, 64, 1], strides = [1, 1, 1]} : vector<8x64x1xf32> to vector<1x64x1xf32>
    %180 = vector.shape_cast %179 : vector<1x64x1xf32> to vector<64x1xf32>
    %181 = vector.broadcast %180 : vector<64x1xf32> to vector<64x32xf32>
    %182 = arith.mulf %178, %181 : vector<64x32xf32>
    %cst_72 = arith.constant dense<0.000000e+00> : vector<32xf32>
    %183 = vector.multi_reduction <add>, %182, %cst_72 [0] : vector<64x32xf32> to vector<32xf32>
    %184 = vector.shape_cast %183 : vector<32xf32> to vector<1x32xf32>
    %185 = vector.extract_strided_slice %95 {offsets = [7, 0, 0], sizes = [1, 64, 32], strides = [1, 1, 1]} : vector<8x64x32xf32> to vector<1x64x32xf32>
    %186 = vector.shape_cast %185 : vector<1x64x32xf32> to vector<64x32xf32>
    %187 = arith.mulf %186, %178 : vector<64x32xf32>
    %188 = vector.extract_strided_slice %100 {offsets = [7, 0, 0], sizes = [1, 64, 32], strides = [1, 1, 1]} : vector<8x64x32xf32> to vector<1x64x32xf32>
    %189 = vector.shape_cast %188 : vector<1x64x32xf32> to vector<64x32xf32>
    %190 = arith.addf %187, %189 : vector<64x32xf32>
    %191 = vector.extract_strided_slice %89 {offsets = [7, 0, 0], sizes = [1, 64, 1], strides = [1, 1, 1]} : vector<8x64x1xf32> to vector<1x64x1xf32>
    %192 = vector.shape_cast %191 : vector<1x64x1xf32> to vector<64x1xf32>
    %193 = vector.broadcast %192 : vector<64x1xf32> to vector<64x32xf32>
    %194 = arith.mulf %190, %193 : vector<64x32xf32>
    %cst_73 = arith.constant dense<0.000000e+00> : vector<32xf32>
    %195 = vector.multi_reduction <add>, %194, %cst_73 [0] : vector<64x32xf32> to vector<32xf32>
    %196 = vector.shape_cast %195 : vector<32xf32> to vector<1x32xf32>
    %197 = tpu.concatenate %112, %124, %136, %148, %160, %172, %184, %196 in 0 : vector<1x32xf32>, vector<1x32xf32>, vector<1x32xf32>, vector<1x32xf32>, vector<1x32xf32>, vector<1x32xf32>, vector<1x32xf32>, vector<1x32xf32> -> vector<8x32xf32>
    %198 = arith.index_cast %79 : i32 to index
    %c0_74 = arith.constant 0 : index
    %199 = vector.load %arg22[%198, %c0_74] : memref<8x64xf32, #tpu.memory_space<vmem>>, vector<8x32xf32>
    tpu.vector_store %arg22[%198, %c0_74], %197 {strides = array<i32>} : memref<8x64xf32, #tpu.memory_space<vmem>>, vector<8x32xf32>,
    %c1_i32 = arith.constant 1 : i32
    %c0_75 = arith.constant 0 : index
    %c0_76 = arith.constant 0 : index
    %200 = vector.load %arg15[%c0_75, %c0_76] : memref<64x64xf32, #tpu.memory_space<vmem>>, vector<64x32xf32>
    tpu.vector_store %arg15[%c0_75, %c0_76], %190 {strides = array<i32>} : memref<64x64xf32, #tpu.memory_space<vmem>>, vector<64x32xf32>,
    %c0_77 = arith.constant 0 : index
    %c32 = arith.constant 32 : index
    %201 = vector.load %arg11[%c0_77, %c32] : memref<64x64xf32, #tpu.memory_space<vmem>>, vector<64x32xf32>
    %c0_78 = arith.constant 0 : index
    %c32_79 = arith.constant 32 : index
    %202 = vector.load %arg15[%c0_78, %c32_79] : memref<64x64xf32, #tpu.memory_space<vmem>>, vector<64x32xf32>
    %c0_i32_80 = arith.constant 0 : i32
    %c8_i32_81 = arith.constant 8 : i32
    %203 = arith.muli %c0_i32_80, %c8_i32_81 : i32
    %204 = tpu.assume_multiple %203, 8 : i32
    %205 = arith.index_cast %204 : i32 to index
    %c32_82 = arith.constant 32 : index
    %206 = vector.load %arg20[%205, %c32_82] : memref<8x64xf32, #tpu.memory_space<vmem>>, vector<8x32xf32>
    %207 = arith.index_cast %204 : i32 to index
    %c32_83 = arith.constant 32 : index
    %208 = vector.load %arg18[%207, %c32_83] : memref<8x64xf32, #tpu.memory_space<vmem>>, vector<8x32xf32>
    %209 = arith.index_cast %204 : i32 to index
    %c0_84 = arith.constant 0 : index
    %210 = vector.load %arg21[%209, %c0_84] : memref<8x128xf32, #tpu.memory_space<vmem>>, vector<8x64xf32>
    %211 = vector.shape_cast %210 : vector<8x64xf32> to vector<8x64x1xf32>
    %212 = arith.index_cast %204 : i32 to index
    %c64_85 = arith.constant 64 : index
    %213 = vector.load %arg21[%212, %c64_85] : memref<8x128xf32, #tpu.memory_space<vmem>>, vector<8x64xf32>
    %214 = vector.shape_cast %213 : vector<8x64xf32> to vector<8x64x1xf32>
    %215 = vector.shape_cast %206 : vector<8x32xf32> to vector<8x1x32xf32>
    %216 = vector.shape_cast %201 : vector<64x32xf32> to vector<1x64x32xf32>
    %217 = vector.broadcast %215 : vector<8x1x32xf32> to vector<8x64x32xf32>
    %218 = vector.broadcast %216 : vector<1x64x32xf32> to vector<8x64x32xf32>
    %219 = arith.mulf %217, %218 : vector<8x64x32xf32>
    %220 = math.exp %219 : vector<8x64x32xf32>
    %221 = arith.mulf %206, %208 : vector<8x32xf32>
    %222 = vector.shape_cast %221 : vector<8x32xf32> to vector<8x1x32xf32>
    %223 = vector.broadcast %222 : vector<8x1x32xf32> to vector<8x64x32xf32>
    %224 = vector.broadcast %211 : vector<8x64x1xf32> to vector<8x64x32xf32>
    %225 = arith.mulf %223, %224 : vector<8x64x32xf32>
    %226 = vector.extract_strided_slice %220 {offsets = [0, 0, 0], sizes = [1, 64, 32], strides = [1, 1, 1]} : vector<8x64x32xf32> to vector<1x64x32xf32>
    %227 = vector.shape_cast %226 : vector<1x64x32xf32> to vector<64x32xf32>
    %228 = arith.mulf %227, %202 : vector<64x32xf32>
    %229 = vector.extract_strided_slice %225 {offsets = [0, 0, 0], sizes = [1, 64, 32], strides = [1, 1, 1]} : vector<8x64x32xf32> to vector<1x64x32xf32>
    %230 = vector.shape_cast %229 : vector<1x64x32xf32> to vector<64x32xf32>
    %231 = arith.addf %228, %230 : vector<64x32xf32>
    %232 = vector.extract_strided_slice %214 {offsets = [0, 0, 0], sizes = [1, 64, 1], strides = [1, 1, 1]} : vector<8x64x1xf32> to vector<1x64x1xf32>
    %233 = vector.shape_cast %232 : vector<1x64x1xf32> to vector<64x1xf32>
    %234 = vector.broadcast %233 : vector<64x1xf32> to vector<64x32xf32>
    %235 = arith.mulf %231, %234 : vector<64x32xf32>
    %cst_86 = arith.constant dense<0.000000e+00> : vector<32xf32>
    %236 = vector.multi_reduction <add>, %235, %cst_86 [0] : vector<64x32xf32> to vector<32xf32>
    %237 = vector.shape_cast %236 : vector<32xf32> to vector<1x32xf32>
    %238 = vector.extract_strided_slice %220 {offsets = [1, 0, 0], sizes = [1, 64, 32], strides = [1, 1, 1]} : vector<8x64x32xf32> to vector<1x64x32xf32>
    %239 = vector.shape_cast %238 : vector<1x64x32xf32> to vector<64x32xf32>
    %240 = arith.mulf %239, %231 : vector<64x32xf32>
    %241 = vector.extract_strided_slice %225 {offsets = [1, 0, 0], sizes = [1, 64, 32], strides = [1, 1, 1]} : vector<8x64x32xf32> to vector<1x64x32xf32>
    %242 = vector.shape_cast %241 : vector<1x64x32xf32> to vector<64x32xf32>
    %243 = arith.addf %240, %242 : vector<64x32xf32>
    %244 = vector.extract_strided_slice %214 {offsets = [1, 0, 0], sizes = [1, 64, 1], strides = [1, 1, 1]} : vector<8x64x1xf32> to vector<1x64x1xf32>
    %245 = vector.shape_cast %244 : vector<1x64x1xf32> to vector<64x1xf32>
    %246 = vector.broadcast %245 : vector<64x1xf32> to vector<64x32xf32>
    %247 = arith.mulf %243, %246 : vector<64x32xf32>
    %cst_87 = arith.constant dense<0.000000e+00> : vector<32xf32>
    %248 = vector.multi_reduction <add>, %247, %cst_87 [0] : vector<64x32xf32> to vector<32xf32>
    %249 = vector.shape_cast %248 : vector<32xf32> to vector<1x32xf32>
    %250 = vector.extract_strided_slice %220 {offsets = [2, 0, 0], sizes = [1, 64, 32], strides = [1, 1, 1]} : vector<8x64x32xf32> to vector<1x64x32xf32>
    %251 = vector.shape_cast %250 : vector<1x64x32xf32> to vector<64x32xf32>
    %252 = arith.mulf %251, %243 : vector<64x32xf32>
    %253 = vector.extract_strided_slice %225 {offsets = [2, 0, 0], sizes = [1, 64, 32], strides = [1, 1, 1]} : vector<8x64x32xf32> to vector<1x64x32xf32>
    %254 = vector.shape_cast %253 : vector<1x64x32xf32> to vector<64x32xf32>
    %255 = arith.addf %252, %254 : vector<64x32xf32>
    %256 = vector.extract_strided_slice %214 {offsets = [2, 0, 0], sizes = [1, 64, 1], strides = [1, 1, 1]} : vector<8x64x1xf32> to vector<1x64x1xf32>
    %257 = vector.shape_cast %256 : vector<1x64x1xf32> to vector<64x1xf32>
    %258 = vector.broadcast %257 : vector<64x1xf32> to vector<64x32xf32>
    %259 = arith.mulf %255, %258 : vector<64x32xf32>
    %cst_88 = arith.constant dense<0.000000e+00> : vector<32xf32>
    %260 = vector.multi_reduction <add>, %259, %cst_88 [0] : vector<64x32xf32> to vector<32xf32>
    %261 = vector.shape_cast %260 : vector<32xf32> to vector<1x32xf32>
    %262 = vector.extract_strided_slice %220 {offsets = [3, 0, 0], sizes = [1, 64, 32], strides = [1, 1, 1]} : vector<8x64x32xf32> to vector<1x64x32xf32>
    %263 = vector.shape_cast %262 : vector<1x64x32xf32> to vector<64x32xf32>
    %264 = arith.mulf %263, %255 : vector<64x32xf32>
    %265 = vector.extract_strided_slice %225 {offsets = [3, 0, 0], sizes = [1, 64, 32], strides = [1, 1, 1]} : vector<8x64x32xf32> to vector<1x64x32xf32>
    %266 = vector.shape_cast %265 : vector<1x64x32xf32> to vector<64x32xf32>
    %267 = arith.addf %264, %266 : vector<64x32xf32>
    %268 = vector.extract_strided_slice %214 {offsets = [3, 0, 0], sizes = [1, 64, 1], strides = [1, 1, 1]} : vector<8x64x1xf32> to vector<1x64x1xf32>
    %269 = vector.shape_cast %268 : vector<1x64x1xf32> to vector<64x1xf32>
    %270 = vector.broadcast %269 : vector<64x1xf32> to vector<64x32xf32>
    %271 = arith.mulf %267, %270 : vector<64x32xf32>
    %cst_89 = arith.constant dense<0.000000e+00> : vector<32xf32>
    %272 = vector.multi_reduction <add>, %271, %cst_89 [0] : vector<64x32xf32> to vector<32xf32>
    %273 = vector.shape_cast %272 : vector<32xf32> to vector<1x32xf32>
    %274 = vector.extract_strided_slice %220 {offsets = [4, 0, 0], sizes = [1, 64, 32], strides = [1, 1, 1]} : vector<8x64x32xf32> to vector<1x64x32xf32>
    %275 = vector.shape_cast %274 : vector<1x64x32xf32> to vector<64x32xf32>
    %276 = arith.mulf %275, %267 : vector<64x32xf32>
    %277 = vector.extract_strided_slice %225 {offsets = [4, 0, 0], sizes = [1, 64, 32], strides = [1, 1, 1]} : vector<8x64x32xf32> to vector<1x64x32xf32>
    %278 = vector.shape_cast %277 : vector<1x64x32xf32> to vector<64x32xf32>
    %279 = arith.addf %276, %278 : vector<64x32xf32>
    %280 = vector.extract_strided_slice %214 {offsets = [4, 0, 0], sizes = [1, 64, 1], strides = [1, 1, 1]} : vector<8x64x1xf32> to vector<1x64x1xf32>
    %281 = vector.shape_cast %280 : vector<1x64x1xf32> to vector<64x1xf32>
    %282 = vector.broadcast %281 : vector<64x1xf32> to vector<64x32xf32>
    %283 = arith.mulf %279, %282 : vector<64x32xf32>
    %cst_90 = arith.constant dense<0.000000e+00> : vector<32xf32>
    %284 = vector.multi_reduction <add>, %283, %cst_90 [0] : vector<64x32xf32> to vector<32xf32>
    %285 = vector.shape_cast %284 : vector<32xf32> to vector<1x32xf32>
    %286 = vector.extract_strided_slice %220 {offsets = [5, 0, 0], sizes = [1, 64, 32], strides = [1, 1, 1]} : vector<8x64x32xf32> to vector<1x64x32xf32>
    %287 = vector.shape_cast %286 : vector<1x64x32xf32> to vector<64x32xf32>
    %288 = arith.mulf %287, %279 : vector<64x32xf32>
    %289 = vector.extract_strided_slice %225 {offsets = [5, 0, 0], sizes = [1, 64, 32], strides = [1, 1, 1]} : vector<8x64x32xf32> to vector<1x64x32xf32>
    %290 = vector.shape_cast %289 : vector<1x64x32xf32> to vector<64x32xf32>
    %291 = arith.addf %288, %290 : vector<64x32xf32>
    %292 = vector.extract_strided_slice %214 {offsets = [5, 0, 0], sizes = [1, 64, 1], strides = [1, 1, 1]} : vector<8x64x1xf32> to vector<1x64x1xf32>
    %293 = vector.shape_cast %292 : vector<1x64x1xf32> to vector<64x1xf32>
    %294 = vector.broadcast %293 : vector<64x1xf32> to vector<64x32xf32>
    %295 = arith.mulf %291, %294 : vector<64x32xf32>
    %cst_91 = arith.constant dense<0.000000e+00> : vector<32xf32>
    %296 = vector.multi_reduction <add>, %295, %cst_91 [0] : vector<64x32xf32> to vector<32xf32>
    %297 = vector.shape_cast %296 : vector<32xf32> to vector<1x32xf32>
    %298 = vector.extract_strided_slice %220 {offsets = [6, 0, 0], sizes = [1, 64, 32], strides = [1, 1, 1]} : vector<8x64x32xf32> to vector<1x64x32xf32>
    %299 = vector.shape_cast %298 : vector<1x64x32xf32> to vector<64x32xf32>
    %300 = arith.mulf %299, %291 : vector<64x32xf32>
    %301 = vector.extract_strided_slice %225 {offsets = [6, 0, 0], sizes = [1, 64, 32], strides = [1, 1, 1]} : vector<8x64x32xf32> to vector<1x64x32xf32>
    %302 = vector.shape_cast %301 : vector<1x64x32xf32> to vector<64x32xf32>
    %303 = arith.addf %300, %302 : vector<64x32xf32>
    %304 = vector.extract_strided_slice %214 {offsets = [6, 0, 0], sizes = [1, 64, 1], strides = [1, 1, 1]} : vector<8x64x1xf32> to vector<1x64x1xf32>
    %305 = vector.shape_cast %304 : vector<1x64x1xf32> to vector<64x1xf32>
    %306 = vector.broadcast %305 : vector<64x1xf32> to vector<64x32xf32>
    %307 = arith.mulf %303, %306 : vector<64x32xf32>
    %cst_92 = arith.constant dense<0.000000e+00> : vector<32xf32>
    %308 = vector.multi_reduction <add>, %307, %cst_92 [0] : vector<64x32xf32> to vector<32xf32>
    %309 = vector.shape_cast %308 : vector<32xf32> to vector<1x32xf32>
    %310 = vector.extract_strided_slice %220 {offsets = [7, 0, 0], sizes = [1, 64, 32], strides = [1, 1, 1]} : vector<8x64x32xf32> to vector<1x64x32xf32>
    %311 = vector.shape_cast %310 : vector<1x64x32xf32> to vector<64x32xf32>
    %312 = arith.mulf %311, %303 : vector<64x32xf32>
    %313 = vector.extract_strided_slice %225 {offsets = [7, 0, 0], sizes = [1, 64, 32], strides = [1, 1, 1]} : vector<8x64x32xf32> to vector<1x64x32xf32>
    %314 = vector.shape_cast %313 : vector<1x64x32xf32> to vector<64x32xf32>
    %315 = arith.addf %312, %314 : vector<64x32xf32>
    %316 = vector.extract_strided_slice %214 {offsets = [7, 0, 0], sizes = [1, 64, 1], strides = [1, 1, 1]} : vector<8x64x1xf32> to vector<1x64x1xf32>
    %317 = vector.shape_cast %316 : vector<1x64x1xf32> to vector<64x1xf32>
    %318 = vector.broadcast %317 : vector<64x1xf32> to vector<64x32xf32>
    %319 = arith.mulf %315, %318 : vector<64x32xf32>
    %cst_93 = arith.constant dense<0.000000e+00> : vector<32xf32>
    %320 = vector.multi_reduction <add>, %319, %cst_93 [0] : vector<64x32xf32> to vector<32xf32>
    %321 = vector.shape_cast %320 : vector<32xf32> to vector<1x32xf32>
    %322 = tpu.concatenate %237, %249, %261, %273, %285, %297, %309, %321 in 0 : vector<1x32xf32>, vector<1x32xf32>, vector<1x32xf32>, vector<1x32xf32>, vector<1x32xf32>, vector<1x32xf32>, vector<1x32xf32>, vector<1x32xf32> -> vector<8x32xf32>
    %323 = arith.index_cast %204 : i32 to index
    %c32_94 = arith.constant 32 : index
    %324 = vector.load %arg22[%323, %c32_94] : memref<8x64xf32, #tpu.memory_space<vmem>>, vector<8x32xf32>
    tpu.vector_store %arg22[%323, %c32_94], %322 {strides = array<i32>} : memref<8x64xf32, #tpu.memory_space<vmem>>, vector<8x32xf32>,
    %c1_i32_95 = arith.constant 1 : i32
    %c0_96 = arith.constant 0 : index
    %c32_97 = arith.constant 32 : index
    %325 = vector.load %arg15[%c0_96, %c32_97] : memref<64x64xf32, #tpu.memory_space<vmem>>, vector<64x32xf32>
    tpu.vector_store %arg15[%c0_96, %c32_97], %315 {strides = array<i32>} : memref<64x64xf32, #tpu.memory_space<vmem>>, vector<64x32xf32>,
    %c0_98 = arith.constant 0 : index
    %c0_99 = arith.constant 0 : index
    %326 = vector.load %arg22[%c0_98, %c0_99] : memref<8x64xf32, #tpu.memory_space<vmem>>, vector<8x64xf32>
    %c0_100 = arith.constant 0 : index
    %c0_101 = arith.constant 0 : index
    %327 = vector.load %arg18[%c0_100, %c0_101] : memref<8x64xf32, #tpu.memory_space<vmem>>, vector<8x64xf32>
    %c0_102 = arith.constant 0 : index
    %c0_103 = arith.constant 0 : index
    %328 = vector.load %arg12[%c0_102, %c0_103] : memref<1x64xf32, #tpu.memory_space<vmem>>, vector<1x64xf32>
    %329 = vector.broadcast %328 : vector<1x64xf32> to vector<8x64xf32>
    %330 = arith.mulf %327, %329 : vector<8x64xf32>
    %331 = arith.addf %326, %330 : vector<8x64xf32>
    %c0_104 = arith.constant 0 : index
    %c0_105 = arith.constant 0 : index
    %332 = vector.load %arg19[%c0_104, %c0_105] : memref<8x64xf32, #tpu.memory_space<vmem>>, vector<8x64xf32>
    %333 = arith.negf %332 : vector<8x64xf32>
    %334 = math.exp %333 : vector<8x64xf32>
    %cst_106 = arith.constant 1.000000e+00 : f32
    %335 = vector.broadcast %cst_106 : f32 to vector<8x64xf32>
    %336 = arith.addf %335, %334 : vector<8x64xf32>
    %337 = arith.divf %335, %336 : vector<8x64xf32>
    %338 = arith.mulf %332, %337 : vector<8x64xf32>
    %339 = arith.mulf %331, %338 : vector<8x64xf32>
    %c0_107 = arith.constant 0 : index
    %c0_108 = arith.constant 0 : index
    %340 = vector.load %arg13[%c0_107, %c0_108] : memref<64x32xf32, #tpu.memory_space<vmem>>, vector<64x32xf32>
    %cst_109 = arith.constant dense<0.000000e+00> : vector<8x32xf32>
    %341 = tpu.matmul %339, %340, %cst_109 {dimension_numbers = #tpu.dot_dimension_numbers<[1], [0], [0], [1], [0, 0, 1, 1], [], []>} : vector<8x64xf32>, vector<64x32xf32>, vector<8x32xf32> -> vector<8x32xf32>
    %342 = arith.addf %341, %4 : vector<8x32xf32>
    %c0_110 = arith.constant 0 : index
    %c0_111 = arith.constant 0 : index
    %c0_112 = arith.constant 0 : index
    %343 = vector.load %arg14[%c0_110, %c0_111, %c0_112] : memref<1x8x32xf32, #tpu.memory_space<vmem>>, vector<1x8x32xf32>
    %344 = vector.shape_cast %343 : vector<1x8x32xf32> to vector<8x32xf32>
    %345 = vector.shape_cast %342 : vector<8x32xf32> to vector<1x8x32xf32>
    tpu.vector_store %arg14[%c0_110, %c0_111, %c0_112], %345 {strides = array<i32>} : memref<1x8x32xf32, #tpu.memory_space<vmem>>, vector<1x8x32xf32>,
    return
  }
  func.func @transform_0(%arg0: i32, %arg1: i32) -> (i32, i32, i32) {
    %c0_i32 = arith.constant 0 : i32
    %c0_i32_0 = arith.constant 0 : i32
    return %arg0, %arg1, %c0_i32 : i32, i32, i32
  }
  func.func @transform_1(%arg0: i32, %arg1: i32) -> (i32, i32) {
    %c0_i32 = arith.constant 0 : i32
    %c0_i32_0 = arith.constant 0 : i32
    %c0_i32_1 = arith.constant 0 : i32
    return %c0_i32, %c0_i32_0 : i32, i32
  }
  func.func @transform_2(%arg0: i32, %arg1: i32) -> (i32, i32) {
    %c0_i32 = arith.constant 0 : i32
    %c0_i32_0 = arith.constant 0 : i32
    %c0_i32_1 = arith.constant 0 : i32
    return %c0_i32, %c0_i32_0 : i32, i32
  }
  func.func @transform_3(%arg0: i32, %arg1: i32) -> (i32, i32) {
    %c0_i32 = arith.constant 0 : i32
    %c0_i32_0 = arith.constant 0 : i32
    %c0_i32_1 = arith.constant 0 : i32
    return %c0_i32, %c0_i32_0 : i32, i32
  }
  func.func @transform_4(%arg0: i32, %arg1: i32) -> (i32, i32) {
    %c0_i32 = arith.constant 0 : i32
    %c0_i32_0 = arith.constant 0 : i32
    %c0_i32_1 = arith.constant 0 : i32
    return %c0_i32, %c0_i32_0 : i32, i32
  }
  func.func @transform_5(%arg0: i32, %arg1: i32) -> (i32, i32) {
    %c0_i32 = arith.constant 0 : i32
    %c0_i32_0 = arith.constant 0 : i32
    %c0_i32_1 = arith.constant 0 : i32
    return %c0_i32, %c0_i32_0 : i32, i32
  }
  func.func @transform_6(%arg0: i32, %arg1: i32) -> (i32, i32) {
    %c0_i32 = arith.constant 0 : i32
    %c0_i32_0 = arith.constant 0 : i32
    %c0_i32_1 = arith.constant 0 : i32
    return %c0_i32, %c0_i32_0 : i32, i32
  }
  func.func @transform_7(%arg0: i32, %arg1: i32) -> (i32, i32) {
    %c0_i32 = arith.constant 0 : i32
    %c0_i32_0 = arith.constant 0 : i32
    %c0_i32_1 = arith.constant 0 : i32
    return %c0_i32, %c0_i32_0 : i32, i32
  }
  func.func @transform_8(%arg0: i32, %arg1: i32) -> (i32, i32) {
    %c0_i32 = arith.constant 0 : i32
    %c0_i32_0 = arith.constant 0 : i32
    %c0_i32_1 = arith.constant 0 : i32
    return %c0_i32, %c0_i32_0 : i32, i32
  }
  func.func @transform_9(%arg0: i32, %arg1: i32) -> (i32, i32) {
    %c0_i32 = arith.constant 0 : i32
    %c0_i32_0 = arith.constant 0 : i32
    %c0_i32_1 = arith.constant 0 : i32
    return %c0_i32, %c0_i32_0 : i32, i32
  }
  func.func @transform_10(%arg0: i32, %arg1: i32) -> (i32, i32) {
    %c0_i32 = arith.constant 0 : i32
    %c0_i32_0 = arith.constant 0 : i32
    %c0_i32_1 = arith.constant 0 : i32
    return %c0_i32, %c0_i32_0 : i32, i32
  }
  func.func @transform_11(%arg0: i32, %arg1: i32) -> (i32, i32) {
    %c0_i32 = arith.constant 0 : i32
    %c0_i32_0 = arith.constant 0 : i32
    %c0_i32_1 = arith.constant 0 : i32
    return %c0_i32, %c0_i32_0 : i32, i32
  }
  func.func @transform_12(%arg0: i32, %arg1: i32) -> (i32, i32, i32) {
    %c0_i32 = arith.constant 0 : i32
    %c0_i32_0 = arith.constant 0 : i32
    return %arg0, %arg1, %c0_i32 : i32, i32, i32
  }
}

</mosaic_0001>

<bundles_post_ra>
// kernel: tpu_custom_call.1
= control target key start
LH: loop header
LB: loop body
LE: loop exit
PB: predicated region body
PF: predicated region fallthrough
CT: control target
= control target key end

     0   :  { %s7991_s0 = inlined_call_operand.hbm [shape: f32[2,16,32], index: 0, kind: input, shape index: {}]   ;;  %s7992_s1 = inlined_call_operand.hbm [shape: f32[1,32], index: 1, kind: input, shape index: {}]   ;;  %s7993_s2 = inlined_call_operand.hbm [shape: f32[32,128], index: 2, kind: input, shape index: {}]   ;;  %s7994_s3 = inlined_call_operand.hbm [shape: f32[4,64], index: 3, kind: input, shape index: {}]   ;;  %s7995_s4 = inlined_call_operand.hbm [shape: f32[1,64], index: 4, kind: input, shape index: {}]   ;;  %s7996_s5 = inlined_call_operand.hbm [shape: f32[64,128], index: 5, kind: input, shape index: {}]   ;;  %s7997_s6 = inlined_call_operand.hbm [shape: f32[64,2], index: 6, kind: input, shape index: {}]   ;;  %s7998_s7 = inlined_call_operand.hbm [shape: f32[2,64], index: 7, kind: input, shape index: {}]   ;;  %s7999_s8 = inlined_call_operand.hbm [shape: f32[1,64], index: 8, kind: input, shape index: {}]   ;;  %s8000_s9 = inlined_call_operand.hbm [shape: f32[64,64], index: 9, kind: input, shape index: {}]   ;;  %s8001_s10 = inlined_call_operand.hbm [shape: f32[1,64], index: 10, kind: input, shape index: {}]   ;;  %s8002_s11 = inlined_call_operand.hbm [shape: f32[64,32], index: 11, kind: input, shape index: {}]   ;;  %s8003_s12 = inlined_call_operand.hbm [shape: f32[2,16,32], index: 12, kind: output, shape index: {}]  }
   0x1   :  { %8125 = sst [smem:[#allocation158_spill]] %s7991_s0 }
   0x2   :  { %8126 = sst [smem:[#allocation159_spill]] %s7992_s1 }
   0x3   :  { %8127 = sst [smem:[#allocation160_spill]] %s7993_s2 }
   0x4   :  { %8128 = sst [smem:[#allocation161_spill]] %s7994_s3 }
   0x5   :  { %8129 = sst [smem:[#allocation162_spill]] %s7995_s4 }
   0x6   :  { %8130 = sst [smem:[#allocation163_spill]] %s7996_s5 }
   0x7   :  { %8131 = sst [smem:[#allocation164_spill]] %s7997_s6 }
   0x8   :  { %8132 = sst [smem:[#allocation165_spill]] %s8003_s12 }
   0x9   :  { %17 = vsyncpa [#allocation11], 0 }
   0xa   :  { %19 = vsyncpa [#allocation11 + $0x1], 0 }
   0xb   :  { %20 = vsyncpa [#allocation14], 0 }
   0xc   :  { %21 = vsyncpa [#allocation17], 0 }
   0xd   :  { %22 = vsyncpa [#allocation20], 0 }
   0xe   :  { %23 = vsyncpa [#allocation23], 0 }
   0xf   :  { %24 = vsyncpa [#allocation26], 0 }
  0x10   :  { %25 = vsyncpa [#allocation29], 0 }
  0x11   :  { %26 = vsyncpa [#allocation12], 0 }
  0x12   :  { %28 = vsyncpa [#allocation12 + $0x1], 0  ;;  %s5262_s21 = smov 0   ;;  %s5264_s22 = smov 0  }
  0x13   :  { %s5266_s23 = smov 0   ;;  %s5268_s24 = smov 0  }
  0x14   :  { %s5270_s25 = smov 0   ;;  %s5272_s26 = smov 0  }
  0x15   :  { %s5274_s27 = smov 0   ;;  %s5276_s28 = smov 0  }
  0x16 LB: > { %8133 = sst [smem:[#allocation39_spill]] %s5146_s21  ;;  %s8004_s29 = sadd.s32 4294967295, %s5174_s28   ;;  %s5174_s28 = sphi %s5276_s28, %s34_s28   ;;  %s5170_s27 = sphi %s5274_s27, %s8616_s27   ;;  %s5166_s26 = sphi %s5272_s26, %s8615_s26   ;;  %s5162_s25 = sphi %s5270_s25, %s8614_s25   ;;  %s5158_s24 = sphi %s5268_s24, %s8613_s24   ;;  %s5154_s23 = sphi %s5266_s23, %s8612_s23   ;;  %s5150_s22 = sphi %s5264_s22, %s8611_s22   ;;  %s5146_s21 = sphi %s5262_s21, %s8609_s21  }
  0x17   : > { %8134 = sst [smem:[#allocation40_spill]] %s5150_s22  ;;  %p4080_p0 = scmp.ge.s32.totalorder %s5174_s28, 1 }
  0x18   : > { %8135 = sst [smem:[#allocation41_spill]] %s5158_s24  ;;  %p5306_p1 = scmp.eq.s32.totalorder %s8004_s29, 0 }
  0x19   : > { %8136 = sst [smem:[#allocation42_spill]] %s5162_s25  ;;  %p338_p2 = scmp.lt.s32.totalorder %s5174_s28, 5 }
  0x1a   : > { %s8137_s30 = scalar_select %p5306_p1, 1, 0 }
  0x1b   : > { %p5311_p3 = pnand %p4080_p0, %p338_p2  ;;  %s5176_s14 = smov [#allocation13]  }
  0x1c   : > { %8138 = sst [smem:[#allocation43_spill]] %s8137_s30  ;;  %s351_s15 = sshll.u32 %s5176_s14, 4  ;;  %s352_s15 = int_to_ptr.vmem [resolvable:$true] %s351_s15 }
  0x1d   : > { %s8139_s13 = scalar_select %p5311_p3, 1, 0 }
  0x1e   : > { %p4329_p4 = pneg %p5311_p3  ;;  %s5177_s16 = smov [#allocation16]  }
  0x1f   : > { %8140 = sst [smem:[#allocation44_spill]] %s8139_s13  ;;  %s375_s17 = sshll.u32 %s5177_s16, 4  ;;  %s5323_s17 = int_to_ptr.vmem [resolvable:$true] %s375_s17 }
  0x20   : > { %p5319_p5 = pnand %p4329_p4, %p5306_p1  ;;  %s5178_s19 = smov [#allocation19]  }
  0x21   : > { %s5325_s20 = sshll.u32 %s5178_s19, 4  ;;  %s8142_s1 = sld [smem:[#allocation159_spill]]  ;;  %s397_s20 = int_to_ptr.vmem [resolvable:$true] %s5325_s20 }
  0x22   : > { %p5335_p7 = pneg %p5319_p5 }
  0x27   : > { %s4714_s14 = scalar_lea.hbm %s8142_s1, 16 }
  0x28   : > { %p4715_p6 = scmp.ne.s32.totalorder %s8142_s1, %s4714_s14  ;;  %p4721_p10 = scmp.lt.u32.totalorder %s4714_s14, %s8142_s1 }
  0x2a   : > { %p4717_p8 = pnand %p5335_p7, %p4715_p6 }
  0x2c   : > { %p4718_p9 = pneg %p4717_p8 }
  0x2e   : > { %p4723_p11 = pnand %p4721_p10, %p4718_p9 }
  0x30   : > { %4726 = shalt.err (!%p4723_p11)
}
  0x31   : > { %s4727_s12 = scalar_lea.vmem %s352_s15, 16  ;;  %s4734_s24 = scalar_lea.vmem %s352_s15, 32 }
  0x32   : > { %p4728_p12 = scmp.ne.s32.totalorder %s352_s15, %s4727_s12  ;;  %p4735_p2 = scmp.lt.s32.totalorder %s352_s15, %s352_s15 }
  0x33   : > { %p4736_p4 = scmp.lt.s32.totalorder %s4734_s24, %s4727_s12 }
  0x34   : > { %p4730_p13 = pnand %p4728_p12, %p5335_p7 }
  0x35   : > { %p4737_p3 = por %p4736_p4, %p4735_p2 }
  0x36   : > { %p4731_p0 = pneg %p4730_p13 }
  0x38   : > { %p4738_p1 = pnand %p4737_p3, %p4731_p0 }
  0x3a   : > { %4741 = shalt.err (!%p4738_p1)
}
  0x3b   : > { %4332 = dma.hbm_to_vmem [thread:$0]  (!%p5319_p5), %s8142_s1, 16, %s352_s15, [#allocation14]  }
  0x3c   : > { %s8144_s3 = sld [smem:[#allocation161_spill]] }
  0x42   : > { %s4742_s19 = scalar_lea.hbm %s8144_s3, 64 }
  0x43   : > { %p4743_p6 = scmp.ne.s32.totalorder %s8144_s3, %s4742_s19  ;;  %p4749_p1 = scmp.lt.u32.totalorder %s4742_s19, %s8144_s3 }
  0x45   : > { %p4745_p8 = pnand %p4743_p6, %p5335_p7 }
  0x47   : > { %p4746_p9 = pneg %p4745_p8 }
  0x49   : > { %p4751_p3 = pnand %p4749_p1, %p4746_p9 }
  0x4b   : > { %4754 = shalt.err (!%p4751_p3)
}
  0x4c   : > { %s4755_s15 = scalar_lea.vmem %s5323_s17, 64  ;;  %p4763_p13 = scmp.lt.s32.totalorder %s5323_s17, %s5323_s17 }
  0x4d   : > { %p4756_p10 = scmp.ne.s32.totalorder %s5323_s17, %s4755_s15  ;;  %p4764_p0 = scmp.lt.s32.totalorder %s4755_s15, %s4755_s15 }
  0x4f   : > { %p4758_p11 = pnand %p4756_p10, %p5335_p7  ;;  %p4765_p2 = por %p4764_p0, %p4763_p13 }
  0x51   : > { %p4759_p12 = pneg %p4758_p11 }
  0x53   : > { %p4766_p4 = pnand %p4765_p2, %p4759_p12 }
  0x55   : > { %4769 = shalt.err (!%p4766_p4)
}
  0x56   : > { %4338 = dma.hbm_to_vmem [thread:$0]  (!%p5319_p5), %s8144_s3, 64, %s5323_s17, [#allocation17]  }
  0x57   : > { %s8145_s5 = sld [smem:[#allocation163_spill]] }
  0x5d   : > { %s4770_s13 = scalar_lea.hbm %s8145_s5, 1024 }
  0x5e   : > { %p4771_p6 = scmp.ne.s32.totalorder %s8145_s5, %s4770_s13  ;;  %p4777_p1 = scmp.lt.u32.totalorder %s4770_s13, %s8145_s5 }
  0x60   : > { %p4773_p8 = pnand %p4771_p6, %p5335_p7 }
  0x62   : > { %p4774_p9 = pneg %p4773_p8 }
  0x64   : > { %p4779_p3 = pnand %p4777_p1, %p4774_p9 }
  0x66   : > { %4782 = shalt.err (!%p4779_p3)
}
  0x67   : > { %s4783_s15 = scalar_lea.vmem %s397_s20, 1024  ;;  %p4791_p13 = scmp.lt.s32.totalorder %s397_s20, %s397_s20 }
  0x68   : > { %p4784_p10 = scmp.ne.s32.totalorder %s397_s20, %s4783_s15  ;;  %p4792_p0 = scmp.lt.s32.totalorder %s4783_s15, %s4783_s15 }
  0x6a   : > { %p4786_p11 = pnand %p4784_p10, %p5335_p7  ;;  %p4793_p2 = por %p4792_p0, %p4791_p13 }
  0x6c   : > { %p4787_p12 = pneg %p4786_p11 }
  0x6e   : > { %p4794_p4 = pnand %p4793_p2, %p4787_p12 }
  0x70   : > { %4797 = shalt.err (!%p4794_p4)
}
  0x71   : > { %s5179_s17 = smov 128   ;;  %s5180_s0 = smov 8  }
  0x72   : > { %4344 = dma.hbm_to_vmem [thread:$0]  (!%p5319_p5), %s8145_s5, 1024, %s397_s20, [#allocation20], %s5179_s17, %s5179_s17, %s5180_s0  }
  0x73   : > { %s5181_s29 = smov [#allocation22]   ;;  %s5182_s14 = smov [#allocation25]  }
  0x74   : > { %s423_s13 = sshll.u32 %s5181_s29, 4  ;;  %s444_s19 = sshll.u32 %s5182_s14, 4  ;;  %s424_s13 = int_to_ptr.vmem [resolvable:$true] %s423_s13  ;;  %s445_s19 = int_to_ptr.vmem [resolvable:$true] %s444_s19 }
  0x75   : > { %s4798_s15 = scalar_lea.hbm %s7998_s7, 32 }
  0x76   : > { %p4799_p6 = scmp.ne.s32.totalorder %s7998_s7, %s4798_s15  ;;  %p4805_p1 = scmp.lt.u32.totalorder %s4798_s15, %s7998_s7 }
  0x78   : > { %p4801_p8 = pnand %p4799_p6, %p5335_p7 }
  0x7a   : > { %p4802_p9 = pneg %p4801_p8 }
  0x7c   : > { %p4807_p3 = pnand %p4805_p1, %p4802_p9 }
  0x7e   : > { %4810 = shalt.err (!%p4807_p3)
}
  0x7f   : > { %s4811_s20 = scalar_lea.vmem %s424_s13, 32  ;;  %p4819_p13 = scmp.lt.s32.totalorder %s424_s13, %s424_s13 }
  0x80   : > { %p4812_p10 = scmp.ne.s32.totalorder %s424_s13, %s4811_s20  ;;  %p4820_p0 = scmp.lt.s32.totalorder %s4811_s20, %s4811_s20 }
  0x82   : > { %p4814_p11 = pnand %p4812_p10, %p5335_p7  ;;  %p4821_p2 = por %p4820_p0, %p4819_p13 }
  0x84   : > { %p4815_p12 = pneg %p4814_p11 }
  0x86   : > { %p4822_p4 = pnand %p4821_p2, %p4815_p12 }
  0x88   : > { %4825 = shalt.err (!%p4822_p4)
}
  0x89   : > { %4350 = dma.hbm_to_vmem [thread:$0]  (!%p5319_p5), %s7998_s7, 32, %s424_s13, [#allocation23]  }
  0x8a   : > { %s4826_s30 = scalar_lea.hbm %s8000_s9, 1024 }
  0x8b   : > { %p4827_p6 = scmp.ne.s32.totalorder %s8000_s9, %s4826_s30  ;;  %p4833_p1 = scmp.lt.u32.totalorder %s4826_s30, %s8000_s9 }
  0x8d   : > { %p4829_p8 = pnand %p4827_p6, %p5335_p7 }
  0x8f   : > { %p4830_p9 = pneg %p4829_p8 }
  0x91   : > { %p4835_p3 = pnand %p4833_p1, %p4830_p9 }
  0x93   : > { %4838 = shalt.err (!%p4835_p3)
}
  0x94   : > { %s4839_s24 = scalar_lea.vmem %s445_s19, 1024  ;;  %p4847_p13 = scmp.lt.s32.totalorder %s445_s19, %s445_s19 }
  0x95   : > { %p4840_p10 = scmp.ne.s32.totalorder %s445_s19, %s4839_s24  ;;  %p4848_p0 = scmp.lt.s32.totalorder %s4839_s24, %s4839_s24 }
  0x97   : > { %p4842_p11 = pnand %p4840_p10, %p5335_p7  ;;  %p4849_p2 = por %p4848_p0, %p4847_p13 }
  0x99   : > { %p4843_p12 = pneg %p4842_p11 }
  0x9b   : > { %p4850_p4 = pnand %p4849_p2, %p4843_p12 }
  0x9d   : > { %4853 = shalt.err (!%p4850_p4)
}
  0x9e   : > { %4356 = dma.hbm_to_vmem [thread:$0]  (!%p5319_p5), %s8000_s9, 1024, %s445_s19, [#allocation26], %s5179_s17, %s5179_s17, %s5180_s0  }
  0x9f   : > { %s5183_s20 = smov [#allocation15]   ;;  %s5184_s3 = smov [#allocation18]  }
  0xa0   : > { %s361_s1 = sshll.u32 %s5183_s20, 4  ;;  %s386_s21 = sshll.u32 %s5184_s3, 4  ;;  %s362_s1 = int_to_ptr.vmem [resolvable:$true] %s361_s1  ;;  %s387_s21 = int_to_ptr.vmem [resolvable:$true] %s386_s21 }
  0xa1   : > { %s8146_s2 = sld [smem:[#allocation160_spill]] }
  0xa7   : > { %s4854_s25 = scalar_lea.hbm %s8146_s2, 512 }
  0xa8   : > { %p4855_p6 = scmp.ne.s32.totalorder %s8146_s2, %s4854_s25  ;;  %p4861_p1 = scmp.lt.u32.totalorder %s4854_s25, %s8146_s2 }
  0xaa   : > { %p4857_p8 = pnand %p4855_p6, %p5335_p7 }
  0xac   : > { %p4858_p9 = pneg %p4857_p8 }
  0xae   : > { %p4863_p3 = pnand %p4861_p1, %p4858_p9 }
  0xb0   : > { %4866 = shalt.err (!%p4863_p3)
}
  0xb1   : > { %s4867_s19 = scalar_lea.vmem %s362_s1, 512  ;;  %p4875_p13 = scmp.lt.s32.totalorder %s362_s1, %s362_s1 }
  0xb2   : > { %p4868_p10 = scmp.ne.s32.totalorder %s362_s1, %s4867_s19  ;;  %p4876_p0 = scmp.lt.s32.totalorder %s4867_s19, %s4867_s19 }
  0xb4   : > { %p4870_p11 = pnand %p4868_p10, %p5335_p7  ;;  %p4877_p2 = por %p4876_p0, %p4875_p13 }
  0xb6   : > { %p4871_p12 = pneg %p4870_p11 }
  0xb8   : > { %p4878_p4 = pnand %p4877_p2, %p4871_p12 }
  0xba   : > { %4881 = shalt.err (!%p4878_p4)
}
  0xbb   : > { %4335 = dma.hbm_to_vmem [thread:$0]  (!%p5319_p5), %s8146_s2, 512, %s362_s1, [#allocation14], %s5179_s17, %s5179_s17, %s5180_s0  }
  0xbc   : > { %s8147_s4 = sld [smem:[#allocation162_spill]] }
  0xc2   : > { %s4882_s22 = scalar_lea.hbm %s8147_s4, 16 }
  0xc3   : > { %p4883_p6 = scmp.ne.s32.totalorder %s8147_s4, %s4882_s22  ;;  %p4889_p1 = scmp.lt.u32.totalorder %s4882_s22, %s8147_s4 }
  0xc5   : > { %p4885_p8 = pnand %p4883_p6, %p5335_p7 }
  0xc7   : > { %p4886_p9 = pneg %p4885_p8 }
  0xc9   : > { %p4891_p3 = pnand %p4889_p1, %p4886_p9 }
  0xcb   : > { %4894 = shalt.err (!%p4891_p3)
}
  0xcc   : > { %s4895_s12 = scalar_lea.vmem %s387_s21, 16  ;;  %s4902_s1 = scalar_lea.vmem %s387_s21, 32 }
  0xcd   : > { %p4896_p10 = scmp.ne.s32.totalorder %s387_s21, %s4895_s12  ;;  %p4903_p13 = scmp.lt.s32.totalorder %s387_s21, %s387_s21 }
  0xce   : > { %p4904_p0 = scmp.lt.s32.totalorder %s4902_s1, %s4895_s12 }
  0xcf   : > { %p4898_p11 = pnand %p4896_p10, %p5335_p7 }
  0xd0   : > { %p4905_p2 = por %p4904_p0, %p4903_p13 }
  0xd1   : > { %p4899_p12 = pneg %p4898_p11 }
  0xd3   : > { %p4906_p4 = pnand %p4905_p2, %p4899_p12 }
  0xd5   : > { %4909 = shalt.err (!%p4906_p4)
}
  0xd6   : > { %4341 = dma.hbm_to_vmem [thread:$0]  (!%p5319_p5), %s8147_s4, 16, %s387_s21, [#allocation17]  }
  0xd7   : > { %s5185_s13 = smov [#allocation21]   ;;  %s5186_s20 = smov [#allocation24]  }
  0xd8   : > { %s409_s15 = sshll.u32 %s5185_s13, 4  ;;  %s434_s3 = sshll.u32 %s5186_s20, 4  ;;  %s410_s15 = int_to_ptr.vmem [resolvable:$true] %s409_s15  ;;  %s435_s3 = int_to_ptr.vmem [resolvable:$true] %s434_s3 }
  0xd9   : > { %s8148_s6 = sld [smem:[#allocation164_spill]] }
  0xdf   : > { %s4910_s25 = scalar_lea.hbm %s8148_s6, 1024 }
  0xe0   : > { %p4911_p6 = scmp.ne.s32.totalorder %s8148_s6, %s4910_s25  ;;  %p4917_p1 = scmp.lt.u32.totalorder %s4910_s25, %s8148_s6 }
  0xe2   : > { %p4913_p8 = pnand %p4911_p6, %p5335_p7 }
  0xe4   : > { %p4914_p9 = pneg %p4913_p8 }
  0xe6   : > { %p4919_p3 = pnand %p4917_p1, %p4914_p9 }
  0xe8   : > { %4922 = shalt.err (!%p4919_p3)
}
  0xe9   : > { %s4923_s21 = scalar_lea.vmem %s410_s15, 1024  ;;  %p4931_p13 = scmp.lt.s32.totalorder %s410_s15, %s410_s15 }
  0xea   : > { %p4924_p10 = scmp.ne.s32.totalorder %s410_s15, %s4923_s21  ;;  %p4932_p0 = scmp.lt.s32.totalorder %s4923_s21, %s4923_s21 }
  0xec   : > { %p4926_p11 = pnand %p4924_p10, %p5335_p7  ;;  %p4933_p2 = por %p4932_p0, %p4931_p13 }
  0xee   : > { %p4927_p12 = pneg %p4926_p11 }
  0xf0   : > { %p4934_p4 = pnand %p4933_p2, %p4927_p12 }
  0xf2   : > { %4937 = shalt.err (!%p4934_p4)
}
  0xf3   : > { %4347 = dma.hbm_to_vmem [thread:$0]  (!%p5319_p5), %s8148_s6, 1024, %s410_s15, [#allocation20], %s5179_s17, %s5179_s17, %s5180_s0  }
  0xf4   : > { %s4938_s22 = scalar_lea.hbm %s7999_s8, 16 }
  0xf5   : > { %p4939_p6 = scmp.ne.s32.totalorder %s7999_s8, %s4938_s22  ;;  %p4945_p1 = scmp.lt.u32.totalorder %s4938_s22, %s7999_s8 }
  0xf7   : > { %p4941_p8 = pnand %p4939_p6, %p5335_p7 }
  0xf9   : > { %p4942_p9 = pneg %p4941_p8 }
  0xfb   : > { %p4947_p3 = pnand %p4945_p1, %p4942_p9 }
  0xfd   : > { %4950 = shalt.err (!%p4947_p3)
}
  0xfe   : > { %s4951_s12 = scalar_lea.vmem %s435_s3, 16  ;;  %s4958_s15 = scalar_lea.vmem %s435_s3, 32 }
  0xff   : > { %p4952_p10 = scmp.ne.s32.totalorder %s435_s3, %s4951_s12  ;;  %p4959_p13 = scmp.lt.s32.totalorder %s435_s3, %s435_s3 }
 0x100   : > { %p4960_p0 = scmp.lt.s32.totalorder %s4958_s15, %s4951_s12 }
 0x101   : > { %p4954_p11 = pnand %p4952_p10, %p5335_p7 }
 0x102   : > { %p4961_p2 = por %p4960_p0, %p4959_p13 }
 0x103   : > { %p4955_p12 = pneg %p4954_p11 }
 0x105   : > { %p4962_p4 = pnand %p4961_p2, %p4955_p12 }
 0x107   : > { %4965 = shalt.err (!%p4962_p4)
}
 0x108   : > { %4353 = dma.hbm_to_vmem [thread:$0]  (!%p5319_p5), %s7999_s8, 16, %s435_s3, [#allocation23]  }
 0x109   : > { %s5187_s24 = smov [#allocation27]   ;;  %s5188_s13 = smov [#allocation28]  }
 0x10a   : > { %s458_s19 = sshll.u32 %s5187_s24, 4  ;;  %s468_s20 = sshll.u32 %s5188_s13, 4  ;;  %s459_s19 = int_to_ptr.vmem [resolvable:$true] %s458_s19  ;;  %s469_s20 = int_to_ptr.vmem [resolvable:$true] %s468_s20 }
 0x10b   : > { %s4966_s25 = scalar_lea.hbm %s8001_s10, 16 }
 0x10c   : > { %p4967_p6 = scmp.ne.s32.totalorder %s8001_s10, %s4966_s25  ;;  %p4973_p1 = scmp.lt.u32.totalorder %s4966_s25, %s8001_s10 }
 0x10e   : > { %p4969_p8 = pnand %p4967_p6, %p5335_p7 }
 0x110   : > { %p4970_p9 = pneg %p4969_p8 }
 0x112   : > { %p4975_p3 = pnand %p4973_p1, %p4970_p9 }
 0x114   : > { %4978 = shalt.err (!%p4975_p3)
}
 0x115   : > { %s4979_s3 = scalar_lea.vmem %s459_s19, 16  ;;  %s4986_s1 = scalar_lea.vmem %s459_s19, 32 }
 0x116   : > { %p4980_p10 = scmp.ne.s32.totalorder %s459_s19, %s4979_s3  ;;  %p4987_p13 = scmp.lt.s32.totalorder %s459_s19, %s459_s19 }
 0x117   : > { %p4988_p0 = scmp.lt.s32.totalorder %s4986_s1, %s4979_s3 }
 0x118   : > { %p4982_p11 = pnand %p4980_p10, %p5335_p7 }
 0x119   : > { %p4989_p2 = por %p4988_p0, %p4987_p13 }
 0x11a   : > { %p4983_p12 = pneg %p4982_p11 }
 0x11c   : > { %p4990_p4 = pnand %p4989_p2, %p4983_p12 }
 0x11e   : > { %4993 = shalt.err (!%p4990_p4)
}
 0x11f   : > { %4359 = dma.hbm_to_vmem [thread:$0]  (!%p5319_p5), %s8001_s10, 16, %s459_s19, [#allocation26]  }
 0x120   : > { %s4994_s30 = scalar_lea.hbm %s8002_s11, 1024 }
 0x121   : > { %p4995_p6 = scmp.ne.s32.totalorder %s8002_s11, %s4994_s30  ;;  %p5001_p1 = scmp.lt.u32.totalorder %s4994_s30, %s8002_s11 }
 0x123   : > { %p4997_p8 = pnand %p4995_p6, %p5335_p7 }
 0x125   : > { %p4998_p9 = pneg %p4997_p8 }
 0x127   : > { %p5003_p3 = pnand %p5001_p1, %p4998_p9 }
 0x129   : > { %5006 = shalt.err (!%p5003_p3)
}
 0x12a   : > { %s5007_s15 = scalar_lea.vmem %s469_s20, 1024  ;;  %p5015_p13 = scmp.lt.s32.totalorder %s469_s20, %s469_s20 }
 0x12b   : > { %p5008_p10 = scmp.ne.s32.totalorder %s469_s20, %s5007_s15  ;;  %p5016_p0 = scmp.lt.s32.totalorder %s5007_s15, %s5007_s15 }
 0x12d   : > { %p5010_p11 = pnand %p5008_p10, %p5335_p7  ;;  %p5017_p2 = por %p5016_p0, %p5015_p13 }
 0x12f   : > { %p5011_p12 = pneg %p5010_p11 }
 0x131   : > { %p5018_p4 = pnand %p5017_p2, %p5011_p12 }
 0x133   : > { %5021 = shalt.err (!%p5018_p4)
}
 0x134   : > { %s8149_s16 = sld [smem:[#allocation40_spill]]  ;;  %s8150_s1 = sld [smem:[#allocation39_spill]] }
 0x135   : > { %4362 = dma.hbm_to_vmem [thread:$0]  (!%p5319_p5), %s8002_s11, 1024, %s469_s20, [#allocation29], %s5179_s17, %s5179_s17, %s5180_s0  }
 0x136   : > { %s4079_s18 = sadd.s32 4294967294, %s5174_s28   ;;  %s8151_s21 = sld [smem:[#allocation43_spill]] }
 0x137   : > { %s43_s24 = sadd.s32 1, %s5166_s26  ;;  %s46_s13 = sadd.s32 1, %s5170_s27 }
 0x138   : > { %p44_p7 = scmp.ge.s32.totalorder %s43_s24, 2  ;;  %s55_s22 = sadd.s32 1, %s5154_s23 }
 0x139   : > { %p63_p8 = scmp.eq.s32.totalorder %s5174_s28, 0  ;;  %s8153_s17 = sadd.s32 4294967295, %s5174_s28  }
 0x13a   : > { %p62_p6 = scmp.ne.s32.totalorder %s5154_s23, %s8149_s16  ;;  %s8618_s24 = smov (%p44_p7, %s43_s24), 0 }
 0x13b   : > { %s8620_s13 = smov (!%p44_p7, %s46_s13), %s5170_s27  ;;  %s51_s30 = ssub.s32 %s5166_s26, %s8618_s24 }
 0x13c   : > { %p5564_p9 = por %p63_p8, %p62_p6  ;;  %p48_p5 = scmp.ge.s32.totalorder %s8620_s13, 2 }
 0x13d   : > { %p68_p1 = scmp.ne.s32.totalorder %s8149_s16, %s8150_s1  ;;  %p325_p3 = scmp.eq.s32.totalorder %s8153_s17, 3 }
 0x13e   : > { %p331_p10 = scmp.eq.s32.totalorder %s4079_s18, 3  ;;  %s8622_s13 = smov (%p48_p5, %s8620_s13), 0 }
 0x13f   : > { %p8154_p11 = scmp.ne.s32.totalorder %s8151_s21, 0  ;;  %p5580_p13 = por %p325_p3, %p62_p6 }
 0x140   : > { %s50_s29 = ssub.s32 %s5170_s27, %s8622_s13  ;;  %p5586_p0 = por %p331_p10, %p68_p1 }
 0x141   : > { %p5576_p12 = por %p8154_p11, %p68_p1  ;;  %s52_s12 = sor.u32 %s51_s30, %s50_s29 }
 0x142   : > { %s8156_s20 = scalar_select %p5580_p13, 1, 0 }
 0x143   : > { %s8157_s14 = scalar_select %p5586_p0, 1, 0 }
 0x144   : > { %p4382_p2 = scmp.lt.s32.totalorder %s5174_s28, 4  ;;  %p53_p4 = scmp.eq.s32.totalorder %s52_s12, 0 }
 0x145   : > { %s482_s15 = sand.u32 1, %s5154_s23   ;;  %s4094_s16 = sshll.u32 %s5170_s27, 1 }
 0x146   : > { %s4093_s19 = sshll.u32 %s482_s15, 3  ;;  %s491_s1 = sadd.s32 %s5166_s26, %s4094_s16 }
 0x147   : > { %s5593_s3 = scalar_select %p53_p4, %s5154_s23, %s55_s22  }
 0x148   : > { %s486_s18 = scalar_lea.vmem [#allocation10], %s4093_s19  ;;  %s4095_s17 = sshll.u32 %s491_s1, 7 }
 0x149   : > { %s495_s21 = sshll.u32 %s486_s18, 4  ;;  %s8158_s5 = sld [smem:[#allocation158_spill]]  ;;  %s5597_s21 = int_to_ptr.vmem [resolvable:$true] %s495_s21 }
 0x14a   : > { %p5606_p7 = pnand %p4382_p2, %p5564_p9  ;;  %s483_s30 = scalar_lea.sflag [#allocation11], %s482_s15 }
 0x14c   : > { %p5024_p8 = pneg %p5606_p7 }
 0x14f   : > { %s5602_s6 = scalar_lea.hbm %s8158_s5, %s4095_s17  ;;  %s5027_s25 = scalar_lea.hbm %s8158_s5, 512 }
 0x150   : > { %s5022_s29 = scalar_lea.hbm %s5602_s6, 128  ;;  %p5028_p9 = scmp.lt.u32.totalorder %s5602_s6, %s8158_s5 }
 0x151   : > { %p5023_p6 = scmp.ne.s32.totalorder %s5602_s6, %s5022_s29  ;;  %p5029_p3 = scmp.lt.u32.totalorder %s5027_s25, %s5022_s29 }
 0x152   : > { %p5031_p11 = scmp.lt.u32.totalorder %s5022_s29, %s5602_s6 }
 0x153   : > { %p5025_p5 = pnand %p5024_p8, %p5023_p6  ;;  %p5030_p10 = por %p5029_p3, %p5028_p9 }
 0x155   : > { %p5026_p1 = pneg %p5025_p5  ;;  %p5032_p2 = por %p5031_p11, %p5030_p10 }
 0x157   : > { %p5033_p4 = pnand %p5032_p2, %p5026_p1 }
 0x159   : > { %5036 = shalt.err (!%p5033_p4)
}
 0x15a   : > { %s5037_s15 = scalar_lea.vmem %s5597_s21, 128  ;;  %s5189_s16 = smov [#allocation10]  }
 0x15b   : > { %p5038_p6 = scmp.ne.s32.totalorder %s5597_s21, %s5037_s15  ;;  %s5042_s1 = sshll.u32 %s5189_s16, 4  ;;  %s5043_s1 = int_to_ptr.vmem [resolvable:$false] %s5042_s1 }
 0x15c   : > { %s5044_s18 = scalar_lea.vmem %s5043_s1, 256  ;;  %p5045_p13 = scmp.lt.s32.totalorder %s5597_s21, %s5043_s1 }
 0x15d   : > { %p5040_p5 = pnand %p5038_p6, %p5024_p8  ;;  %p5046_p9 = scmp.lt.s32.totalorder %s5044_s18, %s5037_s15 }
 0x15f   : > { %p5041_p0 = pneg %p5040_p5  ;;  %p5047_p3 = por %p5046_p9, %p5045_p13 }
 0x161   : > { %p5048_p10 = pnand %p5047_p3, %p5041_p0 }
 0x163   : > { %5051 = shalt.err (!%p5048_p10)
}
 0x164   : > { %4366 = dma.hbm_to_vmem [thread:$0]  (!%p5606_p7), %s5602_s6, 128, %s5597_s21, %s483_s30  }
 0x165   : > { %s8160_s17 = sld [smem:[#allocation44_spill]] }
 0x16b   : > { %p8161_p1 = scmp.ne.s32.totalorder %s8160_s17, 0 }
 0x16d   : > { %504 = sbr.rel (%p8161_p1) target bundleno = 1959 (0x7a7), region = 68 }
 0x174   : > { %s8162_s29 = sld [smem:[#allocation40_spill]] }
 0x17a   : > { %s5638_s2 = sand.u32 1, %s8162_s29  }
 0x17b   : > { %s4097_s4 = sshll.u32 %s5638_s2, 3  ;;  %s507_s25 = scalar_lea.sflag [#allocation11], %s5638_s2 }
 0x17c   : > { %s5642_s12 = scalar_lea.vmem [#allocation10], %s4097_s4 }
 0x17d   : > { %5113 = dma.done.wait (%p5576_p12), %s507_s25, 128  }
 0x17e   : > { %5115 = vsyncadd (%p5576_p12), %s507_s25, 4294967168  ;;  %s8163_s22 = sld [smem:[#allocation43_spill]] }
 0x184   : > { %p8164_p13 = scmp.ne.s32.totalorder %s8163_s22, 0 }
 0x186   : > { %5117 = dma.done.wait (%p8164_p13), [#allocation14], 528  }
 0x187   : > { %5119 = vsyncadd (%p8164_p13), [#allocation14], 4294966768 }
 0x188   : > { %5121 = dma.done.wait (%p8164_p13), [#allocation17], 80  }
 0x189   : > { %5123 = vsyncadd (%p8164_p13), [#allocation17], 4294967216 }
 0x18a   : > { %5125 = dma.done.wait (%p8164_p13), [#allocation20], 2048  }
 0x18b   : > { %5127 = vsyncadd (%p8164_p13), [#allocation20], 4294965248 }
 0x18c   : > { %5129 = dma.done.wait (%p8164_p13), [#allocation23], 48  }
 0x18d   : > { %5131 = vsyncadd (%p8164_p13), [#allocation23], 4294967248 }
 0x18e   : > { %5133 = dma.done.wait (%p8164_p13), [#allocation26], 1040  }
 0x18f   : > { %5135 = vsyncadd (%p8164_p13), [#allocation26], 4294966256 }
 0x190   : > { %5137 = dma.done.wait (%p8164_p13), [#allocation29], 1024  }
 0x191   : > { %5139 = vsyncadd (%p8164_p13), [#allocation29], 4294966272  ;;  %s5672_s6 = scalar_lea.vmem [#allocation30], %s4097_s4  ;;  %s8165_s0 = sld [smem:[#allocation41_spill]] }
 0x197   : > { %p4110_p12 = scmp.ne.s32.totalorder %s8165_s0, 0 }
 0x198   : > { %vm599_vm0 = vcmask (!%p4110_p12), 523264   ;;  %vm608_vm1 = vcmask (!%p4110_p12), 518144   ;;  %v5190_v0 = vmov (!%p4110_p12), 0.0  }
 0x199   : > { %598 = sbr.rel (%p4110_p12) target bundleno = 416 (0x1a0), region = 120  ;;  %600 = vst.msk [vmem:[#allocation2] sm:$0xff] (!%p4110_p12), %vm599_vm0, %v5190_v0  ;;  %601 = vst.msk [vmem:[#allocation2 + $0x8] sm:$0xff] (!%p4110_p12), %vm599_vm0, %v5190_v0 }
 0x19a   : > { %602 = vst.msk [vmem:[#allocation2 + $0x10] sm:$0xff] (!%p4110_p12), %vm599_vm0, %v5190_v0  ;;  %603 = vst.msk [vmem:[#allocation2 + $0x18] sm:$0xff] (!%p4110_p12), %vm599_vm0, %v5190_v0 }
 0x19b   : > { %604 = vst.msk [vmem:[#allocation2 + $0x20] sm:$0xff] (!%p4110_p12), %vm599_vm0, %v5190_v0  ;;  %605 = vst.msk [vmem:[#allocation2 + $0x28] sm:$0xff] (!%p4110_p12), %vm599_vm0, %v5190_v0 }
 0x19c   : > { %606 = vst.msk [vmem:[#allocation2 + $0x30] sm:$0xff] (!%p4110_p12), %vm599_vm0, %v5190_v0  ;;  %607 = vst.msk [vmem:[#allocation2 + $0x38] sm:$0xff] (!%p4110_p12), %vm599_vm0, %v5190_v0 }
 0x19d   : > { %609 = vst.msk [vmem:[#allocation3] sm:$0x7] (!%p4110_p12), %vm608_vm1, %v5190_v0 }
 0x1a0 PF: > { %v610_v1 = vld [vmem:[%s5642_s12] sm:$0xff]  ;;  %vm612_vm2 = vcmask 261120   ;;  %v629_v4 = vld [vmem:[#allocation15] sm:$0xff]  ;;  %v8015_v7 = vmov 0.0|0.0   ;;  %vm5192_vm3 = vmmov 0   ;;  %v5193_v10 = vmov 0.0  }
 0x1a1   : > { %v611_v2 = vmul.f32 %v610_v1, %v610_v1  ;;  %v630_v5 = vld [vmem:[#allocation15 + $0x8] sm:$0xff]  ;;  %v631_v6 = vld [vmem:[#allocation15 + $0x10] sm:$0xff]  ;;  %4239 = vmatprep.subr.bf16.mxu0 %v8015_v7  ;;  %v632_v9 = vld [vmem:[#allocation15 + $0x18] sm:$0xff]  ;;  %4174 = vmatprep.mubr.msk.f32.mxu0 %vm5192_vm3, %v5193_v10  ;;  %vm713_vm4 = vcmask 518144   ;;  %vm710_vm5 = vcmask 523264   ;;  %s5194_s21 = smov 64  }
 0x1a2   : > { %v4240_v8 = vpack.c.bf16 %v630_v5, %v629_v4  ;;  %4245 = vmatprep.subr.bf16.mxu1 %v8015_v7  ;;  %4193 = vmatprep.mubr.msk.f32.mxu1 %vm5192_vm3, %v5193_v10  ;;  %v4243_v11 = vpack.c.bf16 %v632_v9, %v631_v6  ;;  %v4111_v16 = vld [vmem:[#allocation13] ss:$0 sm:$0xff]  ;;  %v767_v20 = vld [vmem:[#allocation19] sm:$0xff]  ;;  %v768_v21 = vld [vmem:[#allocation19 + $0x8] sm:$0xff]  ;;  %vm939_vm6 = vcmask 1041408   ;;  %v1046_v9 = vlaneseq  ;;  %s8603_s30 = sld [smem:[#allocation42_spill]] }
 0x1a3   : > { %v613_v3 = vsel %vm612_vm2, %v611_v2, 0.0  ;;  %v849_v22 = vld [vmem:[#allocation21] sm:$0xff]  ;;  %v4246_v23 = vpack.c.bf16 %v768_v21, %v767_v20  ;;  %v850_v24 = vld [vmem:[#allocation21 + $0x8] sm:$0xff]  ;;  %v769_v26 = vld [vmem:[#allocation19 + $0x10] sm:$0xff]  ;;  %vm935_vm7 = vcmask 15360   ;;  %vm3417_vm10 = vcmask 523520  }
 0x1a4   : > { %614 = vadd.xlane.f32.xlu0 %v613_v3  ;;  %4241 = vmatpush3.bf16.msra.mxu0 %v4240_v8  ;;  %v712_v19 = vld [vmem:[#allocation3] sm:$0x7]  ;;  %v4258_v25 = vpack.c.bf16 %v850_v24, %v849_v22  ;;  %v770_v27 = vld [vmem:[#allocation19 + $0x18] sm:$0xff]  ;;  %v771_v32 = vld [vmem:[#allocation19 + $0x20] sm:$0xff]  ;;  %vm2379_vm11 = vcmask 1040384   ;;  %vm2382_vm12 = vcmask 1042432  }
 0x1a5   : > { %4242 = vmatprep.subr.bf16.mxu0 %v8015_v7  ;;  %714 = vst.msk [vmem:[#allocation4] sm:$0x7] %vm713_vm4, %v712_v19  ;;  %4247 = vmatpush3.bf16.msra.mxu1 %v4246_v23  ;;  %v851_v28 = vld [vmem:[#allocation21 + $0x10] sm:$0xff]  ;;  %v4249_v29 = vpack.c.bf16 %v770_v27, %v769_v26  ;;  %v852_v30 = vld [vmem:[#allocation21 + $0x18] sm:$0xff]  ;;  %v772_v33 = vld [vmem:[#allocation19 + $0x28] sm:$0xff]  ;;  %vm2384_vm13 = vcmask 1043456  }
 0x1a6   : > { %4248 = vmatprep.subr.bf16.mxu1 %v8015_v7  ;;  %v4261_v31 = vpack.c.bf16 %v852_v30, %v851_v28  ;;  %v853_v34 = vld [vmem:[#allocation21 + $0x20] sm:$0xff]  ;;  %v4252_v35 = vpack.c.bf16 %v772_v33, %v771_v32  ;;  %v854_v36 = vld [vmem:[#allocation21 + $0x28] sm:$0xff]  ;;  %v773_v37 = vld [vmem:[#allocation19 + $0x30] sm:$0xff]  ;;  %vm2386_vm14 = vcmask 1044480   ;;  %vm2388_vm15 = vcmask 1045504   ;;  %s8604_s19 = sld [smem:[#allocation41_spill]] }
 0x1a7   : > { %v774_v38 = vld [vmem:[#allocation19 + $0x38] sm:$0xff]  ;;  %v4264_v39 = vpack.c.bf16 %v854_v36, %v853_v34  ;;  %v855_v40 = vld [vmem:[#allocation21 + $0x30] sm:$0xff]  ;;  %v927_v8 = vld [vmem:[#allocation22] sm:$0x3]  ;;  %vm2390_vm0 = vcmask 1046528   ;;  %s3888_s18 = sshll.u32 %s5672_s6, 4  ;;  %s7937_s18 = int_to_ptr.vmem [resolvable:$true] %s3888_s18 }
 0x1a8   : > { %4244 = vmatpush3.bf16.msra.mxu0 %v4243_v11  ;;  %v856_v41 = vld [vmem:[#allocation21 + $0x38] sm:$0xff]  ;;  %v4255_v42 = vpack.c.bf16 %v774_v38, %v773_v37  ;;  %v5712_v11 = vshrl.u32 %v1046_v9, 7  ;;  %s4128_s15 = sshll.u32 %s8603_s30, 1  ;;  %s8605_s4 = sld [smem:[#allocation165_spill]] }
 0x1a9   : > { %4257 = vmatprep.subr.bf16.mxu0 %v8015_v7  ;;  %4250 = vmatpush3.bf16.msra.mxu1 %v4249_v29  ;;  %v4267_v43 = vpack.c.bf16 %v856_v41, %v855_v40  ;;  %v4113_v46 = vld [vmem:[#allocation16] ss:$0 sm:$0xff]  ;;  %v4114_v47 = vld [vmem:[#allocation16 + $0x1] ss:$0 sm:$0xff]  ;;  %v4115_v48 = vld [vmem:[#allocation16 + $0x2] ss:$0 sm:$0xff] }
 0x1aa   : > { %4251 = vmatprep.subr.bf16.mxu1 %v8015_v7  ;;  %v4116_v56 = vld [vmem:[#allocation16 + $0x3] ss:$0 sm:$0xff]  ;;  %v4117_v61 = vld [vmem:[#allocation18] ss:$0 sm:$0xff]  ;;  %v1118_v19 = vsub.s32 2, %v5712_v11  ;;  %v1153_v21 = vsub.s32 3, %v5712_v11 }
 0x1ab   : > { %v1188_v23 = vsub.s32 4, %v5712_v11  ;;  %v1258_v27 = vsub.s32 6, %v5712_v11  ;;  %v1293_v29 = vsub.s32 7, %v5712_v11  ;;  %s3873_s22 = scalar_lea.sflag [#allocation12], %s5638_s2  ;;  %s5052_s0 = scalar_lea.vmem %s7937_s18, 128 }
 0x1ac   : > { %s3884_s16 = sadd.s32 %s8604_s19, %s4128_s15  ;;  %p5053_p0 = scmp.ne.s32.totalorder %s7937_s18, %s5052_s0 }
 0x1ad   : > { %4253 = vmatpush3.bf16.msra.mxu1 %v4252_v35  ;;  %s4129_s1 = sshll.u32 %s3884_s16, 7  ;;  %p8606_p7 = scmp.ne.s32.totalorder %s8156_s20, 0 }
 0x1ae   : > { %4254 = vmatprep.subr.bf16.mxu1 %v8015_v7  ;;  %s7935_s25 = scalar_lea.hbm %s8605_s4, %s4129_s1 }
 0x1af   : > { %p5054_p8 = pnand %p5053_p0, %p8606_p7 }
 0x1b1   : > { %4256 = vmatpush3.bf16.msra.mxu1 %v4255_v42  ;;  %p5055_p11 = pneg %p5054_p8 }
 0x1b2   : > { %4269 = vmatprep.subr.bf16.mxu1 %v8015_v7 }
 0x231   : > { %v615_v12 = vpop.xlane.xlu0 %614 }
 0x232   : > { %v617_v13 = vmul.f32 0.03125, %v615_v12  ;;  %v5715_v12 = vsub.s32 0, %v5712_v11 }
 0x234   : > { %v618_v14 = vadd.f32 1.1920929e-07, %v617_v13 }
 0x236   : > { %4479 = vrsqrt.f32 %v618_v14 }
 0x240   : > { %v4480_v15 = vpop.eup %4479 }
 0x241   : > { %v620_v17 = vmul.f32 %v4480_v15, %v610_v1  ;;  %v1083_v15 = vsub.s32 1, %v5712_v11 }
 0x243   : > { %v628_v18 = vmul.f32 %v4111_v16, %v620_v17 }
 0x245   : > { %4175 = vmatmul.mubr.msk.f32.vlgmr.msra.gmra.mrb[0].mxu0 %vm612_vm2, %v628_v18 }
 0x246   : > { %4212 = vmatprep.mubr.msk.f32.mxu0 %vm5192_vm3, %v5193_v10  ;;  %4259 = vmatpush3.bf16.msra.mxu0 %v4258_v25  ;;  %v1223_v25 = vsub.s32 5, %v5712_v11 }
 0x247   : > { %4260 = vmatprep.subr.bf16.mxu0 %v8015_v7 }
 0x24a   : > { %4262 = vmatpush3.bf16.msra.mxu0 %v4261_v31 }
 0x24b   : > { %4263 = vmatprep.subr.bf16.mxu0 %v8015_v7 }
 0x24e   : > { %4265 = vmatpush3.bf16.msra.mxu0 %v4264_v39 }
 0x24f   : > { %4266 = vmatprep.subr.bf16.mxu0 %v8015_v7 }
 0x252   : > { %4268 = vmatpush3.bf16.msra.mxu0 %v4267_v43 }
 0x253   : > { %4215 = vmatprep.subr.mxu0 %v5193_v10 }
 0x318   : > { %v702_v44 = vpop.f32.mrb[0].mxu0 }
 0x319   : > { %715 = vst.msk [vmem:[#allocation4 + $0x3] sm:$0xff] %vm710_vm5, %v702_v44  ;;  %707 = vrot.lane.b32.xlu0 %v702_v44, %s5194_s21  ;;  %v4176_v45 = vpop.f32.mrb[1].mxu0 }
 0x320   : > { %v716_v49 = vld [vmem:[#allocation4 + $0x8] sm:$0x7]  ;;  %v718_v50 = vld [vmem:[#allocation4] sm:$0xff] }
 0x321   : > { %v726_v51 = vld [vmem:[#allocation4 + $0x1] sm:$0xff]  ;;  %717 = vst.msk [vmem:[#allocation3] sm:$0x7] %vm713_vm4, %v716_v49  ;;  %v724_v52 = vmul.f32 %v4113_v46, %v718_v50 }
 0x322   : > { %v732_v53 = vmul.f32 %v4114_v47, %v726_v51  ;;  %v734_v54 = vld [vmem:[#allocation4 + $0x2] sm:$0xff] }
 0x323   : > { %v742_v55 = vld [vmem:[#allocation4 + $0x3] sm:$0xff]  ;;  %v740_v58 = vmul.f32 %v4115_v48, %v734_v54 }
 0x324   : > { %v733_v57 = vadd.f32 %v732_v53, %v724_v52  ;;  %v748_v60 = vmul.f32 %v4116_v56, %v742_v55 }
 0x326   : > { %v741_v59 = vadd.f32 %v740_v58, %v733_v57 }
 0x328   : > { %v749_v62 = vadd.f32 %v748_v60, %v741_v59 }
 0x32a   : > { %v757_v63 = vadd.f32 %v4117_v61, %v749_v62 }
 0x32c   : > { %v4118_v0 = vmul.f32 -1.442695, %v757_v63 }
 0x32e   : > { %4481 = vpow2.f32 %v4118_v0 }
 0x338   : > { %v4482_v1 = vpop.eup %4481 }
 0x339   : > { %v761_v2 = vadd.f32 1.0, %v4482_v1 }
 0x33b   : > { %4483 = vrcp.f32 %v761_v2 }
 0x345   : > { %v4484_v3 = vpop.eup %4483 }
 0x346   : > { %v764_v4 = vmul.f32 %v4484_v3, %v757_v63 }
 0x348   : > { %765 = vst.msk [vmem:[#allocation5] sm:$0xff] %vm710_vm5, %v764_v4 }
 0x34f   : > { %v5700_v5 = vld [vmem:[#allocation5] sm:$0xff] }
 0x350   : > { %4194 = vmatmul.mubr.msk.f32.vlgmr.msra.gmra.mrb[0].mxu1 %vm710_vm5, %v5700_v5  ;;  %4213 = vmatmul.mubr.msk.f32.vlgmr.msra.gmra.mrb[2].mxu0 %vm710_vm5, %v5700_v5 }
 0x351   : > { %4217 = vmatprep.mubr.msk.f32.mxu0 %vm5192_vm3, %v5193_v10  ;;  %4236 = vmatprep.mubr.msk.f32.mxu1 %vm5192_vm3, %v5193_v10 }
 0x352   : > { %4216 = vmatpush3.msk.msra.mxu0 %vm939_vm6, %v927_v8 }
 0x38b   : > { %v708_v6 = vpop.permute.xlu0 %707 }
 0x38c   : > { %711 = vst.msk [vmem:[#allocation6] sm:$0xff] %vm710_vm5, %v708_v6 }
 0x423   : > { %v5717_v13 = vpop.f32.mrb[0].mxu1  ;;  %v923_v14 = vpop.f32.mrb[2].mxu0 }
 0x424   : > { %v5721_v10 = vrot.slane %v5717_v13, %v5715_v12  ;;  %v4195_v16 = vpop.f32.mrb[1].mxu1  ;;  %v4214_v17 = vpop.f32.mrb[3].mxu0  ;;  %4218 = vmatmul.mubr.msk.f32.vlgmr.msra.gmra.mrb[4].mxu0 %vm935_vm7, %v923_v14  ;;  %v5727_v18 = vrot.slane %v5717_v13, %v1083_v15  ;;  %v5739_v20 = vrot.slane %v5717_v13, %v1118_v19  ;;  %v5751_v22 = vrot.slane %v5717_v13, %v1153_v21 }
 0x425   : > { %v5763_v24 = vrot.slane %v5717_v13, %v1188_v23  ;;  %v5775_v26 = vrot.slane %v5717_v13, %v1223_v25  ;;  %v5787_v28 = vrot.slane %v5717_v13, %v1258_v27  ;;  %v5799_v30 = vrot.slane %v5717_v13, %v1293_v29  ;;  %v4121_v23 = vld [vmem:[#allocation24] ss:$0 sm:$0xff] }
 0x426   : > { %8166 = vst [vmem:[#allocation45_spill] sm:$0xff] %v5721_v10  ;;  %1079 = vbcast.lane.b32.xlu0 %v5721_v10, 312  ;;  %1051 = vbcast.lane.b32.xlu1 %v5721_v10, 256  ;;  %8167 = vst [vmem:[#allocation46_spill] sm:$0xff] %v5727_v18 }
 0x42a   : > { %1090 = vbcast.lane.b32.xlu0 %v5727_v18, 264  ;;  %1055 = vbcast.lane.b32.xlu1 %v5721_v10, 264 }
 0x42e   : > { %1098 = vbcast.lane.b32.xlu0 %v5727_v18, 280  ;;  %1059 = vbcast.lane.b32.xlu1 %v5721_v10, 272 }
 0x432   : > { %1106 = vbcast.lane.b32.xlu0 %v5727_v18, 296  ;;  %1063 = vbcast.lane.b32.xlu1 %v5721_v10, 280 }
 0x436   : > { %1114 = vbcast.lane.b32.xlu0 %v5727_v18, 312  ;;  %1067 = vbcast.lane.b32.xlu1 %v5721_v10, 288 }
 0x43a   : > { %1125 = vbcast.lane.b32.xlu0 %v5739_v20, 264  ;;  %1071 = vbcast.lane.b32.xlu1 %v5721_v10, 296 }
 0x43e   : > { %1133 = vbcast.lane.b32.xlu0 %v5739_v20, 280  ;;  %1075 = vbcast.lane.b32.xlu1 %v5721_v10, 304 }
 0x442   : > { %1141 = vbcast.lane.b32.xlu0 %v5739_v20, 296  ;;  %1086 = vbcast.lane.b32.xlu1 %v5727_v18, 256 }
 0x446   : > { %1149 = vbcast.lane.b32.xlu0 %v5739_v20, 312  ;;  %1094 = vbcast.lane.b32.xlu1 %v5727_v18, 272 }
 0x44a   : > { %1160 = vbcast.lane.b32.xlu0 %v5751_v22, 264  ;;  %1102 = vbcast.lane.b32.xlu1 %v5727_v18, 288 }
 0x44e   : > { %1168 = vbcast.lane.b32.xlu0 %v5751_v22, 280  ;;  %1110 = vbcast.lane.b32.xlu1 %v5727_v18, 304 }
 0x452   : > { %1176 = vbcast.lane.b32.xlu0 %v5751_v22, 296  ;;  %1121 = vbcast.lane.b32.xlu1 %v5739_v20, 256 }
 0x456   : > { %1184 = vbcast.lane.b32.xlu0 %v5751_v22, 312  ;;  %1129 = vbcast.lane.b32.xlu1 %v5739_v20, 272 }
 0x45a   : > { %1195 = vbcast.lane.b32.xlu0 %v5763_v24, 264  ;;  %1137 = vbcast.lane.b32.xlu1 %v5739_v20, 288 }
 0x45e   : > { %1203 = vbcast.lane.b32.xlu0 %v5763_v24, 280  ;;  %1145 = vbcast.lane.b32.xlu1 %v5739_v20, 304 }
 0x462   : > { %1211 = vbcast.lane.b32.xlu0 %v5763_v24, 296  ;;  %1156 = vbcast.lane.b32.xlu1 %v5751_v22, 256 }
 0x466   : > { %1219 = vbcast.lane.b32.xlu0 %v5763_v24, 312  ;;  %1164 = vbcast.lane.b32.xlu1 %v5751_v22, 272 }
 0x46a   : > { %1230 = vbcast.lane.b32.xlu0 %v5775_v26, 264  ;;  %1172 = vbcast.lane.b32.xlu1 %v5751_v22, 288 }
 0x46e   : > { %1238 = vbcast.lane.b32.xlu0 %v5775_v26, 280  ;;  %1180 = vbcast.lane.b32.xlu1 %v5751_v22, 304 }
 0x472   : > { %1246 = vbcast.lane.b32.xlu0 %v5775_v26, 296  ;;  %1191 = vbcast.lane.b32.xlu1 %v5763_v24, 256 }
 0x476   : > { %1254 = vbcast.lane.b32.xlu0 %v5775_v26, 312  ;;  %1199 = vbcast.lane.b32.xlu1 %v5763_v24, 272 }
 0x47a   : > { %1265 = vbcast.lane.b32.xlu0 %v5787_v28, 264  ;;  %1207 = vbcast.lane.b32.xlu1 %v5763_v24, 288 }
 0x47e   : > { %1273 = vbcast.lane.b32.xlu0 %v5787_v28, 280  ;;  %1215 = vbcast.lane.b32.xlu1 %v5763_v24, 304 }
 0x482   : > { %1281 = vbcast.lane.b32.xlu0 %v5787_v28, 296  ;;  %1226 = vbcast.lane.b32.xlu1 %v5775_v26, 256 }
 0x486   : > { %1289 = vbcast.lane.b32.xlu0 %v5787_v28, 312  ;;  %1234 = vbcast.lane.b32.xlu1 %v5775_v26, 272 }
 0x48a   : > { %1300 = vbcast.lane.b32.xlu0 %v5799_v30, 264  ;;  %1242 = vbcast.lane.b32.xlu1 %v5775_v26, 288 }
 0x48e   : > { %1308 = vbcast.lane.b32.xlu0 %v5799_v30, 280  ;;  %1250 = vbcast.lane.b32.xlu1 %v5775_v26, 304 }
 0x492   : > { %1316 = vbcast.lane.b32.xlu0 %v5799_v30, 296  ;;  %1261 = vbcast.lane.b32.xlu1 %v5787_v28, 256 }
 0x496   : > { %1324 = vbcast.lane.b32.xlu0 %v5799_v30, 312  ;;  %1269 = vbcast.lane.b32.xlu1 %v5787_v28, 272 }
 0x498   : > { %v5809_v31 = vpop.permute.xlu0 %1079  ;;  %v5811_v32 = vpop.permute.xlu1 %1051 }
 0x499   : > { %8168 = vst [vmem:[#allocation47_spill] sm:$0xff] %v5809_v31 }
 0x49a   : > { %1332 = vbcast.lane.b32.xlu0 %v5721_v10, 328  ;;  %1277 = vbcast.lane.b32.xlu1 %v5787_v28, 288 }
 0x49c   : > { %v5815_v33 = vpop.permute.xlu0 %1090  ;;  %v5817_v34 = vpop.permute.xlu1 %1055 }
 0x49d   : > { %8169 = vst [vmem:[#allocation48_spill] sm:$0xff] %v5815_v33 }
 0x49e   : > { %1340 = vbcast.lane.b32.xlu0 %v5721_v10, 344  ;;  %1285 = vbcast.lane.b32.xlu1 %v5787_v28, 304 }
 0x4a0   : > { %v5821_v35 = vpop.permute.xlu0 %1098  ;;  %v5823_v36 = vpop.permute.xlu1 %1059 }
 0x4a2   : > { %1348 = vbcast.lane.b32.xlu0 %v5721_v10, 360  ;;  %1296 = vbcast.lane.b32.xlu1 %v5799_v30, 256 }
 0x4a4   : > { %v5827_v37 = vpop.permute.xlu0 %1106  ;;  %v5829_v38 = vpop.permute.xlu1 %1063 }
 0x4a5   : > { %8170 = vst [vmem:[#allocation49_spill] sm:$0xff] %v5827_v37 }
 0x4a6   : > { %1356 = vbcast.lane.b32.xlu0 %v5721_v10, 376  ;;  %1304 = vbcast.lane.b32.xlu1 %v5799_v30, 272 }
 0x4a8   : > { %v5833_v39 = vpop.permute.xlu0 %1114  ;;  %v5835_v40 = vpop.permute.xlu1 %1067 }
 0x4a9   : > { %8171 = vst [vmem:[#allocation50_spill] sm:$0xff] %v5833_v39  ;;  %8172 = vst [vmem:[#allocation51_spill] sm:$0xff] %v5835_v40 }
 0x4aa   : > { %1364 = vbcast.lane.b32.xlu0 %v5727_v18, 328  ;;  %1312 = vbcast.lane.b32.xlu1 %v5799_v30, 288 }
 0x4ac   : > { %v5839_v41 = vpop.permute.xlu0 %1125  ;;  %v5841_v42 = vpop.permute.xlu1 %1071 }
 0x4ad   : > { %8173 = vst [vmem:[#allocation52_spill] sm:$0xff] %v5839_v41  ;;  %8174 = vst [vmem:[#allocation53_spill] sm:$0xff] %v5841_v42 }
 0x4ae   : > { %1372 = vbcast.lane.b32.xlu0 %v5727_v18, 344  ;;  %1320 = vbcast.lane.b32.xlu1 %v5799_v30, 304 }
 0x4b0   : > { %v5845_v43 = vpop.permute.xlu0 %1133  ;;  %v5847_v44 = vpop.permute.xlu1 %1075 }
 0x4b1   : > { %8175 = vst [vmem:[#allocation54_spill] sm:$0xff] %v5847_v44 }
 0x4b2   : > { %1380 = vbcast.lane.b32.xlu0 %v5727_v18, 360  ;;  %1328 = vbcast.lane.b32.xlu1 %v5721_v10, 320 }
 0x4b4   : > { %v5851_v45 = vpop.permute.xlu0 %1141  ;;  %v5853_v46 = vpop.permute.xlu1 %1086 }
 0x4b5   : > { %8176 = vst [vmem:[#allocation55_spill] sm:$0xff] %v5851_v45 }
 0x4b6   : > { %1388 = vbcast.lane.b32.xlu0 %v5727_v18, 376  ;;  %1336 = vbcast.lane.b32.xlu1 %v5721_v10, 336 }
 0x4b8   : > { %v5857_v47 = vpop.permute.xlu0 %1149  ;;  %v5859_v48 = vpop.permute.xlu1 %1094 }
 0x4b9   : > { %8177 = vst [vmem:[#allocation56_spill] sm:$0xff] %v5857_v47 }
 0x4ba   : > { %1396 = vbcast.lane.b32.xlu0 %v5739_v20, 328  ;;  %1344 = vbcast.lane.b32.xlu1 %v5721_v10, 352 }
 0x4bc   : > { %v5863_v49 = vpop.permute.xlu0 %1160  ;;  %v5865_v50 = vpop.permute.xlu1 %1102 }
 0x4bd   : > { %8178 = vst [vmem:[#allocation57_spill] sm:$0xff] %v5863_v49  ;;  %8179 = vst [vmem:[#allocation58_spill] sm:$0xff] %v5865_v50 }
 0x4be   : > { %2425 = vbcast.lane.b32.xlu0 %v5721_v10, 256  ;;  %1352 = vbcast.lane.b32.xlu1 %v5721_v10, 368 }
 0x4c0   : > { %v5869_v51 = vpop.permute.xlu0 %1168  ;;  %v5871_v52 = vpop.permute.xlu1 %1110 }
 0x4c1   : > { %8180 = vst [vmem:[#allocation59_spill] sm:$0xff] %v5871_v52 }
 0x4c2   : > { %2433 = vbcast.lane.b32.xlu0 %v5721_v10, 272  ;;  %1360 = vbcast.lane.b32.xlu1 %v5727_v18, 320 }
 0x4c4   : > { %v5875_v53 = vpop.permute.xlu0 %1176  ;;  %v5877_v54 = vpop.permute.xlu1 %1121 }
 0x4c5   : > { %8181 = vst [vmem:[#allocation60_spill] sm:$0xff] %v5875_v53 }
 0x4c6   : > { %2460 = vbcast.lane.b32.xlu0 %v5727_v18, 256  ;;  %1368 = vbcast.lane.b32.xlu1 %v5727_v18, 336 }
 0x4c8   : > { %v5881_v55 = vpop.permute.xlu0 %1184  ;;  %v5883_v56 = vpop.permute.xlu1 %1129 }
 0x4c9   : > { %8182 = vst [vmem:[#allocation61_spill] sm:$0xff] %v5881_v55 }
 0x4ca   : > { %2441 = vbcast.lane.b32.xlu0 %v5721_v10, 288  ;;  %1376 = vbcast.lane.b32.xlu1 %v5727_v18, 352 }
 0x4cc   : > { %v5887_v57 = vpop.permute.xlu0 %1195  ;;  %v5889_v58 = vpop.permute.xlu1 %1137 }
 0x4cd   : > { %8183 = vst [vmem:[#allocation62_spill] sm:$0xff] %v5887_v57  ;;  %8184 = vst [vmem:[#allocation63_spill] sm:$0xff] %v5889_v58 }
 0x4ce   : > { %2445 = vbcast.lane.b32.xlu0 %v5721_v10, 296  ;;  %1384 = vbcast.lane.b32.xlu1 %v5727_v18, 368 }
 0x4d0   : > { %v5893_v59 = vpop.permute.xlu0 %1203  ;;  %v5895_v60 = vpop.permute.xlu1 %1145 }
 0x4d1   : > { %8185 = vst [vmem:[#allocation64_spill] sm:$0xff] %v5895_v60 }
 0x4d2   : > { %2495 = vbcast.lane.b32.xlu0 %v5739_v20, 256  ;;  %1392 = vbcast.lane.b32.xlu1 %v5739_v20, 320 }
 0x4d4   : > { %v5899_v61 = vpop.permute.xlu0 %1211  ;;  %v5901_v62 = vpop.permute.xlu1 %1156 }
 0x4d5   : > { %8186 = vst [vmem:[#allocation65_spill] sm:$0xff] %v5899_v61 }
 0x4d6   : > { %2449 = vbcast.lane.b32.xlu0 %v5721_v10, 304  ;;  %1400 = vbcast.lane.b32.xlu1 %v5739_v20, 336 }
 0x4d8   : > { %v5905_v63 = vpop.permute.xlu0 %1219  ;;  %v5907_v0 = vpop.permute.xlu1 %1164 }
 0x4d9   : > { %8187 = vst [vmem:[#allocation66_spill] sm:$0xff] %v5905_v63 }
 0x4da   : > { %2503 = vbcast.lane.b32.xlu0 %v5739_v20, 272  ;;  %2429 = vbcast.lane.b32.xlu1 %v5721_v10, 264 }
 0x4dc   : > { %v5911_v1 = vpop.permute.xlu0 %1230  ;;  %v5913_v2 = vpop.permute.xlu1 %1172 }
 0x4dd   : > { %8188 = vst [vmem:[#allocation67_spill] sm:$0xff] %v5911_v1  ;;  %8189 = vst [vmem:[#allocation68_spill] sm:$0xff] %v5913_v2 }
 0x4de   : > { %2480 = vbcast.lane.b32.xlu0 %v5727_v18, 296  ;;  %2437 = vbcast.lane.b32.xlu1 %v5721_v10, 280 }
 0x4e0   : > { %v5917_v3 = vpop.permute.xlu0 %1238  ;;  %v5919_v4 = vpop.permute.xlu1 %1180 }
 0x4e1   : > { %8190 = vst [vmem:[#allocation69_spill] sm:$0xff] %v5919_v4  ;;  %v5195_v4 = vmov 1966171168  }
 0x4e2   : > { %2530 = vbcast.lane.b32.xlu0 %v5751_v22, 256  ;;  %2464 = vbcast.lane.b32.xlu1 %v5727_v18, 264  ;;  %v1585_v57 = vunpack.c.l.s4 %v5195_v4 }
 0x4e4   : > { %v5923_v6 = vpop.permute.xlu0 %1246  ;;  %v5925_v8 = vpop.permute.xlu1 %1191 }
 0x4e5   : > { %8191 = vst [vmem:[#allocation70_spill] sm:$0xff] %v5923_v6  ;;  %8192 = vst [vmem:[#allocation71_spill] sm:$0xff] %v5925_v8 }
 0x4e6   : > { %2484 = vbcast.lane.b32.xlu0 %v5727_v18, 304  ;;  %2468 = vbcast.lane.b32.xlu1 %v5727_v18, 272 }
 0x4e8   : > { %v5929_v9 = vpop.permute.xlu0 %1254  ;;  %v5931_v13 = vpop.permute.xlu1 %1199 }
 0x4e9   : > { %8193 = vst [vmem:[#allocation72_spill] sm:$0xff] %v5929_v9 }
 0x4ea   : > { %2538 = vbcast.lane.b32.xlu0 %v5751_v22, 272  ;;  %2472 = vbcast.lane.b32.xlu1 %v5727_v18, 280 }
 0x4ec   : > { %v5935_v14 = vpop.permute.xlu0 %1265  ;;  %v5937_v15 = vpop.permute.xlu1 %1207 }
 0x4ed   : > { %8194 = vst [vmem:[#allocation73_spill] sm:$0xff] %v5935_v14  ;;  %8195 = vst [vmem:[#allocation74_spill] sm:$0xff] %v5937_v15 }
 0x4ee   : > { %2515 = vbcast.lane.b32.xlu0 %v5739_v20, 296  ;;  %2499 = vbcast.lane.b32.xlu1 %v5739_v20, 264 }
 0x4f0   : > { %v5941_v16 = vpop.permute.xlu0 %1273  ;;  %v5943_v17 = vpop.permute.xlu1 %1215 }
 0x4f1   : > { %8196 = vst [vmem:[#allocation75_spill] sm:$0xff] %v5941_v16  ;;  %8197 = vst [vmem:[#allocation76_spill] sm:$0xff] %v5943_v17 }
 0x4f2   : > { %2565 = vbcast.lane.b32.xlu0 %v5763_v24, 256  ;;  %2476 = vbcast.lane.b32.xlu1 %v5727_v18, 288 }
 0x4f4   : > { %v5947_v19 = vpop.permute.xlu0 %1281  ;;  %v5949_v21 = vpop.permute.xlu1 %1226 }
 0x4f5   : > { %8198 = vst [vmem:[#allocation77_spill] sm:$0xff] %v5947_v19  ;;  %8199 = vst [vmem:[#allocation78_spill] sm:$0xff] %v5949_v21 }
 0x4f6   : > { %2519 = vbcast.lane.b32.xlu0 %v5739_v20, 304  ;;  %2453 = vbcast.lane.b32.xlu1 %v5721_v10, 312 }
 0x4f7   : > { %v1009_v25 = vpop.f32.mrb[4].mxu0 }
 0x4f8   : > { %v1010_v27 = vadd.f32 %v4121_v23, %v1009_v25  ;;  %v5953_v29 = vpop.permute.xlu0 %1289  ;;  %v5955_v7 = vpop.permute.xlu1 %1234 }
 0x4f9   : > { %8200 = vst [vmem:[#allocation79_spill] sm:$0xff] %v5953_v29  ;;  %v4219_v6 = vpop.f32.mrb[5].mxu0 }
 0x4fa   : > { %v1014_v61 = vmul.f32 1.442695, %v1010_v27  ;;  %2573 = vbcast.lane.b32.xlu0 %v5763_v24, 272  ;;  %2507 = vbcast.lane.b32.xlu1 %v5739_v20, 280  ;;  %vm1013_vm9 = vcmp.gt.f32.partialorder %v1010_v27, 20.0 }
 0x4fc   : > { %4485 = vpow2.f32 %v1014_v61  ;;  %v5959_v19 = vpop.permute.xlu0 %1300  ;;  %v5961_v53 = vpop.permute.xlu1 %1242 }
 0x4fd   : > { %8201 = vst [vmem:[#allocation80_spill] sm:$0xff] %v5959_v19  ;;  %8202 = vst [vmem:[#allocation81_spill] sm:$0xff] %v5961_v53  ;;  %v1586_v53 = vunpack.c.0.s8 %v1585_v57 }
 0x4fe   : > { %2550 = vbcast.lane.b32.xlu0 %v5751_v22, 296  ;;  %2534 = vbcast.lane.b32.xlu1 %v5751_v22, 264 }
 0x4ff   : > { %v6009_v4 = vsub.s32 %v1586_v53, %v5712_v11 }
 0x500   : > { %v5965_v23 = vpop.permute.xlu0 %1308  ;;  %v5967_v25 = vpop.permute.xlu1 %1250 }
 0x501   : > { %8203 = vst [vmem:[#allocation82_spill] sm:$0xff] %v5965_v23  ;;  %8204 = vst [vmem:[#allocation83_spill] sm:$0xff] %v5967_v25 }
 0x502   : > { %2600 = vbcast.lane.b32.xlu0 %v5775_v26, 256  ;;  %2511 = vbcast.lane.b32.xlu1 %v5739_v20, 288 }
 0x504   : > { %v5971_v6 = vpop.permute.xlu0 %1316  ;;  %v5973_v45 = vpop.permute.xlu1 %1261 }
 0x505   : > { %8205 = vst [vmem:[#allocation84_spill] sm:$0xff] %v5971_v6  ;;  %8206 = vst [vmem:[#allocation85_spill] sm:$0xff] %v5973_v45 }
 0x506   : > { %v4486_v61 = vpop.eup %4485  ;;  %2554 = vbcast.lane.b32.xlu0 %v5751_v22, 304  ;;  %2488 = vbcast.lane.b32.xlu1 %v5727_v18, 312 }
 0x507   : > { %v1016_v14 = vadd.f32 1.0, %v4486_v61  ;;  %v1019_v55 = vmul.f32 -0.5, %v4486_v61  ;;  %v1022_v25 = vand.u32 2147483647, %v4486_v61 }
 0x508   : > { %v5977_v9 = vpop.permute.xlu0 %1324  ;;  %v5979_v63 = vpop.permute.xlu1 %1269 }
 0x509   : > { %8207 = vst [vmem:[#allocation86_spill] sm:$0xff] %v5977_v9  ;;  %4487 = vlog2.f32 %v1016_v14  ;;  %v1020_v1 = vadd.f32 1.0, %v1019_v55  ;;  %vm1023_vm8 = vcmp.lt.f32.partialorder %v1022_v25, 0.0004427343 }
 0x50a   : > { %2608 = vbcast.lane.b32.xlu0 %v5775_v26, 272  ;;  %2542 = vbcast.lane.b32.xlu1 %v5751_v22, 280 }
 0x50b   : > { %v1021_v29 = vmul.f32 %v4486_v61, %v1020_v1 }
 0x50c   : > { %v5983_v47 = vpop.permute.xlu0 %1332  ;;  %v5985_v17 = vpop.permute.xlu1 %1277 }
 0x50d   : > { %8208 = vst [vmem:[#allocation87_spill] sm:$0xff] %v5985_v17 }
 0x50e   : > { %2585 = vbcast.lane.b32.xlu0 %v5763_v24, 296  ;;  %2569 = vbcast.lane.b32.xlu1 %v5763_v24, 264 }
 0x510   : > { %v5989_v6 = vpop.permute.xlu0 %1340  ;;  %v5991_v9 = vpop.permute.xlu1 %1285 }
 0x511   : > { %8209 = vst [vmem:[#allocation88_spill] sm:$0xff] %v5989_v6  ;;  %8210 = vst [vmem:[#allocation89_spill] sm:$0xff] %v5991_v9 }
 0x512   : > { %2635 = vbcast.lane.b32.xlu0 %v5787_v28, 256  ;;  %2546 = vbcast.lane.b32.xlu1 %v5751_v22, 288 }
 0x513   : > { %v4488_v14 = vpop.eup %4487 }
 0x514   : > { %v1018_v19 = vmul.f32 0.6931472, %v4488_v14  ;;  %v5995_v17 = vpop.permute.xlu0 %1348  ;;  %v5997_v60 = vpop.permute.xlu1 %1296 }
 0x515   : > { %8211 = vst [vmem:[#allocation90_spill] sm:$0xff] %v5995_v17  ;;  %8212 = vst [vmem:[#allocation91_spill] sm:$0xff] %v5997_v60 }
 0x516   : > { %v1024_v55 = vsel %vm1023_vm8, %v1021_v29, %v1018_v19  ;;  %2589 = vbcast.lane.b32.xlu0 %v5763_v24, 304  ;;  %2523 = vbcast.lane.b32.xlu1 %v5739_v20, 312 }
 0x517   : > { %v1025_v9 = vsel %vm1013_vm9, %v1010_v27, %v1024_v55 }
 0x518   : > { %1026 = vst.msk [vmem:[#allocation7] sm:$0xff] %vm710_vm5, %v1025_v9  ;;  %v6002_v15 = vpop.permute.xlu0 %1356  ;;  %v6004_v1 = vpop.permute.xlu1 %1304 }
 0x519   : > { %8213 = vst [vmem:[#allocation92_spill] sm:$0xff] %v6002_v15  ;;  %8214 = vst [vmem:[#allocation93_spill] sm:$0xff] %v6004_v1 }
 0x51a   : > { %2643 = vbcast.lane.b32.xlu0 %v5787_v28, 272  ;;  %2577 = vbcast.lane.b32.xlu1 %v5763_v24, 280 }
 0x51c   : > { %v6011_v19 = vpop.permute.xlu0 %1364  ;;  %v6013_v29 = vpop.permute.xlu1 %1312 }
 0x51d   : > { %8215 = vst [vmem:[#allocation94_spill] sm:$0xff] %v6011_v19  ;;  %8216 = vst [vmem:[#allocation95_spill] sm:$0xff] %v6013_v29 }
 0x51e   : > { %2706 = vbcast.lane.b32.xlu0 %v5721_v10, 328  ;;  %2604 = vbcast.lane.b32.xlu1 %v5775_v26, 264 }
 0x51f   : > { %v1043_v57 = vld [vmem:[#allocation7] sm:$0xff] }
 0x520   : > { %v1590_v9 = vrot.slane %v1043_v57, %v6009_v4  ;;  %v6018_v27 = vpop.permute.xlu0 %1372  ;;  %v6020_v25 = vpop.permute.xlu1 %1320  ;;  %v1583_v11 = vcombine.high %v1043_v57, %v1043_v57  ;;  %v1864_v55 = vmul.f32 %v1043_v57, %v5700_v5 }
 0x521   : > { %8217 = vst [vmem:[#allocation96_spill] sm:$0xff] %v6018_v27  ;;  %8218 = vst [vmem:[#allocation97_spill] sm:$0xff] %v6020_v25  ;;  %v6038_v25 = vld [vmem:[#allocation25 + $0x10] sm:$0xff]  ;;  %v6067_v27 = vld [vmem:[#allocation25 + $0x18] sm:$0xff] }
 0x522   : > { %v1598_v61 = vcombine.high %v1590_v9, %v1590_v9  ;;  %v1606_v14 = vrot.slane %v1590_v9, %v6009_v4  ;;  %2738 = vbcast.lane.b32.xlu0 %v5727_v18, 328  ;;  %2581 = vbcast.lane.b32.xlu1 %v5763_v24, 288  ;;  %v1866_v5 = vcombine.high %v1864_v55, %v1864_v55 }
 0x523   : > { %v1873_v58 = vrot.slane %v1864_v55, %v6009_v4 }
 0x524   : > { %v1620_v53 = vrot.slane %v1598_v61, %v6009_v4  ;;  %v6027_v29 = vpop.permute.xlu0 %1380  ;;  %v6029_v52 = vpop.permute.xlu1 %1328  ;;  %v1628_v49 = vcombine.high %v1606_v14, %v1606_v14  ;;  %v6032_v2 = vrot.slane %v1606_v14, %v5715_v12  ;;  %v1597_v61 = vrot.slane %v1583_v11, %v6009_v4 }
 0x525   : > { %8219 = vst [vmem:[#allocation98_spill] sm:$0xff] %v6027_v29 }
 0x526   : > { %8220 = vst [vmem:[#allocation99_spill] sm:$0xff] %v6032_v2  ;;  %1428 = vbcast.lane.b32.xlu0 %v5751_v22, 328  ;;  %v6036_v9 = vrot.slane %v1620_v53, %v5715_v12  ;;  %2558 = vbcast.lane.b32.xlu1 %v5751_v22, 312  ;;  %v1630_v14 = vcombine.high %v1620_v53, %v1620_v53 }
 0x527   : > { %v6048_v50 = vrot.slane %v1628_v49, %v5715_v12  ;;  %v1674_v44 = vmul.f32 %v6032_v2, %v6038_v25  ;;  %v1599_v11 = vcombine.high %v1597_v61, %v1597_v61  ;;  %v1613_v49 = vrot.slane %v1597_v61, %v6009_v4 }
 0x528   : > { %8221 = vst [vmem:[#allocation100_spill] sm:$0xff] %v6036_v9  ;;  %v6042_v57 = vpop.permute.xlu0 %1388  ;;  %v6044_v29 = vpop.permute.xlu1 %1336  ;;  %v1682_v40 = vmul.f32 %v6036_v9, %v6038_v25  ;;  %v1881_v53 = vcombine.high %v1873_v58, %v1873_v58  ;;  %v6063_v41 = vrot.slane %v1630_v14, %v5715_v12 }
 0x529   : > { %8222 = vst [vmem:[#allocation101_spill] sm:$0xff] %v6042_v57  ;;  %8223 = vst [vmem:[#allocation102_spill] sm:$0xff] %v6044_v29  ;;  %v1880_v57 = vrot.slane %v1866_v5, %v6009_v4  ;;  %v1740_v37 = vmul.f32 1.442695, %v1674_v44  ;;  %v1690_v15 = vmul.f32 %v6048_v50, %v6038_v25  ;;  %v6072_v5 = vrot.slane %v1599_v11, %v6009_v4 }
 0x52a   : > { %8224 = vst [vmem:[#allocation103_spill] sm:$0xff] %v6048_v50  ;;  %2770 = vbcast.lane.b32.xlu0 %v5739_v20, 328  ;;  %2612 = vbcast.lane.b32.xlu1 %v5775_v26, 280  ;;  %8227 = vst [vmem:[#allocation106_spill] sm:$0xff] %v6063_v41  ;;  %v1756_v17 = vmul.f32 1.442695, %v1682_v40  ;;  %v1889_v44 = vrot.slane %v1873_v58, %v6009_v4  ;;  %v1903_v40 = vrot.slane %v1881_v53, %v6009_v4 }
 0x52b   : > { %4489 = vpow2.f32 %v1740_v37  ;;  %v1882_v61 = vcombine.high %v1880_v57, %v1880_v57  ;;  %v1896_v37 = vrot.slane %v1880_v57, %v6009_v4  ;;  %v1698_v31 = vmul.f32 %v6063_v41, %v6038_v25 }
 0x52c   : > { %v6057_v39 = vpop.permute.xlu0 %1396  ;;  %v6059_v55 = vpop.permute.xlu1 %1344  ;;  %v1772_v60 = vmul.f32 1.442695, %v1690_v15  ;;  %v1675_v11 = vmul.f32 %v6032_v2, %v6067_v27  ;;  %v1629_v19 = vcombine.high %v1613_v49, %v1613_v49  ;;  %4491 = vpow2.f32 %v1756_v17 }
 0x52d   : > { %8225 = vst [vmem:[#allocation104_spill] sm:$0xff] %v6057_v39  ;;  %8226 = vst [vmem:[#allocation105_spill] sm:$0xff] %v6059_v55  ;;  %v6080_v39 = vrot.slane %v1613_v49, %v5715_v12  ;;  %v1683_v58 = vmul.f32 %v6036_v9, %v6067_v27  ;;  %v6094_v57 = vrot.slane %v6072_v5, %v5715_v12 }
 0x52e   : > { %1460 = vbcast.lane.b32.xlu0 %v5763_v24, 328  ;;  %2639 = vbcast.lane.b32.xlu1 %v5787_v28, 264  ;;  %v6097_v53 = vrot.slane %v1882_v61, %v6009_v4  ;;  %v1911_v15 = vcombine.high %v1889_v44, %v1889_v44  ;;  %v1912_v17 = vcombine.high %v1896_v37, %v1896_v37  ;;  %v1742_v45 = vmul.f32 1.442695, %v1675_v11 }
 0x52f   : > { %8230 = vst [vmem:[#allocation109_spill] sm:$0xff] %v6080_v39  ;;  %8231 = vst [vmem:[#allocation110_spill] sm:$0xff] %v6094_v57  ;;  %v1913_v49 = vcombine.high %v1903_v40, %v1903_v40  ;;  %v1706_v42 = vmul.f32 %v6080_v39, %v6038_v25  ;;  %v1631_v6 = vcombine.high %v6072_v5, %v6072_v5  ;;  %4493 = vpow2.f32 %v1772_v60  ;;  %v6122_v60 = vld [vmem:[#allocation25] sm:$0xff] }
 0x530   : > { %v6075_v55 = vpop.permute.xlu0 %2425  ;;  %v6077_v14 = vpop.permute.xlu1 %1352  ;;  %v6108_v33 = vrot.slane %v1889_v44, %v5715_v12  ;;  %v1788_v4 = vmul.f32 1.442695, %v1698_v31  ;;  %v6111_v61 = vrot.slane %v1629_v19, %v5715_v12  ;;  %4495 = vpow2.f32 %v1742_v45 }
 0x531   : > { %8228 = vst [vmem:[#allocation107_spill] sm:$0xff] %v6075_v55  ;;  %8229 = vst [vmem:[#allocation108_spill] sm:$0xff] %v6077_v14  ;;  %v1758_v21 = vmul.f32 1.442695, %v1683_v58  ;;  %v6118_v23 = vrot.slane %v1903_v40, %v5715_v12  ;;  %v1714_v5 = vmul.f32 %v6094_v57, %v6038_v25  ;;  %v6131_v44 = vrot.slane %v1911_v15, %v5715_v12 }
 0x532   : > { %2620 = vbcast.lane.b32.xlu0 %v5775_v26, 296  ;;  %2616 = vbcast.lane.b32.xlu1 %v5775_v26, 288  ;;  %8234 = vst [vmem:[#allocation113_spill] sm:$0xff] %v6108_v33  ;;  %8235 = vst [vmem:[#allocation114_spill] sm:$0xff] %v6111_v61  ;;  %v6134_v40 = vrot.slane %v1912_v17, %v5715_v12  ;;  %v1804_v58 = vmul.f32 1.442695, %v1706_v42  ;;  %v6137_v11 = vrot.slane %v1913_v49, %v5715_v12 }
 0x533   : > { %8236 = vst [vmem:[#allocation115_spill] sm:$0xff] %v6118_v23  ;;  %8239 = vst [vmem:[#allocation118_spill] sm:$0xff] %v6131_v44  ;;  %4497 = vpow2.f32 %v1788_v4  ;;  %v6140_v1 = vrot.slane %v1896_v37, %v5715_v12  ;;  %v1672_v17 = vmul.f32 %v6032_v2, %v6122_v60  ;;  %v1820_v42 = vmul.f32 1.442695, %v1714_v5 }
 0x534   : > { %v6099_v14 = vpop.permute.xlu0 %2433  ;;  %v6101_v55 = vpop.permute.xlu1 %1360  ;;  %8240 = vst [vmem:[#allocation119_spill] sm:$0xff] %v6137_v11  ;;  %4499 = vpow2.f32 %v1758_v21  ;;  %v6150_v49 = vrot.slane %v6097_v53, %v5715_v12  ;;  %v1680_v37 = vmul.f32 %v6036_v9, %v6122_v60  ;;  %v1973_v5 = vmul.f32 %v6131_v44, %v5883_v56 }
 0x535   : > { %8232 = vst [vmem:[#allocation111_spill] sm:$0xff] %v6099_v14  ;;  %8233 = vst [vmem:[#allocation112_spill] sm:$0xff] %v6101_v55  ;;  %v1037_v14 = vld [vmem:[#allocation2 + $0x10] sm:$0xff]  ;;  %v1691_v55 = vmul.f32 %v6048_v50, %v6067_v27  ;;  %v4490_v45 = vpop.eup %4489  ;;  %4501 = vpow2.f32 %v1804_v58  ;;  %v6174_v8 = vrot.slane %v1631_v6, %v5715_v12  ;;  %v1688_v56 = vmul.f32 %v6048_v50, %v6122_v60 }
 0x536   : > { %2670 = vbcast.lane.b32.xlu0 %v5799_v30, 256  ;;  %2702 = vbcast.lane.b32.xlu1 %v5721_v10, 320  ;;  %8241 = vst [vmem:[#allocation120_spill] sm:$0xff] %v6140_v1  ;;  %v2021_v29 = vmul.f32 %v4490_v45, %v1037_v14  ;;  %v1965_v14 = vmul.f32 %v6118_v23, %v5859_v48 }
 0x537   : > { %v1774_v15 = vmul.f32 1.442695, %v1691_v55  ;;  %v4492_v55 = vpop.eup %4491  ;;  %8245 = vst [vmem:[#allocation124_spill] sm:$0xff] %v6174_v8  ;;  %v6180_v16 = vmul.f32 %v6140_v1, %v5931_v13  ;;  %v1723_v13 = vmul.f32 %v6111_v61, %v6067_v27  ;;  %v1768_v50 = vmul.f32 1.442695, %v1688_v56 }
 0x538   : > { %v6126_v31 = vpop.permute.xlu0 %2460  ;;  %v6128_v19 = vpop.permute.xlu1 %1368 }
 0x539   : > { %8237 = vst [vmem:[#allocation116_spill] sm:$0xff] %v6126_v31  ;;  %8238 = vst [vmem:[#allocation117_spill] sm:$0xff] %v6128_v19  ;;  %v1957_v31 = vmul.f32 %v6108_v33, %v5823_v36  ;;  %v1699_v19 = vmul.f32 %v6063_v41, %v6067_v27  ;;  %4503 = vpow2.f32 %v1774_v15 }
 0x53a   : > { %2710 = vbcast.lane.b32.xlu0 %v5721_v10, 336  ;;  %2734 = vbcast.lane.b32.xlu1 %v5727_v18, 320  ;;  %v1038_v10 = vld [vmem:[#allocation2 + $0x18] sm:$0xff] }
 0x53b   : > { %v6152_v4 = vadd.f32 %v2021_v29, %v1957_v31  ;;  %v1981_v29 = vmul.f32 %v6137_v11, %v5907_v0  ;;  %v1707_v31 = vmul.f32 %v6080_v39, %v6067_v27  ;;  %v1790_v48 = vmul.f32 1.442695, %v1699_v19  ;;  %v4494_v0 = vpop.eup %4493 }
 0x53c   : > { %v6158_v36 = vpop.permute.xlu0 %2441  ;;  %v6160_v21 = vpop.permute.xlu1 %1376 }
 0x53d   : > { %8242 = vst [vmem:[#allocation121_spill] sm:$0xff] %v6152_v4  ;;  %8243 = vst [vmem:[#allocation122_spill] sm:$0xff] %v6158_v36  ;;  %v2066_v45 = vmul.f32 %v4492_v55, %v6152_v4  ;;  %v1715_v36 = vmul.f32 %v6094_v57, %v6067_v27  ;;  %v1752_v55 = vmul.f32 1.442695, %v1680_v37  ;;  %v6190_v19 = vpop.eup %4495 }
 0x53e   : > { %8244 = vst [vmem:[#allocation123_spill] sm:$0xff] %v6160_v21  ;;  %v1736_v21 = vmul.f32 1.442695, %v1672_v17  ;;  %2798 = vbcast.lane.b32.xlu0 %v5751_v22, 320  ;;  %1424 = vbcast.lane.b32.xlu1 %v5751_v22, 320  ;;  %8249 = vst [vmem:[#allocation128_spill] sm:$0xff] %v6190_v19  ;;  %v6194_v17 = vmul.f32 %v6150_v49, %v5955_v7  ;;  %v1696_v7 = vmul.f32 %v6063_v41, %v6122_v60  ;;  %v4498_v4 = vpop.eup %4497 }
 0x53f   : > { %v6182_v58 = vadd.f32 %v2066_v45, %v1965_v14  ;;  %v1822_v14 = vmul.f32 1.442695, %v1715_v36  ;;  %v1958_v45 = vmul.f32 %v6108_v33, %v5829_v38  ;;  %v1722_v38 = vmul.f32 %v6111_v61, %v6038_v25  ;;  %v4500_v36 = vpop.eup %4499  ;;  %v6232_v41 = vld [vmem:[#allocation25 + $0x28] sm:$0xff] }
 0x540   : > { %4505 = vpow2.f32 %v1736_v21  ;;  %v6186_v6 = vpop.permute.xlu0 %2445  ;;  %v6188_v15 = vpop.permute.xlu1 %1384  ;;  %v1806_v21 = vmul.f32 1.442695, %v1707_v31 }
 0x541   : > { %8246 = vst [vmem:[#allocation125_spill] sm:$0xff] %v6182_v58  ;;  %8247 = vst [vmem:[#allocation126_spill] sm:$0xff] %v6186_v6  ;;  %4507 = vpow2.f32 %v1820_v42  ;;  %v2111_v37 = vmul.f32 %v4494_v0, %v6182_v58  ;;  %v2022_v6 = vmul.f32 %v6190_v19, %v1038_v10  ;;  %v1731_v42 = vmul.f32 %v6174_v8, %v6067_v27 }
 0x542   : > { %8248 = vst [vmem:[#allocation127_spill] sm:$0xff] %v6188_v15  ;;  %v6202_v15 = vld [vmem:[#allocation25 + $0x8] sm:$0xff]  ;;  %4509 = vpow2.f32 %v1790_v48  ;;  %1432 = vbcast.lane.b32.xlu0 %v5751_v22, 336  ;;  %2766 = vbcast.lane.b32.xlu1 %v5739_v20, 320  ;;  %v1838_v48 = vmul.f32 1.442695, %v1723_v13  ;;  %v1704_v19 = vmul.f32 %v6080_v39, %v6122_v60 }
 0x543   : > { %v6208_v31 = vadd.f32 %v2111_v37, %v1973_v5  ;;  %v6210_v0 = vadd.f32 %v2022_v6, %v1958_v45  ;;  %4511 = vpow2.f32 %v1752_v55  ;;  %v1966_v5 = vmul.f32 %v6118_v23, %v5821_v35  ;;  %v1035_v35 = vld [vmem:[#allocation2] sm:$0xff] }
 0x544   : > { %v6216_v10 = vpop.permute.xlu0 %2495  ;;  %v6218_v27 = vpop.permute.xlu1 %1392  ;;  %4513 = vpow2.f32 %v1806_v21  ;;  %v1673_v56 = vmul.f32 %v6032_v2, %v6202_v15  ;;  %v1836_v37 = vmul.f32 1.442695, %v1722_v38  ;;  %v1854_v45 = vmul.f32 1.442695, %v1731_v42 }
 0x545   : > { %8250 = vst [vmem:[#allocation129_spill] sm:$0xff] %v6216_v10  ;;  %8251 = vst [vmem:[#allocation130_spill] sm:$0xff] %v6218_v27  ;;  %v2156_v55 = vmul.f32 %v4498_v4, %v6208_v31  ;;  %4515 = vpow2.f32 %v1822_v14  ;;  %v2067_v6 = vmul.f32 %v4500_v36, %v6210_v0  ;;  %v4502_v21 = vpop.eup %4501  ;;  %v1784_v58 = vmul.f32 1.442695, %v1696_v7 }
 0x546   : > { %4517 = vpow2.f32 %v1768_v50  ;;  %v1738_v10 = vmul.f32 1.442695, %v1673_v56  ;;  %1492 = vbcast.lane.b32.xlu0 %v5775_v26, 328  ;;  %1456 = vbcast.lane.b32.xlu1 %v5763_v24, 320  ;;  %v4504_v50 = vpop.eup %4503  ;;  %v1982_v42 = vmul.f32 %v6137_v11, %v5869_v51  ;;  %v1712_v7 = vmul.f32 %v6094_v57, %v6122_v60 }
 0x547   : > { %v6228_v13 = vadd.f32 %v2156_v55, %v1981_v29  ;;  %v6230_v27 = vadd.f32 %v2067_v6, %v1966_v5  ;;  %4519 = vpow2.f32 %v1836_v37  ;;  %v1974_v29 = vmul.f32 %v6131_v44, %v5845_v43 }
 0x548   : > { %v6236_v4 = vpop.permute.xlu0 %2449  ;;  %v6238_v14 = vpop.permute.xlu1 %1400  ;;  %4521 = vpow2.f32 %v1738_v10  ;;  %v1720_v56 = vmul.f32 %v6111_v61, %v6122_v60  ;;  %v1800_v6 = vmul.f32 1.442695, %v1704_v19  ;;  %v1955_v43 = vmul.f32 %v6108_v33, %v5811_v32 }
 0x549   : > { %8252 = vst [vmem:[#allocation131_spill] sm:$0xff] %v6228_v13  ;;  %8253 = vst [vmem:[#allocation132_spill] sm:$0xff] %v6236_v4  ;;  %v2201_v36 = vmul.f32 %v4502_v21, %v6228_v13  ;;  %4523 = vpow2.f32 %v1838_v48  ;;  %v2112_v5 = vmul.f32 %v4504_v50, %v6230_v27  ;;  %v1677_v10 = vmul.f32 %v6032_v2, %v6232_v41  ;;  %v6262_v48 = vld [vmem:[#allocation25 + $0x38] sm:$0xff] }
 0x54a   : > { %v6246_v38 = vpop.eup %4505  ;;  %4525 = vpow2.f32 %v1784_v58  ;;  %v1730_v50 = vmul.f32 %v6174_v8, %v6038_v25  ;;  %2830 = vbcast.lane.b32.xlu0 %v5763_v24, 320  ;;  %2593 = vbcast.lane.b32.xlu1 %v5763_v24, 312  ;;  %v1681_v4 = vmul.f32 %v6036_v9, %v6202_v15 }
 0x54b   : > { %v4508_v55 = vpop.eup %4507  ;;  %v2019_v51 = vmul.f32 %v6246_v38, %v1035_v35  ;;  %v6258_v37 = vadd.f32 %v2201_v36, %v6180_v16  ;;  %v6260_v21 = vadd.f32 %v2112_v5, %v1974_v29  ;;  %4527 = vpow2.f32 %v1854_v45 }
 0x54c   : > { %v6268_v32 = vpop.permute.xlu0 %2503  ;;  %v6270_v19 = vpop.permute.xlu1 %2429  ;;  %v1816_v16 = vmul.f32 1.442695, %v1712_v7  ;;  %v1963_v29 = vmul.f32 %v6118_v23, %v5853_v46  ;;  %v1852_v13 = vmul.f32 1.442695, %v1730_v50  ;;  %4529 = vpow2.f32 %v1800_v6 }
 0x54d   : > { %8254 = vst [vmem:[#allocation133_spill] sm:$0xff] %v6258_v37  ;;  %8255 = vst [vmem:[#allocation134_spill] sm:$0xff] %v6260_v21  ;;  %v4510_v35 = vpop.eup %4509  ;;  %v2027_v58 = vadd.f32 %v2019_v51, %v1955_v43  ;;  %v2246_v5 = vmul.f32 %v4508_v55, %v6258_v37  ;;  %v1746_v45 = vmul.f32 1.442695, %v1677_v10  ;;  %v1679_v7 = vmul.f32 %v6032_v2, %v6262_v48 }
 0x54e   : > { %8256 = vst [vmem:[#allocation135_spill] sm:$0xff] %v6268_v32  ;;  %8257 = vst [vmem:[#allocation136_spill] sm:$0xff] %v6270_v19  ;;  %v6274_v36 = vpop.eup %4511  ;;  %v2157_v25 = vmul.f32 %v4510_v35, %v6260_v21  ;;  %4531 = vpow2.f32 %v1852_v13  ;;  %v1754_v55 = vmul.f32 1.442695, %v1681_v4  ;;  %1404 = vbcast.lane.b32.xlu0 %v5739_v20, 344  ;;  %2647 = vbcast.lane.b32.xlu1 %v5787_v28, 280 }
 0x54f   : > { %v4514_v32 = vpop.eup %4513  ;;  %v2064_v19 = vmul.f32 %v6274_v36, %v2027_v58  ;;  %v6284_v43 = vadd.f32 %v2246_v5, %v6194_v17  ;;  %v1990_v35 = vmul.f32 %v6140_v1, %v5893_v59  ;;  %4533 = vpow2.f32 %v1816_v16 }
 0x550   : > { %v4516_v46 = vpop.eup %4515  ;;  %v6286_v51 = vadd.f32 %v2157_v25, %v1982_v42  ;;  %v6290_v50 = vpop.permute.xlu0 %2480  ;;  %v1832_v17 = vmul.f32 1.442695, %v1720_v56  ;;  %v1036_v42 = vld [vmem:[#allocation2 + $0x8] sm:$0xff]  ;;  %v1971_v25 = vmul.f32 %v6131_v44, %v5877_v54  ;;  %4535 = vpow2.f32 %v1754_v55 }
 0x551   : > { %8258 = vst [vmem:[#allocation137_spill] sm:$0xff] %v6284_v43  ;;  %8260 = vst [vmem:[#allocation139_spill] sm:$0xff] %v6290_v50  ;;  %v6292_v6 = vpop.permute.xlu1 %2437  ;;  %v6294_v10 = vpop.eup %4517  ;;  %v6298_v5 = vadd.f32 %v2064_v19, %v1963_v29  ;;  %v1956_v50 = vmul.f32 %v6108_v33, %v5817_v34  ;;  %v1728_v56 = vmul.f32 %v6174_v8, %v6122_v60  ;;  %v1750_v19 = vmul.f32 1.442695, %v1679_v7 }
 0x552   : > { %8259 = vst [vmem:[#allocation138_spill] sm:$0xff] %v6286_v51  ;;  %8261 = vst [vmem:[#allocation140_spill] sm:$0xff] %v6292_v6  ;;  %v4520_v13 = vpop.eup %4519  ;;  %v2202_v4 = vmul.f32 %v4514_v32, %v6286_v51  ;;  %4537 = vpow2.f32 %v1746_v45  ;;  %v2035_v54 = vmul.f32 %v2027_v58, %v6029_v52  ;;  %1520 = vbcast.lane.b32.xlu0 %v5787_v28, 320  ;;  %2674 = vbcast.lane.b32.xlu1 %v5799_v30, 264 }
 0x553   : > { %v4522_v37 = vpop.eup %4521  ;;  %v2109_v21 = vmul.f32 %v6294_v10, %v6298_v5  ;;  %v2291_v59 = vmul.f32 %v4520_v13, %v6284_v43  ;;  %v8265_v60 = vcombine.high %v6097_v53, %v6097_v53  ;;  %v1998_v58 = vmul.f32 %v6150_v49, %v5917_v3 }
 0x554   : > { %v4524_v16 = vpop.eup %4523  ;;  %v6310_v29 = vadd.f32 %v2202_v4, %v1990_v35  ;;  %v2020_v32 = vmul.f32 %v4522_v37, %v1036_v42  ;;  %v6315_v34 = vpop.permute.xlu0 %2530  ;;  %v2005_v37 = vmul.f32 %v6134_v40, %v5979_v63  ;;  %4539 = vpow2.f32 %v1832_v17  ;;  %v8271_v17 = vld [vmem:[#allocation75_spill] sm:$0xff] }
 0x555   : > { %8263 = vst [vmem:[#allocation142_spill] sm:$0xff] %v6315_v34  ;;  %v6317_v55 = vpop.permute.xlu1 %2464  ;;  %v6323_v7 = vrot.slane %v8265_v60, %v5715_v12  ;;  %v6325_v35 = vadd.f32 %v2109_v21, %v1971_v25  ;;  %v4526_v52 = vpop.eup %4525  ;;  %v1979_v4 = vmul.f32 %v6137_v11, %v5901_v62  ;;  %4541 = vpow2.f32 %v1750_v19  ;;  %v8272_v19 = vld [vmem:[#allocation71_spill] sm:$0xff] }
 0x556   : > { %8262 = vst [vmem:[#allocation141_spill] sm:$0xff] %v6310_v29  ;;  %8264 = vst [vmem:[#allocation143_spill] sm:$0xff] %v6317_v55  ;;  %v2247_v45 = vmul.f32 %v4516_v46, %v6310_v29  ;;  %v2028_v42 = vadd.f32 %v2020_v32, %v1956_v50  ;;  %v4528_v13 = vpop.eup %4527  ;;  %v6335_v53 = vadd.f32 %v2291_v59, %v2005_v37  ;;  %v1848_v25 = vmul.f32 1.442695, %v1728_v56  ;;  %v8275_v56 = vld [vmem:[#allocation121_spill] sm:$0xff]  ;;  %v8312_v55 = vld [vmem:[#allocation52_spill] sm:$0xff] }
 0x557   : > { %8266 = vst [vmem:[#allocation144_spill] sm:$0xff] %v6323_v7  ;;  %v2154_v12 = vmul.f32 %v4526_v52, %v6325_v35  ;;  %v2043_v3 = vsel %vm612_vm2, %v2035_v54, 0.0  ;;  %2624 = vbcast.lane.b32.xlu0 %v5775_v26, 304  ;;  %2742 = vbcast.lane.b32.xlu1 %v5727_v18, 336  ;;  %v4530_v62 = vpop.eup %4529  ;;  %v2006_v59 = vmul.f32 %v6134_v40, %v8271_v17 }
 0x558   : > { %8267 = vst [vmem:[#allocation145_spill] sm:$0xff] %v6335_v53  ;;  %v6337_v21 = vadd.f32 %v2247_v45, %v1998_v58  ;;  %v2036_v63 = vmul.f32 %v2028_v42, %v5983_v47  ;;  %v6343_v46 = vpop.permute.xlu0 %2484  ;;  %v1987_v32 = vmul.f32 %v6140_v1, %v8272_v19  ;;  %v8274_v47 = vld [vmem:[#allocation102_spill] sm:$0xff]  ;;  %v4532_v37 = vpop.eup %4531  ;;  %v8276_v45 = vld [vmem:[#allocation93_spill] sm:$0xff]  ;;  %v1685_v43 = vmul.f32 %v6036_v9, %v6232_v41  ;;  %v8277_v19 = vld [vmem:[#allocation103_spill] sm:$0xff] }
 0x559   : > { %8269 = vst [vmem:[#allocation147_spill] sm:$0xff] %v6343_v46  ;;  %v6345_v50 = vpop.permute.xlu1 %2468  ;;  %v6351_v60 = vadd.f32 %v2154_v12, %v1979_v4  ;;  %v2037_v54 = vmul.f32 %v8275_v56, %v8274_v47  ;;  %v2013_v29 = vmul.f32 %v6323_v7, %v8276_v45  ;;  %v4534_v17 = vpop.eup %4533  ;;  %v2336_v4 = vmul.f32 %v4532_v37, %v6335_v53 }
 0x55a   : > { %8268 = vst [vmem:[#allocation146_spill] sm:$0xff] %v6337_v21  ;;  %8270 = vst [vmem:[#allocation148_spill] sm:$0xff] %v6345_v50  ;;  %v2292_v52 = vmul.f32 %v4524_v16, %v6337_v21  ;;  %v2044_v58 = vsel %vm612_vm2, %v2036_v63, 0.0  ;;  %v1689_v47 = vmul.f32 %v8277_v19, %v6202_v15  ;;  %v4536_v56 = vpop.eup %4535  ;;  %v8278_v50 = vld [vmem:[#allocation82_spill] sm:$0xff]  ;;  %4543 = vpow2.f32 %v1848_v25 }
 0x55b   : > { %8273 = vst [vmem:[#allocation75_spill] sm:$0xff] %v6351_v60  ;;  %v2199_v51 = vmul.f32 %v4530_v62, %v6351_v60  ;;  %v2045_v12 = vadd.f32 %v2044_v58, %v2043_v3  ;;  %v2014_v16 = vmul.f32 %v6323_v7, %v8278_v50  ;;  %2678 = vbcast.lane.b32.xlu0 %v5799_v30, 272  ;;  %v2046_v58 = vsel %vm612_vm2, %v2037_v54, 0.0 }
 0x55c   : > { %v6367_v63 = vadd.f32 %v2292_v52, %v2006_v59  ;;  %v6370_v45 = vpop.permute.xlu0 %2538  ;;  %v6376_v37 = vadd.f32 %v2336_v4, %v2013_v29  ;;  %v2065_v3 = vmul.f32 %v4536_v56, %v2028_v42  ;;  %2802 = vbcast.lane.b32.xlu1 %v5751_v22, 328  ;;  %v4538_v21 = vpop.eup %4537  ;;  %v8284_v59 = vld [vmem:[#allocation78_spill] sm:$0xff]  ;;  %v1762_v53 = vmul.f32 1.442695, %v1685_v43  ;;  %v8287_v4 = vld [vmem:[#allocation88_spill] sm:$0xff] }
 0x55d   : > { %8280 = vst [vmem:[#allocation102_spill] sm:$0xff] %v6370_v45  ;;  %v6372_v41 = vpop.permute.xlu1 %2472  ;;  %v6374_v62 = vadd.f32 %v2199_v51, %v1987_v32  ;;  %v1995_v25 = vmul.f32 %v6150_v49, %v8284_v59  ;;  %v1040_v52 = vld [vmem:[#allocation2 + $0x28] sm:$0xff]  ;;  %v2047_v60 = vadd.f32 %v2046_v58, %v2045_v12  ;;  %v8285_v51 = vld [vmem:[#allocation48_spill] sm:$0xff]  ;;  %v1687_v42 = vmul.f32 %v6036_v9, %v6262_v48 }
 0x55e   : > { %8279 = vst [vmem:[#allocation71_spill] sm:$0xff] %v6367_v63  ;;  %8281 = vst [vmem:[#allocation121_spill] sm:$0xff] %v6372_v41  ;;  %v2337_v50 = vmul.f32 %v4528_v13, %v6367_v63  ;;  %v1964_v29 = vmul.f32 %v6118_v23, %v8285_v51  ;;  %v1770_v32 = vmul.f32 1.442695, %v1689_v47  ;;  %v4540_v54 = vpop.eup %4539  ;;  %v2038_v56 = vmul.f32 %v6210_v0, %v8287_v4  ;;  %v1042_v51 = vld [vmem:[#allocation2 + $0x38] sm:$0xff]  ;;  %v8292_v0 = vld [vmem:[#allocation85_spill] sm:$0xff] }
 0x55f   : > { %8282 = vst [vmem:[#allocation93_spill] sm:$0xff] %v6374_v62  ;;  %8283 = vst [vmem:[#allocation82_spill] sm:$0xff] %v6376_v37  ;;  %v2244_v41 = vmul.f32 %v4534_v17, %v6374_v62  ;;  %2746 = vbcast.lane.b32.xlu0 %v5727_v18, 344  ;;  %v6399_v12 = vpop.eup %4541  ;;  %v2024_v59 = vmul.f32 %v4538_v21, %v1040_v52  ;;  %v2003_v47 = vmul.f32 %v6134_v40, %v8292_v0 }
 0x560   : > { %2395 = vst.msk [vmem:[#allocation2 + $0x10] sm:$0xff] %vm612_vm2, %v6376_v37  ;;  %v6390_v13 = vadd.f32 %v2337_v50, %v2014_v16  ;;  %v6395_v43 = vpop.permute.xlu0 %2515  ;;  %8290 = vst [vmem:[#allocation149_spill] sm:$0xff] %v6399_v12  ;;  %v2073_v63 = vadd.f32 %v2065_v3, %v1964_v29  ;;  %4545 = vpow2.f32 %v1770_v32  ;;  %1488 = vbcast.lane.b32.xlu1 %v5775_v26, 320  ;;  %v8293_v50 = vld [vmem:[#allocation53_spill] sm:$0xff]  ;;  %v2048_v29 = vsel %vm612_vm2, %v2038_v56, 0.0 }
 0x561   : > { %8288 = vst [vmem:[#allocation48_spill] sm:$0xff] %v6395_v43  ;;  %v6397_v17 = vpop.permute.xlu1 %2499  ;;  %v6401_v58 = vadd.f32 %v2244_v41, %v1995_v25  ;;  %4547 = vpow2.f32 %v1762_v53  ;;  %v1960_v4 = vmul.f32 %v6108_v33, %v8293_v50  ;;  %v1766_v41 = vmul.f32 1.442695, %v1687_v42  ;;  %v6411_v25 = vld [vmem:[#allocation25 + $0x20] sm:$0xff] }
 0x562   : > { %8286 = vst [vmem:[#allocation78_spill] sm:$0xff] %v6390_v13  ;;  %8289 = vst [vmem:[#allocation88_spill] sm:$0xff] %v6397_v17  ;;  %v2026_v21 = vmul.f32 %v6399_v12, %v1042_v51  ;;  %v8298_v50 = vld [vmem:[#allocation91_spill] sm:$0xff]  ;;  %v1684_v56 = vmul.f32 %v6036_v9, %v6411_v25 }
 0x563   : > { %8291 = vst [vmem:[#allocation150_spill] sm:$0xff] %v6401_v58  ;;  %2396 = vst.msk [vmem:[#allocation2 + $0x18] sm:$0xff] %vm612_vm2, %v6390_v13  ;;  %v2289_v16 = vmul.f32 %v4540_v54, %v6401_v58  ;;  %2862 = vbcast.lane.b32.xlu0 %v5775_v26, 320  ;;  %v2032_v32 = vadd.f32 %v2024_v59, %v1960_v4  ;;  %v8297_v54 = vld [vmem:[#allocation94_spill] sm:$0xff]  ;;  %v6423_v13 = vld [vmem:[#allocation25 + $0x30] sm:$0xff]  ;;  %v2011_v51 = vmul.f32 %v6323_v7, %v8298_v50 }
 0x564   : > { %v6415_v3 = vpop.permute.xlu0 %2565  ;;  %v2081_v0 = vmul.f32 %v2073_v63, %v8297_v54  ;;  %2774 = vbcast.lane.b32.xlu1 %v5739_v20, 336  ;;  %v4544_v42 = vpop.eup %4543  ;;  %v8299_v43 = vld [vmem:[#allocation47_spill] sm:$0xff]  ;;  %4549 = vpow2.f32 %v1766_v41  ;;  %v6437_v54 = vadd.f32 %v2048_v29, %v2047_v60  ;;  %v1695_v50 = vmul.f32 %v8277_v19, %v6262_v48 }
 0x565   : > { %8294 = vst [vmem:[#allocation85_spill] sm:$0xff] %v6415_v3  ;;  %v6417_v52 = vpop.permute.xlu1 %2476  ;;  %v6419_v53 = vadd.f32 %v2289_v16, %v2003_v47  ;;  %v1962_v37 = vmul.f32 %v6108_v33, %v8299_v43  ;;  %v1676_v47 = vmul.f32 %v6032_v2, %v6411_v25  ;;  %v8300_v16 = vld [vmem:[#allocation96_spill] sm:$0xff]  ;;  %v1678_v43 = vmul.f32 %v6032_v2, %v6423_v13 }
 0x566   : > { %8295 = vst [vmem:[#allocation53_spill] sm:$0xff] %v6417_v52  ;;  %v2083_v4 = vmul.f32 %v6230_v27, %v8300_v16  ;;  %v2089_v60 = vsel %vm612_vm2, %v2081_v0, 0.0  ;;  %v1713_v0 = vmul.f32 %v6094_v57, %v6202_v15  ;;  %v1724_v2 = vmul.f32 %v6111_v61, %v6411_v25 }
 0x567   : > { %8296 = vst [vmem:[#allocation151_spill] sm:$0xff] %v6419_v53  ;;  %v2334_v59 = vmul.f32 %v4544_v42, %v6419_v53  ;;  %v2034_v62 = vadd.f32 %v2026_v21, %v1962_v37  ;;  %v1744_v58 = vmul.f32 1.442695, %v1676_v47  ;;  %1436 = vbcast.lane.b32.xlu0 %v5751_v22, 344  ;;  %v8303_v42 = vld [vmem:[#allocation90_spill] sm:$0xff]  ;;  %v8306_v47 = vld [vmem:[#allocation112_spill] sm:$0xff] }
 0x568   : > { %v6444_v12 = vpop.permute.xlu0 %2519  ;;  %v2040_v53 = vmul.f32 %v2032_v32, %v8303_v42  ;;  %v8305_v37 = vld [vmem:[#allocation106_spill] sm:$0xff]  ;;  %2834 = vbcast.lane.b32.xlu1 %v5763_v24, 328  ;;  %v1760_v21 = vmul.f32 1.442695, %v1684_v56  ;;  %v1748_v29 = vmul.f32 1.442695, %v1678_v43  ;;  %v2080_v16 = vmul.f32 %v6298_v5, %v8306_v47 }
 0x569   : > { %8301 = vst [vmem:[#allocation94_spill] sm:$0xff] %v6444_v12  ;;  %v6446_v3 = vpop.permute.xlu1 %2453  ;;  %v6449_v27 = vadd.f32 %v2334_v59, %v2011_v51  ;;  %v1697_v41 = vmul.f32 %v8305_v37, %v6202_v15  ;;  %4551 = vpow2.f32 %v1744_v58  ;;  %v1705_v51 = vmul.f32 %v6080_v39, %v6202_v15  ;;  %v8307_v59 = vld [vmem:[#allocation117_spill] sm:$0xff]  ;;  %v8309_v43 = vld [vmem:[#allocation92_spill] sm:$0xff] }
 0x56a   : > { %8302 = vst [vmem:[#allocation91_spill] sm:$0xff] %v6446_v3  ;;  %v4546_v12 = vpop.eup %4545  ;;  %v8308_v42 = vld [vmem:[#allocation125_spill] sm:$0xff]  ;;  %v1692_v58 = vmul.f32 %v8277_v19, %v6411_v25  ;;  %v2042_v17 = vmul.f32 %v2034_v62, %v8309_v43  ;;  %4553 = vpow2.f32 %v1748_v29  ;;  %v2088_v47 = vsel %vm612_vm2, %v2080_v16, 0.0 }
 0x56b   : > { %8304 = vst [vmem:[#allocation47_spill] sm:$0xff] %v6449_v27  ;;  %2393 = vst.msk [vmem:[#allocation2] sm:$0xff] %vm612_vm2, %v6449_v27  ;;  %v2082_v3 = vmul.f32 %v8308_v42, %v8307_v59  ;;  %v4548_v56 = vpop.eup %4547  ;;  %v2110_v5 = vmul.f32 %v4546_v12, %v2073_v63  ;;  %1552 = vbcast.lane.b32.xlu0 %v5799_v30, 320  ;;  %v1786_v34 = vmul.f32 1.442695, %v1697_v41  ;;  %4555 = vpow2.f32 %v1760_v21  ;;  %v8313_v43 = vld [vmem:[#allocation49_spill] sm:$0xff] }
 0x56c   : > { %v6470_v27 = vpop.permute.xlu0 %2573  ;;  %v2069_v46 = vmul.f32 %v4548_v56, %v2032_v32  ;;  %v1972_v59 = vmul.f32 %v6131_v44, %v8312_v55  ;;  %v2090_v42 = vadd.f32 %v2089_v60, %v2088_v47  ;;  %1464 = vbcast.lane.b32.xlu1 %v5763_v24, 336  ;;  %v1700_v12 = vmul.f32 %v8305_v37, %v6411_v25  ;;  %v8314_v32 = vld [vmem:[#allocation50_spill] sm:$0xff] }
 0x56d   : > { %8310 = vst [vmem:[#allocation96_spill] sm:$0xff] %v6470_v27  ;;  %v6472_v45 = vpop.permute.xlu1 %2507  ;;  %v2091_v63 = vsel %vm612_vm2, %v2082_v3, 0.0  ;;  %v1776_v29 = vmul.f32 1.442695, %v1692_v58  ;;  %v2093_v16 = vsel %vm612_vm2, %v2083_v4, 0.0  ;;  %v6485_v41 = vmul.f32 %v6118_v23, %v8314_v32 }
 0x56e   : > { %8311 = vst [vmem:[#allocation90_spill] sm:$0xff] %v6472_v45  ;;  %v1968_v45 = vmul.f32 %v6118_v23, %v8313_v43  ;;  %v2092_v55 = vadd.f32 %v2091_v63, %v2090_v42  ;;  %v6488_v60 = vsel %vm612_vm2, %v2040_v53, 0.0  ;;  %v6491_v21 = vsel %vm612_vm2, %v2042_v17, 0.0  ;;  %v6502_v47 = vpop.eup %4549 }
 0x56f   : > { %v6493_v3 = vmul.f32 1.442695, %v1695_v50  ;;  %v6495_v56 = vadd.f32 %v2110_v5, %v1972_v59  ;;  %2778 = vbcast.lane.b32.xlu0 %v5739_v20, 344  ;;  %8317 = vst [vmem:[#allocation117_spill] sm:$0xff] %v6502_v47  ;;  %4557 = vpow2.f32 %v1786_v34  ;;  %v6506_v53 = vmul.f32 1.442695, %v1705_v51 }
 0x570   : > { %v6498_v4 = vpop.permute.xlu0 %2550  ;;  %v6504_v43 = vadd.f32 %v2069_v46, %v1968_v45  ;;  %v6508_v42 = vmul.f32 1.442695, %v1713_v0  ;;  %1524 = vbcast.lane.b32.xlu1 %v5787_v28, 328  ;;  %v6512_v17 = vmul.f32 %v6502_v47, %v2034_v62  ;;  %v1039_v50 = vld [vmem:[#allocation2 + $0x20] sm:$0xff]  ;;  %v1708_v59 = vmul.f32 %v6080_v39, %v6411_v25  ;;  %v8319_v46 = vld [vmem:[#allocation107_spill] sm:$0xff] }
 0x571   : > { %8315 = vst [vmem:[#allocation106_spill] sm:$0xff] %v6498_v4  ;;  %v6500_v58 = vpop.permute.xlu1 %2534  ;;  %4559 = vpow2.f32 %v1776_v29  ;;  %v1792_v63 = vmul.f32 1.442695, %v1700_v12  ;;  %v3329_v45 = vmul.f32 %v8319_v46, %v6108_v33  ;;  %v1716_v51 = vmul.f32 %v6094_v57, %v6411_v25  ;;  %v8321_v62 = vld [vmem:[#allocation104_spill] sm:$0xff]  ;;  %v8322_v47 = vld [vmem:[#allocation51_spill] sm:$0xff]  ;;  %v8323_v12 = vld [vmem:[#allocation54_spill] sm:$0xff] }
 0x572   : > { %8316 = vst [vmem:[#allocation112_spill] sm:$0xff] %v6500_v58  ;;  %8318 = vst [vmem:[#allocation125_spill] sm:$0xff] %v6504_v43  ;;  %v2409_v5 = vld [vmem:[#allocation2] sm:$0xff]  ;;  %v6521_v0 = vadd.f32 %v2093_v16, %v2092_v55  ;;  %v2126_v4 = vmul.f32 %v6495_v56, %v8321_v62  ;;  %v1959_v58 = vmul.f32 %v6108_v33, %v8322_v47  ;;  %v1041_v29 = vld [vmem:[#allocation2 + $0x30] sm:$0xff] }
 0x573   : > { %v3393_v34 = vmul.f32 %v6246_v38, %v2409_v5  ;;  %v6523_v32 = vpop.eup %4551  ;;  %v1961_v27 = vmul.f32 %v6108_v33, %v8323_v12  ;;  %v1686_v38 = vmul.f32 %v6036_v9, %v6423_v13  ;;  %2894 = vbcast.lane.b32.xlu0 %v5787_v28, 320  ;;  %v8327_v62 = vld [vmem:[#allocation116_spill] sm:$0xff]  ;;  %4561 = vpow2.f32 %v1792_v63 }
 0x574   : > { %8320 = vst [vmem:[#allocation92_spill] sm:$0xff] %v6523_v32  ;;  %v6534_v5 = vpop.permute.xlu0 %2600  ;;  %v2023_v55 = vmul.f32 %v6523_v32, %v1039_v50  ;;  %v3337_v47 = vmul.f32 %v8327_v62, %v6118_v23  ;;  %2651 = vbcast.lane.b32.xlu1 %v5787_v28, 288  ;;  %v6546_v12 = vpop.eup %4553  ;;  %v1808_v9 = vmul.f32 1.442695, %v1708_v59  ;;  %v2134_v52 = vsel %vm612_vm2, %v2126_v4, 0.0  ;;  %v8328_v32 = vld [vmem:[#allocation58_spill] sm:$0xff] }
 0x575   : > { %8324 = vst [vmem:[#allocation52_spill] sm:$0xff] %v6534_v5  ;;  %v6536_v16 = vpop.permute.xlu1 %2511  ;;  %v6539_v46 = vadd.f32 %v3393_v34, %v3329_v45  ;;  %v1694_v5 = vmul.f32 %v8277_v19, %v6423_v13  ;;  %v2025_v50 = vmul.f32 %v6546_v12, %v1041_v29  ;;  %v1824_v34 = vmul.f32 1.442695, %v1716_v51  ;;  %v6553_v62 = vpop.eup %4555  ;;  %v8329_v59 = vld [vmem:[#allocation130_spill] sm:$0xff]  ;;  %v8334_v4 = vld [vmem:[#allocation45_spill] sm:$0xff] }
 0x576   : > { %8325 = vst [vmem:[#allocation49_spill] sm:$0xff] %v6536_v16  ;;  %v1764_v16 = vmul.f32 1.442695, %v1686_v38  ;;  %v2031_v18 = vadd.f32 %v2023_v55, %v1959_v58  ;;  %v1967_v6 = vmul.f32 %v6118_v23, %v8328_v32  ;;  %v2125_v63 = vmul.f32 %v6325_v35, %v8329_v59  ;;  %v8332_v38 = vld [vmem:[#allocation105_spill] sm:$0xff] }
 0x577   : > { %8326 = vst [vmem:[#allocation50_spill] sm:$0xff] %v6539_v46  ;;  %v3439_v45 = vmul.f32 %v6274_v36, %v6539_v46  ;;  %1408 = vbcast.lane.b32.xlu0 %v5739_v20, 352  ;;  %v2033_v55 = vadd.f32 %v2025_v50, %v1961_v27  ;;  %v1780_v32 = vmul.f32 1.442695, %v1694_v5  ;;  %v2127_v35 = vmul.f32 %v6208_v31, %v6238_v14 }
 0x578   : > { %4563 = vpow2.f32 %v1764_v16  ;;  %v6561_v58 = vpop.permute.xlu0 %2554  ;;  %v2039_v36 = vmul.f32 %v2031_v18, %v8332_v38  ;;  %v2068_v51 = vmul.f32 %v6553_v62, %v2031_v18  ;;  %2714 = vbcast.lane.b32.xlu1 %v8334_v4, 344  ;;  %v2133_v16 = vsel %vm612_vm2, %v2125_v63, 0.0  ;;  %v8338_v63 = vld [vmem:[#allocation123_spill] sm:$0xff] }
 0x579   : > { %8330 = vst [vmem:[#allocation107_spill] sm:$0xff] %v6561_v58  ;;  %v6563_v29 = vpop.permute.xlu1 %2488  ;;  %v6567_v46 = vadd.f32 %v3439_v45, %v3337_v47  ;;  %4565 = vpow2.f32 %v1808_v9  ;;  %v4558_v59 = vpop.eup %4557  ;;  %v1732_v5 = vmul.f32 %v6174_v8, %v6411_v25  ;;  %v2135_v47 = vadd.f32 %v2134_v52, %v2133_v16  ;;  %v8341_v16 = vld [vmem:[#allocation98_spill] sm:$0xff] }
 0x57a   : > { %8331 = vst [vmem:[#allocation104_spill] sm:$0xff] %v6563_v29  ;;  %v2050_v58 = vsel %vm612_vm2, %v2039_v36, 0.0  ;;  %v8335_v29 = vld [vmem:[#allocation108_spill] sm:$0xff]  ;;  %v2076_v38 = vadd.f32 %v2068_v51, %v1967_v6  ;;  %v2136_v31 = vsel %vm612_vm2, %v2127_v35, 0.0  ;;  %4567 = vpow2.f32 %v1824_v34  ;;  %v8337_v6 = vld [vmem:[#allocation63_spill] sm:$0xff] }
 0x57b   : > { %8333 = vst [vmem:[#allocation51_spill] sm:$0xff] %v6567_v46  ;;  %v2041_v19 = vmul.f32 %v2033_v55, %v8335_v29  ;;  %v6577_v18 = vmul.f32 %v6294_v10, %v6567_v46  ;;  %v6579_v27 = vpop.eup %4559  ;;  %v2051_v9 = vadd.f32 %v2050_v58, %v6437_v54  ;;  %1528 = vbcast.lane.b32.xlu0 %v5787_v28, 336  ;;  %v1840_v52 = vmul.f32 1.442695, %v1724_v2  ;;  %v8395_v46 = vld [vmem:[#allocation135_spill] sm:$0xff] }
 0x57c   : > { %v6586_v14 = vpop.permute.xlu0 %2608  ;;  %v1975_v10 = vmul.f32 %v6131_v44, %v8337_v6  ;;  %v2113_v45 = vmul.f32 %v6579_v27, %v2076_v38  ;;  %v2084_v54 = vmul.f32 %v2076_v38, %v8338_v63  ;;  %2806 = vbcast.lane.b32.xlu1 %v5751_v22, 336  ;;  %4569 = vpow2.f32 %v1780_v32 }
 0x57d   : > { %8336 = vst [vmem:[#allocation54_spill] sm:$0xff] %v6586_v14  ;;  %v6588_v50 = vpop.permute.xlu1 %2542  ;;  %v2053_v25 = vadd.f32 %v6488_v60, %v2051_v9  ;;  %v6596_v58 = vadd.f32 %v2136_v31, %v2135_v47  ;;  %4571 = vpow2.f32 %v6506_v53  ;;  %v2054_v29 = vsel %vm612_vm2, %v2041_v19, 0.0  ;;  %v6603_v51 = vpop.eup %4561  ;;  %v8343_v9 = vld [vmem:[#allocation68_spill] sm:$0xff] }
 0x57e   : > { %v6600_v34 = vadd.f32 %v2113_v45, %v1975_v10  ;;  %v2095_v36 = vsel %vm612_vm2, %v2084_v54, 0.0  ;;  %v2085_v35 = vmul.f32 %v6504_v43, %v8341_v16  ;;  %v2155_v38 = vmul.f32 %v4558_v59, %v6495_v56  ;;  %v8346_v54 = vld [vmem:[#allocation59_spill] sm:$0xff]  ;;  %v8375_v14 = vld [vmem:[#allocation84_spill] sm:$0xff] }
 0x57f   : > { %8339 = vst [vmem:[#allocation116_spill] sm:$0xff] %v6596_v58  ;;  %v2055_v60 = vadd.f32 %v2054_v29, %v2053_v25  ;;  %v2096_v2 = vadd.f32 %v2095_v36, %v6521_v0  ;;  %2655 = vbcast.lane.b32.xlu0 %v5787_v28, 296  ;;  %v1856_v19 = vmul.f32 1.442695, %v1732_v5  ;;  %v1983_v47 = vmul.f32 %v6137_v11, %v8343_v9  ;;  %v8344_v0 = vld [vmem:[#allocation57_spill] sm:$0xff]  ;;  %v8349_v9 = vld [vmem:[#allocation74_spill] sm:$0xff] }
 0x580   : > { %8340 = vst [vmem:[#allocation58_spill] sm:$0xff] %v6600_v34  ;;  %v6610_v32 = vpop.permute.xlu0 %2585  ;;  %v2158_v31 = vmul.f32 %v6603_v51, %v6600_v34  ;;  %v1702_v6 = vmul.f32 %v8305_v37, %v6423_v13  ;;  %2866 = vbcast.lane.b32.xlu1 %v5775_v26, 328  ;;  %v1980_v59 = vmul.f32 %v6137_v11, %v8344_v0  ;;  %4573 = vpow2.f32 %v1840_v52 }
 0x581   : > { %8342 = vst [vmem:[#allocation130_spill] sm:$0xff] %v6610_v32  ;;  %v6612_v53 = vpop.permute.xlu1 %2569  ;;  %v6626_v10 = vadd.f32 %v6491_v21, %v2055_v60  ;;  %v1710_v5 = vmul.f32 %v6080_v39, %v6423_v13  ;;  %v6632_v45 = vadd.f32 %v6512_v17, %v6485_v41  ;;  %v1969_v25 = vmul.f32 %v6118_v23, %v8346_v54 }
 0x582   : > { %v6621_v56 = vpop.eup %4563  ;;  %v6634_v63 = vadd.f32 %v2158_v31, %v1983_v47  ;;  %v2097_v21 = vsel %vm612_vm2, %v2085_v35, 0.0  ;;  %v1721_v52 = vmul.f32 %v6111_v61, %v6202_v15  ;;  %v6644_v16 = vadd.f32 %v2155_v38, %v1980_v59  ;;  %v8351_v59 = vld [vmem:[#allocation101_spill] sm:$0xff] }
 0x583   : > { %v2070_v29 = vmul.f32 %v6621_v56, %v2033_v55  ;;  %v6639_v36 = vpop.eup %4565  ;;  %v1796_v60 = vmul.f32 1.442695, %v1702_v6  ;;  %2718 = vbcast.lane.b32.xlu0 %v8334_v4, 352  ;;  %4575 = vpow2.f32 %v1856_v19  ;;  %v1991_v55 = vmul.f32 %v6140_v1, %v8349_v9  ;;  %v8353_v9 = vld [vmem:[#allocation127_spill] sm:$0xff] }
 0x584   : > { %8345 = vst [vmem:[#allocation105_spill] sm:$0xff] %v6634_v63  ;;  %8347 = vst [vmem:[#allocation108_spill] sm:$0xff] %v6644_v16  ;;  %v6647_v41 = vpop.permute.xlu0 %2635  ;;  %v2203_v47 = vmul.f32 %v6639_v36, %v6634_v63  ;;  %1496 = vbcast.lane.b32.xlu1 %v5775_v26, 336  ;;  %v2098_v31 = vadd.f32 %v2097_v21, %v2096_v2  ;;  %v1718_v38 = vmul.f32 %v6094_v57, %v6423_v13  ;;  %v6658_v0 = vpop.eup %4567 }
 0x585   : > { %8348 = vst [vmem:[#allocation63_spill] sm:$0xff] %v6647_v41  ;;  %v6649_v17 = vpop.permute.xlu1 %2546  ;;  %v2078_v35 = vadd.f32 %v2070_v29, %v1969_v25  ;;  %4577 = vpow2.f32 %v1796_v60  ;;  %v1812_v6 = vmul.f32 1.442695, %v1710_v5  ;;  %8350 = vst [vmem:[#allocation123_spill] sm:$0xff] %v6658_v0  ;;  %v2087_v19 = vmul.f32 %v6632_v45, %v8351_v59  ;;  %v8354_v29 = vld [vmem:[#allocation81_spill] sm:$0xff] }
 0x586   : > { %4579 = vpow2.f32 %v6508_v42  ;;  %v6663_v54 = vadd.f32 %v2203_v47, %v1991_v55  ;;  %v6666_v25 = vpop.eup %4569  ;;  %v1999_v2 = vmul.f32 %v6150_v49, %v8354_v29  ;;  %v1726_v59 = vmul.f32 %v6111_v61, %v6423_v13 }
 0x587   : > { %v2086_v32 = vmul.f32 %v2078_v35, %v8353_v9  ;;  %4581 = vpow2.f32 %v6493_v3  ;;  %2810 = vbcast.lane.b32.xlu0 %v5751_v22, 344  ;;  %v4572_v60 = vpop.eup %4571  ;;  %v2115_v47 = vmul.f32 %v6666_v25, %v2078_v35  ;;  %v1828_v29 = vmul.f32 1.442695, %v1718_v38  ;;  %v8357_v35 = vld [vmem:[#allocation62_spill] sm:$0xff] }
 0x588   : > { %8352 = vst [vmem:[#allocation98_spill] sm:$0xff] %v6663_v54  ;;  %v6672_v5 = vpop.permute.xlu0 %2589  ;;  %v2248_v42 = vmul.f32 %v6658_v0, %v6663_v54  ;;  %1556 = vbcast.lane.b32.xlu1 %v5799_v30, 328  ;;  %v2200_v3 = vmul.f32 %v4572_v60, %v6644_v16  ;;  %4583 = vpow2.f32 %v1812_v6  ;;  %v2101_v63 = vsel %vm612_vm2, %v2087_v19, 0.0  ;;  %v8356_v54 = vld [vmem:[#allocation64_spill] sm:$0xff] }
 0x589   : > { %v6674_v21 = vpop.permute.xlu1 %2523  ;;  %v2099_v55 = vsel %vm612_vm2, %v2086_v32, 0.0  ;;  %v1834_v34 = vmul.f32 1.442695, %v1721_v52  ;;  %v1977_v32 = vmul.f32 %v6131_v44, %v8356_v54  ;;  %v1988_v43 = vmul.f32 %v6140_v1, %v8357_v35  ;;  %v8359_v52 = vld [vmem:[#allocation87_spill] sm:$0xff] }
 0x58a   : > { %v2100_v9 = vadd.f32 %v2099_v55, %v2098_v31  ;;  %v6685_v58 = vadd.f32 %v2248_v42, %v1999_v2  ;;  %v4574_v0 = vpop.eup %4573  ;;  %v1734_v60 = vmul.f32 %v6174_v8, %v6423_v13  ;;  %v2007_v6 = vmul.f32 %v6134_v40, %v8359_v52  ;;  %v8367_v52 = vld [vmem:[#allocation69_spill] sm:$0xff] }
 0x58b   : > { %2926 = vbcast.lane.b32.xlu0 %v5799_v30, 320  ;;  %v1844_v54 = vmul.f32 1.442695, %v1726_v59  ;;  %v6703_v2 = vadd.f32 %v2115_v47, %v1977_v32  ;;  %4585 = vpow2.f32 %v1828_v29  ;;  %v1703_v13 = vmul.f32 %v8305_v37, %v6262_v48 }
 0x58c   : > { %8355 = vst [vmem:[#allocation68_spill] sm:$0xff] %v6685_v58  ;;  %v6691_v41 = vadd.f32 %v2101_v63, %v2100_v9  ;;  %v6696_v31 = vpop.permute.xlu0 %2643  ;;  %v2293_v19 = vmul.f32 %v4574_v0, %v6685_v58  ;;  %2838 = vbcast.lane.b32.xlu1 %v5763_v24, 336  ;;  %v6706_v63 = vadd.f32 %v2200_v3, %v1988_v43  ;;  %4587 = vpow2.f32 %v1834_v34  ;;  %v8364_v0 = vld [vmem:[#allocation95_spill] sm:$0xff] }
 0x58d   : > { %8358 = vst [vmem:[#allocation57_spill] sm:$0xff] %v6696_v31  ;;  %v6698_v38 = vpop.permute.xlu1 %2577  ;;  %8360 = vst [vmem:[#allocation59_spill] sm:$0xff] %v6703_v2  ;;  %v4576_v42 = vpop.eup %4575  ;;  %v1711_v9 = vmul.f32 %v6080_v39, %v6262_v48  ;;  %v2015_v47 = vmul.f32 %v6323_v7, %v8364_v0  ;;  %v1860_v59 = vmul.f32 1.442695, %v1734_v60  ;;  %v1798_v32 = vmul.f32 1.442695, %v1703_v13 }
 0x58e   : > { %8361 = vst [vmem:[#allocation74_spill] sm:$0xff] %v6706_v63  ;;  %v6710_v55 = vadd.f32 %v2293_v19, %v2007_v6  ;;  %4589 = vpow2.f32 %v1844_v54  ;;  %v1985_v6 = vmul.f32 %v6137_v11, %v8367_v52  ;;  %v1719_v0 = vmul.f32 %v6094_v57, %v6262_v48 }
 0x58f   : > { %v6714_v35 = vpop.eup %4577  ;;  %1440 = vbcast.lane.b32.xlu0 %v5751_v22, 352  ;;  %4591 = vpow2.f32 %v1798_v32  ;;  %v1814_v58 = vmul.f32 1.442695, %v1711_v9  ;;  %v6752_v9 = vmul.f32 %v6323_v7, %v8375_v14  ;;  %v8377_v32 = vld [vmem:[#allocation67_spill] sm:$0xff] }
 0x590   : > { %8362 = vst [vmem:[#allocation101_spill] sm:$0xff] %v6710_v55  ;;  %8363 = vst [vmem:[#allocation127_spill] sm:$0xff] %v6714_v35  ;;  %v6719_v43 = vpop.permute.xlu0 %2706  ;;  %v4580_v29 = vpop.eup %4579  ;;  %v2338_v34 = vmul.f32 %v4576_v42, %v6710_v55  ;;  %v2160_v19 = vmul.f32 %v6714_v35, %v6703_v2  ;;  %2898 = vbcast.lane.b32.xlu1 %v5787_v28, 328  ;;  %v8373_v2 = vld [vmem:[#allocation80_spill] sm:$0xff]  ;;  %4593 = vpow2.f32 %v1860_v59 }
 0x591   : > { %8365 = vst [vmem:[#allocation81_spill] sm:$0xff] %v6719_v43  ;;  %v6721_v3 = vpop.permute.xlu1 %2604  ;;  %v6729_v60 = vpop.eup %4581  ;;  %v2245_v13 = vmul.f32 %v4580_v29, %v6706_v63  ;;  %v6746_v31 = vmul.f32 %v6323_v7, %v8373_v2  ;;  %v8374_v29 = vld [vmem:[#allocation83_spill] sm:$0xff]  ;;  %v8379_v2 = vld [vmem:[#allocation76_spill] sm:$0xff]  ;;  %4595 = vpow2.f32 %v1814_v58 }
 0x592   : > { %8366 = vst [vmem:[#allocation64_spill] sm:$0xff] %v6721_v3  ;;  %8368 = vst [vmem:[#allocation62_spill] sm:$0xff] %v6729_v60  ;;  %v8369_v3 = vld [vmem:[#allocation79_spill] sm:$0xff]  ;;  %v6738_v42 = vadd.f32 %v2338_v34, %v2015_v47  ;;  %v6740_v52 = vadd.f32 %v2160_v19, %v1985_v6  ;;  %v6742_v55 = vpop.eup %4583  ;;  %v2001_v63 = vmul.f32 %v6150_v49, %v8374_v29 }
 0x593   : > { %v6736_v54 = vmul.f32 %v6134_v40, %v8369_v3  ;;  %8372 = vst [vmem:[#allocation69_spill] sm:$0xff] %v6742_v55  ;;  %8376 = vst [vmem:[#allocation79_spill] sm:$0xff] %v6752_v9  ;;  %v1996_v3 = vmul.f32 %v6150_v49, %v8377_v32  ;;  %1560 = vbcast.lane.b32.xlu0 %v5799_v30, 336  ;;  %v2116_v34 = vmul.f32 %v6729_v60, %v6632_v45  ;;  %v8381_v9 = vld [vmem:[#allocation86_spill] sm:$0xff]  ;;  %v8387_v58 = vld [vmem:[#allocation111_spill] sm:$0xff] }
 0x594   : > { %8370 = vst [vmem:[#allocation87_spill] sm:$0xff] %v6738_v42  ;;  %8371 = vst [vmem:[#allocation95_spill] sm:$0xff] %v6740_v52  ;;  %v6757_v47 = vpop.permute.xlu0 %2738  ;;  %v1993_v6 = vmul.f32 %v6140_v1, %v8379_v2  ;;  %v2205_v14 = vmul.f32 %v6742_v55, %v6740_v52  ;;  %1468 = vbcast.lane.b32.xlu1 %v5763_v24, 344  ;;  %v1727_v32 = vmul.f32 %v6111_v61, %v6262_v48  ;;  %v8384_v52 = vld [vmem:[#allocation56_spill] sm:$0xff] }
 0x595   : > { %8378 = vst [vmem:[#allocation80_spill] sm:$0xff] %v6757_v47  ;;  %2397 = vst.msk [vmem:[#allocation2 + $0x20] sm:$0xff] %vm612_vm2, %v6738_v42  ;;  %v6768_v19 = vpop.permute.xlu1 %2581  ;;  %v6770_v29 = vadd.f32 %v2245_v13, %v1996_v3  ;;  %v1830_v45 = vmul.f32 1.442695, %v1719_v0  ;;  %v6776_v59 = vmul.f32 %v6323_v7, %v8381_v9  ;;  %v8382_v42 = vld [vmem:[#allocation89_spill] sm:$0xff]  ;;  %v1978_v4 = vmul.f32 %v6131_v44, %v8384_v52  ;;  %v6784_v47 = vpop.eup %4585  ;;  %v8389_v9 = vld [vmem:[#allocation122_spill] sm:$0xff] }
 0x596   : > { %v2009_v2 = vmul.f32 %v6134_v40, %v8382_v42  ;;  %v6780_v16 = vadd.f32 %v2205_v14, %v1993_v6  ;;  %8385 = vst [vmem:[#allocation67_spill] sm:$0xff] %v6784_v47  ;;  %v8386_v13 = vld [vmem:[#allocation97_spill] sm:$0xff]  ;;  %v6790_v0 = vmul.f32 %v8387_v58, %v6108_v33  ;;  %v3333_v61 = vmul.f32 %v8389_v9, %v6108_v33  ;;  %v4588_v52 = vpop.eup %4587  ;;  %v2412_v58 = vld [vmem:[#allocation2 + $0x18] sm:$0xff] }
 0x597   : > { %8380 = vst [vmem:[#allocation83_spill] sm:$0xff] %v6770_v29  ;;  %v2017_v3 = vmul.f32 %v6323_v7, %v8386_v13  ;;  %v1735_v42 = vmul.f32 %v6174_v8, %v6262_v48  ;;  %2842 = vbcast.lane.b32.xlu0 %v5763_v24, 344  ;;  %v8391_v14 = vld [vmem:[#allocation129_spill] sm:$0xff]  ;;  %v8392_v13 = vld [vmem:[#allocation132_spill] sm:$0xff]  ;;  %v6807_v9 = vadd.f32 %v2116_v34, %v1978_v4  ;;  %v2058_v55 = vrot.slane %v6626_v10, 4 }
 0x598   : > { %8383 = vst [vmem:[#allocation84_spill] sm:$0xff] %v6780_v16  ;;  %8388 = vst [vmem:[#allocation76_spill] sm:$0xff] %v6790_v0  ;;  %v6797_v6 = vpop.permute.xlu0 %1428  ;;  %v3345_v60 = vmul.f32 %v8391_v14, %v6131_v44  ;;  %v6803_v7 = vmul.f32 %v8392_v13, %v6108_v33  ;;  %v2250_v43 = vmul.f32 %v6784_v47, %v6780_v16  ;;  %2628 = vbcast.lane.b32.xlu1 %v5775_v26, 312  ;;  %v4590_v57 = vpop.eup %4589  ;;  %v8397_v4 = vld [vmem:[#allocation136_spill] sm:$0xff] }
 0x599   : > { %8390 = vst [vmem:[#allocation86_spill] sm:$0xff] %v6797_v6  ;;  %8393 = vst [vmem:[#allocation89_spill] sm:$0xff] %v6807_v9  ;;  %v6810_v48 = vpop.permute.xlu1 %2558  ;;  %v6813_v6 = vmul.f32 %v4588_v52, %v6770_v29  ;;  %4597 = vpow2.f32 %v1830_v45  ;;  %v1846_v14 = vmul.f32 1.442695, %v1727_v32  ;;  %v6821_v16 = vmul.f32 %v8395_v46, %v6131_v44  ;;  %v6829_v52 = vpop.eup %4591  ;;  %v8400_v32 = vld [vmem:[#allocation140_spill] sm:$0xff] }
 0x59a   : > { %v6817_v13 = vadd.f32 %v6577_v18, %v3345_v60  ;;  %v6825_v34 = vmul.f32 %v8397_v4, %v6108_v33  ;;  %v6827_v47 = vadd.f32 %v2250_v43, %v2001_v63  ;;  %v2103_v45 = vrot.slane %v6691_v41, 4  ;;  %v8401_v18 = vld [vmem:[#allocation128_spill] sm:$0xff]  ;;  %v8404_v43 = vld [vmem:[#allocation61_spill] sm:$0xff] }
 0x59b   : > { %8396 = vst [vmem:[#allocation97_spill] sm:$0xff] %v6821_v16  ;;  %v3332_v0 = vmul.f32 %v8400_v32, %v6108_v33  ;;  %v3396_v60 = vmul.f32 %v8401_v18, %v2412_v58  ;;  %1412 = vbcast.lane.b32.xlu0 %v5739_v20, 360  ;;  %v8403_v16 = vld [vmem:[#allocation92_spill] sm:$0xff]  ;;  %v2161_v35 = vmul.f32 %v6829_v52, %v6807_v9  ;;  %4599 = vpow2.f32 %v1846_v14  ;;  %v4594_v18 = vpop.eup %4593  ;;  %v8411_v14 = vld [vmem:[#allocation46_spill] sm:$0xff] }
 0x59c   : > { %8394 = vst [vmem:[#allocation56_spill] sm:$0xff] %v6817_v13  ;;  %8398 = vst [vmem:[#allocation111_spill] sm:$0xff] %v6825_v34  ;;  %v2413_v29 = vld [vmem:[#allocation2 + $0x20] sm:$0xff]  ;;  %v1862_v13 = vmul.f32 1.442695, %v1735_v42  ;;  %v6836_v46 = vpop.permute.xlu0 %2770  ;;  %v2295_v63 = vmul.f32 %v4590_v57, %v6827_v47  ;;  %v1986_v34 = vmul.f32 %v6137_v11, %v8404_v43  ;;  %2682 = vbcast.lane.b32.xlu1 %v5799_v30, 280  ;;  %v6858_v9 = vpop.eup %4595 }
 0x59d   : > { %8399 = vst [vmem:[#allocation122_spill] sm:$0xff] %v6827_v47  ;;  %8402 = vst [vmem:[#allocation129_spill] sm:$0xff] %v6836_v46  ;;  %v3397_v4 = vmul.f32 %v8403_v16, %v2413_v29  ;;  %v6845_v32 = vpop.permute.xlu1 %2612  ;;  %v2059_v42 = vadd.f32 %v2058_v55, %v6626_v10  ;;  %v1729_v58 = vmul.f32 %v6174_v8, %v6202_v15  ;;  %v8408_v29 = vld [vmem:[#allocation53_spill] sm:$0xff]  ;;  %v8410_v46 = vld [vmem:[#allocation66_spill] sm:$0xff] }
 0x59e   : > { %8405 = vst [vmem:[#allocation132_spill] sm:$0xff] %v6845_v32  ;;  %v6852_v57 = vadd.f32 %v2295_v63, %v2009_v2  ;;  %v3341_v43 = vmul.f32 %v8408_v29, %v6118_v23  ;;  %v6856_v47 = vadd.f32 %v2161_v35, %v1986_v34  ;;  %v2104_v32 = vadd.f32 %v2103_v45, %v6691_v41  ;;  %v6863_v55 = vld [vmem:[#allocation25 + $0x8] sm:$0xff] }
 0x59f   : > { %v6850_v16 = vadd.f32 %v3397_v4, %v3333_v61  ;;  %v1994_v10 = vmul.f32 %v6140_v1, %v8410_v46  ;;  %v1850_v15 = vmul.f32 1.442695, %v1729_v58  ;;  %1532 = vbcast.lane.b32.xlu0 %v5787_v28, 344  ;;  %4601 = vpow2.f32 %v1862_v13  ;;  %v8414_v46 = vld [vmem:[#allocation49_spill] sm:$0xff]  ;;  %v8418_v13 = vld [vmem:[#allocation99_spill] sm:$0xff] }
 0x5a0   : > { %8407 = vst [vmem:[#allocation136_spill] sm:$0xff] %v6852_v57  ;;  %8409 = vst [vmem:[#allocation140_spill] sm:$0xff] %v6856_v47  ;;  %v2340_v61 = vmul.f32 %v4594_v18, %v6852_v57  ;;  %v2206_v35 = vmul.f32 %v6858_v9, %v6856_v47  ;;  %2750 = vbcast.lane.b32.xlu1 %v8411_v14, 352  ;;  %v6872_v41 = vpop.permute.xlu0 %1460  ;;  %v2060_v45 = vrot.slane %v2059_v42, 2  ;;  %v2105_v57 = vrot.slane %v2104_v32, 2 }
 0x5a1   : > { %8406 = vst [vmem:[#allocation135_spill] sm:$0xff] %v6850_v16  ;;  %v3443_v2 = vmul.f32 %v6553_v62, %v6850_v16  ;;  %8412 = vst [vmem:[#allocation128_spill] sm:$0xff] %v6872_v41  ;;  %v6874_v34 = vpop.permute.xlu1 %2639  ;;  %v3349_v4 = vmul.f32 %v8414_v46, %v6131_v44  ;;  %4603 = vpow2.f32 %v1850_v15  ;;  %v3047_v18 = vmul.f32 %v6863_v55, %v8418_v13  ;;  %v8420_v16 = vld [vmem:[#allocation143_spill] sm:$0xff] }
 0x5a2   : > { %8413 = vst [vmem:[#allocation92_spill] sm:$0xff] %v6874_v34  ;;  %v6878_v63 = vadd.f32 %v2340_v61, %v2017_v3  ;;  %v6882_v62 = vadd.f32 %v2206_v35, %v1994_v10  ;;  %v6886_v47 = vadd.f32 %v3396_v60, %v3332_v0  ;;  %v6890_v34 = vmul.f32 %v8420_v16, %v6118_v23  ;;  %v8421_v3 = vld [vmem:[#allocation142_spill] sm:$0xff]  ;;  %v8425_v46 = vld [vmem:[#allocation147_spill] sm:$0xff] }
 0x5a3   : > { %v6880_v58 = vadd.f32 %v3443_v2, %v3341_v43  ;;  %v4598_v29 = vpop.eup %4597  ;;  %2686 = vbcast.lane.b32.xlu0 %v5799_v30, 288  ;;  %v6895_v15 = vmul.f32 %v8421_v3, %v6137_v11  ;;  %v8422_v43 = vld [vmem:[#allocation72_spill] sm:$0xff]  ;;  %v2061_v35 = vadd.f32 %v2060_v45, %v2059_v42  ;;  %v6913_v3 = vmul.f32 %v8425_v46, %v6118_v23  ;;  %v8431_v46 = vld [vmem:[#allocation102_spill] sm:$0xff] }
 0x5a4   : > { %8415 = vst [vmem:[#allocation61_spill] sm:$0xff] %v6878_v63  ;;  %8417 = vst [vmem:[#allocation66_spill] sm:$0xff] %v6882_v62  ;;  %v2002_v10 = vmul.f32 %v6150_v49, %v8422_v43  ;;  %v2251_v61 = vmul.f32 %v4598_v29, %v6882_v62  ;;  %2870 = vbcast.lane.b32.xlu1 %v5775_v26, 336  ;;  %v6905_v60 = vpop.permute.xlu0 %2620  ;;  %v6909_v2 = vld [vmem:[#allocation25 + $0x10] sm:$0xff]  ;;  %v2106_v45 = vadd.f32 %v2105_v57, %v2104_v32  ;;  %v6941_v32 = vld [vmem:[#allocation25] sm:$0xff] }
 0x5a5   : > { %8416 = vst [vmem:[#allocation53_spill] sm:$0xff] %v6880_v58  ;;  %8419 = vst [vmem:[#allocation49_spill] sm:$0xff] %v6886_v47  ;;  %v3488_v0 = vmul.f32 %v6579_v27, %v6880_v58  ;;  %v6907_v16 = vpop.permute.xlu1 %2616  ;;  %v8426_v43 = vld [vmem:[#allocation148_spill] sm:$0xff]  ;;  %v3357_v27 = vmul.f32 %v6649_v17, %v6137_v11  ;;  %v4600_v42 = vpop.eup %4599  ;;  %v6929_v41 = vmul.f32 %v8431_v46, %v6137_v11  ;;  %v8438_v47 = vld [vmem:[#allocation121_spill] sm:$0xff] }
 0x5a6   : > { %2399 = vst.msk [vmem:[#allocation2 + $0x30] sm:$0xff] %vm612_vm2, %v6878_v63  ;;  %8423 = vst [vmem:[#allocation143_spill] sm:$0xff] %v6905_v60  ;;  %v6917_v63 = vmul.f32 %v8426_v43, %v6118_v23  ;;  %v6921_v29 = vadd.f32 %v2251_v61, %v2002_v10  ;;  %v8430_v60 = vld [vmem:[#allocation73_spill] sm:$0xff]  ;;  %v3048_v43 = vmul.f32 %v6909_v2, %v8418_v13  ;;  %v8434_v61 = vld [vmem:[#allocation100_spill] sm:$0xff] }
 0x5a7   : > { %8424 = vst [vmem:[#allocation142_spill] sm:$0xff] %v6907_v16  ;;  %v6923_v62 = vadd.f32 %v3488_v0, %v3349_v4  ;;  %v2004_v58 = vmul.f32 %v6134_v40, %v8430_v60  ;;  %v3112_v16 = vmul.f32 1.442695, %v3047_v18  ;;  %8432 = vst [vmem:[#allocation73_spill] sm:$0xff] %v6929_v41  ;;  %2754 = vbcast.lane.b32.xlu0 %v8411_v14, 360  ;;  %v2062_v18 = vrot.slane %v2061_v35, 1 }
 0x5a8   : > { %8427 = vst [vmem:[#allocation72_spill] sm:$0xff] %v6917_v63  ;;  %8428 = vst [vmem:[#allocation147_spill] sm:$0xff] %v6921_v29  ;;  %v2296_v17 = vmul.f32 %v4600_v42, %v6921_v29  ;;  %2930 = vbcast.lane.b32.xlu1 %v5799_v30, 328  ;;  %v3070_v57 = vmul.f32 %v6941_v32, %v8305_v37  ;;  %v3055_v0 = vmul.f32 %v6863_v55, %v8434_v61  ;;  %v6949_v42 = vpop.permute.xlu0 %2670 }
 0x5a9   : > { %8429 = vst [vmem:[#allocation148_spill] sm:$0xff] %v6923_v62  ;;  %v3533_v4 = vmul.f32 %v6603_v51, %v6923_v62  ;;  %v6938_v10 = vadd.f32 %v6813_v6, %v2004_v58  ;;  %v3365_v60 = vmul.f32 %v6768_v19, %v6140_v1  ;;  %8435 = vst [vmem:[#allocation152_spill] sm:$0xff] %v6949_v42  ;;  %v6951_v51 = vpop.permute.xlu1 %2702  ;;  %v3114_v6 = vmul.f32 1.442695, %v3048_v43  ;;  %v4602_v58 = vpop.eup %4601 }
 0x5aa   : > { %v6954_v46 = vadd.f32 %v2296_v17, %v6736_v54  ;;  %4605 = vpow2.f32 %v3112_v16  ;;  %v3158_v62 = vmul.f32 1.442695, %v3070_v57  ;;  %v2107_v41 = vrot.slane %v2106_v45, 1 }
 0x5ab   : > { %8433 = vst [vmem:[#allocation102_spill] sm:$0xff] %v6938_v10  ;;  %v6956_v29 = vadd.f32 %v3533_v4, %v3357_v27  ;;  %v4604_v13 = vpop.eup %4603  ;;  %v6960_v63 = vmul.f32 %v8438_v47, %v6118_v23  ;;  %2874 = vbcast.lane.b32.xlu0 %v5775_v26, 344  ;;  %4607 = vpow2.f32 %v3114_v6  ;;  %v3078_v19 = vmul.f32 %v6941_v32, %v6080_v39  ;;  %v8439_v47 = vld [vmem:[#allocation103_spill] sm:$0xff] }
 0x5ac   : > { %8436 = vst [vmem:[#allocation153_spill] sm:$0xff] %v6954_v46  ;;  %v2341_v27 = vmul.f32 %v4602_v58, %v6954_v46  ;;  %v2335_v16 = vmul.f32 %v4604_v13, %v6938_v10  ;;  %1500 = vbcast.lane.b32.xlu1 %v5775_v26, 344  ;;  %v3128_v17 = vmul.f32 1.442695, %v3055_v0  ;;  %v3063_v4 = vmul.f32 %v6863_v55, %v8439_v47  ;;  %v6973_v57 = vpop.permute.xlu0 %2710  ;;  %v8445_v0 = vld [vmem:[#allocation88_spill] sm:$0xff]  ;;  %v8446_v46 = vld [vmem:[#allocation85_spill] sm:$0xff] }
 0x5ad   : > { %8437 = vst [vmem:[#allocation154_spill] sm:$0xff] %v6956_v29  ;;  %v2415_v8 = vld [vmem:[#allocation2 + $0x30] sm:$0xff]  ;;  %v3578_v43 = vmul.f32 %v6639_v36, %v6956_v29  ;;  %v2735_v6 = vpop.permute.xlu1 %2734  ;;  %4609 = vpow2.f32 %v3158_v62  ;;  %v6986_v13 = vadd.f32 %v2062_v18, %v2061_v35  ;;  %v6990_v58 = vmul.f32 %v8445_v0, %v6131_v44  ;;  %v8449_v18 = vld [vmem:[#allocation96_spill] sm:$0xff] }
 0x5ae   : > { %v3399_v54 = vmul.f32 %v6546_v12, %v2415_v8  ;;  %v6979_v8 = vadd.f32 %v2341_v27, %v6776_v59  ;;  %v6982_v12 = vadd.f32 %v2335_v16, %v6746_v31  ;;  %v6994_v62 = vmul.f32 %v8446_v46, %v6140_v1  ;;  %v8448_v59 = vld [vmem:[#allocation91_spill] sm:$0xff] }
 0x5af   : > { %v6984_v36 = vadd.f32 %v3578_v43, %v3365_v60  ;;  %8444 = vst [vmem:[#allocation157_spill] sm:$0xff] %v6986_v13  ;;  %1444 = vbcast.lane.b32.xlu0 %v5751_v22, 360  ;;  %v3336_v35 = vmul.f32 %v8448_v59, %v6108_v33  ;;  %v7007_v60 = vmul.f32 %v8449_v18, %v6140_v1  ;;  %v3174_v46 = vmul.f32 1.442695, %v3078_v19  ;;  %v8453_v59 = vld [vmem:[#allocation90_spill] sm:$0xff]  ;;  %v8454_v19 = vld [vmem:[#allocation112_spill] sm:$0xff] }
 0x5b0   : > { %v6976_v42 = vadd.f32 %v3399_v54, %v6803_v7  ;;  %8441 = vst [vmem:[#allocation103_spill] sm:$0xff] %v6979_v8  ;;  %8442 = vst [vmem:[#allocation155_spill] sm:$0xff] %v6982_v12  ;;  %v8447_v7 = vld [vmem:[#allocation94_spill] sm:$0xff]  ;;  %2782 = vbcast.lane.b32.xlu1 %v5739_v20, 352  ;;  %4611 = vpow2.f32 %v3128_v17  ;;  %v3144_v27 = vmul.f32 1.442695, %v3063_v4  ;;  %v7012_v16 = vpop.permute.xlu0 %2798  ;;  %v3056_v43 = vmul.f32 %v6909_v2, %v8434_v61 }
 0x5b1   : > { %8443 = vst [vmem:[#allocation156_spill] sm:$0xff] %v6984_v36  ;;  %v3351_v54 = vmul.f32 %v8447_v7, %v6131_v44  ;;  %2400 = vst.msk [vmem:[#allocation2 + $0x38] sm:$0xff] %vm612_vm2, %v6979_v8  ;;  %v7018_v0 = vadd.f32 %v2107_v41, %v2106_v45  ;;  %v7025_v18 = vmul.f32 %v8453_v59, %v6131_v44  ;;  %v8455_v4 = vld [vmem:[#allocation107_spill] sm:$0xff]  ;;  %4613 = vpow2.f32 %v3174_v46 }
 0x5b2   : > { %8440 = vst [vmem:[#allocation121_spill] sm:$0xff] %v6976_v42  ;;  %v3445_v31 = vmul.f32 %v6621_v56, %v6976_v42  ;;  %8450 = vst [vmem:[#allocation88_spill] sm:$0xff] %v7007_v60  ;;  %v7014_v56 = vpop.permute.xlu1 %1424  ;;  %v7029_v17 = vmul.f32 %v8454_v19, %v6137_v11  ;;  %v3359_v8 = vmul.f32 %v8455_v4, %v6137_v11  ;;  %v8456_v42 = vld [vmem:[#allocation104_spill] sm:$0xff]  ;;  %v2411_v45 = vld [vmem:[#allocation2 + $0x10] sm:$0xff]  ;;  %4615 = vpow2.f32 %v3144_v27 }
 0x5b3   : > { %2394 = vst.msk [vmem:[#allocation2 + $0x8] sm:$0xff] %vm612_vm2, %v6982_v12  ;;  %8451 = vst [vmem:[#allocation85_spill] sm:$0xff] %v7018_v0  ;;  %v3344_v29 = vmul.f32 %v8456_v42, %v6118_v23  ;;  %v7037_v41 = vmul.f32 %v6588_v50, %v6137_v11  ;;  %1564 = vbcast.lane.b32.xlu0 %v5799_v30, 344  ;;  %v3367_v19 = vmul.f32 %v6672_v5, %v6140_v1  ;;  %v8460_v12 = vld [vmem:[#allocation149_spill] sm:$0xff]  ;;  %v8462_v60 = vld [vmem:[#allocation76_spill] sm:$0xff] }
 0x5b4   : > { %v7021_v7 = vadd.f32 %v3445_v31, %v6913_v3  ;;  %v7041_v3 = vmul.f32 %v6612_v53, %v6140_v1  ;;  %v4606_v31 = vpop.eup %4605  ;;  %2902 = vbcast.lane.b32.xlu1 %v5787_v28, 336  ;;  %v7049_v50 = vpop.permute.xlu0 %1432  ;;  %v3130_v53 = vmul.f32 1.442695, %v3056_v43  ;;  %v3071_v23 = vmul.f32 %v6863_v55, %v8305_v37 }
 0x5b5   : > { %v4608_v42 = vpop.eup %4607  ;;  %v7061_v5 = vmul.f32 %v6698_v38, %v6140_v1  ;;  %v7065_v43 = vmul.f32 %v6810_v48, %v6137_v11  ;;  %v8463_v48 = vld [vmem:[#allocation51_spill] sm:$0xff] }
 0x5b6   : > { %8452 = vst [vmem:[#allocation94_spill] sm:$0xff] %v7021_v7  ;;  %v3490_v59 = vmul.f32 %v6666_v25, %v7021_v7  ;;  %v2767_v4 = vpop.permute.xlu1 %2766  ;;  %v7057_v25 = vmul.f32 %v6674_v21, %v6131_v44  ;;  %v3395_v46 = vmul.f32 %v4608_v42, %v2411_v45  ;;  %v7070_v21 = vld [vmem:[#allocation25 + $0x18] sm:$0xff]  ;;  %v8461_v42 = vld [vmem:[#allocation127_spill] sm:$0xff]  ;;  %4617 = vpow2.f32 %v3130_v53 }
 0x5b7   : > { %8458 = vst [vmem:[#allocation96_spill] sm:$0xff] %v7061_v5  ;;  %v4610_v7 = vpop.eup %4609  ;;  %2846 = vbcast.lane.b32.xlu0 %v5763_v24, 352  ;;  %v3057_v38 = vmul.f32 %v7070_v21, %v8434_v61  ;;  %v3160_v61 = vmul.f32 1.442695, %v3071_v23  ;;  %v8469_v53 = vld [vmem:[#allocation110_spill] sm:$0xff] }
 0x5b8   : > { %v7053_v36 = vadd.f32 %v3490_v59, %v3351_v54  ;;  %v2416_v27 = vld [vmem:[#allocation2 + $0x38] sm:$0xff]  ;;  %v8459_v54 = vld [vmem:[#allocation50_spill] sm:$0xff]  ;;  %v7078_v44 = vadd.f32 %v3395_v46, %v8462_v60  ;;  %1472 = vbcast.lane.b32.xlu1 %v5763_v24, 352  ;;  %v7083_v10 = vpop.permute.xlu0 %1492  ;;  %v3086_v23 = vmul.f32 %v6941_v32, %v8469_v53 }
 0x5b9   : > { %v3409_v59 = vmul.f32 %v8459_v54, %v6951_v51  ;;  %v3400_v45 = vmul.f32 %v8460_v12, %v2416_v27  ;;  %v3455_v51 = vmul.f32 %v8463_v48, %v2735_v6  ;;  %v8464_v54 = vld [vmem:[#allocation56_spill] sm:$0xff]  ;;  %4619 = vpow2.f32 %v3160_v61 }
 0x5ba   : > { %8457 = vst [vmem:[#allocation91_spill] sm:$0xff] %v7053_v36  ;;  %v2410_v33 = vld [vmem:[#allocation2 + $0x8] sm:$0xff]  ;;  %v3535_v13 = vmul.f32 %v8461_v42, %v7053_v36  ;;  %v3529_v11 = vmul.f32 %v4610_v7, %v8464_v54  ;;  %v7085_v5 = vpop.permute.xlu1 %1456  ;;  %v3411_v60 = vmul.f32 %v7078_v44, %v6973_v57  ;;  %v4612_v46 = vpop.eup %4611  ;;  %v3132_v42 = vmul.f32 1.442695, %v3057_v38 }
 0x5bb   : > { %v3394_v0 = vmul.f32 %v4606_v31, %v2410_v33  ;;  %8465 = vst [vmem:[#allocation90_spill] sm:$0xff] %v7085_v5  ;;  %v7087_v12 = vadd.f32 %v3400_v45, %v3336_v35  ;;  %v8468_v33 = vld [vmem:[#allocation111_spill] sm:$0xff]  ;;  %v3418_v6 = vsel %vm3417_vm10, %v3409_v59, 0.0  ;;  %1416 = vbcast.lane.b32.xlu0 %v5739_v20, 368  ;;  %v8471_v35 = vld [vmem:[#allocation69_spill] sm:$0xff]  ;;  %v3065_v61 = vmul.f32 %v7070_v21, %v8439_v47 }
 0x5bc   : > { %v7089_v27 = vadd.f32 %v3535_v13, %v3359_v8  ;;  %v7096_v7 = vadd.f32 %v3529_v11, %v6895_v15  ;;  %v8470_v8 = vld [vmem:[#allocation117_spill] sm:$0xff]  ;;  %2659 = vbcast.lane.b32.xlu1 %v5787_v28, 304  ;;  %v3421_v11 = vsel %vm3417_vm10, %v3411_v60, 0.0  ;;  %v3463_v15 = vsel %vm3417_vm10, %v3455_v51, 0.0  ;;  %v7109_v59 = vpop.permute.xlu0 %2830 }
 0x5bd   : > { %8466 = vst [vmem:[#allocation112_spill] sm:$0xff] %v7087_v12  ;;  %v3402_v31 = vadd.f32 %v3394_v0, %v8468_v33  ;;  %v3446_v13 = vmul.f32 %v8470_v8, %v7087_v12  ;;  %v8472_v45 = vld [vmem:[#allocation81_spill] sm:$0xff]  ;;  %v3064_v33 = vmul.f32 %v6909_v2, %v8439_v47  ;;  %v4614_v8 = vpop.eup %4613  ;;  %4621 = vpow2.f32 %v3132_v42  ;;  %v8475_v12 = vld [vmem:[#allocation62_spill] sm:$0xff] }
 0x5be   : > { %8467 = vst [vmem:[#allocation107_spill] sm:$0xff] %v7089_v27  ;;  %v3580_v0 = vmul.f32 %v8471_v35, %v7089_v27  ;;  %v2594_v38 = vpop.permute.xlu1 %2593  ;;  %v3574_v51 = vmul.f32 %v4614_v8, %v7096_v7  ;;  %v8477_v27 = vld [vmem:[#allocation45_spill] sm:$0xff]  ;;  %v8479_v8 = vld [vmem:[#allocation67_spill] sm:$0xff] }
 0x5bf   : > { %v3410_v57 = vmul.f32 %v3402_v31, %v8472_v45  ;;  %v3440_v48 = vmul.f32 %v4612_v46, %v3402_v31  ;;  %v7113_v36 = vadd.f32 %v3446_v13, %v3344_v29  ;;  %v4616_v45 = vpop.eup %4615  ;;  %1536 = vbcast.lane.b32.xlu0 %v5787_v28, 352  ;;  %v8476_v13 = vld [vmem:[#allocation80_spill] sm:$0xff] }
 0x5c0   : > { %v7115_v35 = vadd.f32 %v3580_v0, %v3367_v19  ;;  %2722 = vbcast.lane.b32.xlu1 %v8477_v27, 360 }
 0x5c1   : > { %8473 = vst [vmem:[#allocation104_spill] sm:$0xff] %v7113_v36  ;;  %v3419_v31 = vsel %vm3417_vm10, %v3410_v57, 0.0  ;;  %v3448_v46 = vadd.f32 %v3440_v48, %v6890_v34  ;;  %v3491_v29 = vmul.f32 %v8475_v12, %v7113_v36  ;;  %v3500_v57 = vmul.f32 %v8464_v54, %v2767_v4  ;;  %v7133_v48 = vpop.permute.xlu0 %1404 }
 0x5c2   : > { %8474 = vst [vmem:[#allocation50_spill] sm:$0xff] %v7115_v35  ;;  %v3420_v60 = vadd.f32 %v3419_v31, %v3418_v6  ;;  %v7131_v6 = vadd.f32 %v3574_v51, %v6994_v62  ;;  %v7135_v42 = vpop.permute.xlu1 %2647  ;;  %v3625_v31 = vmul.f32 %v8479_v8, %v7115_v35  ;;  %v3190_v12 = vmul.f32 1.442695, %v3086_v23  ;;  %v8481_v23 = vld [vmem:[#allocation129_spill] sm:$0xff]  ;;  %v8487_v35 = vld [vmem:[#allocation54_spill] sm:$0xff] }
 0x5c3   : > { %v3456_v19 = vmul.f32 %v3448_v46, %v8476_v13  ;;  %v3485_v0 = vmul.f32 %v4616_v45, %v3448_v46  ;;  %8478 = vst [vmem:[#allocation149_spill] sm:$0xff] %v7135_v42  ;;  %v7140_v13 = vadd.f32 %v3491_v29, %v7057_v25  ;;  %v4618_v46 = vpop.eup %4617  ;;  %2690 = vbcast.lane.b32.xlu0 %v5799_v30, 296  ;;  %v3508_v25 = vsel %vm3417_vm10, %v3500_v57, 0.0  ;;  %v8483_v29 = vld [vmem:[#allocation86_spill] sm:$0xff] }
 0x5c4   : > { %v7128_v34 = vadd.f32 %v3421_v11, %v3420_v60  ;;  %v3146_v11 = vmul.f32 1.442695, %v3064_v33  ;;  %v3079_v62 = vmul.f32 %v6863_v55, %v6080_v39  ;;  %v3148_v60 = vmul.f32 1.442695, %v3065_v61  ;;  %2814 = vbcast.lane.b32.xlu1 %v5751_v22, 352  ;;  %v8482_v33 = vld [vmem:[#allocation52_spill] sm:$0xff] }
 0x5c5   : > { %8480 = vst [vmem:[#allocation127_spill] sm:$0xff] %v7140_v13  ;;  %v3464_v4 = vsel %vm3417_vm10, %v3456_v19, 0.0  ;;  %v3493_v54 = vadd.f32 %v3485_v0, %v6990_v58  ;;  %v3536_v51 = vmul.f32 %v6829_v52, %v7140_v13  ;;  %v3441_v58 = vmul.f32 %v4618_v46, %v7078_v44  ;;  %v8484_v19 = vld [vmem:[#allocation108_spill] sm:$0xff]  ;;  %v8485_v52 = vld [vmem:[#allocation114_spill] sm:$0xff] }
 0x5c6   : > { %v3465_v45 = vadd.f32 %v3464_v4, %v3463_v15  ;;  %v7155_v15 = vmul.f32 %v8482_v33, %v6150_v49  ;;  %v2171_v0 = vmul.f32 %v8484_v19, %v8483_v29  ;;  %v7159_v4 = vpop.permute.xlu0 %1520  ;;  %v7161_v61 = vpop.permute.xlu1 %2674  ;;  %4623 = vpow2.f32 %v3190_v12  ;;  %v8489_v19 = vld [vmem:[#allocation63_spill] sm:$0xff] }
 0x5c7   : > { %v3501_v8 = vmul.f32 %v3493_v54, %v8481_v23  ;;  %v3094_v23 = vmul.f32 %v6941_v32, %v8485_v52  ;;  %v7166_v57 = vadd.f32 %v3536_v51, %v7065_v43  ;;  %v3368_v46 = vmul.f32 %v2594_v38, %v6140_v1  ;;  %v4620_v33 = vpop.eup %4619  ;;  %2758 = vbcast.lane.b32.xlu0 %v8411_v14, 368  ;;  %v8490_v38 = vld [vmem:[#allocation72_spill] sm:$0xff] }
 0x5c8   : > { %4625 = vpow2.f32 %v3146_v11  ;;  %v7172_v29 = vmul.f32 %v8487_v35, %v6150_v49  ;;  %v7176_v36 = vmul.f32 %v8489_v19, %v6134_v40  ;;  %v3176_v43 = vmul.f32 1.442695, %v3079_v62  ;;  %2934 = vbcast.lane.b32.xlu1 %v5799_v30, 336  ;;  %v8491_v19 = vld [vmem:[#allocation57_spill] sm:$0xff] }
 0x5c9   : > { %8486 = vst [vmem:[#allocation76_spill] sm:$0xff] %v7166_v57  ;;  %v3509_v44 = vsel %vm3417_vm10, %v3501_v8, 0.0  ;;  %v3581_v51 = vmul.f32 %v6858_v9, %v7166_v57  ;;  %v3449_v11 = vadd.f32 %v3441_v58, %v8490_v38  ;;  %4627 = vpow2.f32 %v3148_v60  ;;  %v4622_v8 = vpop.eup %4621  ;;  %v8493_v9 = vld [vmem:[#allocation75_spill] sm:$0xff] }
 0x5ca   : > { %8488 = vst [vmem:[#allocation51_spill] sm:$0xff] %v7172_v29  ;;  %v7178_v12 = vadd.f32 %v3509_v44, %v3508_v25  ;;  %v3073_v35 = vmul.f32 %v7070_v21, %v8305_v37  ;;  %v7189_v13 = vmul.f32 %v8491_v19, %v6134_v40  ;;  %v2179_v25 = vsel %vm612_vm2, %v2171_v0, 0.0  ;;  %v2625_v44 = vpop.permute.xlu0 %2624  ;;  %v2743_v62 = vpop.permute.xlu1 %2742  ;;  %v8494_v38 = vld [vmem:[#allocation131_spill] sm:$0xff] }
 0x5cb   : > { %v3206_v42 = vmul.f32 1.442695, %v3094_v23  ;;  %v2170_v57 = vmul.f32 %v8493_v9, %v7014_v56  ;;  %v7194_v14 = vadd.f32 %v3581_v51, %v3368_v46  ;;  %v3375_v60 = vmul.f32 %v2625_v44, %v6150_v49  ;;  %2878 = vbcast.lane.b32.xlu0 %v5775_v26, 352 }
 0x5cc   : > { %8492 = vst [vmem:[#allocation56_spill] sm:$0xff] %v7189_v13  ;;  %v3457_v58 = vmul.f32 %v3449_v11, %v2743_v62  ;;  %v2172_v5 = vmul.f32 %v8494_v38, %v7049_v50  ;;  %v3530_v19 = vmul.f32 %v4620_v33, %v3493_v54  ;;  %v8495_v13 = vld [vmem:[#allocation49_spill] sm:$0xff]  ;;  %4629 = vpow2.f32 %v3176_v43  ;;  %1504 = vbcast.lane.b32.xlu1 %v5775_v26, 352 }
 0x5cd   : > { %v3442_v29 = vmul.f32 %v4622_v8, %v8495_v13  ;;  %v3545_v0 = vmul.f32 %v7096_v7, %v7012_v16  ;;  %v7203_v23 = vadd.f32 %v3625_v31, %v3375_v60  ;;  %v3164_v46 = vmul.f32 1.442695, %v3073_v35  ;;  %v8497_v35 = vld [vmem:[#allocation124_spill] sm:$0xff] }
 0x5ce   : > { %v3466_v56 = vsel %vm3417_vm10, %v3457_v58, 0.0  ;;  %v7207_v44 = vpop.permute.xlu0 %2678  ;;  %v3538_v50 = vadd.f32 %v3530_v19, %v7029_v17  ;;  %4631 = vpow2.f32 %v3206_v42  ;;  %v2803_v54 = vpop.permute.xlu1 %2802  ;;  %v3072_v33 = vmul.f32 %v6909_v2, %v8305_v37 }
 0x5cf   : > { %8496 = vst [vmem:[#allocation111_spill] sm:$0xff] %v7203_v23  ;;  %v3467_v51 = vadd.f32 %v3466_v56, %v3465_v45  ;;  %4633 = vpow2.f32 %v3164_v46  ;;  %v3081_v16 = vmul.f32 %v7070_v21, %v6080_v39  ;;  %1448 = vbcast.lane.b32.xlu0 %v5751_v22, 368  ;;  %v3450_v43 = vadd.f32 %v3442_v29, %v6960_v63 }
 0x5d0   : > { %v4624_v7 = vpop.eup %4623  ;;  %v3546_v31 = vmul.f32 %v3538_v50, %v2803_v54  ;;  %v3087_v45 = vmul.f32 %v6863_v55, %v8469_v53  ;;  %v3102_v17 = vmul.f32 %v6941_v32, %v8497_v35  ;;  %v3553_v8 = vsel %vm3417_vm10, %v3545_v0, 0.0  ;;  %2786 = vbcast.lane.b32.xlu1 %v5739_v20, 360 }
 0x5d1   : > { %v2178_v62 = vsel %vm612_vm2, %v2170_v57, 0.0  ;;  %v2181_v9 = vsel %vm612_vm2, %v2172_v5, 0.0  ;;  %v3180_v60 = vmul.f32 1.442695, %v3081_v16  ;;  %v3619_v63 = vmul.f32 %v4624_v7, %v7131_v6  ;;  %v7230_v57 = vld [vmem:[#allocation25 + $0x28] sm:$0xff] }
 0x5d2   : > { %v4626_v42 = vpop.eup %4625  ;;  %v3554_v58 = vsel %vm3417_vm10, %v3546_v31, 0.0  ;;  %v2747_v38 = vpop.permute.xlu0 %2746  ;;  %v3222_v19 = vmul.f32 1.442695, %v3102_v17  ;;  %v3162_v0 = vmul.f32 1.442695, %v3072_v33  ;;  %v1693_v5 = vmul.f32 %v7230_v57, %v8439_v47 }
 0x5d3   : > { %v3486_v29 = vmul.f32 %v4626_v42, %v3449_v11  ;;  %v4628_v56 = vpop.eup %4627  ;;  %v7226_v46 = vadd.f32 %v3554_v58, %v3553_v8  ;;  %v3458_v32 = vmul.f32 %v3450_v43, %v2747_v38  ;;  %v7228_v54 = vpop.permute.xlu1 %1488  ;;  %v2180_v16 = vadd.f32 %v2179_v25, %v2178_v62  ;;  %1568 = vbcast.lane.b32.xlu0 %v5799_v30, 352  ;;  %v8499_v62 = vld [vmem:[#allocation97_spill] sm:$0xff] }
 0x5d4   : > { %v3487_v31 = vmul.f32 %v4628_v56, %v3450_v43  ;;  %v3192_v23 = vmul.f32 1.442695, %v3087_v45  ;;  %4635 = vpow2.f32 %v3222_v19  ;;  %2906 = vbcast.lane.b32.xlu1 %v5787_v28, 344  ;;  %v3627_v7 = vadd.f32 %v3619_v63, %v7155_v15 }
 0x5d5   : > { %v3468_v11 = vsel %vm3417_vm10, %v3458_v32, 0.0  ;;  %4637 = vpow2.f32 %v3180_v60  ;;  %v1701_v33 = vmul.f32 %v7230_v57, %v8305_v37  ;;  %v2182_v42 = vadd.f32 %v2181_v9, %v2180_v16 }
 0x5d6   : > { %v4630_v17 = vpop.eup %4629  ;;  %v7240_v8 = vadd.f32 %v3468_v11, %v3467_v51  ;;  %v2863_v25 = vpop.permute.xlu0 %2862  ;;  %v7243_v58 = vadd.f32 %v3486_v29, %v8499_v62  ;;  %v7246_v43 = vadd.f32 %v3487_v31, %v7025_v18  ;;  %4639 = vpow2.f32 %v3162_v0  ;;  %v8500_v11 = vld [vmem:[#allocation138_spill] sm:$0xff] }
 0x5d7   : > { %v7248_v45 = vmul.f32 %v3627_v7, %v2863_v25  ;;  %v2775_v38 = vpop.permute.xlu1 %2774  ;;  %v3080_v15 = vmul.f32 %v6909_v2, %v6080_v39  ;;  %v1778_v60 = vmul.f32 1.442695, %v1693_v5  ;;  %2850 = vbcast.lane.b32.xlu0 %v5763_v24, 360  ;;  %v3575_v51 = vmul.f32 %v4630_v17, %v3538_v50 }
 0x5d8   : > { %8498 = vst [vmem:[#allocation110_spill] sm:$0xff] %v7240_v8  ;;  %v4632_v63 = vpop.eup %4631  ;;  %v3502_v9 = vmul.f32 %v7243_v58, %v2775_v38  ;;  %4641 = vpow2.f32 %v3192_v23  ;;  %v3095_v29 = vmul.f32 %v6863_v55, %v8485_v52  ;;  %1476 = vbcast.lane.b32.xlu1 %v5763_v24, 360  ;;  %v1709_v56 = vmul.f32 %v7230_v57, %v6080_v39  ;;  %v8501_v38 = vld [vmem:[#allocation144_spill] sm:$0xff] }
 0x5d9   : > { %v4634_v18 = vpop.eup %4633  ;;  %v3664_v19 = vmul.f32 %v4632_v63, %v3627_v7  ;;  %4643 = vpow2.f32 %v1778_v60  ;;  %v1794_v32 = vmul.f32 1.442695, %v1701_v33  ;;  %v3590_v0 = vmul.f32 %v7131_v6, %v7109_v59  ;;  %v8502_v60 = vld [vmem:[#allocation152_spill] sm:$0xff] }
 0x5da   : > { %v3511_v5 = vsel %vm3417_vm10, %v3502_v9, 0.0  ;;  %v1437_v16 = vpop.permute.xlu0 %1436  ;;  %v3583_v23 = vadd.f32 %v3575_v51, %v7041_v3  ;;  %v3532_v50 = vmul.f32 %v4634_v18, %v7246_v43  ;;  %v3178_v62 = vmul.f32 1.442695, %v3080_v15  ;;  %v8503_v9 = vld [vmem:[#allocation64_spill] sm:$0xff] }
 0x5db   : > { %v3512_v31 = vadd.f32 %v3511_v5, %v7178_v12  ;;  %v2173_v17 = vmul.f32 %v8500_v11, %v1437_v16  ;;  %v2835_v7 = vpop.permute.xlu1 %2834  ;;  %v7267_v25 = vadd.f32 %v3664_v19, %v7176_v36  ;;  %1420 = vbcast.lane.b32.xlu0 %v5739_v20, 376  ;;  %v3208_v6 = vmul.f32 1.442695, %v3095_v29  ;;  %v8504_v16 = vld [vmem:[#allocation128_spill] sm:$0xff] }
 0x5dc   : > { %v3591_v33 = vmul.f32 %v3583_v23, %v2835_v7  ;;  %v7271_v59 = vadd.f32 %v3532_v50, %v7037_v41  ;;  %v1717_v3 = vmul.f32 %v7230_v57, %v8469_v53  ;;  %v3385_v12 = vmul.f32 %v8502_v60, %v8501_v38  ;;  %2663 = vbcast.lane.b32.xlu1 %v5787_v28, 312  ;;  %v8505_v50 = vld [vmem:[#allocation74_spill] sm:$0xff] }
 0x5dd   : > { %v2183_v63 = vsel %vm612_vm2, %v2173_v17, 0.0  ;;  %4645 = vpow2.f32 %v1794_v32  ;;  %v1810_v36 = vmul.f32 1.442695, %v1709_v56  ;;  %v3370_v51 = vmul.f32 %v8503_v9, %v6150_v49 }
 0x5de   : > { %v4636_v15 = vpop.eup %4635  ;;  %v3598_v41 = vsel %vm3417_vm10, %v3590_v0, 0.0  ;;  %v7282_v18 = vadd.f32 %v2183_v63, %v2182_v42  ;;  %v3599_v29 = vsel %vm3417_vm10, %v3591_v33, 0.0  ;;  %v7285_v19 = vpop.permute.xlu0 %1552  ;;  %v7289_v11 = vmul.f32 %v8505_v50, %v8504_v16  ;;  %v8506_v0 = vld [vmem:[#allocation92_spill] sm:$0xff]  ;;  %v8507_v63 = vld [vmem:[#allocation83_spill] sm:$0xff] }
 0x5df   : > { %v4638_v5 = vpop.eup %4637  ;;  %v7291_v17 = vadd.f32 %v3599_v29, %v3598_v41  ;;  %v7293_v56 = vpop.permute.xlu1 %1464  ;;  %v3709_v32 = vmul.f32 %v4636_v15, %v7267_v25  ;;  %4647 = vpow2.f32 %v3178_v62  ;;  %v7298_v42 = vmul.f32 %v8506_v0, %v6134_v40  ;;  %1540 = vbcast.lane.b32.xlu0 %v5787_v28, 360  ;;  %v8508_v29 = vld [vmem:[#allocation134_spill] sm:$0xff]  ;;  %v8510_v0 = vld [vmem:[#allocation96_spill] sm:$0xff] }
 0x5e0   : > { %4649 = vpow2.f32 %v3208_v6  ;;  %v3577_v7 = vmul.f32 %v4638_v5, %v7271_v59  ;;  %v1826_v33 = vmul.f32 1.442695, %v1717_v3  ;;  %v4640_v60 = vpop.eup %4639  ;;  %v2261_v9 = vmul.f32 %v8507_v63, %v7083_v10  ;;  %2726 = vbcast.lane.b32.xlu1 %v8477_v27, 368  ;;  %v8509_v6 = vld [vmem:[#allocation151_spill] sm:$0xff] }
 0x5e1   : > { %v7305_v41 = vadd.f32 %v3709_v32, %v3385_v12  ;;  %v1725_v62 = vmul.f32 %v7230_v57, %v8485_v52  ;;  %4651 = vpow2.f32 %v1810_v36  ;;  %v2128_v16 = vmul.f32 %v8508_v29, %v7133_v48  ;;  %v8511_v36 = vld [vmem:[#allocation102_spill] sm:$0xff] }
 0x5e2   : > { %v4642_v15 = vpop.eup %4641  ;;  %v2305_v5 = vmul.f32 %v8509_v6, %v7159_v4  ;;  %v2779_v3 = vpop.permute.xlu0 %2778  ;;  %v3531_v50 = vmul.f32 %v4640_v60, %v7243_v58  ;;  %v7315_v10 = vadd.f32 %v3577_v7, %v8510_v0  ;;  %v1733_v48 = vmul.f32 %v7230_v57, %v8497_v35  ;;  %v8512_v58 = vld [vmem:[#allocation55_spill] sm:$0xff]  ;;  %v8513_v7 = vld [vmem:[#allocation118_spill] sm:$0xff] }
 0x5e3   : > { %v4644_v63 = vpop.eup %4643  ;;  %v3503_v12 = vmul.f32 %v7246_v43, %v2779_v3  ;;  %v1525_v32 = vpop.permute.xlu1 %1524  ;;  %v3620_v8 = vmul.f32 %v4642_v15, %v3583_v23  ;;  %3762 = vst.msk [vmem:[#allocation2] sm:$0xff] %vm3417_vm10, %v7305_v41  ;;  %v3088_v4 = vmul.f32 %v6909_v2, %v8469_v53  ;;  %2730 = vbcast.lane.b32.xlu0 %v8477_v27, 376  ;;  %4653 = vpow2.f32 %v1826_v33  ;;  %v8514_v43 = vld [vmem:[#allocation125_spill] sm:$0xff] }
 0x5e4   : > { %v2306_v29 = vmul.f32 %v8511_v36, %v1525_v32  ;;  %v1976_v60 = vmul.f32 %v8513_v7, %v8512_v58  ;;  %v2114_v6 = vmul.f32 %v4644_v63, %v8514_v43  ;;  %2818 = vbcast.lane.b32.xlu1 %v5751_v22, 360  ;;  %v1842_v15 = vmul.f32 1.442695, %v1725_v62  ;;  %v8516_v33 = vld [vmem:[#allocation73_spill] sm:$0xff] }
 0x5e5   : > { %v3513_v23 = vsel %vm3417_vm10, %v3503_v12, 0.0  ;;  %v3194_v3 = vmul.f32 1.442695, %v3088_v4  ;;  %v3103_v57 = vmul.f32 %v6863_v55, %v8497_v35  ;;  %v2138_v0 = vsel %vm612_vm2, %v2128_v16, 0.0  ;;  %v8518_v16 = vld [vmem:[#allocation119_spill] sm:$0xff] }
 0x5e6   : > { %v7334_v32 = vadd.f32 %v3513_v23, %v3512_v31  ;;  %v2895_v27 = vpop.permute.xlu0 %2894  ;;  %v3539_v36 = vadd.f32 %v3531_v50, %v8516_v33  ;;  %v7337_v39 = vadd.f32 %v2114_v6, %v1976_v60  ;;  %v7340_v63 = vsel %vm612_vm2, %v2261_v9, 0.0  ;;  %v8517_v31 = vld [vmem:[#allocation60_spill] sm:$0xff] }
 0x5e7   : > { %v4646_v58 = vpop.eup %4645  ;;  %v7343_v12 = vmul.f32 %v7267_v25, %v2895_v27  ;;  %v7345_v62 = vpop.permute.xlu1 %2651  ;;  %v7347_v4 = vadd.f32 %v3620_v8, %v3370_v51  ;;  %4655 = vpow2.f32 %v3194_v3  ;;  %2822 = vbcast.lane.b32.xlu0 %v5751_v22, 368  ;;  %v1858_v55 = vmul.f32 1.442695, %v1733_v48  ;;  %v8519_v9 = vld [vmem:[#allocation116_spill] sm:$0xff] }
 0x5e8   : > { %8515 = vst [vmem:[#allocation117_spill] sm:$0xff] %v7334_v32  ;;  %v1984_v50 = vmul.f32 %v8518_v16, %v8517_v31  ;;  %v2159_v60 = vmul.f32 %v4646_v58, %v7337_v39  ;;  %v3224_v43 = vmul.f32 1.442695, %v3103_v57  ;;  %v2139_v23 = vadd.f32 %v2138_v0, %v8519_v9  ;;  %2938 = vbcast.lane.b32.xlu1 %v5799_v30, 344  ;;  %v8521_v58 = vld [vmem:[#allocation58_spill] sm:$0xff] }
 0x5e9   : > { %v4648_v6 = vpop.eup %4647  ;;  %v2313_v25 = vsel %vm612_vm2, %v2305_v5, 0.0  ;;  %4657 = vpow2.f32 %v1842_v15  ;;  %v3096_v8 = vmul.f32 %v6909_v2, %v8485_v52  ;;  %v3104_v57 = vmul.f32 %v6909_v2, %v8497_v35  ;;  %v7364_v9 = vld [vmem:[#allocation25 + $0x38] sm:$0xff] }
 0x5ea   : > { %v4650_v51 = vpop.eup %4649  ;;  %v1409_v3 = vpop.permute.xlu0 %1408  ;;  %v3576_v48 = vmul.f32 %v4648_v6, %v3539_v36  ;;  %v7358_v27 = vadd.f32 %v2159_v60, %v1984_v50  ;;  %4659 = vpow2.f32 %v3224_v43  ;;  %8522 = vst [vmem:[#allocation81_spill] sm:$0xff] %v7364_v9  ;;  %v3093_v15 = vmul.f32 %v7364_v9, %v8469_v53  ;;  %v8523_v50 = vld [vmem:[#allocation65_spill] sm:$0xff] }
 0x5eb   : > { %v4652_v33 = vpop.eup %4651  ;;  %v2129_v0 = vmul.f32 %v8521_v58, %v1409_v3  ;;  %v2715_v31 = vpop.permute.xlu1 %2714  ;;  %v3665_v5 = vmul.f32 %v4650_v51, %v7347_v4  ;;  %v3210_v32 = vmul.f32 1.442695, %v3096_v8  ;;  %2942 = vbcast.lane.b32.xlu0 %v5799_v30, 352  ;;  %4661 = vpow2.f32 %v1858_v55  ;;  %v8524_v55 = vld [vmem:[#allocation88_spill] sm:$0xff] }
 0x5ec   : > { %8520 = vst [vmem:[#allocation69_spill] sm:$0xff] %v7358_v27  ;;  %v3412_v6 = vmul.f32 %v8495_v13, %v2715_v31  ;;  %v1992_v2 = vmul.f32 %v6140_v1, %v8523_v50  ;;  %v2204_v60 = vmul.f32 %v4652_v33, %v7358_v27  ;;  %v2314_v43 = vsel %vm612_vm2, %v2306_v29, 0.0  ;;  %1508 = vbcast.lane.b32.xlu1 %v5775_v26, 360  ;;  %v8526_v33 = vld [vmem:[#allocation150_spill] sm:$0xff]  ;;  %v8527_v27 = vld [vmem:[#allocation145_spill] sm:$0xff] }
 0x5ed   : > { %v2140_v51 = vsel %vm612_vm2, %v2129_v0, 0.0  ;;  %4663 = vpow2.f32 %v3210_v32  ;;  %v3226_v3 = vmul.f32 1.442695, %v3104_v57  ;;  %v4654_v58 = vpop.eup %4653  ;;  %v7380_v9 = vadd.f32 %v3576_v48, %v8524_v55  ;;  %v8530_v55 = vld [vmem:[#allocation77_spill] sm:$0xff] }
 0x5ee   : > { %v7376_v8 = vadd.f32 %v2140_v51, %v2139_v23  ;;  %v3423_v13 = vsel %vm3417_vm10, %v3412_v6, 0.0  ;;  %v1529_v31 = vpop.permute.xlu0 %1528  ;;  %v7382_v50 = vadd.f32 %v2204_v60, %v1992_v2  ;;  %v2260_v29 = vmul.f32 %v8526_v33, %v7228_v54  ;;  %v8528_v6 = vld [vmem:[#allocation70_spill] sm:$0xff] }
 0x5ef   : > { %v3424_v0 = vadd.f32 %v3423_v13, %v7128_v34  ;;  %v2307_v1 = vmul.f32 %v8527_v27, %v1529_v31  ;;  %v2807_v32 = vpop.permute.xlu1 %2806  ;;  %v7389_v57 = vadd.f32 %v3665_v5, %v7298_v42  ;;  %v2315_v23 = vadd.f32 %v2314_v43, %v2313_v25  ;;  %1512 = vbcast.lane.b32.xlu0 %v5775_v26, 368  ;;  %v7397_v34 = vld [vmem:[#allocation25 + $0x28] sm:$0xff] }
 0x5f0   : > { %8525 = vst [vmem:[#allocation62_spill] sm:$0xff] %v7382_v50  ;;  %v3547_v51 = vmul.f32 %v3539_v36, %v2807_v32  ;;  %v2000_v48 = vmul.f32 %v6150_v49, %v8528_v6  ;;  %v2249_v2 = vmul.f32 %v4654_v58, %v7382_v50  ;;  %2790 = vbcast.lane.b32.xlu1 %v5739_v20, 368  ;;  %4665 = vpow2.f32 %v3226_v3  ;;  %v8531_v6 = vld [vmem:[#allocation51_spill] sm:$0xff] }
 0x5f1   : > { %v4656_v60 = vpop.eup %4655  ;;  %v2316_v54 = vsel %vm612_vm2, %v2307_v1, 0.0  ;;  %v3089_v42 = vmul.f32 %v7070_v21, %v8469_v53  ;;  %v3386_v58 = vmul.f32 %v7161_v61, %v8501_v38  ;;  %v7413_v13 = vmul.f32 %v7207_v44, %v8501_v38  ;;  %v8532_v61 = vld [vmem:[#allocation99_spill] sm:$0xff] }
 0x5f2   : > { %v7401_v36 = vadd.f32 %v2316_v54, %v2315_v23  ;;  %v3556_v25 = vsel %vm3417_vm10, %v3547_v51, 0.0  ;;  %v7404_v27 = vpop.permute.xlu0 %2655  ;;  %v7406_v5 = vadd.f32 %v2249_v2, %v2000_v48  ;;  %v3621_v43 = vmul.f32 %v4656_v60, %v7380_v9  ;;  %v8533_v54 = vld [vmem:[#allocation85_spill] sm:$0xff] }
 0x5f3   : > { %v4658_v1 = vpop.eup %4657  ;;  %v3557_v3 = vadd.f32 %v3556_v25, %v7226_v46  ;;  %v2867_v31 = vpop.permute.xlu1 %2866  ;;  %v2008_v33 = vmul.f32 %v6134_v40, %v8530_v55  ;;  %2794 = vbcast.lane.b32.xlu0 %v5739_v20, 376  ;;  %v3051_v44 = vmul.f32 %v7397_v34, %v8532_v61  ;;  %v3204_v46 = vmul.f32 1.442695, %v3093_v15  ;;  %v8534_v25 = vld [vmem:[#allocation157_spill] sm:$0xff] }
 0x5f4   : > { %8529 = vst [vmem:[#allocation80_spill] sm:$0xff] %v7406_v5  ;;  %v4660_v32 = vpop.eup %4659  ;;  %v3636_v23 = vmul.f32 %v7347_v4, %v2867_v31  ;;  %v2294_v51 = vmul.f32 %v4658_v1, %v7406_v5  ;;  %v7422_v48 = vadd.f32 %v3621_v43, %v8531_v6  ;;  %2910 = vbcast.lane.b32.xlu1 %v5787_v28, 352  ;;  %v3196_v60 = vmul.f32 1.442695, %v3089_v42  ;;  %v8535_v42 = vld [vmem:[#allocation135_spill] sm:$0xff] }
 0x5f5   : > { %v3710_v2 = vmul.f32 %v4660_v32, %v7389_v57  ;;  %v7431_v4 = vsel %vm2379_vm11, %v8534_v25, %v8533_v54  ;;  %v4662_v20 = vpop.eup %4661  ;;  %v2268_v1 = vsel %vm612_vm2, %v2260_v29, 0.0  ;;  %v3643_v43 = vsel %vm3417_vm10, %v7248_v45, 0.0  ;;  %v8536_v29 = vld [vmem:[#allocation137_spill] sm:$0xff] }
 0x5f6   : > { %v3644_v31 = vsel %vm3417_vm10, %v3636_v23, 0.0  ;;  %v2719_v55 = vpop.permute.xlu0 %2718  ;;  %v7437_v6 = vadd.f32 %v2294_v51, %v2008_v33  ;;  %v3097_v54 = vmul.f32 %v7070_v21, %v8485_v52  ;;  %v3120_v23 = vmul.f32 1.442695, %v3051_v44 }
 0x5f7   : > { %v4664_v15 = vpop.eup %4663  ;;  %v7439_v61 = vadd.f32 %v3644_v31, %v3643_v43  ;;  %v3413_v32 = vmul.f32 %v8535_v42, %v2719_v55  ;;  %v1497_v5 = vpop.permute.xlu1 %1496  ;;  %v7442_v50 = vadd.f32 %v3710_v2, %v3386_v58  ;;  %2914 = vbcast.lane.b32.xlu0 %v5787_v28, 360  ;;  %v2270_v51 = vadd.f32 %v7340_v63, %v2268_v1  ;;  %v8537_v43 = vld [vmem:[#allocation47_spill] sm:$0xff]  ;;  %v8539_v63 = vld [vmem:[#allocation56_spill] sm:$0xff] }
 0x5f8   : > { %v2262_v25 = vmul.f32 %v8536_v29, %v1497_v5  ;;  %v2339_v45 = vmul.f32 %v4662_v20, %v7437_v6  ;;  %v3666_v33 = vmul.f32 %v4664_v15, %v7422_v48  ;;  %v2350_v31 = vmul.f32 %v8537_v43, %v7285_v19  ;;  %1480 = vbcast.lane.b32.xlu1 %v5763_v24, 368  ;;  %v8538_v20 = vld [vmem:[#allocation79_spill] sm:$0xff] }
 0x5f9   : > { %v3425_v58 = vsel %vm3417_vm10, %v3413_v32, 0.0  ;;  %3763 = vst.msk [vmem:[#allocation2 + $0x8] sm:$0xff] %vm3417_vm10, %v7442_v50  ;;  %4667 = vpow2.f32 %v3196_v60  ;;  %v4711_v15 = vld [vmem:[#allocation25 + $0x20] sm:$0xff] }
 0x5fa   : > { %v7457_v5 = vadd.f32 %v3425_v58, %v3424_v0  ;;  %v2271_v2 = vsel %vm612_vm2, %v2262_v25, 0.0  ;;  %v2811_v44 = vpop.permute.xlu0 %2810  ;;  %v7461_v55 = vadd.f32 %v2339_v45, %v8538_v20  ;;  %v7464_v1 = vadd.f32 %v3666_v33, %v8539_v63  ;;  %v4666_v19 = vpop.eup %4665  ;;  %v8540_v43 = vld [vmem:[#allocation155_spill] sm:$0xff]  ;;  %v8541_v25 = vld [vmem:[#allocation100_spill] sm:$0xff]  ;;  %v8542_v20 = vld [vmem:[#allocation90_spill] sm:$0xff] }
 0x5fb   : > { %v3098_v42 = vmul.f32 %v4711_v15, %v8485_v52  ;;  %v7467_v32 = vadd.f32 %v2271_v2, %v2270_v51  ;;  %v3548_v29 = vmul.f32 %v7271_v59, %v2811_v44  ;;  %v1557_v60 = vpop.permute.xlu1 %1556  ;;  %v3212_v0 = vmul.f32 1.442695, %v3097_v54  ;;  %1544 = vbcast.lane.b32.xlu0 %v5787_v28, 368  ;;  %v8543_v51 = vld [vmem:[#allocation93_spill] sm:$0xff] }
 0x5fc   : > { %v2351_v58 = vmul.f32 %v8540_v43, %v1557_v60  ;;  %2398 = vst.msk [vmem:[#allocation2 + $0x28] sm:$0xff] %vm612_vm2, %v7461_v55  ;;  %v3059_v45 = vmul.f32 %v7397_v34, %v8541_v25  ;;  %4669 = vpow2.f32 %v3120_v23  ;;  %v3711_v33 = vmul.f32 %v4666_v19, %v7464_v1  ;;  %2694 = vbcast.lane.b32.xlu1 %v5799_v30, 304 }
 0x5fd   : > { %v2215_v2 = vmul.f32 %v8543_v51, %v8542_v20  ;;  %v3558_v59 = vsel %vm3417_vm10, %v3548_v29, 0.0  ;;  %4671 = vpow2.f32 %v3204_v46  ;;  %v3105_v54 = vmul.f32 %v7070_v21, %v8497_v35 }
 0x5fe   : > { %v2358_v44 = vsel %vm612_vm2, %v2350_v31, 0.0  ;;  %v7484_v63 = vadd.f32 %v3558_v59, %v3557_v3  ;;  %v2359_v60 = vsel %vm612_vm2, %v2351_v58, 0.0  ;;  %v2927_v23 = vpop.permute.xlu0 %2926  ;;  %v7488_v19 = vadd.f32 %v3711_v33, %v7413_v13  ;;  %v8544_v3 = vld [vmem:[#allocation133_spill] sm:$0xff]  ;;  %v8545_v13 = vld [vmem:[#allocation46_spill] sm:$0xff]  ;;  %v8546_v58 = vld [vmem:[#allocation132_spill] sm:$0xff] }
 0x5ff   : > { %v3214_v43 = vmul.f32 1.442695, %v3098_v42  ;;  %v2360_v25 = vadd.f32 %v2359_v60, %v2358_v44  ;;  %v7491_v29 = vmul.f32 %v7305_v41, %v2927_v23  ;;  %v2839_v20 = vpop.permute.xlu1 %2838  ;;  %4673 = vpow2.f32 %v3212_v0  ;;  %2826 = vbcast.lane.b32.xlu0 %v5751_v22, 376  ;;  %v8547_v44 = vld [vmem:[#allocation105_spill] sm:$0xff] }
 0x600   : > { %v3592_v46 = vmul.f32 %v7380_v9, %v2839_v20  ;;  %v3136_v21 = vmul.f32 1.442695, %v3059_v45  ;;  %3764 = vst.msk [vmem:[#allocation2 + $0x10] sm:$0xff] %vm3417_vm10, %v7488_v19  ;;  %v2217_v31 = vmul.f32 %v8544_v3, %v7293_v56  ;;  %2762 = vbcast.lane.b32.xlu1 %v8545_v13, 376  ;;  %v3228_v42 = vmul.f32 1.442695, %v3105_v54 }
 0x601   : > { %v3372_v41 = vmul.f32 %v8546_v58, %v6150_v49  ;;  %v2224_v0 = vsel %vm612_vm2, %v7289_v11, 0.0  ;;  %v2223_v9 = vsel %vm612_vm2, %v2215_v2, 0.0  ;;  %4675 = vpow2.f32 %v3214_v43 }
 0x602   : > { %v3601_v33 = vsel %vm3417_vm10, %v3592_v46, 0.0  ;;  %v1441_v45 = vpop.permute.xlu0 %1440  ;;  %v3067_v54 = vmul.f32 %v7397_v34, %v8439_v47  ;;  %4677 = vpow2.f32 %v3136_v21  ;;  %v3106_v20 = vmul.f32 %v4711_v15, %v8497_v35 }
 0x603   : > { %v4668_v51 = vpop.eup %4667  ;;  %v3602_v59 = vadd.f32 %v3601_v33, %v7291_v17  ;;  %v2174_v56 = vmul.f32 %v8547_v44, %v1441_v45  ;;  %v2899_v60 = vpop.permute.xlu1 %2898  ;;  %2946 = vbcast.lane.b32.xlu0 %v5799_v30, 360  ;;  %v2414_v11 = vld [vmem:[#allocation2 + $0x28] sm:$0xff]  ;;  %v2225_v46 = vadd.f32 %v2224_v0, %v2223_v9  ;;  %v2226_v43 = vsel %vm612_vm2, %v2217_v31, 0.0 }
 0x604   : > { %v3681_v23 = vmul.f32 %v7389_v57, %v2899_v60  ;;  %v3622_v2 = vmul.f32 %v4668_v51, %v7315_v10  ;;  %2882 = vbcast.lane.b32.xlu1 %v5775_v26, 360  ;;  %4679 = vpow2.f32 %v3228_v42  ;;  %v3688_v47 = vsel %vm3417_vm10, %v7343_v12, 0.0  ;;  %v8548_v31 = vld [vmem:[#allocation82_spill] sm:$0xff]  ;;  %v8549_v51 = vld [vmem:[#allocation113_spill] sm:$0xff] }
 0x605   : > { %v2185_v17 = vsel %vm612_vm2, %v2174_v56, 0.0  ;;  %v3152_v42 = vmul.f32 1.442695, %v3067_v54  ;;  %v8550_v44 = vld [vmem:[#allocation126_spill] sm:$0xff]  ;;  %v8551_v12 = vld [vmem:[#allocation149_spill] sm:$0xff] }
 0x606   : > { %v4670_v3 = vpop.eup %4669  ;;  %v7520_v57 = vadd.f32 %v2185_v17, %v7282_v18  ;;  %v3689_v21 = vsel %vm3417_vm10, %v3681_v23, 0.0  ;;  %v1561_v13 = vpop.permute.xlu0 %1560  ;;  %v7523_v58 = vadd.f32 %v3622_v2, %v3372_v41  ;;  %v3334_v56 = vmul.f32 %v8550_v44, %v8549_v51  ;;  %v8552_v60 = vld [vmem:[#allocation141_spill] sm:$0xff]  ;;  %v8553_v2 = vld [vmem:[#allocation142_spill] sm:$0xff] }
 0x607   : > { %v4672_v15 = vpop.eup %4671  ;;  %v7525_v0 = vadd.f32 %v3689_v21, %v3688_v47  ;;  %v2352_v9 = vmul.f32 %v8548_v31, %v1561_v13  ;;  %v1469_v33 = vpop.permute.xlu1 %1468  ;;  %v3398_v45 = vmul.f32 %v4670_v3, %v2414_v11  ;;  %v3380_v18 = vmul.f32 %v8551_v12, %v6134_v40  ;;  %1576 = vbcast.lane.b32.xlu0 %v5799_v30, 368  ;;  %v8554_v21 = vld [vmem:[#allocation156_spill] sm:$0xff]  ;;  %v8555_v13 = vld [vmem:[#allocation123_spill] sm:$0xff] }
 0x608   : > { %v2218_v17 = vmul.f32 %v8552_v60, %v1469_v33  ;;  %v3230_v41 = vmul.f32 1.442695, %v3106_v20  ;;  %v3373_v47 = vmul.f32 %v8553_v2, %v6150_v49  ;;  %v3623_v31 = vmul.f32 %v8555_v13, %v8554_v21  ;;  %1452 = vbcast.lane.b32.xlu1 %v5751_v22, 376 }
 0x609   : > { %v4674_v23 = vpop.eup %4673  ;;  %v2227_v11 = vadd.f32 %v2226_v43, %v2225_v46  ;;  %v2361_v54 = vsel %vm612_vm2, %v2352_v9, 0.0  ;;  %v3626_v44 = vmul.f32 %v4672_v15, %v7194_v14  ;;  %v7548_v13 = vadd.f32 %v3398_v45, %v3334_v56 }
 0x60a   : > { %v7540_v3 = vadd.f32 %v2361_v54, %v2360_v25  ;;  %v2228_v51 = vsel %vm612_vm2, %v2218_v17, 0.0  ;;  %v2843_v33 = vpop.permute.xlu0 %2842  ;;  %v3667_v20 = vmul.f32 %v4674_v23, %v7523_v58  ;;  %4681 = vpow2.f32 %v3152_v42  ;;  %v8557_v54 = vld [vmem:[#allocation139_spill] sm:$0xff] }
 0x60b   : > { %v7545_v12 = vadd.f32 %v2228_v51, %v2227_v11  ;;  %v3593_v60 = vmul.f32 %v7315_v10, %v2843_v33  ;;  %v2629_v2 = vpop.permute.xlu1 %2628  ;;  %2918 = vbcast.lane.b32.xlu0 %v5787_v28, 368  ;;  %v3075_v22 = vmul.f32 %v7397_v34, %v8305_v37  ;;  %4683 = vpow2.f32 %v3230_v41  ;;  %v4676_v43 = vpop.eup %4675  ;;  %v8556_v11 = vld [vmem:[#allocation115_spill] sm:$0xff] }
 0x60c   : > { %v3376_v46 = vmul.f32 %v2629_v2, %v6150_v49  ;;  %v7554_v25 = vadd.f32 %v3667_v20, %v3380_v18  ;;  %v7556_v15 = vadd.f32 %v3623_v31, %v3373_v47  ;;  %1572 = vbcast.lane.b32.xlu1 %v5799_v30, 360  ;;  %v4678_v10 = vpop.eup %4677  ;;  %v3381_v37 = vmul.f32 %v7345_v62, %v6134_v40  ;;  %v8558_v20 = vld [vmem:[#allocation109_spill] sm:$0xff] }
 0x60d   : > { %v3603_v9 = vsel %vm3417_vm10, %v3593_v60, 0.0  ;;  %v3444_v23 = vmul.f32 %v4678_v10, %v7548_v13  ;;  %v3168_v31 = vmul.f32 1.442695, %v3075_v22  ;;  %v3342_v51 = vmul.f32 %v8557_v54, %v8556_v11  ;;  %v8559_v22 = vld [vmem:[#allocation71_spill] sm:$0xff]  ;;  %v8561_v11 = vld [vmem:[#allocation110_spill] sm:$0xff] }
 0x60e   : > { %v7560_v45 = vadd.f32 %v3603_v9, %v3602_v59  ;;  %v7562_v42 = vadd.f32 %v3626_v44, %v3376_v46  ;;  %v1413_v56 = vpop.permute.xlu0 %1412  ;;  %v4680_v17 = vpop.eup %4679  ;;  %v3668_v33 = vmul.f32 %v4676_v43, %v7556_v15  ;;  %v3083_v60 = vmul.f32 %v7397_v34, %v8558_v20  ;;  %v8560_v43 = vld [vmem:[#allocation53_spill] sm:$0xff]  ;;  %v8562_v20 = vld [vmem:[#allocation48_spill] sm:$0xff] }
 0x60f   : > { %v2130_v18 = vmul.f32 %v7337_v39, %v1413_v56  ;;  %v2683_v41 = vpop.permute.xlu1 %2682  ;;  %2890 = vbcast.lane.b32.xlu0 %v5775_v26, 376  ;;  %v3712_v59 = vmul.f32 %v4680_v17, %v7554_v25  ;;  %v3452_v56 = vadd.f32 %v3444_v23, %v3342_v51  ;;  %4685 = vpow2.f32 %v3168_v31 }
 0x610   : > { %v3388_v47 = vmul.f32 %v2683_v41, %v8501_v38  ;;  %2854 = vbcast.lane.b32.xlu1 %v5763_v24, 368  ;;  %v7583_v46 = vadd.f32 %v3668_v33, %v3381_v37 }
 0x611   : > { %v2142_v44 = vsel %vm612_vm2, %v2130_v18, 0.0 }
 0x612   : > { %v7577_v39 = vadd.f32 %v2142_v44, %v7376_v8  ;;  %v1533_v62 = vpop.permute.xlu0 %1532  ;;  %v7581_v2 = vadd.f32 %v3712_v59, %v3388_v47  ;;  %v3184_v59 = vmul.f32 1.442695, %v3083_v60 }
 0x613   : > { %v2308_v9 = vmul.f32 %v8559_v22, %v1533_v62  ;;  %v2751_v10 = vpop.permute.xlu1 %2750  ;;  %1580 = vbcast.lane.b32.xlu0 %v5799_v30, 376  ;;  %v3350_v22 = vmul.f32 %v8562_v20, %v8513_v7 }
 0x614   : > { %v3459_v17 = vmul.f32 %v8560_v43, %v2751_v10  ;;  %3765 = vst.msk [vmem:[#allocation2 + $0x18] sm:$0xff] %vm3417_vm10, %v7581_v2  ;;  %v4682_v8 = vpop.eup %4681  ;;  %1484 = vbcast.lane.b32.xlu1 %v5763_v24, 376  ;;  %4687 = vpow2.f32 %v3184_v59  ;;  %v3733_v59 = vsel %vm3417_vm10, %v7491_v29, 0.0 }
 0x615   : > { %v2318_v18 = vsel %vm612_vm2, %v2308_v9, 0.0  ;;  %v4684_v41 = vpop.eup %4683  ;;  %v3489_v33 = vmul.f32 %v4682_v8, %v3452_v56 }
 0x616   : > { %v7593_v37 = vadd.f32 %v2318_v18, %v7401_v36  ;;  %v3470_v47 = vsel %vm3417_vm10, %v3459_v17, 0.0  ;;  %v2687_v23 = vpop.permute.xlu0 %2686  ;;  %v3713_v44 = vmul.f32 %v4684_v41, %v7583_v46  ;;  %v3091_v36 = vmul.f32 %v7397_v34, %v8469_v53  ;;  %v8563_v18 = vld [vmem:[#allocation106_spill] sm:$0xff] }
 0x617   : > { %v3471_v54 = vadd.f32 %v3470_v47, %v8561_v11  ;;  %v3389_v31 = vmul.f32 %v2687_v23, %v8501_v38  ;;  %v2871_v51 = vpop.permute.xlu1 %2870  ;;  %2954 = vbcast.lane.b32.xlu0 %v5799_v30, 376  ;;  %v7610_v8 = vadd.f32 %v3489_v33, %v3350_v22  ;;  %v3358_v41 = vmul.f32 %v8563_v18, %v8518_v16  ;;  %v4712_v23 = vld [vmem:[#allocation25 + $0x30] sm:$0xff]  ;;  %v8566_v18 = vld [vmem:[#allocation130_spill] sm:$0xff] }
 0x618   : > { %v3637_v62 = vmul.f32 %v7422_v48, %v2871_v51  ;;  %2698 = vbcast.lane.b32.xlu1 %v5799_v30, 312  ;;  %v3200_v7 = vmul.f32 1.442695, %v3091_v36  ;;  %v3099_v51 = vmul.f32 %v7397_v34, %v8485_v52  ;;  %v8564_v36 = vld [vmem:[#allocation146_spill] sm:$0xff] }
 0x619   : > { %v7606_v60 = vadd.f32 %v3713_v44, %v3389_v31 }
 0x61a   : > { %v3646_v9 = vsel %vm3417_vm10, %v3637_v62, 0.0  ;;  %v2755_v10 = vpop.permute.xlu0 %2754  ;;  %4689 = vpow2.f32 %v3200_v7 }
 0x61b   : > { %v3647_v43 = vadd.f32 %v3646_v9, %v7439_v61  ;;  %v3460_v17 = vmul.f32 %v3452_v56, %v2755_v10  ;;  %v2931_v48 = vpop.permute.xlu1 %2930  ;;  %3766 = vst.msk [vmem:[#allocation2 + $0x20] sm:$0xff] %vm3417_vm10, %v7606_v60  ;;  %v3100_v61 = vmul.f32 %v4712_v23, %v8485_v52  ;;  %v4686_v56 = vpop.eup %4685  ;;  %v3108_v9 = vmul.f32 %v4712_v23, %v8497_v35 }
 0x61c   : > { %v3726_v53 = vmul.f32 %v7442_v50, %v2931_v48  ;;  %2886 = vbcast.lane.b32.xlu1 %v5775_v26, 368  ;;  %v3534_v62 = vmul.f32 %v4686_v56, %v7610_v8  ;;  %v3216_v48 = vmul.f32 1.442695, %v3099_v51  ;;  %v8567_v56 = vld [vmem:[#allocation69_spill] sm:$0xff] }
 0x61d   : > { %v3472_v47 = vsel %vm3417_vm10, %v3460_v17, 0.0  ;;  %v3218_v22 = vmul.f32 1.442695, %v3100_v61  ;;  %v3234_v51 = vmul.f32 1.442695, %v3108_v9 }
 0x61e   : > { %v7622_v11 = vadd.f32 %v3472_v47, %v3471_v54  ;;  %v3734_v31 = vsel %vm3417_vm10, %v3726_v53, 0.0  ;;  %v2875_v50 = vpop.permute.xlu0 %2874  ;;  %v7634_v54 = vadd.f32 %v3534_v62, %v3358_v41  ;;  %v8565_v53 = vld [vmem:[#allocation120_spill] sm:$0xff]  ;;  %v4688_v41 = vpop.eup %4687  ;;  %v8569_v62 = vld [vmem:[#allocation117_spill] sm:$0xff] }
 0x61f   : > { %v7627_v16 = vadd.f32 %v3734_v31, %v3733_v59  ;;  %v3638_v33 = vmul.f32 %v7523_v58, %v2875_v50  ;;  %v1501_v44 = vpop.permute.xlu1 %1500  ;;  %v3366_v47 = vmul.f32 %v8566_v18, %v8565_v53  ;;  %v8568_v31 = vld [vmem:[#allocation148_spill] sm:$0xff]  ;;  %4691 = vpow2.f32 %v3218_v22  ;;  %v8571_v22 = vld [vmem:[#allocation143_spill] sm:$0xff] }
 0x620   : > { %v2263_v20 = vmul.f32 %v8564_v36, %v1501_v44  ;;  %1516 = vbcast.lane.b32.xlu1 %v5775_v26, 376  ;;  %v3579_v50 = vmul.f32 %v4688_v41, %v7634_v54  ;;  %4693 = vpow2.f32 %v3216_v48  ;;  %v3374_v9 = vmul.f32 %v8571_v22, %v6150_v49  ;;  %v8575_v22 = vld [vmem:[#allocation101_spill] sm:$0xff] }
 0x621   : > { %v3648_v29 = vsel %vm3417_vm10, %v3638_v33, 0.0  ;;  %4695 = vpow2.f32 %v3234_v51  ;;  %v8573_v51 = vld [vmem:[#allocation59_spill] sm:$0xff] }
 0x622   : > { %v7637_v10 = vadd.f32 %v3648_v29, %v3647_v43  ;;  %v2273_v17 = vsel %vm612_vm2, %v2263_v20, 0.0  ;;  %v1445_v58 = vpop.permute.xlu0 %1444  ;;  %v3107_v43 = vmul.f32 %v7397_v34, %v8497_v35  ;;  %v8570_v20 = vld [vmem:[#allocation78_spill] sm:$0xff] }
 0x623   : > { %v7643_v7 = vadd.f32 %v2273_v17, %v7467_v32  ;;  %v2175_v59 = vmul.f32 %v8567_v56, %v1445_v58  ;;  %v2783_v26 = vpop.permute.xlu1 %2782  ;;  %v7660_v17 = vadd.f32 %v3579_v50, %v3366_v47 }
 0x624   : > { %v3504_v61 = vmul.f32 %v8568_v31, %v2783_v26  ;;  %2858 = vbcast.lane.b32.xlu1 %v5763_v24, 376  ;;  %v3232_v58 = vmul.f32 1.442695, %v3107_v43  ;;  %v4690_v48 = vpop.eup %4689  ;;  %v8572_v26 = vld [vmem:[#allocation98_spill] sm:$0xff] }
 0x625   : > { %v2187_v23 = vsel %vm612_vm2, %v2175_v59, 0.0  ;;  %v3624_v49 = vmul.f32 %v4690_v48, %v7660_v17 }
 0x626   : > { %v7653_v32 = vadd.f32 %v2187_v23, %v7520_v57  ;;  %v3515_v33 = vsel %vm3417_vm10, %v3504_v61, 0.0  ;;  %v1565_v44 = vpop.permute.xlu0 %1564  ;;  %4697 = vpow2.f32 %v3232_v58 }
 0x627   : > { %v7657_v36 = vadd.f32 %v3515_v33, %v8569_v62  ;;  %v2353_v34 = vmul.f32 %v8570_v20, %v1565_v44  ;;  %v2903_v29 = vpop.permute.xlu1 %2902  ;;  %v8574_v20 = vld [vmem:[#allocation111_spill] sm:$0xff] }
 0x628   : > { %v3682_v24 = vmul.f32 %v7464_v1, %v2903_v29  ;;  %1548 = vbcast.lane.b32.xlu1 %v5787_v28, 376 }
 0x629   : > { %v2363_v57 = vsel %vm612_vm2, %v2353_v34, 0.0  ;;  %v4692_v23 = vpop.eup %4691 }
 0x62a   : > { %v7668_v53 = vadd.f32 %v2363_v57, %v7540_v3  ;;  %v3691_v18 = vsel %vm3417_vm10, %v3682_v24, 0.0  ;;  %v2847_v56 = vpop.permute.xlu0 %2846  ;;  %v7679_v3 = vadd.f32 %v3624_v49, %v3374_v9  ;;  %v4694_v62 = vpop.eup %4693  ;;  %v3670_v34 = vmul.f32 %v4692_v23, %v8574_v20  ;;  %v3792_v23 = vld [vmem:[#allocation28 + $0x10] sm:$0xff] }
 0x62b   : > { %v7672_v47 = vadd.f32 %v3691_v18, %v7525_v0  ;;  %v3594_v1 = vmul.f32 %v8554_v21, %v2847_v56  ;;  %v1473_v59 = vpop.permute.xlu1 %1472  ;;  %v3382_v21 = vmul.f32 %v7404_v27, %v6134_v40  ;;  %v4696_v58 = vpop.eup %4695 }
 0x62c   : > { %v2219_v41 = vmul.f32 %v8572_v26, %v1473_v59  ;;  %2950 = vbcast.lane.b32.xlu1 %v5799_v30, 368  ;;  %v3669_v29 = vmul.f32 %v4694_v62, %v7679_v3 }
 0x62d   : > { %v3605_v31 = vsel %vm3417_vm10, %v3594_v1, 0.0 }
 0x62e   : > { %v7682_v61 = vadd.f32 %v3605_v31, %v7560_v45  ;;  %v2230_v0 = vsel %vm612_vm2, %v2219_v41, 0.0  ;;  %v1417_v43 = vpop.permute.xlu0 %1416  ;;  %v7702_v48 = vadd.f32 %v3669_v29, %v3382_v21  ;;  %v8576_v21 = vld [vmem:[#allocation154_spill] sm:$0xff] }
 0x62f   : > { %v7688_v50 = vadd.f32 %v2230_v0, %v7545_v12  ;;  %v2131_v33 = vmul.f32 %v8573_v51, %v1417_v43  ;;  %v2660_v44 = vpop.permute.xlu1 %2659  ;;  %v3790_v0 = vld [vmem:[#allocation28] sm:$0xff]  ;;  %v3791_v43 = vld [vmem:[#allocation28 + $0x8] sm:$0xff] }
 0x630   : > { %v3383_v30 = vmul.f32 %v2660_v44, %v6134_v40  ;;  %2922 = vbcast.lane.b32.xlu1 %v5787_v28, 376  ;;  %v4698_v1 = vpop.eup %4697  ;;  %v3793_v44 = vld [vmem:[#allocation28 + $0x18] sm:$0xff] }
 0x631   : > { %v2144_v45 = vsel %vm612_vm2, %v2131_v33, 0.0  ;;  %v4270_v33 = vpack.c.bf16 %v3791_v43, %v3790_v0  ;;  %v3797_v43 = vld [vmem:[#allocation28 + $0x38] sm:$0xff] }
 0x632   : > { %v7697_v24 = vadd.f32 %v2144_v45, %v7577_v39  ;;  %v1537_v27 = vpop.permute.xlu0 %1536  ;;  %v7699_v12 = vadd.f32 %v3670_v34, %v3383_v30  ;;  %v8577_v45 = vld [vmem:[#allocation94_spill] sm:$0xff] }
 0x633   : > { %v2309_v9 = vmul.f32 %v8575_v22, %v1537_v27  ;;  %v2723_v57 = vpop.permute.xlu1 %2722  ;;  %4271 = vmatpush3.bf16.msra.mxu1 %v4270_v33  ;;  %v3794_v22 = vld [vmem:[#allocation28 + $0x20] sm:$0xff] }
 0x634   : > { %v3414_v18 = vmul.f32 %v7548_v13, %v2723_v57  ;;  %v7706_v56 = vmul.f32 %v4696_v58, %v7699_v12  ;;  %v3714_v13 = vmul.f32 %v4698_v1, %v7702_v48  ;;  %v8578_v58 = vmov 0.0|0.0  }
 0x635   : > { %v2320_v28 = vsel %vm612_vm2, %v2309_v9, 0.0  ;;  %4272 = vmatprep.subr.bf16.mxu1 %v8578_v58  ;;  %v3795_v9 = vld [vmem:[#allocation28 + $0x28] sm:$0xff] }
 0x636   : > { %v7710_v39 = vadd.f32 %v2320_v28, %v7593_v37  ;;  %v3427_v59 = vsel %vm3417_vm10, %v3414_v18, 0.0  ;;  %v2691_v49 = vpop.permute.xlu0 %2690  ;;  %v8579_v28 = vld [vmem:[#allocation81_spill] sm:$0xff] }
 0x637   : > { %v7714_v26 = vadd.f32 %v3427_v59, %v7457_v5  ;;  %v3390_v41 = vmul.f32 %v2691_v49, %v8501_v38  ;;  %v2815_v31 = vpop.permute.xlu1 %2814  ;;  %v4273_v5 = vpack.c.bf16 %v3793_v44, %v3792_v23  ;;  %v3101_v1 = vmul.f32 %v8579_v28, %v8485_v52  ;;  %v8580_v23 = vld [vmem:[#allocation68_spill] sm:$0xff] }
 0x638   : > { %v3549_v51 = vmul.f32 %v8576_v21, %v2815_v31 }
 0x639   : > { %v7719_v37 = vadd.f32 %v3714_v13, %v3390_v41  ;;  %4274 = vmatpush3.bf16.msra.mxu1 %v4273_v5  ;;  %v4276_v41 = vpack.c.bf16 %v3795_v9, %v3794_v22  ;;  %v3220_v21 = vmul.f32 1.442695, %v3101_v1 }
 0x63a   : > { %v3560_v62 = vsel %vm3417_vm10, %v3549_v51, 0.0  ;;  %v2759_v30 = vpop.permute.xlu0 %2758  ;;  %4275 = vmatprep.subr.bf16.mxu1 %v8578_v58  ;;  %v3109_v51 = vmul.f32 %v8579_v28, %v8497_v35 }
 0x63b   : > { %v7723_v34 = vadd.f32 %v3560_v62, %v7484_v63  ;;  %v3461_v29 = vmul.f32 %v8577_v45, %v2759_v30  ;;  %v2935_v27 = vpop.permute.xlu1 %2934  ;;  %3767 = vst.msk [vmem:[#allocation2 + $0x28] sm:$0xff] %vm3417_vm10, %v7719_v37  ;;  %4699 = vpow2.f32 %v3220_v21 }
 0x63c   : > { %v3727_v57 = vmul.f32 %v7488_v19, %v2935_v27  ;;  %v3796_v19 = vld [vmem:[#allocation28 + $0x30] sm:$0xff]  ;;  %v3236_v45 = vmul.f32 1.442695, %v3109_v51 }
 0x63d   : > { %v3474_v18 = vsel %vm3417_vm10, %v3461_v29, 0.0  ;;  %4277 = vmatpush3.bf16.msra.mxu1 %v4276_v41 }
 0x63e   : > { %v7734_v63 = vadd.f32 %v3474_v18, %v7622_v11  ;;  %v3736_v59 = vsel %vm3417_vm10, %v3727_v57, 0.0  ;;  %v2879_v49 = vpop.permute.xlu0 %2878  ;;  %4278 = vmatprep.subr.bf16.mxu1 %v8578_v58  ;;  %4701 = vpow2.f32 %v3236_v45  ;;  %v8581_v18 = vld [vmem:[#allocation62_spill] sm:$0xff] }
 0x63f   : > { %v7738_v31 = vadd.f32 %v3736_v59, %v7627_v16  ;;  %v3639_v13 = vmul.f32 %v7556_v15, %v2879_v49  ;;  %v1505_v0 = vpop.permute.xlu1 %1504  ;;  %v4279_v15 = vpack.c.bf16 %v3797_v43, %v3796_v19 }
 0x640   : > { %v2264_v52 = vmul.f32 %v8580_v23, %v1505_v0 }
 0x641   : > { %v3650_v11 = vsel %vm3417_vm10, %v3639_v13, 0.0  ;;  %4280 = vmatpush3.bf16.msra.mxu1 %v4279_v15  ;;  %v8582_v13 = vld [vmem:[#allocation89_spill] sm:$0xff] }
 0x642   : > { %v7747_v33 = vadd.f32 %v3650_v11, %v7637_v10  ;;  %v2275_v16 = vsel %vm612_vm2, %v2264_v52, 0.0  ;;  %v7750_v44 = vpop.permute.xlu0 %1448 }
 0x643   : > { %v7753_v62 = vadd.f32 %v2275_v16, %v7643_v7  ;;  %v2787_v30 = vpop.permute.xlu1 %2786 }
 0x644   : > { %v3505_v5 = vmul.f32 %v7610_v8, %v2787_v30 }
 0x645   : > { %v4700_v49 = vpop.eup %4699 }
 0x646   : > { %v3517_v35 = vsel %vm3417_vm10, %v3505_v5, 0.0  ;;  %v7758_v10 = vpop.permute.xlu0 %1568  ;;  %v3671_v19 = vmul.f32 %v4700_v49, %v7562_v42 }
 0x647   : > { %v3518_v29 = vadd.f32 %v3517_v35, %v7657_v36  ;;  %v2907_v27 = vpop.permute.xlu1 %2906 }
 0x648   : > { %v3683_v22 = vmul.f32 %v7554_v25, %v2907_v27  ;;  %v4702_v11 = vpop.eup %4701 }
 0x64a   : > { %v3693_v7 = vsel %vm3417_vm10, %v3683_v22, 0.0  ;;  %v2851_v9 = vpop.permute.xlu0 %2850 }
 0x64b   : > { %v7764_v58 = vadd.f32 %v3693_v7, %v7672_v47  ;;  %v3595_v8 = vmul.f32 %v7660_v17, %v2851_v9  ;;  %v1477_v57 = vpop.permute.xlu1 %1476 }
 0x64c   : > { %v2220_v28 = vmul.f32 %v8581_v18, %v1477_v57  ;;  %v8584_v57 = vld [vmem:[#allocation107_spill] sm:$0xff] }
 0x64d   : > { %v3607_v1 = vsel %vm3417_vm10, %v3595_v8, 0.0 }
 0x64e   : > { %v7770_v59 = vadd.f32 %v3607_v1, %v7682_v61  ;;  %v2232_v36 = vsel %vm612_vm2, %v2220_v28, 0.0  ;;  %v1421_v25 = vpop.permute.xlu0 %1420 }
 0x64f   : > { %v7774_v41 = vadd.f32 %v2232_v36, %v7688_v50  ;;  %v2132_v47 = vmul.f32 %v8582_v13, %v1421_v25  ;;  %v2664_v0 = vpop.permute.xlu1 %2663  ;;  %v8583_v50 = vld [vmem:[#allocation121_spill] sm:$0xff] }
 0x650   : > { %v3384_v17 = vmul.f32 %v2664_v0, %v6134_v40 }
 0x651   : > { %v2146_v43 = vsel %vm612_vm2, %v2132_v47, 0.0 }
 0x652   : > { %v2147_v23 = vadd.f32 %v2146_v43, %v7697_v24  ;;  %v7781_v61 = vadd.f32 %v3671_v19, %v3384_v17  ;;  %v7783_v52 = vpop.permute.xlu0 %1540  ;;  %v8585_v43 = vld [vmem:[#allocation112_spill] sm:$0xff] }
 0x653   : > { %v2727_v21 = vpop.permute.xlu1 %2726 }
 0x654   : > { %v2148_v51 = vrot.slane %v2147_v23, 4  ;;  %v3415_v16 = vmul.f32 %v8583_v50, %v2727_v21  ;;  %v7787_v15 = vmul.f32 %v4702_v11, %v7781_v61 }
 0x656   : > { %v2149_v30 = vadd.f32 %v2148_v51, %v2147_v23  ;;  %v3429_v40 = vsel %vm3417_vm10, %v3415_v16, 0.0  ;;  %v2731_v5 = vpop.permute.xlu0 %2730  ;;  %v8586_v23 = vld [vmem:[#allocation91_spill] sm:$0xff] }
 0x657   : > { %v3430_v45 = vadd.f32 %v3429_v40, %v7714_v26  ;;  %v2819_v35 = vpop.permute.xlu1 %2818  ;;  %v8587_v16 = vld [vmem:[#allocation127_spill] sm:$0xff] }
 0x658   : > { %v2150_v24 = vrot.slane %v2149_v30, 2  ;;  %v3550_v27 = vmul.f32 %v7634_v54, %v2819_v35 }
 0x65a   : > { %v2151_v22 = vadd.f32 %v2150_v24, %v2149_v30  ;;  %v3562_v7 = vsel %vm3417_vm10, %v3550_v27, 0.0  ;;  %v2823_v9 = vpop.permute.xlu0 %2822 }
 0x65b   : > { %v3563_v8 = vadd.f32 %v3562_v7, %v7723_v34  ;;  %v3551_v18 = vmul.f32 %v8584_v57, %v2823_v9  ;;  %v2939_v28 = vpop.permute.xlu1 %2938 }
 0x65c   : > { %v2152_v1 = vrot.slane %v2151_v22, 1  ;;  %v3728_v36 = vmul.f32 %v7581_v2, %v2939_v28  ;;  %v3416_v2 = vmul.f32 %v8585_v43, %v2731_v5 }
 0x65d   : > { %v3564_v25 = vsel %vm3417_vm10, %v3551_v18, 0.0 }
 0x65e   : > { %v2153_v49 = vadd.f32 %v2152_v1, %v2151_v22  ;;  %v3565_v26 = vadd.f32 %v3564_v25, %v3563_v8  ;;  %v3738_v13 = vsel %vm3417_vm10, %v3728_v36, 0.0  ;;  %v2943_v47 = vpop.permute.xlu0 %2942  ;;  %v3431_v40 = vsel %vm3417_vm10, %v3416_v2, 0.0  ;;  %v8588_v36 = vld [vmem:[#allocation76_spill] sm:$0xff] }
 0x65f   : > { %v3739_v54 = vadd.f32 %v3738_v13, %v7738_v31  ;;  %v7799_v0 = vpop.permute.xlu1 %1508  ;;  %v3432_v24 = vadd.f32 %v3431_v40, %v3430_v45  ;;  %v8589_v13 = vld [vmem:[#allocation104_spill] sm:$0xff] }
 0x660   : > { %v7803_v34 = vsel %vm939_vm6, %v7431_v4, %v2153_v49 }
 0x661   : > { %v3433_v5 = vrot.slane %v3432_v24, 4 }
 0x662   : > { %v7805_v17 = vpop.permute.xlu0 %1512 }
 0x663   : > { %v2791_v19 = vpop.permute.xlu1 %2790  ;;  %v3434_v1 = vadd.f32 %v3433_v5, %v3432_v24 }
 0x664   : > { %v3506_v11 = vmul.f32 %v8586_v23, %v2791_v19 }
 0x666   : > { %v3519_v21 = vsel %vm3417_vm10, %v3506_v11, 0.0  ;;  %v2795_v51 = vpop.permute.xlu0 %2794 }
 0x667   : > { %v3520_v50 = vadd.f32 %v3519_v21, %v3518_v29  ;;  %v3507_v30 = vmul.f32 %v8587_v16, %v2795_v51  ;;  %v2911_v31 = vpop.permute.xlu1 %2910  ;;  %v3729_v29 = vmul.f32 %v7606_v60, %v2943_v47  ;;  %v8590_v60 = vld [vmem:[#allocation95_spill] sm:$0xff]  ;;  %v3435_v21 = vrot.slane %v3434_v1, 2 }
 0x668   : > { %v2176_v47 = vmul.f32 %v8590_v60, %v7750_v44  ;;  %v3684_v51 = vmul.f32 %v7583_v46, %v2911_v31 }
 0x669   : > { %v3521_v35 = vsel %vm3417_vm10, %v3507_v30, 0.0  ;;  %v3740_v43 = vsel %vm3417_vm10, %v3729_v29, 0.0  ;;  %v3436_v46 = vadd.f32 %v3435_v21, %v3434_v1 }
 0x66a   : > { %v2915_v4 = vpop.permute.xlu0 %2914  ;;  %v3522_v22 = vadd.f32 %v3521_v35, %v3520_v50  ;;  %v3741_v40 = vadd.f32 %v3740_v43, %v3739_v54 }
 0x66b   : > { %v1481_v27 = vpop.permute.xlu1 %1480  ;;  %v3437_v1 = vrot.slane %v3436_v46, 1 }
 0x66c   : > { %v3523_v8 = vrot.slane %v3522_v22, 4 }
 0x66e   : > { %v7813_v7 = vpop.permute.xlu0 %1544  ;;  %v3524_v45 = vadd.f32 %v3523_v8, %v3522_v22  ;;  %v3685_v22 = vmul.f32 %v7702_v48, %v2915_v4 }
 0x66f   : > { %v2695_v9 = vpop.permute.xlu1 %2694 }
 0x670   : > { %v3391_v57 = vmul.f32 %v2695_v9, %v8501_v38  ;;  %v3525_v35 = vrot.slane %v3524_v45, 2  ;;  %v3697_v4 = vsel %vm3417_vm10, %v3685_v22, 0.0 }
 0x672   : > { %v2827_v18 = vpop.permute.xlu0 %2826  ;;  %v7818_v28 = vadd.f32 %v7706_v56, %v3391_v57  ;;  %v3526_v29 = vadd.f32 %v3525_v35, %v3524_v45 }
 0x673   : > { %v3552_v25 = vmul.f32 %v8588_v36, %v2827_v18  ;;  %v2763_v49 = vpop.permute.xlu1 %2762  ;;  %v8591_v18 = vld [vmem:[#allocation140_spill] sm:$0xff] }
 0x674   : > { %v3462_v19 = vmul.f32 %v8589_v13, %v2763_v49  ;;  %3768 = vst.msk [vmem:[#allocation2 + $0x30] sm:$0xff] %vm3417_vm10, %v7818_v28 }
 0x675   : > { %v3566_v2 = vsel %vm3417_vm10, %v3552_v25, 0.0 }
 0x676   : > { %v3567_v23 = vadd.f32 %v3566_v2, %v3565_v26  ;;  %v3476_v56 = vsel %vm3417_vm10, %v3462_v19, 0.0  ;;  %v2947_v11 = vpop.permute.xlu0 %2946  ;;  %v2189_v26 = vsel %vm612_vm2, %v2176_v47, 0.0 }
 0x677   : > { %v3477_v50 = vadd.f32 %v3476_v56, %v7734_v63  ;;  %v3730_v16 = vmul.f32 %v7719_v37, %v2947_v11  ;;  %v2883_v30 = vpop.permute.xlu1 %2882  ;;  %v3695_v63 = vsel %vm3417_vm10, %v3684_v51, 0.0  ;;  %v2190_v48 = vadd.f32 %v2189_v26, %v7653_v32 }
 0x678   : > { %v3568_v24 = vrot.slane %v3567_v23, 4  ;;  %v3696_v49 = vadd.f32 %v3695_v63, %v7764_v58 }
 0x679   : > { %v3478_v5 = vrot.slane %v3477_v50, 4  ;;  %v3742_v44 = vsel %vm3417_vm10, %v3730_v16, 0.0 }
 0x67a   : > { %v3569_v9 = vadd.f32 %v3568_v24, %v3567_v23  ;;  %v7835_v8 = vadd.f32 %v3742_v44, %v3741_v40  ;;  %v1577_v57 = vpop.permute.xlu0 %1576  ;;  %v3527_v23 = vrot.slane %v3526_v29, 1  ;;  %v3698_v56 = vadd.f32 %v3697_v4, %v3696_v49 }
 0x67b   : > { %v3479_v31 = vadd.f32 %v3478_v5, %v3477_v50  ;;  %v1453_v37 = vpop.permute.xlu1 %1452  ;;  %v8592_v50 = vld [vmem:[#allocation84_spill] sm:$0xff]  ;;  %v3438_v40 = vadd.f32 %v3437_v1, %v3436_v46  ;;  %v3640_v1 = vmul.f32 %v7679_v3, %v2883_v30  ;;  %v8598_v30 = vld [vmem:[#allocation103_spill] sm:$0xff] }
 0x67c   : > { %v3570_v54 = vrot.slane %v3569_v9, 2  ;;  %v2177_v36 = vmul.f32 %v8591_v18, %v1453_v37  ;;  %v2221_v16 = vmul.f32 %v8592_v50, %v1481_v27  ;;  %v3528_v5 = vadd.f32 %v3527_v23, %v3526_v29 }
 0x67d   : > { %v3480_v25 = vrot.slane %v3479_v31, 2 }
 0x67e   : > { %v3571_v13 = vadd.f32 %v3570_v54, %v3569_v9  ;;  %v2191_v19 = vsel %vm612_vm2, %v2177_v36, 0.0  ;;  %v2919_v43 = vpop.permute.xlu0 %2918  ;;  %v8594_v9 = vld [vmem:[#allocation87_spill] sm:$0xff]  ;;  %v2234_v27 = vsel %vm612_vm2, %v2221_v16, 0.0  ;;  %v8599_v16 = vld [vmem:[#allocation122_spill] sm:$0xff] }
 0x67f   : > { %v3481_v2 = vadd.f32 %v3480_v25, %v3479_v31  ;;  %v2192_v60 = vadd.f32 %v2191_v19, %v2190_v48  ;;  %v3686_v47 = vmul.f32 %v7699_v12, %v2919_v43  ;;  %v1573_v45 = vpop.permute.xlu1 %1572  ;;  %v8593_v12 = vld [vmem:[#allocation50_spill] sm:$0xff]  ;;  %v2354_v63 = vmul.f32 %v8594_v9, %v7758_v10 }
 0x680   : > { %v3572_v11 = vrot.slane %v3571_v13, 1  ;;  %v2355_v29 = vmul.f32 %v7461_v55, %v1573_v45  ;;  %v8595_v10 = vld [vmem:[#allocation66_spill] sm:$0xff]  ;;  %v2235_v19 = vadd.f32 %v2234_v27, %v7774_v41  ;;  %v8600_v27 = vld [vmem:[#allocation147_spill] sm:$0xff] }
 0x681   : > { %v3482_v21 = vrot.slane %v3481_v2, 1  ;;  %v2193_v32 = vrot.slane %v2192_v60, 4  ;;  %v3699_v51 = vsel %vm3417_vm10, %v3686_v47, 0.0 }
 0x682   : > { %v7846_v58 = vadd.f32 %v3699_v51, %v3698_v56  ;;  %v2891_v44 = vpop.permute.xlu0 %2890  ;;  %v3573_v31 = vadd.f32 %v3572_v11, %v3571_v13  ;;  %v2365_v13 = vsel %vm612_vm2, %v2354_v63, 0.0  ;;  %v8596_v56 = vld [vmem:[#allocation80_spill] sm:$0xff] }
 0x683   : > { %v3483_v35 = vadd.f32 %v3482_v21, %v3481_v2  ;;  %v2194_v24 = vadd.f32 %v2193_v32, %v2192_v60  ;;  %v2855_v22 = vpop.permute.xlu1 %2854  ;;  %v2366_v23 = vadd.f32 %v2365_v13, %v7668_v53  ;;  %v2265_v11 = vmul.f32 %v8596_v56, %v7799_v0  ;;  %v8597_v32 = vld [vmem:[#allocation61_spill] sm:$0xff] }
 0x684   : > { %v3596_v26 = vmul.f32 %v8593_v12, %v2855_v22  ;;  %v2356_v41 = vmul.f32 %v8597_v32, %v1577_v57  ;;  %v3642_v57 = vmul.f32 %v7562_v42, %v2891_v44 }
 0x685   : > { %v3754_v37 = vsel %vm2379_vm11, %v3438_v40, %v3483_v35  ;;  %v2195_v54 = vrot.slane %v2194_v24, 2  ;;  %v2266_v40 = vmul.f32 %v8599_v16, %v7805_v17  ;;  %v3652_v35 = vsel %vm3417_vm10, %v3640_v1, 0.0 }
 0x686   : > { %v3755_v18 = vsel %vm939_vm6, %v3754_v37, %v3528_v5  ;;  %v3609_v46 = vsel %vm3417_vm10, %v3596_v26, 0.0  ;;  %v1581_v2 = vpop.permute.xlu0 %1580  ;;  %v3653_v5 = vadd.f32 %v3652_v35, %v7747_v33  ;;  %v2369_v12 = vsel %vm612_vm2, %v2356_v41, 0.0  ;;  %v8602_v41 = vld [vmem:[#allocation153_spill] sm:$0xff] }
 0x687   : > { %v2196_v36 = vadd.f32 %v2195_v54, %v2194_v24  ;;  %v7857_v48 = vadd.f32 %v3609_v46, %v7770_v59  ;;  %v1485_v4 = vpop.permute.xlu1 %1484  ;;  %v7860_v25 = vsel %vm2382_vm12, %v3755_v18, %v3573_v31  ;;  %v2367_v59 = vsel %vm612_vm2, %v2355_v29, 0.0 }
 0x688   : > { %v2222_v49 = vmul.f32 %v8595_v10, %v1485_v4  ;;  %v2357_v51 = vmul.f32 %v8598_v30, %v1581_v2  ;;  %v2368_v24 = vadd.f32 %v2367_v59, %v2366_v23  ;;  %v2279_v9 = vsel %vm612_vm2, %v2266_v40, 0.0  ;;  %v8601_v4 = vld [vmem:[#allocation136_spill] sm:$0xff] }
 0x689   : > { %v2197_v43 = vrot.slane %v2196_v36, 1  ;;  %v3656_v33 = vsel %vm3417_vm10, %v3642_v57, 0.0  ;;  %v2311_v10 = vmul.f32 %v8601_v4, %v7813_v7 }
 0x68a   : > { %v2236_v60 = vsel %vm612_vm2, %v2222_v49, 0.0  ;;  %v2371_v17 = vsel %vm612_vm2, %v2357_v51, 0.0  ;;  %v2955_v40 = vpop.permute.xlu0 %2954 }
 0x68b   : > { %v2198_v55 = vadd.f32 %v2197_v43, %v2196_v36  ;;  %v2237_v47 = vadd.f32 %v2236_v60, %v2235_v19  ;;  %v2699_v45 = vpop.permute.xlu1 %2698  ;;  %v2324_v59 = vsel %vm612_vm2, %v2311_v10, 0.0 }
 0x68c   : > { %v3392_v21 = vmul.f32 %v2699_v45, %v8501_v38  ;;  %v2277_v38 = vsel %vm612_vm2, %v2265_v11, 0.0 }
 0x68d   : > { %v2383_v3 = vsel %vm2382_vm12, %v7803_v34, %v2198_v55  ;;  %v2238_v50 = vrot.slane %v2237_v47, 4  ;;  %v2278_v31 = vadd.f32 %v2277_v38, %v7753_v62 }
 0x68e   : > { %v3724_v53 = vadd.f32 %v7787_v15, %v3392_v21  ;;  %v2370_v15 = vadd.f32 %v2369_v12, %v2368_v24 }
 0x68f   : > { %v2239_v22 = vadd.f32 %v2238_v50, %v2237_v47  ;;  %v2887_v0 = vpop.permute.xlu1 %2886  ;;  %v2280_v46 = vadd.f32 %v2279_v9, %v2278_v31  ;;  %v7902_v47 = vld [vmem:[#allocation6] sm:$0xff] }
 0x690   : > { %3769 = vst.msk [vmem:[#allocation2 + $0x38] sm:$0xff] %vm3417_vm10, %v3724_v53  ;;  %v3641_v34 = vmul.f32 %v8574_v20, %v2887_v0  ;;  %v2310_v20 = vmul.f32 %v7437_v6, %v7783_v52  ;;  %v2372_v54 = vadd.f32 %v2371_v17, %v2370_v15  ;;  %v4125_v50 = vmul.f32 -1.442695, %v7902_v47 }
 0x691   : > { %v2240_v26 = vrot.slane %v2239_v22, 2  ;;  %v3732_v38 = vmul.f32 %v3724_v53, %v2955_v40 }
 0x692   : > { %v3654_v63 = vsel %vm3417_vm10, %v3641_v34, 0.0  ;;  %v2322_v6 = vsel %vm612_vm2, %v2310_v20, 0.0  ;;  %v2373_v52 = vrot.slane %v2372_v54, 4  ;;  %4703 = vpow2.f32 %v4125_v50 }
 0x693   : > { %v2241_v37 = vadd.f32 %v2240_v26, %v2239_v22  ;;  %v3655_v42 = vadd.f32 %v3654_v63, %v3653_v5  ;;  %v1517_v44 = vpop.permute.xlu1 %1516  ;;  %v2323_v45 = vadd.f32 %v2322_v6, %v7710_v39  ;;  %v3746_v53 = vsel %vm3417_vm10, %v3732_v38, 0.0 }
 0x694   : > { %v2267_v18 = vmul.f32 %v8600_v27, %v1517_v44  ;;  %v2374_v21 = vadd.f32 %v2373_v52, %v2372_v54 }
 0x695   : > { %v2242_v36 = vrot.slane %v2241_v37, 1  ;;  %v3657_v29 = vadd.f32 %v3656_v33, %v3655_v42  ;;  %v2325_v30 = vadd.f32 %v2324_v59, %v2323_v45 }
 0x696   : > { %v2281_v62 = vsel %vm612_vm2, %v2267_v18, 0.0  ;;  %v2375_v0 = vrot.slane %v2374_v21, 2 }
 0x697   : > { %v2243_v49 = vadd.f32 %v2242_v36, %v2241_v37  ;;  %v3658_v13 = vrot.slane %v3657_v29, 4  ;;  %v2282_v19 = vadd.f32 %v2281_v62, %v2280_v46  ;;  %v2859_v43 = vpop.permute.xlu1 %2858 }
 0x698   : > { %v3597_v1 = vmul.f32 %v7194_v14, %v2859_v43  ;;  %v2376_v37 = vadd.f32 %v2375_v0, %v2374_v21 }
 0x699   : > { %v2385_v2 = vsel %vm2384_vm13, %v2383_v3, %v2243_v49  ;;  %v3659_v60 = vadd.f32 %v3658_v13, %v3657_v29  ;;  %v2283_v55 = vrot.slane %v2282_v19, 4 }
 0x69a   : > { %v3611_v7 = vsel %vm3417_vm10, %v3597_v1, 0.0 }
 0x69b   : > { %v2284_v23 = vadd.f32 %v2283_v55, %v2282_v19  ;;  %v3612_v56 = vadd.f32 %v3611_v7, %v7857_v48  ;;  %v1549_v11 = vpop.permute.xlu1 %1548  ;;  %v3660_v32 = vrot.slane %v3659_v60, 2 }
 0x69c   : > { %v2312_v14 = vmul.f32 %v8602_v41, %v1549_v11  ;;  %v4704_v19 = vpop.eup %4703  ;;  %v4124_v41 = vld [vmem:[#allocation27] ss:$0 sm:$0xff] }
 0x69d   : > { %v2285_v3 = vrot.slane %v2284_v23, 2  ;;  %v3613_v51 = vrot.slane %v3612_v56, 4  ;;  %v3661_v48 = vadd.f32 %v3660_v32, %v3659_v60  ;;  %v3785_v59 = vadd.f32 1.0, %v4704_v19  ;;  %v3771_v32 = vld [vmem:[#allocation5] sm:$0xff] }
 0x69e   : > { %v2326_v16 = vsel %vm612_vm2, %v2312_v14, 0.0 }
 0x69f   : > { %v2286_v35 = vadd.f32 %v2285_v3, %v2284_v23  ;;  %v3614_v24 = vadd.f32 %v3613_v51, %v3612_v56  ;;  %v2327_v22 = vadd.f32 %v2326_v16, %v2325_v30  ;;  %v2951_v39 = vpop.permute.xlu1 %2950  ;;  %v3662_v42 = vrot.slane %v3661_v48, 1 }
 0x6a0   : > { %v3731_v57 = vmul.f32 %v7818_v28, %v2951_v39  ;;  %4705 = vrcp.f32 %v3785_v59  ;;  %v3779_v30 = vmul.f32 %v4124_v41, %v3771_v32 }
 0x6a1   : > { %v2287_v34 = vrot.slane %v2286_v35, 1  ;;  %v3615_v5 = vrot.slane %v3614_v24, 2  ;;  %v2328_v12 = vrot.slane %v2327_v22, 4  ;;  %v3663_v4 = vadd.f32 %v3662_v42, %v3661_v48 }
 0x6a2   : > { %v3744_v17 = vsel %vm3417_vm10, %v3731_v57, 0.0 }
 0x6a3   : > { %v2288_v26 = vadd.f32 %v2287_v34, %v2286_v35  ;;  %v3616_v9 = vadd.f32 %v3615_v5, %v3614_v24  ;;  %v2329_v15 = vadd.f32 %v2328_v12, %v2327_v22  ;;  %v3745_v63 = vadd.f32 %v3744_v17, %v7835_v8  ;;  %v2923_v31 = vpop.permute.xlu1 %2922  ;;  %v4713_v35 = vld [vmem:[%s5642_s12] sm:$0xff]  ;;  %s5196_s12 = smov [#allocation30]  }
 0x6a4   : > { %v3687_v44 = vmul.f32 %v7781_v61, %v2923_v31  ;;  %v2377_v8 = vrot.slane %v2376_v37, 1  ;;  %s5056_s21 = sshll.u32 %s5196_s12, 4  ;;  %s5057_s21 = int_to_ptr.vmem [resolvable:$false] %s5056_s21 }
 0x6a5   : > { %v2387_v28 = vsel %vm2386_vm14, %v2385_v2, %v2288_v26  ;;  %v3617_v20 = vrot.slane %v3616_v9, 1  ;;  %v2330_v33 = vrot.slane %v2329_v15, 2  ;;  %v3747_v54 = vadd.f32 %v3746_v53, %v3745_v63  ;;  %s5058_s30 = scalar_lea.vmem %s5057_s21, 256  ;;  %p5059_p2 = scmp.lt.s32.totalorder %s7937_s18, %s5057_s21 }
 0x6a6   : > { %v3701_v27 = vsel %vm3417_vm10, %v3687_v44, 0.0  ;;  %v2378_v1 = vadd.f32 %v2377_v8, %v2376_v37  ;;  %p5060_p4 = scmp.lt.s32.totalorder %s5058_s30, %s5052_s0 }
 0x6a7   : > { %v3618_v18 = vadd.f32 %v3617_v20, %v3616_v9  ;;  %v2331_v46 = vadd.f32 %v2330_v33, %v2329_v15  ;;  %v3748_v36 = vrot.slane %v3747_v54, 4  ;;  %v3702_v29 = vadd.f32 %v3701_v27, %v7846_v58 }
 0x6a8   : > { %p5061_p6 = por %p5060_p4, %p5059_p2 }
 0x6a9   : > { %v3757_v10 = vsel %vm2384_vm13, %v7860_v25, %v3618_v18  ;;  %v2332_v62 = vrot.slane %v2331_v46, 1  ;;  %v3749_v49 = vadd.f32 %v3748_v36, %v3747_v54  ;;  %v3703_v61 = vrot.slane %v3702_v29, 4 }
 0x6aa   : > { %v3758_v13 = vsel %vm2386_vm14, %v3757_v10, %v3663_v4  ;;  %v4706_v14 = vpop.eup %4705  ;;  %p5062_p5 = pnand %p5061_p6, %p5055_p11 }
 0x6ab   : > { %v2333_v43 = vadd.f32 %v2332_v62, %v2331_v46  ;;  %v3750_v6 = vrot.slane %v3749_v49, 2  ;;  %v3704_v52 = vadd.f32 %v3703_v61, %v3702_v29  ;;  %v3788_v50 = vmul.f32 %v4706_v14, %v7902_v47 }
 0x6ad   : > { %v2389_v2 = vsel %vm2388_vm15, %v2387_v28, %v2333_v43  ;;  %v3751_v58 = vadd.f32 %v3750_v6, %v3749_v49  ;;  %v3705_v60 = vrot.slane %v3704_v52, 2 }
 0x6ae   : > { %v2391_v55 = vsel %vm2390_vm0, %v2389_v2, %v2378_v1 }
 0x6af   : > { %2392 = vst.msk [vmem:[#allocation9] sm:$0xff] %vm612_vm2, %v2391_v55  ;;  %v3706_v25 = vadd.f32 %v3705_v60, %v3704_v52  ;;  %v3752_v7 = vrot.slane %v3751_v58, 1 }
 0x6b1   : > { %v3707_v45 = vrot.slane %v3706_v25, 1  ;;  %v3753_v56 = vadd.f32 %v3752_v7, %v3751_v58 }
 0x6b3   : > { %v3708_v23 = vadd.f32 %v3707_v45, %v3706_v25 }
 0x6b5   : > { %v3759_v11 = vsel %vm2388_vm15, %v3758_v13, %v3708_v23 }
 0x6b6   : > { %v3760_v21 = vsel %vm2390_vm0, %v3759_v11, %v3753_v56 }
 0x6b7   : > { %3761 = vst.msk [vmem:[#allocation9] sm:$0xff] %vm3417_vm10, %v3760_v21 }
 0x6be   : > { %v3770_v3 = vld [vmem:[#allocation9] sm:$0xff] }
 0x6bf   : > { %v3780_v51 = vadd.f32 %v3779_v30, %v3770_v3 }
 0x6c1   : > { %v3789_v16 = vmul.f32 %v3788_v50, %v3780_v51 }
 0x6c3   : > { %4237 = vmatmul.mubr.msk.f32.vlgmr.msra.gmra.mrb[2].mxu1 %vm710_vm5, %v3789_v16 }
 0x796   : > { %v3867_v40 = vpop.f32.mrb[2].mxu1 }
 0x797   : > { %v3868_v24 = vadd.f32 %v4713_v35, %v3867_v40  ;;  %v4238_v22 = vpop.f32.mrb[3].mxu1 }
 0x799   : > { %3871 = vst.msk [vmem:[%s5672_s6] sm:$0xff] %vm612_vm2, %v3868_v24 }
 0x79a   : > { %5065 = shalt.err (!%p5062_p5)
}
 0x79b   : > { %s5066_s2 = scalar_lea.hbm %s7935_s25, 128  ;;  %s5070_s15 = scalar_lea.hbm %s8605_s4, 512 }
 0x79c   : > { %p5067_p9 = scmp.ne.s32.totalorder %s7935_s25, %s5066_s2  ;;  %p5071_p1 = scmp.lt.u32.totalorder %s7935_s25, %s8605_s4 }
 0x79d   : > { %p5072_p13 = scmp.lt.u32.totalorder %s5070_s15, %s5066_s2  ;;  %p5074_p0 = scmp.lt.u32.totalorder %s5066_s2, %s7935_s25 }
 0x79e   : > { %p5068_p3 = pnand %p5067_p9, %p8606_p7 }
 0x79f   : > { %p5073_p12 = por %p5072_p13, %p5071_p1 }
 0x7a0   : > { %p5069_p10 = pneg %p5068_p3 }
 0x7a1   : > { %p5075_p8 = por %p5074_p0, %p5073_p12 }
 0x7a3   : > { %p5076_p11 = pnand %p5075_p8, %p5069_p10 }
 0x7a5   : > { %5079 = shalt.err (!%p5076_p11)
}
 0x7a6   : > { %4327 = dma.vmem_to_hbm [thread:$0]  (%p8606_p7), %s7937_s18, 128, %s7935_s25, %s3873_s22  }
 0x7a7 PF: > { %s8607_s17 = sld [smem:[#allocation39_spill]]  ;;  %p4394_p2 = scmp.ge.s32.totalorder %s5174_s28, 2 }
 0x7a8   : > { %p8608_p4 = scmp.ne.s32.totalorder %s8157_s14, 0 }
 0x7aa   : > { %p4368_p6 = pnand %p4394_p2, %p8608_p4 }
 0x7ad   : > { %s3900_s29 = sand.u32 1, %s8607_s17  }
 0x7ae   : > { %s3901_s0 = scalar_lea.sflag [#allocation12], %s3900_s29 }
 0x7af   : > { %5141 = dma.done.wait (!%p4368_p6), %s3901_s0, 128  }
 0x7b0   : > { %5143 = vsyncadd (!%p4368_p6), %s3901_s0, 4294967168  ;;  %s34_s28 = sadd.s32 1, %s5174_s28   ;;  %s8609_s21 = sld [smem:[#allocation40_spill]] }
 0x7b1   : > { %p31_p5 = scmp.ge.s32.totalorder %s34_s28, 6   ;;  %s8610_s20 = smov %s8618_s24 }
 0x7b2   : > { %s8611_s22 = smov %s5154_s23  ;;  %s8612_s23 = smov %s5593_s3 }
 0x7b3   : > { %s8613_s24 = smov %s5166_s26  ;;  %s8614_s25 = smov %s5170_s27 }
 0x7b4   : > { %s8615_s26 = smov %s8610_s20  ;;  %s8616_s27 = smov %s8622_s13 }
 0x7b5   :  { %33 = sbr.rel (!%p31_p5) target bundleno = 22 (0x16), region = 161 }
 0x7bc   :  { %3906 = vsyncpa [#allocation11], 1 }
 0x7bd   :  { %3908 = vsyncpa [#allocation11 + $0x1], 1 }
 0x7be   :  { %3909 = vsyncpa [#allocation14], 1 }
 0x7bf   :  { %3910 = vsyncpa [#allocation17], 1 }
 0x7c0   :  { %3911 = vsyncpa [#allocation20], 1 }
 0x7c1   :  { %3912 = vsyncpa [#allocation23], 1 }
 0x7c2   :  { %3913 = vsyncpa [#allocation26], 1 }
 0x7c3   :  { %3914 = vsyncpa [#allocation29], 1 }
 0x7c4   :  { %3915 = vsyncpa [#allocation12], 1 }
 0x7c5   :  { %3917 = vsyncpa [#allocation12 + $0x1], 1 }

// kernel: tpu_custom_call.1
= control target key start
LH: loop header
LB: loop body
LE: loop exit
PB: predicated region body
PF: predicated region fallthrough
CT: control target
= control target key end

     0   :  { %s7991_s0 = inlined_call_operand.hbm [shape: f32[2,16,32], index: 0, kind: input, shape index: {}]   ;;  %s7992_s1 = inlined_call_operand.hbm [shape: f32[1,32], index: 1, kind: input, shape index: {}]   ;;  %s7993_s2 = inlined_call_operand.hbm [shape: f32[32,128], index: 2, kind: input, shape index: {}]   ;;  %s7994_s3 = inlined_call_operand.hbm [shape: f32[4,64], index: 3, kind: input, shape index: {}]   ;;  %s7995_s4 = inlined_call_operand.hbm [shape: f32[1,64], index: 4, kind: input, shape index: {}]   ;;  %s7996_s5 = inlined_call_operand.hbm [shape: f32[64,128], index: 5, kind: input, shape index: {}]   ;;  %s7997_s6 = inlined_call_operand.hbm [shape: f32[64,2], index: 6, kind: input, shape index: {}]   ;;  %s7998_s7 = inlined_call_operand.hbm [shape: f32[2,64], index: 7, kind: input, shape index: {}]   ;;  %s7999_s8 = inlined_call_operand.hbm [shape: f32[1,64], index: 8, kind: input, shape index: {}]   ;;  %s8000_s9 = inlined_call_operand.hbm [shape: f32[64,64], index: 9, kind: input, shape index: {}]   ;;  %s8001_s10 = inlined_call_operand.hbm [shape: f32[1,64], index: 10, kind: input, shape index: {}]   ;;  %s8002_s11 = inlined_call_operand.hbm [shape: f32[64,32], index: 11, kind: input, shape index: {}]   ;;  %s8003_s12 = inlined_call_operand.hbm [shape: f32[2,16,32], index: 12, kind: output, shape index: {}]  }
   0x1   :  { %8125 = sst [smem:[#allocation158_spill]] %s7991_s0 }
   0x2   :  { %8126 = sst [smem:[#allocation159_spill]] %s7992_s1 }
   0x3   :  { %8127 = sst [smem:[#allocation160_spill]] %s7993_s2 }
   0x4   :  { %8128 = sst [smem:[#allocation161_spill]] %s7994_s3 }
   0x5   :  { %8129 = sst [smem:[#allocation162_spill]] %s7995_s4 }
   0x6   :  { %8130 = sst [smem:[#allocation163_spill]] %s7996_s5 }
   0x7   :  { %8131 = sst [smem:[#allocation164_spill]] %s7997_s6 }
   0x8   :  { %8132 = sst [smem:[#allocation165_spill]] %s8003_s12 }
   0x9   :  { %17 = vsyncpa [#allocation11], 0 }
   0xa   :  { %19 = vsyncpa [#allocation11 + $0x1], 0 }
   0xb   :  { %20 = vsyncpa [#allocation14], 0 }
   0xc   :  { %21 = vsyncpa [#allocation17], 0 }
   0xd   :  { %22 = vsyncpa [#allocation20], 0 }
   0xe   :  { %23 = vsyncpa [#allocation23], 0 }
   0xf   :  { %24 = vsyncpa [#allocation26], 0 }
  0x10   :  { %25 = vsyncpa [#allocation29], 0 }
  0x11   :  { %26 = vsyncpa [#allocation12], 0 }
  0x12   :  { %28 = vsyncpa [#allocation12 + $0x1], 0  ;;  %s5262_s21 = smov 0   ;;  %s5264_s22 = smov 0  }
  0x13   :  { %s5266_s23 = smov 0   ;;  %s5268_s24 = smov 0  }
  0x14   :  { %s5270_s25 = smov 0   ;;  %s5272_s26 = smov 0  }
  0x15   :  { %s5274_s27 = smov 0   ;;  %s5276_s28 = smov 0  }
  0x16 LB: > { %8133 = sst [smem:[#allocation39_spill]] %s5146_s21  ;;  %s8004_s29 = sadd.s32 4294967295, %s5174_s28   ;;  %s5174_s28 = sphi %s5276_s28, %s34_s28   ;;  %s5170_s27 = sphi %s5274_s27, %s8616_s27   ;;  %s5166_s26 = sphi %s5272_s26, %s8615_s26   ;;  %s5162_s25 = sphi %s5270_s25, %s8614_s25   ;;  %s5158_s24 = sphi %s5268_s24, %s8613_s24   ;;  %s5154_s23 = sphi %s5266_s23, %s8612_s23   ;;  %s5150_s22 = sphi %s5264_s22, %s8611_s22   ;;  %s5146_s21 = sphi %s5262_s21, %s8609_s21  }
  0x17   : > { %8134 = sst [smem:[#allocation40_spill]] %s5150_s22  ;;  %p4080_p0 = scmp.ge.s32.totalorder %s5174_s28, 1 }
  0x18   : > { %8135 = sst [smem:[#allocation41_spill]] %s5158_s24  ;;  %p5306_p1 = scmp.eq.s32.totalorder %s8004_s29, 0 }
  0x19   : > { %8136 = sst [smem:[#allocation42_spill]] %s5162_s25  ;;  %p338_p2 = scmp.lt.s32.totalorder %s5174_s28, 5 }
  0x1a   : > { %s8137_s30 = scalar_select %p5306_p1, 1, 0 }
  0x1b   : > { %p5311_p3 = pnand %p4080_p0, %p338_p2  ;;  %s5176_s14 = smov [#allocation13]  }
  0x1c   : > { %8138 = sst [smem:[#allocation43_spill]] %s8137_s30  ;;  %s351_s15 = sshll.u32 %s5176_s14, 4  ;;  %s352_s15 = int_to_ptr.vmem [resolvable:$true] %s351_s15 }
  0x1d   : > { %s8139_s13 = scalar_select %p5311_p3, 1, 0 }
  0x1e   : > { %p4329_p4 = pneg %p5311_p3  ;;  %s5177_s16 = smov [#allocation16]  }
  0x1f   : > { %8140 = sst [smem:[#allocation44_spill]] %s8139_s13  ;;  %s375_s17 = sshll.u32 %s5177_s16, 4  ;;  %s5323_s17 = int_to_ptr.vmem [resolvable:$true] %s375_s17 }
  0x20   : > { %p5319_p5 = pnand %p4329_p4, %p5306_p1  ;;  %s5178_s19 = smov [#allocation19]  }
  0x21   : > { %s5325_s20 = sshll.u32 %s5178_s19, 4  ;;  %s8142_s1 = sld [smem:[#allocation159_spill]]  ;;  %s397_s20 = int_to_ptr.vmem [resolvable:$true] %s5325_s20 }
  0x22   : > { %p5335_p7 = pneg %p5319_p5 }
  0x27   : > { %s4714_s14 = scalar_lea.hbm %s8142_s1, 16 }
  0x28   : > { %p4715_p6 = scmp.ne.s32.totalorder %s8142_s1, %s4714_s14  ;;  %p4721_p10 = scmp.lt.u32.totalorder %s4714_s14, %s8142_s1 }
  0x2a   : > { %p4717_p8 = pnand %p5335_p7, %p4715_p6 }
  0x2c   : > { %p4718_p9 = pneg %p4717_p8 }
  0x2e   : > { %p4723_p11 = pnand %p4721_p10, %p4718_p9 }
  0x30   : > { %4726 = shalt.err (!%p4723_p11)
}
  0x31   : > { %s4727_s12 = scalar_lea.vmem %s352_s15, 16  ;;  %s4734_s24 = scalar_lea.vmem %s352_s15, 32 }
  0x32   : > { %p4728_p12 = scmp.ne.s32.totalorder %s352_s15, %s4727_s12  ;;  %p4735_p2 = scmp.lt.s32.totalorder %s352_s15, %s352_s15 }
  0x33   : > { %p4736_p4 = scmp.lt.s32.totalorder %s4734_s24, %s4727_s12 }
  0x34   : > { %p4730_p13 = pnand %p4728_p12, %p5335_p7 }
  0x35   : > { %p4737_p3 = por %p4736_p4, %p4735_p2 }
  0x36   : > { %p4731_p0 = pneg %p4730_p13 }
  0x38   : > { %p4738_p1 = pnand %p4737_p3, %p4731_p0 }
  0x3a   : > { %4741 = shalt.err (!%p4738_p1)
}
  0x3b   : > { %4332 = dma.hbm_to_vmem [thread:$0]  (!%p5319_p5), %s8142_s1, 16, %s352_s15, [#allocation14]  }
  0x3c   : > { %s8144_s3 = sld [smem:[#allocation161_spill]] }
  0x42   : > { %s4742_s19 = scalar_lea.hbm %s8144_s3, 64 }
  0x43   : > { %p4743_p6 = scmp.ne.s32.totalorder %s8144_s3, %s4742_s19  ;;  %p4749_p1 = scmp.lt.u32.totalorder %s4742_s19, %s8144_s3 }
  0x45   : > { %p4745_p8 = pnand %p4743_p6, %p5335_p7 }
  0x47   : > { %p4746_p9 = pneg %p4745_p8 }
  0x49   : > { %p4751_p3 = pnand %p4749_p1, %p4746_p9 }
  0x4b   : > { %4754 = shalt.err (!%p4751_p3)
}
  0x4c   : > { %s4755_s15 = scalar_lea.vmem %s5323_s17, 64  ;;  %p4763_p13 = scmp.lt.s32.totalorder %s5323_s17, %s5323_s17 }
  0x4d   : > { %p4756_p10 = scmp.ne.s32.totalorder %s5323_s17, %s4755_s15  ;;  %p4764_p0 = scmp.lt.s32.totalorder %s4755_s15, %s4755_s15 }
  0x4f   : > { %p4758_p11 = pnand %p4756_p10, %p5335_p7  ;;  %p4765_p2 = por %p4764_p0, %p4763_p13 }
  0x51   : > { %p4759_p12 = pneg %p4758_p11 }
  0x53   : > { %p4766_p4 = pnand %p4765_p2, %p4759_p12 }
  0x55   : > { %4769 = shalt.err (!%p4766_p4)
}
  0x56   : > { %4338 = dma.hbm_to_vmem [thread:$0]  (!%p5319_p5), %s8144_s3, 64, %s5323_s17, [#allocation17]  }
  0x57   : > { %s8145_s5 = sld [smem:[#allocation163_spill]] }
  0x5d   : > { %s4770_s13 = scalar_lea.hbm %s8145_s5, 1024 }
  0x5e   : > { %p4771_p6 = scmp.ne.s32.totalorder %s8145_s5, %s4770_s13  ;;  %p4777_p1 = scmp.lt.u32.totalorder %s4770_s13, %s8145_s5 }
  0x60   : > { %p4773_p8 = pnand %p4771_p6, %p5335_p7 }
  0x62   : > { %p4774_p9 = pneg %p4773_p8 }
  0x64   : > { %p4779_p3 = pnand %p4777_p1, %p4774_p9 }
  0x66   : > { %4782 = shalt.err (!%p4779_p3)
}
  0x67   : > { %s4783_s15 = scalar_lea.vmem %s397_s20, 1024  ;;  %p4791_p13 = scmp.lt.s32.totalorder %s397_s20, %s397_s20 }
  0x68   : > { %p4784_p10 = scmp.ne.s32.totalorder %s397_s20, %s4783_s15  ;;  %p4792_p0 = scmp.lt.s32.totalorder %s4783_s15, %s4783_s15 }
  0x6a   : > { %p4786_p11 = pnand %p4784_p10, %p5335_p7  ;;  %p4793_p2 = por %p4792_p0, %p4791_p13 }
  0x6c   : > { %p4787_p12 = pneg %p4786_p11 }
  0x6e   : > { %p4794_p4 = pnand %p4793_p2, %p4787_p12 }
  0x70   : > { %4797 = shalt.err (!%p4794_p4)
}
  0x71   : > { %s5179_s17 = smov 128   ;;  %s5180_s0 = smov 8  }
  0x72   : > { %4344 = dma.hbm_to_vmem [thread:$0]  (!%p5319_p5), %s8145_s5, 1024, %s397_s20, [#allocation20], %s5179_s17, %s5179_s17, %s5180_s0  }
  0x73   : > { %s5181_s29 = smov [#allocation22]   ;;  %s5182_s14 = smov [#allocation25]  }
  0x74   : > { %s423_s13 = sshll.u32 %s5181_s29, 4  ;;  %s444_s19 = sshll.u32 %s5182_s14, 4  ;;  %s424_s13 = int_to_ptr.vmem [resolvable:$true] %s423_s13  ;;  %s445_s19 = int_to_ptr.vmem [resolvable:$true] %s444_s19 }
  0x75   : > { %s4798_s15 = scalar_lea.hbm %s7998_s7, 32 }
  0x76   : > { %p4799_p6 = scmp.ne.s32.totalorder %s7998_s7, %s4798_s15  ;;  %p4805_p1 = scmp.lt.u32.totalorder %s4798_s15, %s7998_s7 }
  0x78   : > { %p4801_p8 = pnand %p4799_p6, %p5335_p7 }
  0x7a   : > { %p4802_p9 = pneg %p4801_p8 }
  0x7c   : > { %p4807_p3 = pnand %p4805_p1, %p4802_p9 }
  0x7e   : > { %4810 = shalt.err (!%p4807_p3)
}
  0x7f   : > { %s4811_s20 = scalar_lea.vmem %s424_s13, 32  ;;  %p4819_p13 = scmp.lt.s32.totalorder %s424_s13, %s424_s13 }
  0x80   : > { %p4812_p10 = scmp.ne.s32.totalorder %s424_s13, %s4811_s20  ;;  %p4820_p0 = scmp.lt.s32.totalorder %s4811_s20, %s4811_s20 }
  0x82   : > { %p4814_p11 = pnand %p4812_p10, %p5335_p7  ;;  %p4821_p2 = por %p4820_p0, %p4819_p13 }
  0x84   : > { %p4815_p12 = pneg %p4814_p11 }
  0x86   : > { %p4822_p4 = pnand %p4821_p2, %p4815_p12 }
  0x88   : > { %4825 = shalt.err (!%p4822_p4)
}
  0x89   : > { %4350 = dma.hbm_to_vmem [thread:$0]  (!%p5319_p5), %s7998_s7, 32, %s424_s13, [#allocation23]  }
  0x8a   : > { %s4826_s30 = scalar_lea.hbm %s8000_s9, 1024 }
  0x8b   : > { %p4827_p6 = scmp.ne.s32.totalorder %s8000_s9, %s4826_s30  ;;  %p4833_p1 = scmp.lt.u32.totalorder %s4826_s30, %s8000_s9 }
  0x8d   : > { %p4829_p8 = pnand %p4827_p6, %p5335_p7 }
  0x8f   : > { %p4830_p9 = pneg %p4829_p8 }
  0x91   : > { %p4835_p3 = pnand %p4833_p1, %p4830_p9 }
  0x93   : > { %4838 = shalt.err (!%p4835_p3)
}
  0x94   : > { %s4839_s24 = scalar_lea.vmem %s445_s19, 1024  ;;  %p4847_p13 = scmp.lt.s32.totalorder %s445_s19, %s445_s19 }
  0x95   : > { %p4840_p10 = scmp.ne.s32.totalorder %s445_s19, %s4839_s24  ;;  %p4848_p0 = scmp.lt.s32.totalorder %s4839_s24, %s4839_s24 }
  0x97   : > { %p4842_p11 = pnand %p4840_p10, %p5335_p7  ;;  %p4849_p2 = por %p4848_p0, %p4847_p13 }
  0x99   : > { %p4843_p12 = pneg %p4842_p11 }
  0x9b   : > { %p4850_p4 = pnand %p4849_p2, %p4843_p12 }
  0x9d   : > { %4853 = shalt.err (!%p4850_p4)
}
  0x9e   : > { %4356 = dma.hbm_to_vmem [thread:$0]  (!%p5319_p5), %s8000_s9, 1024, %s445_s19, [#allocation26], %s5179_s17, %s5179_s17, %s5180_s0  }
  0x9f   : > { %s5183_s20 = smov [#allocation15]   ;;  %s5184_s3 = smov [#allocation18]  }
  0xa0   : > { %s361_s1 = sshll.u32 %s5183_s20, 4  ;;  %s386_s21 = sshll.u32 %s5184_s3, 4  ;;  %s362_s1 = int_to_ptr.vmem [resolvable:$true] %s361_s1  ;;  %s387_s21 = int_to_ptr.vmem [resolvable:$true] %s386_s21 }
  0xa1   : > { %s8146_s2 = sld [smem:[#allocation160_spill]] }
  0xa7   : > { %s4854_s25 = scalar_lea.hbm %s8146_s2, 512 }
  0xa8   : > { %p4855_p6 = scmp.ne.s32.totalorder %s8146_s2, %s4854_s25  ;;  %p4861_p1 = scmp.lt.u32.totalorder %s4854_s25, %s8146_s2 }
  0xaa   : > { %p4857_p8 = pnand %p4855_p6, %p5335_p7 }
  0xac   : > { %p4858_p9 = pneg %p4857_p8 }
  0xae   : > { %p4863_p3 = pnand %p4861_p1, %p4858_p9 }
  0xb0   : > { %4866 = shalt.err (!%p4863_p3)
}
  0xb1   : > { %s4867_s19 = scalar_lea.vmem %s362_s1, 512  ;;  %p4875_p13 = scmp.lt.s32.totalorder %s362_s1, %s362_s1 }
  0xb2   : > { %p4868_p10 = scmp.ne.s32.totalorder %s362_s1, %s4867_s19  ;;  %p4876_p0 = scmp.lt.s32.totalorder %s4867_s19, %s4867_s19 }
  0xb4   : > { %p4870_p11 = pnand %p4868_p10, %p5335_p7  ;;  %p4877_p2 = por %p4876_p0, %p4875_p13 }
  0xb6   : > { %p4871_p12 = pneg %p4870_p11 }
  0xb8   : > { %p4878_p4 = pnand %p4877_p2, %p4871_p12 }
  0xba   : > { %4881 = shalt.err (!%p4878_p4)
}
  0xbb   : > { %4335 = dma.hbm_to_vmem [thread:$0]  (!%p5319_p5), %s8146_s2, 512, %s362_s1, [#allocation14], %s5179_s17, %s5179_s17, %s5180_s0  }
  0xbc   : > { %s8147_s4 = sld [smem:[#allocation162_spill]] }
  0xc2   : > { %s4882_s22 = scalar_lea.hbm %s8147_s4, 16 }
  0xc3   : > { %p4883_p6 = scmp.ne.s32.totalorder %s8147_s4, %s4882_s22  ;;  %p4889_p1 = scmp.lt.u32.totalorder %s4882_s22, %s8147_s4 }
  0xc5   : > { %p4885_p8 = pnand %p4883_p6, %p5335_p7 }
  0xc7   : > { %p4886_p9 = pneg %p4885_p8 }
  0xc9   : > { %p4891_p3 = pnand %p4889_p1, %p4886_p9 }
  0xcb   : > { %4894 = shalt.err (!%p4891_p3)
}
  0xcc   : > { %s4895_s12 = scalar_lea.vmem %s387_s21, 16  ;;  %s4902_s1 = scalar_lea.vmem %s387_s21, 32 }
  0xcd   : > { %p4896_p10 = scmp.ne.s32.totalorder %s387_s21, %s4895_s12  ;;  %p4903_p13 = scmp.lt.s32.totalorder %s387_s21, %s387_s21 }
  0xce   : > { %p4904_p0 = scmp.lt.s32.totalorder %s4902_s1, %s4895_s12 }
  0xcf   : > { %p4898_p11 = pnand %p4896_p10, %p5335_p7 }
  0xd0   : > { %p4905_p2 = por %p4904_p0, %p4903_p13 }
  0xd1   : > { %p4899_p12 = pneg %p4898_p11 }
  0xd3   : > { %p4906_p4 = pnand %p4905_p2, %p4899_p12 }
  0xd5   : > { %4909 = shalt.err (!%p4906_p4)
}
  0xd6   : > { %4341 = dma.hbm_to_vmem [thread:$0]  (!%p5319_p5), %s8147_s4, 16, %s387_s21, [#allocation17]  }
  0xd7   : > { %s5185_s13 = smov [#allocation21]   ;;  %s5186_s20 = smov [#allocation24]  }
  0xd8   : > { %s409_s15 = sshll.u32 %s5185_s13, 4  ;;  %s434_s3 = sshll.u32 %s5186_s20, 4  ;;  %s410_s15 = int_to_ptr.vmem [resolvable:$true] %s409_s15  ;;  %s435_s3 = int_to_ptr.vmem [resolvable:$true] %s434_s3 }
  0xd9   : > { %s8148_s6 = sld [smem:[#allocation164_spill]] }
  0xdf   : > { %s4910_s25 = scalar_lea.hbm %s8148_s6, 1024 }
  0xe0   : > { %p4911_p6 = scmp.ne.s32.totalorder %s8148_s6, %s4910_s25  ;;  %p4917_p1 = scmp.lt.u32.totalorder %s4910_s25, %s8148_s6 }
  0xe2   : > { %p4913_p8 = pnand %p4911_p6, %p5335_p7 }
  0xe4   : > { %p4914_p9 = pneg %p4913_p8 }
  0xe6   : > { %p4919_p3 = pnand %p4917_p1, %p4914_p9 }
  0xe8   : > { %4922 = shalt.err (!%p4919_p3)
}
  0xe9   : > { %s4923_s21 = scalar_lea.vmem %s410_s15, 1024  ;;  %p4931_p13 = scmp.lt.s32.totalorder %s410_s15, %s410_s15 }
  0xea   : > { %p4924_p10 = scmp.ne.s32.totalorder %s410_s15, %s4923_s21  ;;  %p4932_p0 = scmp.lt.s32.totalorder %s4923_s21, %s4923_s21 }
  0xec   : > { %p4926_p11 = pnand %p4924_p10, %p5335_p7  ;;  %p4933_p2 = por %p4932_p0, %p4931_p13 }
  0xee   : > { %p4927_p12 = pneg %p4926_p11 }
  0xf0   : > { %p4934_p4 = pnand %p4933_p2, %p4927_p12 }
  0xf2   : > { %4937 = shalt.err (!%p4934_p4)
}
  0xf3   : > { %4347 = dma.hbm_to_vmem [thread:$0]  (!%p5319_p5), %s8148_s6, 1024, %s410_s15, [#allocation20], %s5179_s17, %s5179_s17, %s5180_s0  }
  0xf4   : > { %s4938_s22 = scalar_lea.hbm %s7999_s8, 16 }
  0xf5   : > { %p4939_p6 = scmp.ne.s32.totalorder %s7999_s8, %s4938_s22  ;;  %p4945_p1 = scmp.lt.u32.totalorder %s4938_s22, %s7999_s8 }
  0xf7   : > { %p4941_p8 = pnand %p4939_p6, %p5335_p7 }
  0xf9   : > { %p4942_p9 = pneg %p4941_p8 }
  0xfb   : > { %p4947_p3 = pnand %p4945_p1, %p4942_p9 }
  0xfd   : > { %4950 = shalt.err (!%p4947_p3)
}
  0xfe   : > { %s4951_s12 = scalar_lea.vmem %s435_s3, 16  ;;  %s4958_s15 = scalar_lea.vmem %s435_s3, 32 }
  0xff   : > { %p4952_p10 = scmp.ne.s32.totalorder %s435_s3, %s4951_s12  ;;  %p4959_p13 = scmp.lt.s32.totalorder %s435_s3, %s435_s3 }
 0x100   : > { %p4960_p0 = scmp.lt.s32.totalorder %s4958_s15, %s4951_s12 }
 0x101   : > { %p4954_p11 = pnand %p4952_p10, %p5335_p7 }
 0x102   : > { %p4961_p2 = por %p4960_p0, %p4959_p13 }
 0x103   : > { %p4955_p12 = pneg %p4954_p11 }
 0x105   : > { %p4962_p4 = pnand %p4961_p2, %p4955_p12 }
 0x107   : > { %4965 = shalt.err (!%p4962_p4)
}
 0x108   : > { %4353 = dma.hbm_to_vmem [thread:$0]  (!%p5319_p5), %s7999_s8, 16, %s435_s3, [#allocation23]  }
 0x109   : > { %s5187_s24 = smov [#allocation27]   ;;  %s5188_s13 = smov [#allocation28]  }
 0x10a   : > { %s458_s19 = sshll.u32 %s5187_s24, 4  ;;  %s468_s20 = sshll.u32 %s5188_s13, 4  ;;  %s459_s19 = int_to_ptr.vmem [resolvable:$true] %s458_s19  ;;  %s469_s20 = int_to_ptr.vmem [resolvable:$true] %s468_s20 }
 0x10b   : > { %s4966_s25 = scalar_lea.hbm %s8001_s10, 16 }
 0x10c   : > { %p4967_p6 = scmp.ne.s32.totalorder %s8001_s10, %s4966_s25  ;;  %p4973_p1 = scmp.lt.u32.totalorder %s4966_s25, %s8001_s10 }
 0x10e   : > { %p4969_p8 = pnand %p4967_p6, %p5335_p7 }
 0x110   : > { %p4970_p9 = pneg %p4969_p8 }
 0x112   : > { %p4975_p3 = pnand %p4973_p1, %p4970_p9 }
 0x114   : > { %4978 = shalt.err (!%p4975_p3)
}
 0x115   : > { %s4979_s3 = scalar_lea.vmem %s459_s19, 16  ;;  %s4986_s1 = scalar_lea.vmem %s459_s19, 32 }
 0x116   : > { %p4980_p10 = scmp.ne.s32.totalorder %s459_s19, %s4979_s3  ;;  %p4987_p13 = scmp.lt.s32.totalorder %s459_s19, %s459_s19 }
 0x117   : > { %p4988_p0 = scmp.lt.s32.totalorder %s4986_s1, %s4979_s3 }
 0x118   : > { %p4982_p11 = pnand %p4980_p10, %p5335_p7 }
 0x119   : > { %p4989_p2 = por %p4988_p0, %p4987_p13 }
 0x11a   : > { %p4983_p12 = pneg %p4982_p11 }
 0x11c   : > { %p4990_p4 = pnand %p4989_p2, %p4983_p12 }
 0x11e   : > { %4993 = shalt.err (!%p4990_p4)
}
 0x11f   : > { %4359 = dma.hbm_to_vmem [thread:$0]  (!%p5319_p5), %s8001_s10, 16, %s459_s19, [#allocation26]  }
 0x120   : > { %s4994_s30 = scalar_lea.hbm %s8002_s11, 1024 }
 0x121   : > { %p4995_p6 = scmp.ne.s32.totalorder %s8002_s11, %s4994_s30  ;;  %p5001_p1 = scmp.lt.u32.totalorder %s4994_s30, %s8002_s11 }
 0x123   : > { %p4997_p8 = pnand %p4995_p6, %p5335_p7 }
 0x125   : > { %p4998_p9 = pneg %p4997_p8 }
 0x127   : > { %p5003_p3 = pnand %p5001_p1, %p4998_p9 }
 0x129   : > { %5006 = shalt.err (!%p5003_p3)
}
 0x12a   : > { %s5007_s15 = scalar_lea.vmem %s469_s20, 1024  ;;  %p5015_p13 = scmp.lt.s32.totalorder %s469_s20, %s469_s20 }
 0x12b   : > { %p5008_p10 = scmp.ne.s32.totalorder %s469_s20, %s5007_s15  ;;  %p5016_p0 = scmp.lt.s32.totalorder %s5007_s15, %s5007_s15 }
 0x12d   : > { %p5010_p11 = pnand %p5008_p10, %p5335_p7  ;;  %p5017_p2 = por %p5016_p0, %p5015_p13 }
 0x12f   : > { %p5011_p12 = pneg %p5010_p11 }
 0x131   : > { %p5018_p4 = pnand %p5017_p2, %p5011_p12 }
 0x133   : > { %5021 = shalt.err (!%p5018_p4)
}
 0x134   : > { %s8149_s16 = sld [smem:[#allocation40_spill]]  ;;  %s8150_s1 = sld [smem:[#allocation39_spill]] }
 0x135   : > { %4362 = dma.hbm_to_vmem [thread:$0]  (!%p5319_p5), %s8002_s11, 1024, %s469_s20, [#allocation29], %s5179_s17, %s5179_s17, %s5180_s0  }
 0x136   : > { %s4079_s18 = sadd.s32 4294967294, %s5174_s28   ;;  %s8151_s21 = sld [smem:[#allocation43_spill]] }
 0x137   : > { %s43_s24 = sadd.s32 1, %s5166_s26  ;;  %s46_s13 = sadd.s32 1, %s5170_s27 }
 0x138   : > { %p44_p7 = scmp.ge.s32.totalorder %s43_s24, 2  ;;  %s55_s22 = sadd.s32 1, %s5154_s23 }
 0x139   : > { %p63_p8 = scmp.eq.s32.totalorder %s5174_s28, 0  ;;  %s8153_s17 = sadd.s32 4294967295, %s5174_s28  }
 0x13a   : > { %p62_p6 = scmp.ne.s32.totalorder %s5154_s23, %s8149_s16  ;;  %s8618_s24 = smov (%p44_p7, %s43_s24), 0 }
 0x13b   : > { %s8620_s13 = smov (!%p44_p7, %s46_s13), %s5170_s27  ;;  %s51_s30 = ssub.s32 %s5166_s26, %s8618_s24 }
 0x13c   : > { %p5564_p9 = por %p63_p8, %p62_p6  ;;  %p48_p5 = scmp.ge.s32.totalorder %s8620_s13, 2 }
 0x13d   : > { %p68_p1 = scmp.ne.s32.totalorder %s8149_s16, %s8150_s1  ;;  %p325_p3 = scmp.eq.s32.totalorder %s8153_s17, 3 }
 0x13e   : > { %p331_p10 = scmp.eq.s32.totalorder %s4079_s18, 3  ;;  %s8622_s13 = smov (%p48_p5, %s8620_s13), 0 }
 0x13f   : > { %p8154_p11 = scmp.ne.s32.totalorder %s8151_s21, 0  ;;  %p5580_p13 = por %p325_p3, %p62_p6 }
 0x140   : > { %s50_s29 = ssub.s32 %s5170_s27, %s8622_s13  ;;  %p5586_p0 = por %p331_p10, %p68_p1 }
 0x141   : > { %p5576_p12 = por %p8154_p11, %p68_p1  ;;  %s52_s12 = sor.u32 %s51_s30, %s50_s29 }
 0x142   : > { %s8156_s20 = scalar_select %p5580_p13, 1, 0 }
 0x143   : > { %s8157_s14 = scalar_select %p5586_p0, 1, 0 }
 0x144   : > { %p4382_p2 = scmp.lt.s32.totalorder %s5174_s28, 4  ;;  %p53_p4 = scmp.eq.s32.totalorder %s52_s12, 0 }
 0x145   : > { %s482_s15 = sand.u32 1, %s5154_s23   ;;  %s4094_s16 = sshll.u32 %s5170_s27, 1 }
 0x146   : > { %s4093_s19 = sshll.u32 %s482_s15, 3  ;;  %s491_s1 = sadd.s32 %s5166_s26, %s4094_s16 }
 0x147   : > { %s5593_s3 = scalar_select %p53_p4, %s5154_s23, %s55_s22  }
 0x148   : > { %s486_s18 = scalar_lea.vmem [#allocation10], %s4093_s19  ;;  %s4095_s17 = sshll.u32 %s491_s1, 7 }
 0x149   : > { %s495_s21 = sshll.u32 %s486_s18, 4  ;;  %s8158_s5 = sld [smem:[#allocation158_spill]]  ;;  %s5597_s21 = int_to_ptr.vmem [resolvable:$true] %s495_s21 }
 0x14a   : > { %p5606_p7 = pnand %p4382_p2, %p5564_p9  ;;  %s483_s30 = scalar_lea.sflag [#allocation11], %s482_s15 }
 0x14c   : > { %p5024_p8 = pneg %p5606_p7 }
 0x14f   : > { %s5602_s6 = scalar_lea.hbm %s8158_s5, %s4095_s17  ;;  %s5027_s25 = scalar_lea.hbm %s8158_s5, 512 }
 0x150   : > { %s5022_s29 = scalar_lea.hbm %s5602_s6, 128  ;;  %p5028_p9 = scmp.lt.u32.totalorder %s5602_s6, %s8158_s5 }
 0x151   : > { %p5023_p6 = scmp.ne.s32.totalorder %s5602_s6, %s5022_s29  ;;  %p5029_p3 = scmp.lt.u32.totalorder %s5027_s25, %s5022_s29 }
 0x152   : > { %p5031_p11 = scmp.lt.u32.totalorder %s5022_s29, %s5602_s6 }
 0x153   : > { %p5025_p5 = pnand %p5024_p8, %p5023_p6  ;;  %p5030_p10 = por %p5029_p3, %p5028_p9 }
 0x155   : > { %p5026_p1 = pneg %p5025_p5  ;;  %p5032_p2 = por %p5031_p11, %p5030_p10 }
 0x157   : > { %p5033_p4 = pnand %p5032_p2, %p5026_p1 }
 0x159   : > { %5036 = shalt.err (!%p5033_p4)
}
 0x15a   : > { %s5037_s15 = scalar_lea.vmem %s5597_s21, 128  ;;  %s5189_s16 = smov [#allocation10]  }
 0x15b   : > { %p5038_p6 = scmp.ne.s32.totalorder %s5597_s21, %s5037_s15  ;;  %s5042_s1 = sshll.u32 %s5189_s16, 4  ;;  %s5043_s1 = int_to_ptr.vmem [resolvable:$false] %s5042_s1 }
 0x15c   : > { %s5044_s18 = scalar_lea.vmem %s5043_s1, 256  ;;  %p5045_p13 = scmp.lt.s32.totalorder %s5597_s21, %s5043_s1 }
 0x15d   : > { %p5040_p5 = pnand %p5038_p6, %p5024_p8  ;;  %p5046_p9 = scmp.lt.s32.totalorder %s5044_s18, %s5037_s15 }
 0x15f   : > { %p5041_p0 = pneg %p5040_p5  ;;  %p5047_p3 = por %p5046_p9, %p5045_p13 }
 0x161   : > { %p5048_p10 = pnand %p5047_p3, %p5041_p0 }
 0x163   : > { %5051 = shalt.err (!%p5048_p10)
}
 0x164   : > { %4366 = dma.hbm_to_vmem [thread:$0]  (!%p5606_p7), %s5602_s6, 128, %s5597_s21, %s483_s30  }
 0x165   : > { %s8160_s17 = sld [smem:[#allocation44_spill]] }
 0x16b   : > { %p8161_p1 = scmp.ne.s32.totalorder %s8160_s17, 0 }
 0x16d   : > { %504 = sbr.rel (%p8161_p1) target bundleno = 1959 (0x7a7), region = 68 }
 0x174   : > { %s8162_s29 = sld [smem:[#allocation40_spill]] }
 0x17a   : > { %s5638_s2 = sand.u32 1, %s8162_s29  }
 0x17b   : > { %s4097_s4 = sshll.u32 %s5638_s2, 3  ;;  %s507_s25 = scalar_lea.sflag [#allocation11], %s5638_s2 }
 0x17c   : > { %s5642_s12 = scalar_lea.vmem [#allocation10], %s4097_s4 }
 0x17d   : > { %5113 = dma.done.wait (%p5576_p12), %s507_s25, 128  }
 0x17e   : > { %5115 = vsyncadd (%p5576_p12), %s507_s25, 4294967168  ;;  %s8163_s22 = sld [smem:[#allocation43_spill]] }
 0x184   : > { %p8164_p13 = scmp.ne.s32.totalorder %s8163_s22, 0 }
 0x186   : > { %5117 = dma.done.wait (%p8164_p13), [#allocation14], 528  }
 0x187   : > { %5119 = vsyncadd (%p8164_p13), [#allocation14], 4294966768 }
 0x188   : > { %5121 = dma.done.wait (%p8164_p13), [#allocation17], 80  }
 0x189   : > { %5123 = vsyncadd (%p8164_p13), [#allocation17], 4294967216 }
 0x18a   : > { %5125 = dma.done.wait (%p8164_p13), [#allocation20], 2048  }
 0x18b   : > { %5127 = vsyncadd (%p8164_p13), [#allocation20], 4294965248 }
 0x18c   : > { %5129 = dma.done.wait (%p8164_p13), [#allocation23], 48  }
 0x18d   : > { %5131 = vsyncadd (%p8164_p13), [#allocation23], 4294967248 }
 0x18e   : > { %5133 = dma.done.wait (%p8164_p13), [#allocation26], 1040  }
 0x18f   : > { %5135 = vsyncadd (%p8164_p13), [#allocation26], 4294966256 }
 0x190   : > { %5137 = dma.done.wait (%p8164_p13), [#allocation29], 1024  }
 0x191   : > { %5139 = vsyncadd (%p8164_p13), [#allocation29], 4294966272  ;;  %s5672_s6 = scalar_lea.vmem [#allocation30], %s4097_s4  ;;  %s8165_s0 = sld [smem:[#allocation41_spill]] }
 0x197   : > { %p4110_p12 = scmp.ne.s32.totalorder %s8165_s0, 0 }
 0x198   : > { %vm599_vm0 = vcmask (!%p4110_p12), 523264   ;;  %vm608_vm1 = vcmask (!%p4110_p12), 518144   ;;  %v5190_v0 = vmov (!%p4110_p12), 0.0  }
 0x199   : > { %598 = sbr.rel (%p4110_p12) target bundleno = 416 (0x1a0), region = 120  ;;  %600 = vst.msk [vmem:[#allocation2] sm:$0xff] (!%p4110_p12), %vm599_vm0, %v5190_v0  ;;  %601 = vst.msk [vmem:[#allocation2 + $0x8] sm:$0xff] (!%p4110_p12), %vm599_vm0, %v5190_v0 }
 0x19a   : > { %602 = vst.msk [vmem:[#allocation2 + $0x10] sm:$0xff] (!%p4110_p12), %vm599_vm0, %v5190_v0  ;;  %603 = vst.msk [vmem:[#allocation2 + $0x18] sm:$0xff] (!%p4110_p12), %vm599_vm0, %v5190_v0 }
 0x19b   : > { %604 = vst.msk [vmem:[#allocation2 + $0x20] sm:$0xff] (!%p4110_p12), %vm599_vm0, %v5190_v0  ;;  %605 = vst.msk [vmem:[#allocation2 + $0x28] sm:$0xff] (!%p4110_p12), %vm599_vm0, %v5190_v0 }
 0x19c   : > { %606 = vst.msk [vmem:[#allocation2 + $0x30] sm:$0xff] (!%p4110_p12), %vm599_vm0, %v5190_v0  ;;  %607 = vst.msk [vmem:[#allocation2 + $0x38] sm:$0xff] (!%p4110_p12), %vm599_vm0, %v5190_v0 }
 0x19d   : > { %609 = vst.msk [vmem:[#allocation3] sm:$0x7] (!%p4110_p12), %vm608_vm1, %v5190_v0 }
 0x1a0 PF: > { %v610_v1 = vld [vmem:[%s5642_s12] sm:$0xff]  ;;  %vm612_vm2 = vcmask 261120   ;;  %v629_v4 = vld [vmem:[#allocation15] sm:$0xff]  ;;  %v8015_v7 = vmov 0.0|0.0   ;;  %vm5192_vm3 = vmmov 0   ;;  %v5193_v10 = vmov 0.0  }
 0x1a1   : > { %v611_v2 = vmul.f32 %v610_v1, %v610_v1  ;;  %v630_v5 = vld [vmem:[#allocation15 + $0x8] sm:$0xff]  ;;  %v631_v6 = vld [vmem:[#allocation15 + $0x10] sm:$0xff]  ;;  %4239 = vmatprep.subr.bf16.mxu0 %v8015_v7  ;;  %v632_v9 = vld [vmem:[#allocation15 + $0x18] sm:$0xff]  ;;  %4174 = vmatprep.mubr.msk.f32.mxu0 %vm5192_vm3, %v5193_v10  ;;  %vm713_vm4 = vcmask 518144   ;;  %vm710_vm5 = vcmask 523264   ;;  %s5194_s21 = smov 64  }
 0x1a2   : > { %v4240_v8 = vpack.c.bf16 %v630_v5, %v629_v4  ;;  %4245 = vmatprep.subr.bf16.mxu1 %v8015_v7  ;;  %4193 = vmatprep.mubr.msk.f32.mxu1 %vm5192_vm3, %v5193_v10  ;;  %v4243_v11 = vpack.c.bf16 %v632_v9, %v631_v6  ;;  %v4111_v16 = vld [vmem:[#allocation13] ss:$0 sm:$0xff]  ;;  %v767_v20 = vld [vmem:[#allocation19] sm:$0xff]  ;;  %v768_v21 = vld [vmem:[#allocation19 + $0x8] sm:$0xff]  ;;  %vm939_vm6 = vcmask 1041408   ;;  %v1046_v9 = vlaneseq  ;;  %s8603_s30 = sld [smem:[#allocation42_spill]] }
 0x1a3   : > { %v613_v3 = vsel %vm612_vm2, %v611_v2, 0.0  ;;  %v849_v22 = vld [vmem:[#allocation21] sm:$0xff]  ;;  %v4246_v23 = vpack.c.bf16 %v768_v21, %v767_v20  ;;  %v850_v24 = vld [vmem:[#allocation21 + $0x8] sm:$0xff]  ;;  %v769_v26 = vld [vmem:[#allocation19 + $0x10] sm:$0xff]  ;;  %vm935_vm7 = vcmask 15360   ;;  %vm3417_vm10 = vcmask 523520  }
 0x1a4   : > { %614 = vadd.xlane.f32.xlu0 %v613_v3  ;;  %4241 = vmatpush3.bf16.msra.mxu0 %v4240_v8  ;;  %v712_v19 = vld [vmem:[#allocation3] sm:$0x7]  ;;  %v4258_v25 = vpack.c.bf16 %v850_v24, %v849_v22  ;;  %v770_v27 = vld [vmem:[#allocation19 + $0x18] sm:$0xff]  ;;  %v771_v32 = vld [vmem:[#allocation19 + $0x20] sm:$0xff]  ;;  %vm2379_vm11 = vcmask 1040384   ;;  %vm2382_vm12 = vcmask 1042432  }
 0x1a5   : > { %4242 = vmatprep.subr.bf16.mxu0 %v8015_v7  ;;  %714 = vst.msk [vmem:[#allocation4] sm:$0x7] %vm713_vm4, %v712_v19  ;;  %4247 = vmatpush3.bf16.msra.mxu1 %v4246_v23  ;;  %v851_v28 = vld [vmem:[#allocation21 + $0x10] sm:$0xff]  ;;  %v4249_v29 = vpack.c.bf16 %v770_v27, %v769_v26  ;;  %v852_v30 = vld [vmem:[#allocation21 + $0x18] sm:$0xff]  ;;  %v772_v33 = vld [vmem:[#allocation19 + $0x28] sm:$0xff]  ;;  %vm2384_vm13 = vcmask 1043456  }
 0x1a6   : > { %4248 = vmatprep.subr.bf16.mxu1 %v8015_v7  ;;  %v4261_v31 = vpack.c.bf16 %v852_v30, %v851_v28  ;;  %v853_v34 = vld [vmem:[#allocation21 + $0x20] sm:$0xff]  ;;  %v4252_v35 = vpack.c.bf16 %v772_v33, %v771_v32  ;;  %v854_v36 = vld [vmem:[#allocation21 + $0x28] sm:$0xff]  ;;  %v773_v37 = vld [vmem:[#allocation19 + $0x30] sm:$0xff]  ;;  %vm2386_vm14 = vcmask 1044480   ;;  %vm2388_vm15 = vcmask 1045504   ;;  %s8604_s19 = sld [smem:[#allocation41_spill]] }
 0x1a7   : > { %v774_v38 = vld [vmem:[#allocation19 + $0x38] sm:$0xff]  ;;  %v4264_v39 = vpack.c.bf16 %v854_v36, %v853_v34  ;;  %v855_v40 = vld [vmem:[#allocation21 + $0x30] sm:$0xff]  ;;  %v927_v8 = vld [vmem:[#allocation22] sm:$0x3]  ;;  %vm2390_vm0 = vcmask 1046528   ;;  %s3888_s18 = sshll.u32 %s5672_s6, 4  ;;  %s7937_s18 = int_to_ptr.vmem [resolvable:$true] %s3888_s18 }
 0x1a8   : > { %4244 = vmatpush3.bf16.msra.mxu0 %v4243_v11  ;;  %v856_v41 = vld [vmem:[#allocation21 + $0x38] sm:$0xff]  ;;  %v4255_v42 = vpack.c.bf16 %v774_v38, %v773_v37  ;;  %v5712_v11 = vshrl.u32 %v1046_v9, 7  ;;  %s4128_s15 = sshll.u32 %s8603_s30, 1  ;;  %s8605_s4 = sld [smem:[#allocation165_spill]] }
 0x1a9   : > { %4257 = vmatprep.subr.bf16.mxu0 %v8015_v7  ;;  %4250 = vmatpush3.bf16.msra.mxu1 %v4249_v29  ;;  %v4267_v43 = vpack.c.bf16 %v856_v41, %v855_v40  ;;  %v4113_v46 = vld [vmem:[#allocation16] ss:$0 sm:$0xff]  ;;  %v4114_v47 = vld [vmem:[#allocation16 + $0x1] ss:$0 sm:$0xff]  ;;  %v4115_v48 = vld [vmem:[#allocation16 + $0x2] ss:$0 sm:$0xff] }
 0x1aa   : > { %4251 = vmatprep.subr.bf16.mxu1 %v8015_v7  ;;  %v4116_v56 = vld [vmem:[#allocation16 + $0x3] ss:$0 sm:$0xff]  ;;  %v4117_v61 = vld [vmem:[#allocation18] ss:$0 sm:$0xff]  ;;  %v1118_v19 = vsub.s32 2, %v5712_v11  ;;  %v1153_v21 = vsub.s32 3, %v5712_v11 }
 0x1ab   : > { %v1188_v23 = vsub.s32 4, %v5712_v11  ;;  %v1258_v27 = vsub.s32 6, %v5712_v11  ;;  %v1293_v29 = vsub.s32 7, %v5712_v11  ;;  %s3873_s22 = scalar_lea.sflag [#allocation12], %s5638_s2  ;;  %s5052_s0 = scalar_lea.vmem %s7937_s18, 128 }
 0x1ac   : > { %s3884_s16 = sadd.s32 %s8604_s19, %s4128_s15  ;;  %p5053_p0 = scmp.ne.s32.totalorder %s7937_s18, %s5052_s0 }
 0x1ad   : > { %4253 = vmatpush3.bf16.msra.mxu1 %v4252_v35  ;;  %s4129_s1 = sshll.u32 %s3884_s16, 7  ;;  %p8606_p7 = scmp.ne.s32.totalorder %s8156_s20, 0 }
 0x1ae   : > { %4254 = vmatprep.subr.bf16.mxu1 %v8015_v7  ;;  %s7935_s25 = scalar_lea.hbm %s8605_s4, %s4129_s1 }
 0x1af   : > { %p5054_p8 = pnand %p5053_p0, %p8606_p7 }
 0x1b1   : > { %4256 = vmatpush3.bf16.msra.mxu1 %v4255_v42  ;;  %p5055_p11 = pneg %p5054_p8 }
 0x1b2   : > { %4269 = vmatprep.subr.bf16.mxu1 %v8015_v7 }
 0x231   : > { %v615_v12 = vpop.xlane.xlu0 %614 }
 0x232   : > { %v617_v13 = vmul.f32 0.03125, %v615_v12  ;;  %v5715_v12 = vsub.s32 0, %v5712_v11 }
 0x234   : > { %v618_v14 = vadd.f32 1.1920929e-07, %v617_v13 }
 0x236   : > { %4479 = vrsqrt.f32 %v618_v14 }
 0x240   : > { %v4480_v15 = vpop.eup %4479 }
 0x241   : > { %v620_v17 = vmul.f32 %v4480_v15, %v610_v1  ;;  %v1083_v15 = vsub.s32 1, %v5712_v11 }
 0x243   : > { %v628_v18 = vmul.f32 %v4111_v16, %v620_v17 }
 0x245   : > { %4175 = vmatmul.mubr.msk.f32.vlgmr.msra.gmra.mrb[0].mxu0 %vm612_vm2, %v628_v18 }
 0x246   : > { %4212 = vmatprep.mubr.msk.f32.mxu0 %vm5192_vm3, %v5193_v10  ;;  %4259 = vmatpush3.bf16.msra.mxu0 %v4258_v25  ;;  %v1223_v25 = vsub.s32 5, %v5712_v11 }
 0x247   : > { %4260 = vmatprep.subr.bf16.mxu0 %v8015_v7 }
 0x24a   : > { %4262 = vmatpush3.bf16.msra.mxu0 %v4261_v31 }
 0x24b   : > { %4263 = vmatprep.subr.bf16.mxu0 %v8015_v7 }
 0x24e   : > { %4265 = vmatpush3.bf16.msra.mxu0 %v4264_v39 }
 0x24f   : > { %4266 = vmatprep.subr.bf16.mxu0 %v8015_v7 }
 0x252   : > { %4268 = vmatpush3.bf16.msra.mxu0 %v4267_v43 }
 0x253   : > { %4215 = vmatprep.subr.mxu0 %v5193_v10 }
 0x318   : > { %v702_v44 = vpop.f32.mrb[0].mxu0 }
 0x319   : > { %715 = vst.msk [vmem:[#allocation4 + $0x3] sm:$0xff] %vm710_vm5, %v702_v44  ;;  %707 = vrot.lane.b32.xlu0 %v702_v44, %s5194_s21  ;;  %v4176_v45 = vpop.f32.mrb[1].mxu0 }
 0x320   : > { %v716_v49 = vld [vmem:[#allocation4 + $0x8] sm:$0x7]  ;;  %v718_v50 = vld [vmem:[#allocation4] sm:$0xff] }
 0x321   : > { %v726_v51 = vld [vmem:[#allocation4 + $0x1] sm:$0xff]  ;;  %717 = vst.msk [vmem:[#allocation3] sm:$0x7] %vm713_vm4, %v716_v49  ;;  %v724_v52 = vmul.f32 %v4113_v46, %v718_v50 }
 0x322   : > { %v732_v53 = vmul.f32 %v4114_v47, %v726_v51  ;;  %v734_v54 = vld [vmem:[#allocation4 + $0x2] sm:$0xff] }
 0x323   : > { %v742_v55 = vld [vmem:[#allocation4 + $0x3] sm:$0xff]  ;;  %v740_v58 = vmul.f32 %v4115_v48, %v734_v54 }
 0x324   : > { %v733_v57 = vadd.f32 %v732_v53, %v724_v52  ;;  %v748_v60 = vmul.f32 %v4116_v56, %v742_v55 }
 0x326   : > { %v741_v59 = vadd.f32 %v740_v58, %v733_v57 }
 0x328   : > { %v749_v62 = vadd.f32 %v748_v60, %v741_v59 }
 0x32a   : > { %v757_v63 = vadd.f32 %v4117_v61, %v749_v62 }
 0x32c   : > { %v4118_v0 = vmul.f32 -1.442695, %v757_v63 }
 0x32e   : > { %4481 = vpow2.f32 %v4118_v0 }
 0x338   : > { %v4482_v1 = vpop.eup %4481 }
 0x339   : > { %v761_v2 = vadd.f32 1.0, %v4482_v1 }
 0x33b   : > { %4483 = vrcp.f32 %v761_v2 }
 0x345   : > { %v4484_v3 = vpop.eup %4483 }
 0x346   : > { %v764_v4 = vmul.f32 %v4484_v3, %v757_v63 }
 0x348   : > { %765 = vst.msk [vmem:[#allocation5] sm:$0xff] %vm710_vm5, %v764_v4 }
 0x34f   : > { %v5700_v5 = vld [vmem:[#allocation5] sm:$0xff] }
 0x350   : > { %4194 = vmatmul.mubr.msk.f32.vlgmr.msra.gmra.mrb[0].mxu1 %vm710_vm5, %v5700_v5  ;;  %4213 = vmatmul.mubr.msk.f32.vlgmr.msra.gmra.mrb[2].mxu0 %vm710_vm5, %v5700_v5 }
 0x351   : > { %4217 = vmatprep.mubr.msk.f32.mxu0 %vm5192_vm3, %v5193_v10  ;;  %4236 = vmatprep.mubr.msk.f32.mxu1 %vm5192_vm3, %v5193_v10 }
 0x352   : > { %4216 = vmatpush3.msk.msra.mxu0 %vm939_vm6, %v927_v8 }
 0x38b   : > { %v708_v6 = vpop.permute.xlu0 %707 }
 0x38c   : > { %711 = vst.msk [vmem:[#allocation6] sm:$0xff] %vm710_vm5, %v708_v6 }
 0x423   : > { %v5717_v13 = vpop.f32.mrb[0].mxu1  ;;  %v923_v14 = vpop.f32.mrb[2].mxu0 }
 0x424   : > { %v5721_v10 = vrot.slane %v5717_v13, %v5715_v12  ;;  %v4195_v16 = vpop.f32.mrb[1].mxu1  ;;  %v4214_v17 = vpop.f32.mrb[3].mxu0  ;;  %4218 = vmatmul.mubr.msk.f32.vlgmr.msra.gmra.mrb[4].mxu0 %vm935_vm7, %v923_v14  ;;  %v5727_v18 = vrot.slane %v5717_v13, %v1083_v15  ;;  %v5739_v20 = vrot.slane %v5717_v13, %v1118_v19  ;;  %v5751_v22 = vrot.slane %v5717_v13, %v1153_v21 }
 0x425   : > { %v5763_v24 = vrot.slane %v5717_v13, %v1188_v23  ;;  %v5775_v26 = vrot.slane %v5717_v13, %v1223_v25  ;;  %v5787_v28 = vrot.slane %v5717_v13, %v1258_v27  ;;  %v5799_v30 = vrot.slane %v5717_v13, %v1293_v29  ;;  %v4121_v23 = vld [vmem:[#allocation24] ss:$0 sm:$0xff] }
 0x426   : > { %8166 = vst [vmem:[#allocation45_spill] sm:$0xff] %v5721_v10  ;;  %1079 = vbcast.lane.b32.xlu0 %v5721_v10, 312  ;;  %1051 = vbcast.lane.b32.xlu1 %v5721_v10, 256  ;;  %8167 = vst [vmem:[#allocation46_spill] sm:$0xff] %v5727_v18 }
 0x42a   : > { %1090 = vbcast.lane.b32.xlu0 %v5727_v18, 264  ;;  %1055 = vbcast.lane.b32.xlu1 %v5721_v10, 264 }
 0x42e   : > { %1098 = vbcast.lane.b32.xlu0 %v5727_v18, 280  ;;  %1059 = vbcast.lane.b32.xlu1 %v5721_v10, 272 }
 0x432   : > { %1106 = vbcast.lane.b32.xlu0 %v5727_v18, 296  ;;  %1063 = vbcast.lane.b32.xlu1 %v5721_v10, 280 }
 0x436   : > { %1114 = vbcast.lane.b32.xlu0 %v5727_v18, 312  ;;  %1067 = vbcast.lane.b32.xlu1 %v5721_v10, 288 }
 0x43a   : > { %1125 = vbcast.lane.b32.xlu0 %v5739_v20, 264  ;;  %1071 = vbcast.lane.b32.xlu1 %v5721_v10, 296 }
 0x43e   : > { %1133 = vbcast.lane.b32.xlu0 %v5739_v20, 280  ;;  %1075 = vbcast.lane.b32.xlu1 %v5721_v10, 304 }
 0x442   : > { %1141 = vbcast.lane.b32.xlu0 %v5739_v20, 296  ;;  %1086 = vbcast.lane.b32.xlu1 %v5727_v18, 256 }
 0x446   : > { %1149 = vbcast.lane.b32.xlu0 %v5739_v20, 312  ;;  %1094 = vbcast.lane.b32.xlu1 %v5727_v18, 272 }
 0x44a   : > { %1160 = vbcast.lane.b32.xlu0 %v5751_v22, 264  ;;  %1102 = vbcast.lane.b32.xlu1 %v5727_v18, 288 }
 0x44e   : > { %1168 = vbcast.lane.b32.xlu0 %v5751_v22, 280  ;;  %1110 = vbcast.lane.b32.xlu1 %v5727_v18, 304 }
 0x452   : > { %1176 = vbcast.lane.b32.xlu0 %v5751_v22, 296  ;;  %1121 = vbcast.lane.b32.xlu1 %v5739_v20, 256 }
 0x456   : > { %1184 = vbcast.lane.b32.xlu0 %v5751_v22, 312  ;;  %1129 = vbcast.lane.b32.xlu1 %v5739_v20, 272 }
 0x45a   : > { %1195 = vbcast.lane.b32.xlu0 %v5763_v24, 264  ;;  %1137 = vbcast.lane.b32.xlu1 %v5739_v20, 288 }
 0x45e   : > { %1203 = vbcast.lane.b32.xlu0 %v5763_v24, 280  ;;  %1145 = vbcast.lane.b32.xlu1 %v5739_v20, 304 }
 0x462   : > { %1211 = vbcast.lane.b32.xlu0 %v5763_v24, 296  ;;  %1156 = vbcast.lane.b32.xlu1 %v5751_v22, 256 }
 0x466   : > { %1219 = vbcast.lane.b32.xlu0 %v5763_v24, 312  ;;  %1164 = vbcast.lane.b32.xlu1 %v5751_v22, 272 }
 0x46a   : > { %1230 = vbcast.lane.b32.xlu0 %v5775_v26, 264  ;;  %1172 = vbcast.lane.b32.xlu1 %v5751_v22, 288 }
 0x46e   : > { %1238 = vbcast.lane.b32.xlu0 %v5775_v26, 280  ;;  %1180 = vbcast.lane.b32.xlu1 %v5751_v22, 304 }
 0x472   : > { %1246 = vbcast.lane.b32.xlu0 %v5775_v26, 296  ;;  %1191 = vbcast.lane.b32.xlu1 %v5763_v24, 256 }
 0x476   : > { %1254 = vbcast.lane.b32.xlu0 %v5775_v26, 312  ;;  %1199 = vbcast.lane.b32.xlu1 %v5763_v24, 272 }
 0x47a   : > { %1265 = vbcast.lane.b32.xlu0 %v5787_v28, 264  ;;  %1207 = vbcast.lane.b32.xlu1 %v5763_v24, 288 }
 0x47e   : > { %1273 = vbcast.lane.b32.xlu0 %v5787_v28, 280  ;;  %1215 = vbcast.lane.b32.xlu1 %v5763_v24, 304 }
 0x482   : > { %1281 = vbcast.lane.b32.xlu0 %v5787_v28, 296  ;;  %1226 = vbcast.lane.b32.xlu1 %v5775_v26, 256 }
 0x486   : > { %1289 = vbcast.lane.b32.xlu0 %v5787_v28, 312  ;;  %1234 = vbcast.lane.b32.xlu1 %v5775_v26, 272 }
 0x48a   : > { %1300 = vbcast.lane.b32.xlu0 %v5799_v30, 264  ;;  %1242 = vbcast.lane.b32.xlu1 %v5775_v26, 288 }
 0x48e   : > { %1308 = vbcast.lane.b32.xlu0 %v5799_v30, 280  ;;  %1250 = vbcast.lane.b32.xlu1 %v5775_v26, 304 }
 0x492   : > { %1316 = vbcast.lane.b32.xlu0 %v5799_v30, 296  ;;  %1261 = vbcast.lane.b32.xlu1 %v5787_v28, 256 }
 0x496   : > { %1324 = vbcast.lane.b32.xlu0 %v5799_v30, 312  ;;  %1269 = vbcast.lane.b32.xlu1 %v5787_v28, 272 }
 0x498   : > { %v5809_v31 = vpop.permute.xlu0 %1079  ;;  %v5811_v32 = vpop.permute.xlu1 %1051 }
 0x499   : > { %8168 = vst [vmem:[#allocation47_spill] sm:$0xff] %v5809_v31 }
 0x49a   : > { %1332 = vbcast.lane.b32.xlu0 %v5721_v10, 328  ;;  %1277 = vbcast.lane.b32.xlu1 %v5787_v28, 288 }
 0x49c   : > { %v5815_v33 = vpop.permute.xlu0 %1090  ;;  %v5817_v34 = vpop.permute.xlu1 %1055 }
 0x49d   : > { %8169 = vst [vmem:[#allocation48_spill] sm:$0xff] %v5815_v33 }
 0x49e   : > { %1340 = vbcast.lane.b32.xlu0 %v5721_v10, 344  ;;  %1285 = vbcast.lane.b32.xlu1 %v5787_v28, 304 }
 0x4a0   : > { %v5821_v35 = vpop.permute.xlu0 %1098  ;;  %v5823_v36 = vpop.permute.xlu1 %1059 }
 0x4a2   : > { %1348 = vbcast.lane.b32.xlu0 %v5721_v10, 360  ;;  %1296 = vbcast.lane.b32.xlu1 %v5799_v30, 256 }
 0x4a4   : > { %v5827_v37 = vpop.permute.xlu0 %1106  ;;  %v5829_v38 = vpop.permute.xlu1 %1063 }
 0x4a5   : > { %8170 = vst [vmem:[#allocation49_spill] sm:$0xff] %v5827_v37 }
 0x4a6   : > { %1356 = vbcast.lane.b32.xlu0 %v5721_v10, 376  ;;  %1304 = vbcast.lane.b32.xlu1 %v5799_v30, 272 }
 0x4a8   : > { %v5833_v39 = vpop.permute.xlu0 %1114  ;;  %v5835_v40 = vpop.permute.xlu1 %1067 }
 0x4a9   : > { %8171 = vst [vmem:[#allocation50_spill] sm:$0xff] %v5833_v39  ;;  %8172 = vst [vmem:[#allocation51_spill] sm:$0xff] %v5835_v40 }
 0x4aa   : > { %1364 = vbcast.lane.b32.xlu0 %v5727_v18, 328  ;;  %1312 = vbcast.lane.b32.xlu1 %v5799_v30, 288 }
 0x4ac   : > { %v5839_v41 = vpop.permute.xlu0 %1125  ;;  %v5841_v42 = vpop.permute.xlu1 %1071 }
 0x4ad   : > { %8173 = vst [vmem:[#allocation52_spill] sm:$0xff] %v5839_v41  ;;  %8174 = vst [vmem:[#allocation53_spill] sm:$0xff] %v5841_v42 }
 0x4ae   : > { %1372 = vbcast.lane.b32.xlu0 %v5727_v18, 344  ;;  %1320 = vbcast.lane.b32.xlu1 %v5799_v30, 304 }
 0x4b0   : > { %v5845_v43 = vpop.permute.xlu0 %1133  ;;  %v5847_v44 = vpop.permute.xlu1 %1075 }
 0x4b1   : > { %8175 = vst [vmem:[#allocation54_spill] sm:$0xff] %v5847_v44 }
 0x4b2   : > { %1380 = vbcast.lane.b32.xlu0 %v5727_v18, 360  ;;  %1328 = vbcast.lane.b32.xlu1 %v5721_v10, 320 }
 0x4b4   : > { %v5851_v45 = vpop.permute.xlu0 %1141  ;;  %v5853_v46 = vpop.permute.xlu1 %1086 }
 0x4b5   : > { %8176 = vst [vmem:[#allocation55_spill] sm:$0xff] %v5851_v45 }
 0x4b6   : > { %1388 = vbcast.lane.b32.xlu0 %v5727_v18, 376  ;;  %1336 = vbcast.lane.b32.xlu1 %v5721_v10, 336 }
 0x4b8   : > { %v5857_v47 = vpop.permute.xlu0 %1149  ;;  %v5859_v48 = vpop.permute.xlu1 %1094 }
 0x4b9   : > { %8177 = vst [vmem:[#allocation56_spill] sm:$0xff] %v5857_v47 }
 0x4ba   : > { %1396 = vbcast.lane.b32.xlu0 %v5739_v20, 328  ;;  %1344 = vbcast.lane.b32.xlu1 %v5721_v10, 352 }
 0x4bc   : > { %v5863_v49 = vpop.permute.xlu0 %1160  ;;  %v5865_v50 = vpop.permute.xlu1 %1102 }
 0x4bd   : > { %8178 = vst [vmem:[#allocation57_spill] sm:$0xff] %v5863_v49  ;;  %8179 = vst [vmem:[#allocation58_spill] sm:$0xff] %v5865_v50 }
 0x4be   : > { %2425 = vbcast.lane.b32.xlu0 %v5721_v10, 256  ;;  %1352 = vbcast.lane.b32.xlu1 %v5721_v10, 368 }
 0x4c0   : > { %v5869_v51 = vpop.permute.xlu0 %1168  ;;  %v5871_v52 = vpop.permute.xlu1 %1110 }
 0x4c1   : > { %8180 = vst [vmem:[#allocation59_spill] sm:$0xff] %v5871_v52 }
 0x4c2   : > { %2433 = vbcast.lane.b32.xlu0 %v5721_v10, 272  ;;  %1360 = vbcast.lane.b32.xlu1 %v5727_v18, 320 }
 0x4c4   : > { %v5875_v53 = vpop.permute.xlu0 %1176  ;;  %v5877_v54 = vpop.permute.xlu1 %1121 }
 0x4c5   : > { %8181 = vst [vmem:[#allocation60_spill] sm:$0xff] %v5875_v53 }
 0x4c6   : > { %2460 = vbcast.lane.b32.xlu0 %v5727_v18, 256  ;;  %1368 = vbcast.lane.b32.xlu1 %v5727_v18, 336 }
 0x4c8   : > { %v5881_v55 = vpop.permute.xlu0 %1184  ;;  %v5883_v56 = vpop.permute.xlu1 %1129 }
 0x4c9   : > { %8182 = vst [vmem:[#allocation61_spill] sm:$0xff] %v5881_v55 }
 0x4ca   : > { %2441 = vbcast.lane.b32.xlu0 %v5721_v10, 288  ;;  %1376 = vbcast.lane.b32.xlu1 %v5727_v18, 352 }
 0x4cc   : > { %v5887_v57 = vpop.permute.xlu0 %1195  ;;  %v5889_v58 = vpop.permute.xlu1 %1137 }
 0x4cd   : > { %8183 = vst [vmem:[#allocation62_spill] sm:$0xff] %v5887_v57  ;;  %8184 = vst [vmem:[#allocation63_spill] sm:$0xff] %v5889_v58 }
 0x4ce   : > { %2445 = vbcast.lane.b32.xlu0 %v5721_v10, 296  ;;  %1384 = vbcast.lane.b32.xlu1 %v5727_v18, 368 }
 0x4d0   : > { %v5893_v59 = vpop.permute.xlu0 %1203  ;;  %v5895_v60 = vpop.permute.xlu1 %1145 }
 0x4d1   : > { %8185 = vst [vmem:[#allocation64_spill] sm:$0xff] %v5895_v60 }
 0x4d2   : > { %2495 = vbcast.lane.b32.xlu0 %v5739_v20, 256  ;;  %1392 = vbcast.lane.b32.xlu1 %v5739_v20, 320 }
 0x4d4   : > { %v5899_v61 = vpop.permute.xlu0 %1211  ;;  %v5901_v62 = vpop.permute.xlu1 %1156 }
 0x4d5   : > { %8186 = vst [vmem:[#allocation65_spill] sm:$0xff] %v5899_v61 }
 0x4d6   : > { %2449 = vbcast.lane.b32.xlu0 %v5721_v10, 304  ;;  %1400 = vbcast.lane.b32.xlu1 %v5739_v20, 336 }
 0x4d8   : > { %v5905_v63 = vpop.permute.xlu0 %1219  ;;  %v5907_v0 = vpop.permute.xlu1 %1164 }
 0x4d9   : > { %8187 = vst [vmem:[#allocation66_spill] sm:$0xff] %v5905_v63 }
 0x4da   : > { %2503 = vbcast.lane.b32.xlu0 %v5739_v20, 272  ;;  %2429 = vbcast.lane.b32.xlu1 %v5721_v10, 264 }
 0x4dc   : > { %v5911_v1 = vpop.permute.xlu0 %1230  ;;  %v5913_v2 = vpop.permute.xlu1 %1172 }
 0x4dd   : > { %8188 = vst [vmem:[#allocation67_spill] sm:$0xff] %v5911_v1  ;;  %8189 = vst [vmem:[#allocation68_spill] sm:$0xff] %v5913_v2 }
 0x4de   : > { %2480 = vbcast.lane.b32.xlu0 %v5727_v18, 296  ;;  %2437 = vbcast.lane.b32.xlu1 %v5721_v10, 280 }
 0x4e0   : > { %v5917_v3 = vpop.permute.xlu0 %1238  ;;  %v5919_v4 = vpop.permute.xlu1 %1180 }
 0x4e1   : > { %8190 = vst [vmem:[#allocation69_spill] sm:$0xff] %v5919_v4  ;;  %v5195_v4 = vmov 1966171168  }
 0x4e2   : > { %2530 = vbcast.lane.b32.xlu0 %v5751_v22, 256  ;;  %2464 = vbcast.lane.b32.xlu1 %v5727_v18, 264  ;;  %v1585_v57 = vunpack.c.l.s4 %v5195_v4 }
 0x4e4   : > { %v5923_v6 = vpop.permute.xlu0 %1246  ;;  %v5925_v8 = vpop.permute.xlu1 %1191 }
 0x4e5   : > { %8191 = vst [vmem:[#allocation70_spill] sm:$0xff] %v5923_v6  ;;  %8192 = vst [vmem:[#allocation71_spill] sm:$0xff] %v5925_v8 }
 0x4e6   : > { %2484 = vbcast.lane.b32.xlu0 %v5727_v18, 304  ;;  %2468 = vbcast.lane.b32.xlu1 %v5727_v18, 272 }
 0x4e8   : > { %v5929_v9 = vpop.permute.xlu0 %1254  ;;  %v5931_v13 = vpop.permute.xlu1 %1199 }
 0x4e9   : > { %8193 = vst [vmem:[#allocation72_spill] sm:$0xff] %v5929_v9 }
 0x4ea   : > { %2538 = vbcast.lane.b32.xlu0 %v5751_v22, 272  ;;  %2472 = vbcast.lane.b32.xlu1 %v5727_v18, 280 }
 0x4ec   : > { %v5935_v14 = vpop.permute.xlu0 %1265  ;;  %v5937_v15 = vpop.permute.xlu1 %1207 }
 0x4ed   : > { %8194 = vst [vmem:[#allocation73_spill] sm:$0xff] %v5935_v14  ;;  %8195 = vst [vmem:[#allocation74_spill] sm:$0xff] %v5937_v15 }
 0x4ee   : > { %2515 = vbcast.lane.b32.xlu0 %v5739_v20, 296  ;;  %2499 = vbcast.lane.b32.xlu1 %v5739_v20, 264 }
 0x4f0   : > { %v5941_v16 = vpop.permute.xlu0 %1273  ;;  %v5943_v17 = vpop.permute.xlu1 %1215 }
 0x4f1   : > { %8196 = vst [vmem:[#allocation75_spill] sm:$0xff] %v5941_v16  ;;  %8197 = vst [vmem:[#allocation76_spill] sm:$0xff] %v5943_v17 }
 0x4f2   : > { %2565 = vbcast.lane.b32.xlu0 %v5763_v24, 256  ;;  %2476 = vbcast.lane.b32.xlu1 %v5727_v18, 288 }
 0x4f4   : > { %v5947_v19 = vpop.permute.xlu0 %1281  ;;  %v5949_v21 = vpop.permute.xlu1 %1226 }
 0x4f5   : > { %8198 = vst [vmem:[#allocation77_spill] sm:$0xff] %v5947_v19  ;;  %8199 = vst [vmem:[#allocation78_spill] sm:$0xff] %v5949_v21 }
 0x4f6   : > { %2519 = vbcast.lane.b32.xlu0 %v5739_v20, 304  ;;  %2453 = vbcast.lane.b32.xlu1 %v5721_v10, 312 }
 0x4f7   : > { %v1009_v25 = vpop.f32.mrb[4].mxu0 }
 0x4f8   : > { %v1010_v27 = vadd.f32 %v4121_v23, %v1009_v25  ;;  %v5953_v29 = vpop.permute.xlu0 %1289  ;;  %v5955_v7 = vpop.permute.xlu1 %1234 }
 0x4f9   : > { %8200 = vst [vmem:[#allocation79_spill] sm:$0xff] %v5953_v29  ;;  %v4219_v6 = vpop.f32.mrb[5].mxu0 }
 0x4fa   : > { %v1014_v61 = vmul.f32 1.442695, %v1010_v27  ;;  %2573 = vbcast.lane.b32.xlu0 %v5763_v24, 272  ;;  %2507 = vbcast.lane.b32.xlu1 %v5739_v20, 280  ;;  %vm1013_vm9 = vcmp.gt.f32.partialorder %v1010_v27, 20.0 }
 0x4fc   : > { %4485 = vpow2.f32 %v1014_v61  ;;  %v5959_v19 = vpop.permute.xlu0 %1300  ;;  %v5961_v53 = vpop.permute.xlu1 %1242 }
 0x4fd   : > { %8201 = vst [vmem:[#allocation80_spill] sm:$0xff] %v5959_v19  ;;  %8202 = vst [vmem:[#allocation81_spill] sm:$0xff] %v5961_v53  ;;  %v1586_v53 = vunpack.c.0.s8 %v1585_v57 }
 0x4fe   : > { %2550 = vbcast.lane.b32.xlu0 %v5751_v22, 296  ;;  %2534 = vbcast.lane.b32.xlu1 %v5751_v22, 264 }
 0x4ff   : > { %v6009_v4 = vsub.s32 %v1586_v53, %v5712_v11 }
 0x500   : > { %v5965_v23 = vpop.permute.xlu0 %1308  ;;  %v5967_v25 = vpop.permute.xlu1 %1250 }
 0x501   : > { %8203 = vst [vmem:[#allocation82_spill] sm:$0xff] %v5965_v23  ;;  %8204 = vst [vmem:[#allocation83_spill] sm:$0xff] %v5967_v25 }
 0x502   : > { %2600 = vbcast.lane.b32.xlu0 %v5775_v26, 256  ;;  %2511 = vbcast.lane.b32.xlu1 %v5739_v20, 288 }
 0x504   : > { %v5971_v6 = vpop.permute.xlu0 %1316  ;;  %v5973_v45 = vpop.permute.xlu1 %1261 }
 0x505   : > { %8205 = vst [vmem:[#allocation84_spill] sm:$0xff] %v5971_v6  ;;  %8206 = vst [vmem:[#allocation85_spill] sm:$0xff] %v5973_v45 }
 0x506   : > { %v4486_v61 = vpop.eup %4485  ;;  %2554 = vbcast.lane.b32.xlu0 %v5751_v22, 304  ;;  %2488 = vbcast.lane.b32.xlu1 %v5727_v18, 312 }
 0x507   : > { %v1016_v14 = vadd.f32 1.0, %v4486_v61  ;;  %v1019_v55 = vmul.f32 -0.5, %v4486_v61  ;;  %v1022_v25 = vand.u32 2147483647, %v4486_v61 }
 0x508   : > { %v5977_v9 = vpop.permute.xlu0 %1324  ;;  %v5979_v63 = vpop.permute.xlu1 %1269 }
 0x509   : > { %8207 = vst [vmem:[#allocation86_spill] sm:$0xff] %v5977_v9  ;;  %4487 = vlog2.f32 %v1016_v14  ;;  %v1020_v1 = vadd.f32 1.0, %v1019_v55  ;;  %vm1023_vm8 = vcmp.lt.f32.partialorder %v1022_v25, 0.0004427343 }
 0x50a   : > { %2608 = vbcast.lane.b32.xlu0 %v5775_v26, 272  ;;  %2542 = vbcast.lane.b32.xlu1 %v5751_v22, 280 }
 0x50b   : > { %v1021_v29 = vmul.f32 %v4486_v61, %v1020_v1 }
 0x50c   : > { %v5983_v47 = vpop.permute.xlu0 %1332  ;;  %v5985_v17 = vpop.permute.xlu1 %1277 }
 0x50d   : > { %8208 = vst [vmem:[#allocation87_spill] sm:$0xff] %v5985_v17 }
 0x50e   : > { %2585 = vbcast.lane.b32.xlu0 %v5763_v24, 296  ;;  %2569 = vbcast.lane.b32.xlu1 %v5763_v24, 264 }
 0x510   : > { %v5989_v6 = vpop.permute.xlu0 %1340  ;;  %v5991_v9 = vpop.permute.xlu1 %1285 }
 0x511   : > { %8209 = vst [vmem:[#allocation88_spill] sm:$0xff] %v5989_v6  ;;  %8210 = vst [vmem:[#allocation89_spill] sm:$0xff] %v5991_v9 }
 0x512   : > { %2635 = vbcast.lane.b32.xlu0 %v5787_v28, 256  ;;  %2546 = vbcast.lane.b32.xlu1 %v5751_v22, 288 }
 0x513   : > { %v4488_v14 = vpop.eup %4487 }
 0x514   : > { %v1018_v19 = vmul.f32 0.6931472, %v4488_v14  ;;  %v5995_v17 = vpop.permute.xlu0 %1348  ;;  %v5997_v60 = vpop.permute.xlu1 %1296 }
 0x515   : > { %8211 = vst [vmem:[#allocation90_spill] sm:$0xff] %v5995_v17  ;;  %8212 = vst [vmem:[#allocation91_spill] sm:$0xff] %v5997_v60 }
 0x516   : > { %v1024_v55 = vsel %vm1023_vm8, %v1021_v29, %v1018_v19  ;;  %2589 = vbcast.lane.b32.xlu0 %v5763_v24, 304  ;;  %2523 = vbcast.lane.b32.xlu1 %v5739_v20, 312 }
 0x517   : > { %v1025_v9 = vsel %vm1013_vm9, %v1010_v27, %v1024_v55 }
 0x518   : > { %1026 = vst.msk [vmem:[#allocation7] sm:$0xff] %vm710_vm5, %v1025_v9  ;;  %v6002_v15 = vpop.permute.xlu0 %1356  ;;  %v6004_v1 = vpop.permute.xlu1 %1304 }
 0x519   : > { %8213 = vst [vmem:[#allocation92_spill] sm:$0xff] %v6002_v15  ;;  %8214 = vst [vmem:[#allocation93_spill] sm:$0xff] %v6004_v1 }
 0x51a   : > { %2643 = vbcast.lane.b32.xlu0 %v5787_v28, 272  ;;  %2577 = vbcast.lane.b32.xlu1 %v5763_v24, 280 }
 0x51c   : > { %v6011_v19 = vpop.permute.xlu0 %1364  ;;  %v6013_v29 = vpop.permute.xlu1 %1312 }
 0x51d   : > { %8215 = vst [vmem:[#allocation94_spill] sm:$0xff] %v6011_v19  ;;  %8216 = vst [vmem:[#allocation95_spill] sm:$0xff] %v6013_v29 }
 0x51e   : > { %2706 = vbcast.lane.b32.xlu0 %v5721_v10, 328  ;;  %2604 = vbcast.lane.b32.xlu1 %v5775_v26, 264 }
 0x51f   : > { %v1043_v57 = vld [vmem:[#allocation7] sm:$0xff] }
 0x520   : > { %v1590_v9 = vrot.slane %v1043_v57, %v6009_v4  ;;  %v6018_v27 = vpop.permute.xlu0 %1372  ;;  %v6020_v25 = vpop.permute.xlu1 %1320  ;;  %v1583_v11 = vcombine.high %v1043_v57, %v1043_v57  ;;  %v1864_v55 = vmul.f32 %v1043_v57, %v5700_v5 }
 0x521   : > { %8217 = vst [vmem:[#allocation96_spill] sm:$0xff] %v6018_v27  ;;  %8218 = vst [vmem:[#allocation97_spill] sm:$0xff] %v6020_v25  ;;  %v6038_v25 = vld [vmem:[#allocation25 + $0x10] sm:$0xff]  ;;  %v6067_v27 = vld [vmem:[#allocation25 + $0x18] sm:$0xff] }
 0x522   : > { %v1598_v61 = vcombine.high %v1590_v9, %v1590_v9  ;;  %v1606_v14 = vrot.slane %v1590_v9, %v6009_v4  ;;  %2738 = vbcast.lane.b32.xlu0 %v5727_v18, 328  ;;  %2581 = vbcast.lane.b32.xlu1 %v5763_v24, 288  ;;  %v1866_v5 = vcombine.high %v1864_v55, %v1864_v55 }
 0x523   : > { %v1873_v58 = vrot.slane %v1864_v55, %v6009_v4 }
 0x524   : > { %v1620_v53 = vrot.slane %v1598_v61, %v6009_v4  ;;  %v6027_v29 = vpop.permute.xlu0 %1380  ;;  %v6029_v52 = vpop.permute.xlu1 %1328  ;;  %v1628_v49 = vcombine.high %v1606_v14, %v1606_v14  ;;  %v6032_v2 = vrot.slane %v1606_v14, %v5715_v12  ;;  %v1597_v61 = vrot.slane %v1583_v11, %v6009_v4 }
 0x525   : > { %8219 = vst [vmem:[#allocation98_spill] sm:$0xff] %v6027_v29 }
 0x526   : > { %8220 = vst [vmem:[#allocation99_spill] sm:$0xff] %v6032_v2  ;;  %1428 = vbcast.lane.b32.xlu0 %v5751_v22, 328  ;;  %v6036_v9 = vrot.slane %v1620_v53, %v5715_v12  ;;  %2558 = vbcast.lane.b32.xlu1 %v5751_v22, 312  ;;  %v1630_v14 = vcombine.high %v1620_v53, %v1620_v53 }
 0x527   : > { %v6048_v50 = vrot.slane %v1628_v49, %v5715_v12  ;;  %v1674_v44 = vmul.f32 %v6032_v2, %v6038_v25  ;;  %v1599_v11 = vcombine.high %v1597_v61, %v1597_v61  ;;  %v1613_v49 = vrot.slane %v1597_v61, %v6009_v4 }
 0x528   : > { %8221 = vst [vmem:[#allocation100_spill] sm:$0xff] %v6036_v9  ;;  %v6042_v57 = vpop.permute.xlu0 %1388  ;;  %v6044_v29 = vpop.permute.xlu1 %1336  ;;  %v1682_v40 = vmul.f32 %v6036_v9, %v6038_v25  ;;  %v1881_v53 = vcombine.high %v1873_v58, %v1873_v58  ;;  %v6063_v41 = vrot.slane %v1630_v14, %v5715_v12 }
 0x529   : > { %8222 = vst [vmem:[#allocation101_spill] sm:$0xff] %v6042_v57  ;;  %8223 = vst [vmem:[#allocation102_spill] sm:$0xff] %v6044_v29  ;;  %v1880_v57 = vrot.slane %v1866_v5, %v6009_v4  ;;  %v1740_v37 = vmul.f32 1.442695, %v1674_v44  ;;  %v1690_v15 = vmul.f32 %v6048_v50, %v6038_v25  ;;  %v6072_v5 = vrot.slane %v1599_v11, %v6009_v4 }
 0x52a   : > { %8224 = vst [vmem:[#allocation103_spill] sm:$0xff] %v6048_v50  ;;  %2770 = vbcast.lane.b32.xlu0 %v5739_v20, 328  ;;  %2612 = vbcast.lane.b32.xlu1 %v5775_v26, 280  ;;  %8227 = vst [vmem:[#allocation106_spill] sm:$0xff] %v6063_v41  ;;  %v1756_v17 = vmul.f32 1.442695, %v1682_v40  ;;  %v1889_v44 = vrot.slane %v1873_v58, %v6009_v4  ;;  %v1903_v40 = vrot.slane %v1881_v53, %v6009_v4 }
 0x52b   : > { %4489 = vpow2.f32 %v1740_v37  ;;  %v1882_v61 = vcombine.high %v1880_v57, %v1880_v57  ;;  %v1896_v37 = vrot.slane %v1880_v57, %v6009_v4  ;;  %v1698_v31 = vmul.f32 %v6063_v41, %v6038_v25 }
 0x52c   : > { %v6057_v39 = vpop.permute.xlu0 %1396  ;;  %v6059_v55 = vpop.permute.xlu1 %1344  ;;  %v1772_v60 = vmul.f32 1.442695, %v1690_v15  ;;  %v1675_v11 = vmul.f32 %v6032_v2, %v6067_v27  ;;  %v1629_v19 = vcombine.high %v1613_v49, %v1613_v49  ;;  %4491 = vpow2.f32 %v1756_v17 }
 0x52d   : > { %8225 = vst [vmem:[#allocation104_spill] sm:$0xff] %v6057_v39  ;;  %8226 = vst [vmem:[#allocation105_spill] sm:$0xff] %v6059_v55  ;;  %v6080_v39 = vrot.slane %v1613_v49, %v5715_v12  ;;  %v1683_v58 = vmul.f32 %v6036_v9, %v6067_v27  ;;  %v6094_v57 = vrot.slane %v6072_v5, %v5715_v12 }
 0x52e   : > { %1460 = vbcast.lane.b32.xlu0 %v5763_v24, 328  ;;  %2639 = vbcast.lane.b32.xlu1 %v5787_v28, 264  ;;  %v6097_v53 = vrot.slane %v1882_v61, %v6009_v4  ;;  %v1911_v15 = vcombine.high %v1889_v44, %v1889_v44  ;;  %v1912_v17 = vcombine.high %v1896_v37, %v1896_v37  ;;  %v1742_v45 = vmul.f32 1.442695, %v1675_v11 }
 0x52f   : > { %8230 = vst [vmem:[#allocation109_spill] sm:$0xff] %v6080_v39  ;;  %8231 = vst [vmem:[#allocation110_spill] sm:$0xff] %v6094_v57  ;;  %v1913_v49 = vcombine.high %v1903_v40, %v1903_v40  ;;  %v1706_v42 = vmul.f32 %v6080_v39, %v6038_v25  ;;  %v1631_v6 = vcombine.high %v6072_v5, %v6072_v5  ;;  %4493 = vpow2.f32 %v1772_v60  ;;  %v6122_v60 = vld [vmem:[#allocation25] sm:$0xff] }
 0x530   : > { %v6075_v55 = vpop.permute.xlu0 %2425  ;;  %v6077_v14 = vpop.permute.xlu1 %1352  ;;  %v6108_v33 = vrot.slane %v1889_v44, %v5715_v12  ;;  %v1788_v4 = vmul.f32 1.442695, %v1698_v31  ;;  %v6111_v61 = vrot.slane %v1629_v19, %v5715_v12  ;;  %4495 = vpow2.f32 %v1742_v45 }
 0x531   : > { %8228 = vst [vmem:[#allocation107_spill] sm:$0xff] %v6075_v55  ;;  %8229 = vst [vmem:[#allocation108_spill] sm:$0xff] %v6077_v14  ;;  %v1758_v21 = vmul.f32 1.442695, %v1683_v58  ;;  %v6118_v23 = vrot.slane %v1903_v40, %v5715_v12  ;;  %v1714_v5 = vmul.f32 %v6094_v57, %v6038_v25  ;;  %v6131_v44 = vrot.slane %v1911_v15, %v5715_v12 }
 0x532   : > { %2620 = vbcast.lane.b32.xlu0 %v5775_v26, 296  ;;  %2616 = vbcast.lane.b32.xlu1 %v5775_v26, 288  ;;  %8234 = vst [vmem:[#allocation113_spill] sm:$0xff] %v6108_v33  ;;  %8235 = vst [vmem:[#allocation114_spill] sm:$0xff] %v6111_v61  ;;  %v6134_v40 = vrot.slane %v1912_v17, %v5715_v12  ;;  %v1804_v58 = vmul.f32 1.442695, %v1706_v42  ;;  %v6137_v11 = vrot.slane %v1913_v49, %v5715_v12 }
 0x533   : > { %8236 = vst [vmem:[#allocation115_spill] sm:$0xff] %v6118_v23  ;;  %8239 = vst [vmem:[#allocation118_spill] sm:$0xff] %v6131_v44  ;;  %4497 = vpow2.f32 %v1788_v4  ;;  %v6140_v1 = vrot.slane %v1896_v37, %v5715_v12  ;;  %v1672_v17 = vmul.f32 %v6032_v2, %v6122_v60  ;;  %v1820_v42 = vmul.f32 1.442695, %v1714_v5 }
 0x534   : > { %v6099_v14 = vpop.permute.xlu0 %2433  ;;  %v6101_v55 = vpop.permute.xlu1 %1360  ;;  %8240 = vst [vmem:[#allocation119_spill] sm:$0xff] %v6137_v11  ;;  %4499 = vpow2.f32 %v1758_v21  ;;  %v6150_v49 = vrot.slane %v6097_v53, %v5715_v12  ;;  %v1680_v37 = vmul.f32 %v6036_v9, %v6122_v60  ;;  %v1973_v5 = vmul.f32 %v6131_v44, %v5883_v56 }
 0x535   : > { %8232 = vst [vmem:[#allocation111_spill] sm:$0xff] %v6099_v14  ;;  %8233 = vst [vmem:[#allocation112_spill] sm:$0xff] %v6101_v55  ;;  %v1037_v14 = vld [vmem:[#allocation2 + $0x10] sm:$0xff]  ;;  %v1691_v55 = vmul.f32 %v6048_v50, %v6067_v27  ;;  %v4490_v45 = vpop.eup %4489  ;;  %4501 = vpow2.f32 %v1804_v58  ;;  %v6174_v8 = vrot.slane %v1631_v6, %v5715_v12  ;;  %v1688_v56 = vmul.f32 %v6048_v50, %v6122_v60 }
 0x536   : > { %2670 = vbcast.lane.b32.xlu0 %v5799_v30, 256  ;;  %2702 = vbcast.lane.b32.xlu1 %v5721_v10, 320  ;;  %8241 = vst [vmem:[#allocation120_spill] sm:$0xff] %v6140_v1  ;;  %v2021_v29 = vmul.f32 %v4490_v45, %v1037_v14  ;;  %v1965_v14 = vmul.f32 %v6118_v23, %v5859_v48 }
 0x537   : > { %v1774_v15 = vmul.f32 1.442695, %v1691_v55  ;;  %v4492_v55 = vpop.eup %4491  ;;  %8245 = vst [vmem:[#allocation124_spill] sm:$0xff] %v6174_v8  ;;  %v6180_v16 = vmul.f32 %v6140_v1, %v5931_v13  ;;  %v1723_v13 = vmul.f32 %v6111_v61, %v6067_v27  ;;  %v1768_v50 = vmul.f32 1.442695, %v1688_v56 }
 0x538   : > { %v6126_v31 = vpop.permute.xlu0 %2460  ;;  %v6128_v19 = vpop.permute.xlu1 %1368 }
 0x539   : > { %8237 = vst [vmem:[#allocation116_spill] sm:$0xff] %v6126_v31  ;;  %8238 = vst [vmem:[#allocation117_spill] sm:$0xff] %v6128_v19  ;;  %v1957_v31 = vmul.f32 %v6108_v33, %v5823_v36  ;;  %v1699_v19 = vmul.f32 %v6063_v41, %v6067_v27  ;;  %4503 = vpow2.f32 %v1774_v15 }
 0x53a   : > { %2710 = vbcast.lane.b32.xlu0 %v5721_v10, 336  ;;  %2734 = vbcast.lane.b32.xlu1 %v5727_v18, 320  ;;  %v1038_v10 = vld [vmem:[#allocation2 + $0x18] sm:$0xff] }
 0x53b   : > { %v6152_v4 = vadd.f32 %v2021_v29, %v1957_v31  ;;  %v1981_v29 = vmul.f32 %v6137_v11, %v5907_v0  ;;  %v1707_v31 = vmul.f32 %v6080_v39, %v6067_v27  ;;  %v1790_v48 = vmul.f32 1.442695, %v1699_v19  ;;  %v4494_v0 = vpop.eup %4493 }
 0x53c   : > { %v6158_v36 = vpop.permute.xlu0 %2441  ;;  %v6160_v21 = vpop.permute.xlu1 %1376 }
 0x53d   : > { %8242 = vst [vmem:[#allocation121_spill] sm:$0xff] %v6152_v4  ;;  %8243 = vst [vmem:[#allocation122_spill] sm:$0xff] %v6158_v36  ;;  %v2066_v45 = vmul.f32 %v4492_v55, %v6152_v4  ;;  %v1715_v36 = vmul.f32 %v6094_v57, %v6067_v27  ;;  %v1752_v55 = vmul.f32 1.442695, %v1680_v37  ;;  %v6190_v19 = vpop.eup %4495 }
 0x53e   : > { %8244 = vst [vmem:[#allocation123_spill] sm:$0xff] %v6160_v21  ;;  %v1736_v21 = vmul.f32 1.442695, %v1672_v17  ;;  %2798 = vbcast.lane.b32.xlu0 %v5751_v22, 320  ;;  %1424 = vbcast.lane.b32.xlu1 %v5751_v22, 320  ;;  %8249 = vst [vmem:[#allocation128_spill] sm:$0xff] %v6190_v19  ;;  %v6194_v17 = vmul.f32 %v6150_v49, %v5955_v7  ;;  %v1696_v7 = vmul.f32 %v6063_v41, %v6122_v60  ;;  %v4498_v4 = vpop.eup %4497 }
 0x53f   : > { %v6182_v58 = vadd.f32 %v2066_v45, %v1965_v14  ;;  %v1822_v14 = vmul.f32 1.442695, %v1715_v36  ;;  %v1958_v45 = vmul.f32 %v6108_v33, %v5829_v38  ;;  %v1722_v38 = vmul.f32 %v6111_v61, %v6038_v25  ;;  %v4500_v36 = vpop.eup %4499  ;;  %v6232_v41 = vld [vmem:[#allocation25 + $0x28] sm:$0xff] }
 0x540   : > { %4505 = vpow2.f32 %v1736_v21  ;;  %v6186_v6 = vpop.permute.xlu0 %2445  ;;  %v6188_v15 = vpop.permute.xlu1 %1384  ;;  %v1806_v21 = vmul.f32 1.442695, %v1707_v31 }
 0x541   : > { %8246 = vst [vmem:[#allocation125_spill] sm:$0xff] %v6182_v58  ;;  %8247 = vst [vmem:[#allocation126_spill] sm:$0xff] %v6186_v6  ;;  %4507 = vpow2.f32 %v1820_v42  ;;  %v2111_v37 = vmul.f32 %v4494_v0, %v6182_v58  ;;  %v2022_v6 = vmul.f32 %v6190_v19, %v1038_v10  ;;  %v1731_v42 = vmul.f32 %v6174_v8, %v6067_v27 }
 0x542   : > { %8248 = vst [vmem:[#allocation127_spill] sm:$0xff] %v6188_v15  ;;  %v6202_v15 = vld [vmem:[#allocation25 + $0x8] sm:$0xff]  ;;  %4509 = vpow2.f32 %v1790_v48  ;;  %1432 = vbcast.lane.b32.xlu0 %v5751_v22, 336  ;;  %2766 = vbcast.lane.b32.xlu1 %v5739_v20, 320  ;;  %v1838_v48 = vmul.f32 1.442695, %v1723_v13  ;;  %v1704_v19 = vmul.f32 %v6080_v39, %v6122_v60 }
 0x543   : > { %v6208_v31 = vadd.f32 %v2111_v37, %v1973_v5  ;;  %v6210_v0 = vadd.f32 %v2022_v6, %v1958_v45  ;;  %4511 = vpow2.f32 %v1752_v55  ;;  %v1966_v5 = vmul.f32 %v6118_v23, %v5821_v35  ;;  %v1035_v35 = vld [vmem:[#allocation2] sm:$0xff] }
 0x544   : > { %v6216_v10 = vpop.permute.xlu0 %2495  ;;  %v6218_v27 = vpop.permute.xlu1 %1392  ;;  %4513 = vpow2.f32 %v1806_v21  ;;  %v1673_v56 = vmul.f32 %v6032_v2, %v6202_v15  ;;  %v1836_v37 = vmul.f32 1.442695, %v1722_v38  ;;  %v1854_v45 = vmul.f32 1.442695, %v1731_v42 }
 0x545   : > { %8250 = vst [vmem:[#allocation129_spill] sm:$0xff] %v6216_v10  ;;  %8251 = vst [vmem:[#allocation130_spill] sm:$0xff] %v6218_v27  ;;  %v2156_v55 = vmul.f32 %v4498_v4, %v6208_v31  ;;  %4515 = vpow2.f32 %v1822_v14  ;;  %v2067_v6 = vmul.f32 %v4500_v36, %v6210_v0  ;;  %v4502_v21 = vpop.eup %4501  ;;  %v1784_v58 = vmul.f32 1.442695, %v1696_v7 }
 0x546   : > { %4517 = vpow2.f32 %v1768_v50  ;;  %v1738_v10 = vmul.f32 1.442695, %v1673_v56  ;;  %1492 = vbcast.lane.b32.xlu0 %v5775_v26, 328  ;;  %1456 = vbcast.lane.b32.xlu1 %v5763_v24, 320  ;;  %v4504_v50 = vpop.eup %4503  ;;  %v1982_v42 = vmul.f32 %v6137_v11, %v5869_v51  ;;  %v1712_v7 = vmul.f32 %v6094_v57, %v6122_v60 }
 0x547   : > { %v6228_v13 = vadd.f32 %v2156_v55, %v1981_v29  ;;  %v6230_v27 = vadd.f32 %v2067_v6, %v1966_v5  ;;  %4519 = vpow2.f32 %v1836_v37  ;;  %v1974_v29 = vmul.f32 %v6131_v44, %v5845_v43 }
 0x548   : > { %v6236_v4 = vpop.permute.xlu0 %2449  ;;  %v6238_v14 = vpop.permute.xlu1 %1400  ;;  %4521 = vpow2.f32 %v1738_v10  ;;  %v1720_v56 = vmul.f32 %v6111_v61, %v6122_v60  ;;  %v1800_v6 = vmul.f32 1.442695, %v1704_v19  ;;  %v1955_v43 = vmul.f32 %v6108_v33, %v5811_v32 }
 0x549   : > { %8252 = vst [vmem:[#allocation131_spill] sm:$0xff] %v6228_v13  ;;  %8253 = vst [vmem:[#allocation132_spill] sm:$0xff] %v6236_v4  ;;  %v2201_v36 = vmul.f32 %v4502_v21, %v6228_v13  ;;  %4523 = vpow2.f32 %v1838_v48  ;;  %v2112_v5 = vmul.f32 %v4504_v50, %v6230_v27  ;;  %v1677_v10 = vmul.f32 %v6032_v2, %v6232_v41  ;;  %v6262_v48 = vld [vmem:[#allocation25 + $0x38] sm:$0xff] }
 0x54a   : > { %v6246_v38 = vpop.eup %4505  ;;  %4525 = vpow2.f32 %v1784_v58  ;;  %v1730_v50 = vmul.f32 %v6174_v8, %v6038_v25  ;;  %2830 = vbcast.lane.b32.xlu0 %v5763_v24, 320  ;;  %2593 = vbcast.lane.b32.xlu1 %v5763_v24, 312  ;;  %v1681_v4 = vmul.f32 %v6036_v9, %v6202_v15 }
 0x54b   : > { %v4508_v55 = vpop.eup %4507  ;;  %v2019_v51 = vmul.f32 %v6246_v38, %v1035_v35  ;;  %v6258_v37 = vadd.f32 %v2201_v36, %v6180_v16  ;;  %v6260_v21 = vadd.f32 %v2112_v5, %v1974_v29  ;;  %4527 = vpow2.f32 %v1854_v45 }
 0x54c   : > { %v6268_v32 = vpop.permute.xlu0 %2503  ;;  %v6270_v19 = vpop.permute.xlu1 %2429  ;;  %v1816_v16 = vmul.f32 1.442695, %v1712_v7  ;;  %v1963_v29 = vmul.f32 %v6118_v23, %v5853_v46  ;;  %v1852_v13 = vmul.f32 1.442695, %v1730_v50  ;;  %4529 = vpow2.f32 %v1800_v6 }
 0x54d   : > { %8254 = vst [vmem:[#allocation133_spill] sm:$0xff] %v6258_v37  ;;  %8255 = vst [vmem:[#allocation134_spill] sm:$0xff] %v6260_v21  ;;  %v4510_v35 = vpop.eup %4509  ;;  %v2027_v58 = vadd.f32 %v2019_v51, %v1955_v43  ;;  %v2246_v5 = vmul.f32 %v4508_v55, %v6258_v37  ;;  %v1746_v45 = vmul.f32 1.442695, %v1677_v10  ;;  %v1679_v7 = vmul.f32 %v6032_v2, %v6262_v48 }
 0x54e   : > { %8256 = vst [vmem:[#allocation135_spill] sm:$0xff] %v6268_v32  ;;  %8257 = vst [vmem:[#allocation136_spill] sm:$0xff] %v6270_v19  ;;  %v6274_v36 = vpop.eup %4511  ;;  %v2157_v25 = vmul.f32 %v4510_v35, %v6260_v21  ;;  %4531 = vpow2.f32 %v1852_v13  ;;  %v1754_v55 = vmul.f32 1.442695, %v1681_v4  ;;  %1404 = vbcast.lane.b32.xlu0 %v5739_v20, 344  ;;  %2647 = vbcast.lane.b32.xlu1 %v5787_v28, 280 }
 0x54f   : > { %v4514_v32 = vpop.eup %4513  ;;  %v2064_v19 = vmul.f32 %v6274_v36, %v2027_v58  ;;  %v6284_v43 = vadd.f32 %v2246_v5, %v6194_v17  ;;  %v1990_v35 = vmul.f32 %v6140_v1, %v5893_v59  ;;  %4533 = vpow2.f32 %v1816_v16 }
 0x550   : > { %v4516_v46 = vpop.eup %4515  ;;  %v6286_v51 = vadd.f32 %v2157_v25, %v1982_v42  ;;  %v6290_v50 = vpop.permute.xlu0 %2480  ;;  %v1832_v17 = vmul.f32 1.442695, %v1720_v56  ;;  %v1036_v42 = vld [vmem:[#allocation2 + $0x8] sm:$0xff]  ;;  %v1971_v25 = vmul.f32 %v6131_v44, %v5877_v54  ;;  %4535 = vpow2.f32 %v1754_v55 }
 0x551   : > { %8258 = vst [vmem:[#allocation137_spill] sm:$0xff] %v6284_v43  ;;  %8260 = vst [vmem:[#allocation139_spill] sm:$0xff] %v6290_v50  ;;  %v6292_v6 = vpop.permute.xlu1 %2437  ;;  %v6294_v10 = vpop.eup %4517  ;;  %v6298_v5 = vadd.f32 %v2064_v19, %v1963_v29  ;;  %v1956_v50 = vmul.f32 %v6108_v33, %v5817_v34  ;;  %v1728_v56 = vmul.f32 %v6174_v8, %v6122_v60  ;;  %v1750_v19 = vmul.f32 1.442695, %v1679_v7 }
 0x552   : > { %8259 = vst [vmem:[#allocation138_spill] sm:$0xff] %v6286_v51  ;;  %8261 = vst [vmem:[#allocation140_spill] sm:$0xff] %v6292_v6  ;;  %v4520_v13 = vpop.eup %4519  ;;  %v2202_v4 = vmul.f32 %v4514_v32, %v6286_v51  ;;  %4537 = vpow2.f32 %v1746_v45  ;;  %v2035_v54 = vmul.f32 %v2027_v58, %v6029_v52  ;;  %1520 = vbcast.lane.b32.xlu0 %v5787_v28, 320  ;;  %2674 = vbcast.lane.b32.xlu1 %v5799_v30, 264 }
 0x553   : > { %v4522_v37 = vpop.eup %4521  ;;  %v2109_v21 = vmul.f32 %v6294_v10, %v6298_v5  ;;  %v2291_v59 = vmul.f32 %v4520_v13, %v6284_v43  ;;  %v8265_v60 = vcombine.high %v6097_v53, %v6097_v53  ;;  %v1998_v58 = vmul.f32 %v6150_v49, %v5917_v3 }
 0x554   : > { %v4524_v16 = vpop.eup %4523  ;;  %v6310_v29 = vadd.f32 %v2202_v4, %v1990_v35  ;;  %v2020_v32 = vmul.f32 %v4522_v37, %v1036_v42  ;;  %v6315_v34 = vpop.permute.xlu0 %2530  ;;  %v2005_v37 = vmul.f32 %v6134_v40, %v5979_v63  ;;  %4539 = vpow2.f32 %v1832_v17  ;;  %v8271_v17 = vld [vmem:[#allocation75_spill] sm:$0xff] }
 0x555   : > { %8263 = vst [vmem:[#allocation142_spill] sm:$0xff] %v6315_v34  ;;  %v6317_v55 = vpop.permute.xlu1 %2464  ;;  %v6323_v7 = vrot.slane %v8265_v60, %v5715_v12  ;;  %v6325_v35 = vadd.f32 %v2109_v21, %v1971_v25  ;;  %v4526_v52 = vpop.eup %4525  ;;  %v1979_v4 = vmul.f32 %v6137_v11, %v5901_v62  ;;  %4541 = vpow2.f32 %v1750_v19  ;;  %v8272_v19 = vld [vmem:[#allocation71_spill] sm:$0xff] }
 0x556   : > { %8262 = vst [vmem:[#allocation141_spill] sm:$0xff] %v6310_v29  ;;  %8264 = vst [vmem:[#allocation143_spill] sm:$0xff] %v6317_v55  ;;  %v2247_v45 = vmul.f32 %v4516_v46, %v6310_v29  ;;  %v2028_v42 = vadd.f32 %v2020_v32, %v1956_v50  ;;  %v4528_v13 = vpop.eup %4527  ;;  %v6335_v53 = vadd.f32 %v2291_v59, %v2005_v37  ;;  %v1848_v25 = vmul.f32 1.442695, %v1728_v56  ;;  %v8275_v56 = vld [vmem:[#allocation121_spill] sm:$0xff]  ;;  %v8312_v55 = vld [vmem:[#allocation52_spill] sm:$0xff] }
 0x557   : > { %8266 = vst [vmem:[#allocation144_spill] sm:$0xff] %v6323_v7  ;;  %v2154_v12 = vmul.f32 %v4526_v52, %v6325_v35  ;;  %v2043_v3 = vsel %vm612_vm2, %v2035_v54, 0.0  ;;  %2624 = vbcast.lane.b32.xlu0 %v5775_v26, 304  ;;  %2742 = vbcast.lane.b32.xlu1 %v5727_v18, 336  ;;  %v4530_v62 = vpop.eup %4529  ;;  %v2006_v59 = vmul.f32 %v6134_v40, %v8271_v17 }
 0x558   : > { %8267 = vst [vmem:[#allocation145_spill] sm:$0xff] %v6335_v53  ;;  %v6337_v21 = vadd.f32 %v2247_v45, %v1998_v58  ;;  %v2036_v63 = vmul.f32 %v2028_v42, %v5983_v47  ;;  %v6343_v46 = vpop.permute.xlu0 %2484  ;;  %v1987_v32 = vmul.f32 %v6140_v1, %v8272_v19  ;;  %v8274_v47 = vld [vmem:[#allocation102_spill] sm:$0xff]  ;;  %v4532_v37 = vpop.eup %4531  ;;  %v8276_v45 = vld [vmem:[#allocation93_spill] sm:$0xff]  ;;  %v1685_v43 = vmul.f32 %v6036_v9, %v6232_v41  ;;  %v8277_v19 = vld [vmem:[#allocation103_spill] sm:$0xff] }
 0x559   : > { %8269 = vst [vmem:[#allocation147_spill] sm:$0xff] %v6343_v46  ;;  %v6345_v50 = vpop.permute.xlu1 %2468  ;;  %v6351_v60 = vadd.f32 %v2154_v12, %v1979_v4  ;;  %v2037_v54 = vmul.f32 %v8275_v56, %v8274_v47  ;;  %v2013_v29 = vmul.f32 %v6323_v7, %v8276_v45  ;;  %v4534_v17 = vpop.eup %4533  ;;  %v2336_v4 = vmul.f32 %v4532_v37, %v6335_v53 }
 0x55a   : > { %8268 = vst [vmem:[#allocation146_spill] sm:$0xff] %v6337_v21  ;;  %8270 = vst [vmem:[#allocation148_spill] sm:$0xff] %v6345_v50  ;;  %v2292_v52 = vmul.f32 %v4524_v16, %v6337_v21  ;;  %v2044_v58 = vsel %vm612_vm2, %v2036_v63, 0.0  ;;  %v1689_v47 = vmul.f32 %v8277_v19, %v6202_v15  ;;  %v4536_v56 = vpop.eup %4535  ;;  %v8278_v50 = vld [vmem:[#allocation82_spill] sm:$0xff]  ;;  %4543 = vpow2.f32 %v1848_v25 }
 0x55b   : > { %8273 = vst [vmem:[#allocation75_spill] sm:$0xff] %v6351_v60  ;;  %v2199_v51 = vmul.f32 %v4530_v62, %v6351_v60  ;;  %v2045_v12 = vadd.f32 %v2044_v58, %v2043_v3  ;;  %v2014_v16 = vmul.f32 %v6323_v7, %v8278_v50  ;;  %2678 = vbcast.lane.b32.xlu0 %v5799_v30, 272  ;;  %v2046_v58 = vsel %vm612_vm2, %v2037_v54, 0.0 }
 0x55c   : > { %v6367_v63 = vadd.f32 %v2292_v52, %v2006_v59  ;;  %v6370_v45 = vpop.permute.xlu0 %2538  ;;  %v6376_v37 = vadd.f32 %v2336_v4, %v2013_v29  ;;  %v2065_v3 = vmul.f32 %v4536_v56, %v2028_v42  ;;  %2802 = vbcast.lane.b32.xlu1 %v5751_v22, 328  ;;  %v4538_v21 = vpop.eup %4537  ;;  %v8284_v59 = vld [vmem:[#allocation78_spill] sm:$0xff]  ;;  %v1762_v53 = vmul.f32 1.442695, %v1685_v43  ;;  %v8287_v4 = vld [vmem:[#allocation88_spill] sm:$0xff] }
 0x55d   : > { %8280 = vst [vmem:[#allocation102_spill] sm:$0xff] %v6370_v45  ;;  %v6372_v41 = vpop.permute.xlu1 %2472  ;;  %v6374_v62 = vadd.f32 %v2199_v51, %v1987_v32  ;;  %v1995_v25 = vmul.f32 %v6150_v49, %v8284_v59  ;;  %v1040_v52 = vld [vmem:[#allocation2 + $0x28] sm:$0xff]  ;;  %v2047_v60 = vadd.f32 %v2046_v58, %v2045_v12  ;;  %v8285_v51 = vld [vmem:[#allocation48_spill] sm:$0xff]  ;;  %v1687_v42 = vmul.f32 %v6036_v9, %v6262_v48 }
 0x55e   : > { %8279 = vst [vmem:[#allocation71_spill] sm:$0xff] %v6367_v63  ;;  %8281 = vst [vmem:[#allocation121_spill] sm:$0xff] %v6372_v41  ;;  %v2337_v50 = vmul.f32 %v4528_v13, %v6367_v63  ;;  %v1964_v29 = vmul.f32 %v6118_v23, %v8285_v51  ;;  %v1770_v32 = vmul.f32 1.442695, %v1689_v47  ;;  %v4540_v54 = vpop.eup %4539  ;;  %v2038_v56 = vmul.f32 %v6210_v0, %v8287_v4  ;;  %v1042_v51 = vld [vmem:[#allocation2 + $0x38] sm:$0xff]  ;;  %v8292_v0 = vld [vmem:[#allocation85_spill] sm:$0xff] }
 0x55f   : > { %8282 = vst [vmem:[#allocation93_spill] sm:$0xff] %v6374_v62  ;;  %8283 = vst [vmem:[#allocation82_spill] sm:$0xff] %v6376_v37  ;;  %v2244_v41 = vmul.f32 %v4534_v17, %v6374_v62  ;;  %2746 = vbcast.lane.b32.xlu0 %v5727_v18, 344  ;;  %v6399_v12 = vpop.eup %4541  ;;  %v2024_v59 = vmul.f32 %v4538_v21, %v1040_v52  ;;  %v2003_v47 = vmul.f32 %v6134_v40, %v8292_v0 }
 0x560   : > { %2395 = vst.msk [vmem:[#allocation2 + $0x10] sm:$0xff] %vm612_vm2, %v6376_v37  ;;  %v6390_v13 = vadd.f32 %v2337_v50, %v2014_v16  ;;  %v6395_v43 = vpop.permute.xlu0 %2515  ;;  %8290 = vst [vmem:[#allocation149_spill] sm:$0xff] %v6399_v12  ;;  %v2073_v63 = vadd.f32 %v2065_v3, %v1964_v29  ;;  %4545 = vpow2.f32 %v1770_v32  ;;  %1488 = vbcast.lane.b32.xlu1 %v5775_v26, 320  ;;  %v8293_v50 = vld [vmem:[#allocation53_spill] sm:$0xff]  ;;  %v2048_v29 = vsel %vm612_vm2, %v2038_v56, 0.0 }
 0x561   : > { %8288 = vst [vmem:[#allocation48_spill] sm:$0xff] %v6395_v43  ;;  %v6397_v17 = vpop.permute.xlu1 %2499  ;;  %v6401_v58 = vadd.f32 %v2244_v41, %v1995_v25  ;;  %4547 = vpow2.f32 %v1762_v53  ;;  %v1960_v4 = vmul.f32 %v6108_v33, %v8293_v50  ;;  %v1766_v41 = vmul.f32 1.442695, %v1687_v42  ;;  %v6411_v25 = vld [vmem:[#allocation25 + $0x20] sm:$0xff] }
 0x562   : > { %8286 = vst [vmem:[#allocation78_spill] sm:$0xff] %v6390_v13  ;;  %8289 = vst [vmem:[#allocation88_spill] sm:$0xff] %v6397_v17  ;;  %v2026_v21 = vmul.f32 %v6399_v12, %v1042_v51  ;;  %v8298_v50 = vld [vmem:[#allocation91_spill] sm:$0xff]  ;;  %v1684_v56 = vmul.f32 %v6036_v9, %v6411_v25 }
 0x563   : > { %8291 = vst [vmem:[#allocation150_spill] sm:$0xff] %v6401_v58  ;;  %2396 = vst.msk [vmem:[#allocation2 + $0x18] sm:$0xff] %vm612_vm2, %v6390_v13  ;;  %v2289_v16 = vmul.f32 %v4540_v54, %v6401_v58  ;;  %2862 = vbcast.lane.b32.xlu0 %v5775_v26, 320  ;;  %v2032_v32 = vadd.f32 %v2024_v59, %v1960_v4  ;;  %v8297_v54 = vld [vmem:[#allocation94_spill] sm:$0xff]  ;;  %v6423_v13 = vld [vmem:[#allocation25 + $0x30] sm:$0xff]  ;;  %v2011_v51 = vmul.f32 %v6323_v7, %v8298_v50 }
 0x564   : > { %v6415_v3 = vpop.permute.xlu0 %2565  ;;  %v2081_v0 = vmul.f32 %v2073_v63, %v8297_v54  ;;  %2774 = vbcast.lane.b32.xlu1 %v5739_v20, 336  ;;  %v4544_v42 = vpop.eup %4543  ;;  %v8299_v43 = vld [vmem:[#allocation47_spill] sm:$0xff]  ;;  %4549 = vpow2.f32 %v1766_v41  ;;  %v6437_v54 = vadd.f32 %v2048_v29, %v2047_v60  ;;  %v1695_v50 = vmul.f32 %v8277_v19, %v6262_v48 }
 0x565   : > { %8294 = vst [vmem:[#allocation85_spill] sm:$0xff] %v6415_v3  ;;  %v6417_v52 = vpop.permute.xlu1 %2476  ;;  %v6419_v53 = vadd.f32 %v2289_v16, %v2003_v47  ;;  %v1962_v37 = vmul.f32 %v6108_v33, %v8299_v43  ;;  %v1676_v47 = vmul.f32 %v6032_v2, %v6411_v25  ;;  %v8300_v16 = vld [vmem:[#allocation96_spill] sm:$0xff]  ;;  %v1678_v43 = vmul.f32 %v6032_v2, %v6423_v13 }
 0x566   : > { %8295 = vst [vmem:[#allocation53_spill] sm:$0xff] %v6417_v52  ;;  %v2083_v4 = vmul.f32 %v6230_v27, %v8300_v16  ;;  %v2089_v60 = vsel %vm612_vm2, %v2081_v0, 0.0  ;;  %v1713_v0 = vmul.f32 %v6094_v57, %v6202_v15  ;;  %v1724_v2 = vmul.f32 %v6111_v61, %v6411_v25 }
 0x567   : > { %8296 = vst [vmem:[#allocation151_spill] sm:$0xff] %v6419_v53  ;;  %v2334_v59 = vmul.f32 %v4544_v42, %v6419_v53  ;;  %v2034_v62 = vadd.f32 %v2026_v21, %v1962_v37  ;;  %v1744_v58 = vmul.f32 1.442695, %v1676_v47  ;;  %1436 = vbcast.lane.b32.xlu0 %v5751_v22, 344  ;;  %v8303_v42 = vld [vmem:[#allocation90_spill] sm:$0xff]  ;;  %v8306_v47 = vld [vmem:[#allocation112_spill] sm:$0xff] }
 0x568   : > { %v6444_v12 = vpop.permute.xlu0 %2519  ;;  %v2040_v53 = vmul.f32 %v2032_v32, %v8303_v42  ;;  %v8305_v37 = vld [vmem:[#allocation106_spill] sm:$0xff]  ;;  %2834 = vbcast.lane.b32.xlu1 %v5763_v24, 328  ;;  %v1760_v21 = vmul.f32 1.442695, %v1684_v56  ;;  %v1748_v29 = vmul.f32 1.442695, %v1678_v43  ;;  %v2080_v16 = vmul.f32 %v6298_v5, %v8306_v47 }
 0x569   : > { %8301 = vst [vmem:[#allocation94_spill] sm:$0xff] %v6444_v12  ;;  %v6446_v3 = vpop.permute.xlu1 %2453  ;;  %v6449_v27 = vadd.f32 %v2334_v59, %v2011_v51  ;;  %v1697_v41 = vmul.f32 %v8305_v37, %v6202_v15  ;;  %4551 = vpow2.f32 %v1744_v58  ;;  %v1705_v51 = vmul.f32 %v6080_v39, %v6202_v15  ;;  %v8307_v59 = vld [vmem:[#allocation117_spill] sm:$0xff]  ;;  %v8309_v43 = vld [vmem:[#allocation92_spill] sm:$0xff] }
 0x56a   : > { %8302 = vst [vmem:[#allocation91_spill] sm:$0xff] %v6446_v3  ;;  %v4546_v12 = vpop.eup %4545  ;;  %v8308_v42 = vld [vmem:[#allocation125_spill] sm:$0xff]  ;;  %v1692_v58 = vmul.f32 %v8277_v19, %v6411_v25  ;;  %v2042_v17 = vmul.f32 %v2034_v62, %v8309_v43  ;;  %4553 = vpow2.f32 %v1748_v29  ;;  %v2088_v47 = vsel %vm612_vm2, %v2080_v16, 0.0 }
 0x56b   : > { %8304 = vst [vmem:[#allocation47_spill] sm:$0xff] %v6449_v27  ;;  %2393 = vst.msk [vmem:[#allocation2] sm:$0xff] %vm612_vm2, %v6449_v27  ;;  %v2082_v3 = vmul.f32 %v8308_v42, %v8307_v59  ;;  %v4548_v56 = vpop.eup %4547  ;;  %v2110_v5 = vmul.f32 %v4546_v12, %v2073_v63  ;;  %1552 = vbcast.lane.b32.xlu0 %v5799_v30, 320  ;;  %v1786_v34 = vmul.f32 1.442695, %v1697_v41  ;;  %4555 = vpow2.f32 %v1760_v21  ;;  %v8313_v43 = vld [vmem:[#allocation49_spill] sm:$0xff] }
 0x56c   : > { %v6470_v27 = vpop.permute.xlu0 %2573  ;;  %v2069_v46 = vmul.f32 %v4548_v56, %v2032_v32  ;;  %v1972_v59 = vmul.f32 %v6131_v44, %v8312_v55  ;;  %v2090_v42 = vadd.f32 %v2089_v60, %v2088_v47  ;;  %1464 = vbcast.lane.b32.xlu1 %v5763_v24, 336  ;;  %v1700_v12 = vmul.f32 %v8305_v37, %v6411_v25  ;;  %v8314_v32 = vld [vmem:[#allocation50_spill] sm:$0xff] }
 0x56d   : > { %8310 = vst [vmem:[#allocation96_spill] sm:$0xff] %v6470_v27  ;;  %v6472_v45 = vpop.permute.xlu1 %2507  ;;  %v2091_v63 = vsel %vm612_vm2, %v2082_v3, 0.0  ;;  %v1776_v29 = vmul.f32 1.442695, %v1692_v58  ;;  %v2093_v16 = vsel %vm612_vm2, %v2083_v4, 0.0  ;;  %v6485_v41 = vmul.f32 %v6118_v23, %v8314_v32 }
 0x56e   : > { %8311 = vst [vmem:[#allocation90_spill] sm:$0xff] %v6472_v45  ;;  %v1968_v45 = vmul.f32 %v6118_v23, %v8313_v43  ;;  %v2092_v55 = vadd.f32 %v2091_v63, %v2090_v42  ;;  %v6488_v60 = vsel %vm612_vm2, %v2040_v53, 0.0  ;;  %v6491_v21 = vsel %vm612_vm2, %v2042_v17, 0.0  ;;  %v6502_v47 = vpop.eup %4549 }
 0x56f   : > { %v6493_v3 = vmul.f32 1.442695, %v1695_v50  ;;  %v6495_v56 = vadd.f32 %v2110_v5, %v1972_v59  ;;  %2778 = vbcast.lane.b32.xlu0 %v5739_v20, 344  ;;  %8317 = vst [vmem:[#allocation117_spill] sm:$0xff] %v6502_v47  ;;  %4557 = vpow2.f32 %v1786_v34  ;;  %v6506_v53 = vmul.f32 1.442695, %v1705_v51 }
 0x570   : > { %v6498_v4 = vpop.permute.xlu0 %2550  ;;  %v6504_v43 = vadd.f32 %v2069_v46, %v1968_v45  ;;  %v6508_v42 = vmul.f32 1.442695, %v1713_v0  ;;  %1524 = vbcast.lane.b32.xlu1 %v5787_v28, 328  ;;  %v6512_v17 = vmul.f32 %v6502_v47, %v2034_v62  ;;  %v1039_v50 = vld [vmem:[#allocation2 + $0x20] sm:$0xff]  ;;  %v1708_v59 = vmul.f32 %v6080_v39, %v6411_v25  ;;  %v8319_v46 = vld [vmem:[#allocation107_spill] sm:$0xff] }
 0x571   : > { %8315 = vst [vmem:[#allocation106_spill] sm:$0xff] %v6498_v4  ;;  %v6500_v58 = vpop.permute.xlu1 %2534  ;;  %4559 = vpow2.f32 %v1776_v29  ;;  %v1792_v63 = vmul.f32 1.442695, %v1700_v12  ;;  %v3329_v45 = vmul.f32 %v8319_v46, %v6108_v33  ;;  %v1716_v51 = vmul.f32 %v6094_v57, %v6411_v25  ;;  %v8321_v62 = vld [vmem:[#allocation104_spill] sm:$0xff]  ;;  %v8322_v47 = vld [vmem:[#allocation51_spill] sm:$0xff]  ;;  %v8323_v12 = vld [vmem:[#allocation54_spill] sm:$0xff] }
 0x572   : > { %8316 = vst [vmem:[#allocation112_spill] sm:$0xff] %v6500_v58  ;;  %8318 = vst [vmem:[#allocation125_spill] sm:$0xff] %v6504_v43  ;;  %v2409_v5 = vld [vmem:[#allocation2] sm:$0xff]  ;;  %v6521_v0 = vadd.f32 %v2093_v16, %v2092_v55  ;;  %v2126_v4 = vmul.f32 %v6495_v56, %v8321_v62  ;;  %v1959_v58 = vmul.f32 %v6108_v33, %v8322_v47  ;;  %v1041_v29 = vld [vmem:[#allocation2 + $0x30] sm:$0xff] }
 0x573   : > { %v3393_v34 = vmul.f32 %v6246_v38, %v2409_v5  ;;  %v6523_v32 = vpop.eup %4551  ;;  %v1961_v27 = vmul.f32 %v6108_v33, %v8323_v12  ;;  %v1686_v38 = vmul.f32 %v6036_v9, %v6423_v13  ;;  %2894 = vbcast.lane.b32.xlu0 %v5787_v28, 320  ;;  %v8327_v62 = vld [vmem:[#allocation116_spill] sm:$0xff]  ;;  %4561 = vpow2.f32 %v1792_v63 }
 0x574   : > { %8320 = vst [vmem:[#allocation92_spill] sm:$0xff] %v6523_v32  ;;  %v6534_v5 = vpop.permute.xlu0 %2600  ;;  %v2023_v55 = vmul.f32 %v6523_v32, %v1039_v50  ;;  %v3337_v47 = vmul.f32 %v8327_v62, %v6118_v23  ;;  %2651 = vbcast.lane.b32.xlu1 %v5787_v28, 288  ;;  %v6546_v12 = vpop.eup %4553  ;;  %v1808_v9 = vmul.f32 1.442695, %v1708_v59  ;;  %v2134_v52 = vsel %vm612_vm2, %v2126_v4, 0.0  ;;  %v8328_v32 = vld [vmem:[#allocation58_spill] sm:$0xff] }
 0x575   : > { %8324 = vst [vmem:[#allocation52_spill] sm:$0xff] %v6534_v5  ;;  %v6536_v16 = vpop.permute.xlu1 %2511  ;;  %v6539_v46 = vadd.f32 %v3393_v34, %v3329_v45  ;;  %v1694_v5 = vmul.f32 %v8277_v19, %v6423_v13  ;;  %v2025_v50 = vmul.f32 %v6546_v12, %v1041_v29  ;;  %v1824_v34 = vmul.f32 1.442695, %v1716_v51  ;;  %v6553_v62 = vpop.eup %4555  ;;  %v8329_v59 = vld [vmem:[#allocation130_spill] sm:$0xff]  ;;  %v8334_v4 = vld [vmem:[#allocation45_spill] sm:$0xff] }
 0x576   : > { %8325 = vst [vmem:[#allocation49_spill] sm:$0xff] %v6536_v16  ;;  %v1764_v16 = vmul.f32 1.442695, %v1686_v38  ;;  %v2031_v18 = vadd.f32 %v2023_v55, %v1959_v58  ;;  %v1967_v6 = vmul.f32 %v6118_v23, %v8328_v32  ;;  %v2125_v63 = vmul.f32 %v6325_v35, %v8329_v59  ;;  %v8332_v38 = vld [vmem:[#allocation105_spill] sm:$0xff] }
 0x577   : > { %8326 = vst [vmem:[#allocation50_spill] sm:$0xff] %v6539_v46  ;;  %v3439_v45 = vmul.f32 %v6274_v36, %v6539_v46  ;;  %1408 = vbcast.lane.b32.xlu0 %v5739_v20, 352  ;;  %v2033_v55 = vadd.f32 %v2025_v50, %v1961_v27  ;;  %v1780_v32 = vmul.f32 1.442695, %v1694_v5  ;;  %v2127_v35 = vmul.f32 %v6208_v31, %v6238_v14 }
 0x578   : > { %4563 = vpow2.f32 %v1764_v16  ;;  %v6561_v58 = vpop.permute.xlu0 %2554  ;;  %v2039_v36 = vmul.f32 %v2031_v18, %v8332_v38  ;;  %v2068_v51 = vmul.f32 %v6553_v62, %v2031_v18  ;;  %2714 = vbcast.lane.b32.xlu1 %v8334_v4, 344  ;;  %v2133_v16 = vsel %vm612_vm2, %v2125_v63, 0.0  ;;  %v8338_v63 = vld [vmem:[#allocation123_spill] sm:$0xff] }
 0x579   : > { %8330 = vst [vmem:[#allocation107_spill] sm:$0xff] %v6561_v58  ;;  %v6563_v29 = vpop.permute.xlu1 %2488  ;;  %v6567_v46 = vadd.f32 %v3439_v45, %v3337_v47  ;;  %4565 = vpow2.f32 %v1808_v9  ;;  %v4558_v59 = vpop.eup %4557  ;;  %v1732_v5 = vmul.f32 %v6174_v8, %v6411_v25  ;;  %v2135_v47 = vadd.f32 %v2134_v52, %v2133_v16  ;;  %v8341_v16 = vld [vmem:[#allocation98_spill] sm:$0xff] }
 0x57a   : > { %8331 = vst [vmem:[#allocation104_spill] sm:$0xff] %v6563_v29  ;;  %v2050_v58 = vsel %vm612_vm2, %v2039_v36, 0.0  ;;  %v8335_v29 = vld [vmem:[#allocation108_spill] sm:$0xff]  ;;  %v2076_v38 = vadd.f32 %v2068_v51, %v1967_v6  ;;  %v2136_v31 = vsel %vm612_vm2, %v2127_v35, 0.0  ;;  %4567 = vpow2.f32 %v1824_v34  ;;  %v8337_v6 = vld [vmem:[#allocation63_spill] sm:$0xff] }
 0x57b   : > { %8333 = vst [vmem:[#allocation51_spill] sm:$0xff] %v6567_v46  ;;  %v2041_v19 = vmul.f32 %v2033_v55, %v8335_v29  ;;  %v6577_v18 = vmul.f32 %v6294_v10, %v6567_v46  ;;  %v6579_v27 = vpop.eup %4559  ;;  %v2051_v9 = vadd.f32 %v2050_v58, %v6437_v54  ;;  %1528 = vbcast.lane.b32.xlu0 %v5787_v28, 336  ;;  %v1840_v52 = vmul.f32 1.442695, %v1724_v2  ;;  %v8395_v46 = vld [vmem:[#allocation135_spill] sm:$0xff] }
 0x57c   : > { %v6586_v14 = vpop.permute.xlu0 %2608  ;;  %v1975_v10 = vmul.f32 %v6131_v44, %v8337_v6  ;;  %v2113_v45 = vmul.f32 %v6579_v27, %v2076_v38  ;;  %v2084_v54 = vmul.f32 %v2076_v38, %v8338_v63  ;;  %2806 = vbcast.lane.b32.xlu1 %v5751_v22, 336  ;;  %4569 = vpow2.f32 %v1780_v32 }
 0x57d   : > { %8336 = vst [vmem:[#allocation54_spill] sm:$0xff] %v6586_v14  ;;  %v6588_v50 = vpop.permute.xlu1 %2542  ;;  %v2053_v25 = vadd.f32 %v6488_v60, %v2051_v9  ;;  %v6596_v58 = vadd.f32 %v2136_v31, %v2135_v47  ;;  %4571 = vpow2.f32 %v6506_v53  ;;  %v2054_v29 = vsel %vm612_vm2, %v2041_v19, 0.0  ;;  %v6603_v51 = vpop.eup %4561  ;;  %v8343_v9 = vld [vmem:[#allocation68_spill] sm:$0xff] }
 0x57e   : > { %v6600_v34 = vadd.f32 %v2113_v45, %v1975_v10  ;;  %v2095_v36 = vsel %vm612_vm2, %v2084_v54, 0.0  ;;  %v2085_v35 = vmul.f32 %v6504_v43, %v8341_v16  ;;  %v2155_v38 = vmul.f32 %v4558_v59, %v6495_v56  ;;  %v8346_v54 = vld [vmem:[#allocation59_spill] sm:$0xff]  ;;  %v8375_v14 = vld [vmem:[#allocation84_spill] sm:$0xff] }
 0x57f   : > { %8339 = vst [vmem:[#allocation116_spill] sm:$0xff] %v6596_v58  ;;  %v2055_v60 = vadd.f32 %v2054_v29, %v2053_v25  ;;  %v2096_v2 = vadd.f32 %v2095_v36, %v6521_v0  ;;  %2655 = vbcast.lane.b32.xlu0 %v5787_v28, 296  ;;  %v1856_v19 = vmul.f32 1.442695, %v1732_v5  ;;  %v1983_v47 = vmul.f32 %v6137_v11, %v8343_v9  ;;  %v8344_v0 = vld [vmem:[#allocation57_spill] sm:$0xff]  ;;  %v8349_v9 = vld [vmem:[#allocation74_spill] sm:$0xff] }
 0x580   : > { %8340 = vst [vmem:[#allocation58_spill] sm:$0xff] %v6600_v34  ;;  %v6610_v32 = vpop.permute.xlu0 %2585  ;;  %v2158_v31 = vmul.f32 %v6603_v51, %v6600_v34  ;;  %v1702_v6 = vmul.f32 %v8305_v37, %v6423_v13  ;;  %2866 = vbcast.lane.b32.xlu1 %v5775_v26, 328  ;;  %v1980_v59 = vmul.f32 %v6137_v11, %v8344_v0  ;;  %4573 = vpow2.f32 %v1840_v52 }
 0x581   : > { %8342 = vst [vmem:[#allocation130_spill] sm:$0xff] %v6610_v32  ;;  %v6612_v53 = vpop.permute.xlu1 %2569  ;;  %v6626_v10 = vadd.f32 %v6491_v21, %v2055_v60  ;;  %v1710_v5 = vmul.f32 %v6080_v39, %v6423_v13  ;;  %v6632_v45 = vadd.f32 %v6512_v17, %v6485_v41  ;;  %v1969_v25 = vmul.f32 %v6118_v23, %v8346_v54 }
 0x582   : > { %v6621_v56 = vpop.eup %4563  ;;  %v6634_v63 = vadd.f32 %v2158_v31, %v1983_v47  ;;  %v2097_v21 = vsel %vm612_vm2, %v2085_v35, 0.0  ;;  %v1721_v52 = vmul.f32 %v6111_v61, %v6202_v15  ;;  %v6644_v16 = vadd.f32 %v2155_v38, %v1980_v59  ;;  %v8351_v59 = vld [vmem:[#allocation101_spill] sm:$0xff] }
 0x583   : > { %v2070_v29 = vmul.f32 %v6621_v56, %v2033_v55  ;;  %v6639_v36 = vpop.eup %4565  ;;  %v1796_v60 = vmul.f32 1.442695, %v1702_v6  ;;  %2718 = vbcast.lane.b32.xlu0 %v8334_v4, 352  ;;  %4575 = vpow2.f32 %v1856_v19  ;;  %v1991_v55 = vmul.f32 %v6140_v1, %v8349_v9  ;;  %v8353_v9 = vld [vmem:[#allocation127_spill] sm:$0xff] }
 0x584   : > { %8345 = vst [vmem:[#allocation105_spill] sm:$0xff] %v6634_v63  ;;  %8347 = vst [vmem:[#allocation108_spill] sm:$0xff] %v6644_v16  ;;  %v6647_v41 = vpop.permute.xlu0 %2635  ;;  %v2203_v47 = vmul.f32 %v6639_v36, %v6634_v63  ;;  %1496 = vbcast.lane.b32.xlu1 %v5775_v26, 336  ;;  %v2098_v31 = vadd.f32 %v2097_v21, %v2096_v2  ;;  %v1718_v38 = vmul.f32 %v6094_v57, %v6423_v13  ;;  %v6658_v0 = vpop.eup %4567 }
 0x585   : > { %8348 = vst [vmem:[#allocation63_spill] sm:$0xff] %v6647_v41  ;;  %v6649_v17 = vpop.permute.xlu1 %2546  ;;  %v2078_v35 = vadd.f32 %v2070_v29, %v1969_v25  ;;  %4577 = vpow2.f32 %v1796_v60  ;;  %v1812_v6 = vmul.f32 1.442695, %v1710_v5  ;;  %8350 = vst [vmem:[#allocation123_spill] sm:$0xff] %v6658_v0  ;;  %v2087_v19 = vmul.f32 %v6632_v45, %v8351_v59  ;;  %v8354_v29 = vld [vmem:[#allocation81_spill] sm:$0xff] }
 0x586   : > { %4579 = vpow2.f32 %v6508_v42  ;;  %v6663_v54 = vadd.f32 %v2203_v47, %v1991_v55  ;;  %v6666_v25 = vpop.eup %4569  ;;  %v1999_v2 = vmul.f32 %v6150_v49, %v8354_v29  ;;  %v1726_v59 = vmul.f32 %v6111_v61, %v6423_v13 }
 0x587   : > { %v2086_v32 = vmul.f32 %v2078_v35, %v8353_v9  ;;  %4581 = vpow2.f32 %v6493_v3  ;;  %2810 = vbcast.lane.b32.xlu0 %v5751_v22, 344  ;;  %v4572_v60 = vpop.eup %4571  ;;  %v2115_v47 = vmul.f32 %v6666_v25, %v2078_v35  ;;  %v1828_v29 = vmul.f32 1.442695, %v1718_v38  ;;  %v8357_v35 = vld [vmem:[#allocation62_spill] sm:$0xff] }
 0x588   : > { %8352 = vst [vmem:[#allocation98_spill] sm:$0xff] %v6663_v54  ;;  %v6672_v5 = vpop.permute.xlu0 %2589  ;;  %v2248_v42 = vmul.f32 %v6658_v0, %v6663_v54  ;;  %1556 = vbcast.lane.b32.xlu1 %v5799_v30, 328  ;;  %v2200_v3 = vmul.f32 %v4572_v60, %v6644_v16  ;;  %4583 = vpow2.f32 %v1812_v6  ;;  %v2101_v63 = vsel %vm612_vm2, %v2087_v19, 0.0  ;;  %v8356_v54 = vld [vmem:[#allocation64_spill] sm:$0xff] }
 0x589   : > { %v6674_v21 = vpop.permute.xlu1 %2523  ;;  %v2099_v55 = vsel %vm612_vm2, %v2086_v32, 0.0  ;;  %v1834_v34 = vmul.f32 1.442695, %v1721_v52  ;;  %v1977_v32 = vmul.f32 %v6131_v44, %v8356_v54  ;;  %v1988_v43 = vmul.f32 %v6140_v1, %v8357_v35  ;;  %v8359_v52 = vld [vmem:[#allocation87_spill] sm:$0xff] }
 0x58a   : > { %v2100_v9 = vadd.f32 %v2099_v55, %v2098_v31  ;;  %v6685_v58 = vadd.f32 %v2248_v42, %v1999_v2  ;;  %v4574_v0 = vpop.eup %4573  ;;  %v1734_v60 = vmul.f32 %v6174_v8, %v6423_v13  ;;  %v2007_v6 = vmul.f32 %v6134_v40, %v8359_v52  ;;  %v8367_v52 = vld [vmem:[#allocation69_spill] sm:$0xff] }
 0x58b   : > { %2926 = vbcast.lane.b32.xlu0 %v5799_v30, 320  ;;  %v1844_v54 = vmul.f32 1.442695, %v1726_v59  ;;  %v6703_v2 = vadd.f32 %v2115_v47, %v1977_v32  ;;  %4585 = vpow2.f32 %v1828_v29  ;;  %v1703_v13 = vmul.f32 %v8305_v37, %v6262_v48 }
 0x58c   : > { %8355 = vst [vmem:[#allocation68_spill] sm:$0xff] %v6685_v58  ;;  %v6691_v41 = vadd.f32 %v2101_v63, %v2100_v9  ;;  %v6696_v31 = vpop.permute.xlu0 %2643  ;;  %v2293_v19 = vmul.f32 %v4574_v0, %v6685_v58  ;;  %2838 = vbcast.lane.b32.xlu1 %v5763_v24, 336  ;;  %v6706_v63 = vadd.f32 %v2200_v3, %v1988_v43  ;;  %4587 = vpow2.f32 %v1834_v34  ;;  %v8364_v0 = vld [vmem:[#allocation95_spill] sm:$0xff] }
 0x58d   : > { %8358 = vst [vmem:[#allocation57_spill] sm:$0xff] %v6696_v31  ;;  %v6698_v38 = vpop.permute.xlu1 %2577  ;;  %8360 = vst [vmem:[#allocation59_spill] sm:$0xff] %v6703_v2  ;;  %v4576_v42 = vpop.eup %4575  ;;  %v1711_v9 = vmul.f32 %v6080_v39, %v6262_v48  ;;  %v2015_v47 = vmul.f32 %v6323_v7, %v8364_v0  ;;  %v1860_v59 = vmul.f32 1.442695, %v1734_v60  ;;  %v1798_v32 = vmul.f32 1.442695, %v1703_v13 }
 0x58e   : > { %8361 = vst [vmem:[#allocation74_spill] sm:$0xff] %v6706_v63  ;;  %v6710_v55 = vadd.f32 %v2293_v19, %v2007_v6  ;;  %4589 = vpow2.f32 %v1844_v54  ;;  %v1985_v6 = vmul.f32 %v6137_v11, %v8367_v52  ;;  %v1719_v0 = vmul.f32 %v6094_v57, %v6262_v48 }
 0x58f   : > { %v6714_v35 = vpop.eup %4577  ;;  %1440 = vbcast.lane.b32.xlu0 %v5751_v22, 352  ;;  %4591 = vpow2.f32 %v1798_v32  ;;  %v1814_v58 = vmul.f32 1.442695, %v1711_v9  ;;  %v6752_v9 = vmul.f32 %v6323_v7, %v8375_v14  ;;  %v8377_v32 = vld [vmem:[#allocation67_spill] sm:$0xff] }
 0x590   : > { %8362 = vst [vmem:[#allocation101_spill] sm:$0xff] %v6710_v55  ;;  %8363 = vst [vmem:[#allocation127_spill] sm:$0xff] %v6714_v35  ;;  %v6719_v43 = vpop.permute.xlu0 %2706  ;;  %v4580_v29 = vpop.eup %4579  ;;  %v2338_v34 = vmul.f32 %v4576_v42, %v6710_v55  ;;  %v2160_v19 = vmul.f32 %v6714_v35, %v6703_v2  ;;  %2898 = vbcast.lane.b32.xlu1 %v5787_v28, 328  ;;  %v8373_v2 = vld [vmem:[#allocation80_spill] sm:$0xff]  ;;  %4593 = vpow2.f32 %v1860_v59 }
 0x591   : > { %8365 = vst [vmem:[#allocation81_spill] sm:$0xff] %v6719_v43  ;;  %v6721_v3 = vpop.permute.xlu1 %2604  ;;  %v6729_v60 = vpop.eup %4581  ;;  %v2245_v13 = vmul.f32 %v4580_v29, %v6706_v63  ;;  %v6746_v31 = vmul.f32 %v6323_v7, %v8373_v2  ;;  %v8374_v29 = vld [vmem:[#allocation83_spill] sm:$0xff]  ;;  %v8379_v2 = vld [vmem:[#allocation76_spill] sm:$0xff]  ;;  %4595 = vpow2.f32 %v1814_v58 }
 0x592   : > { %8366 = vst [vmem:[#allocation64_spill] sm:$0xff] %v6721_v3  ;;  %8368 = vst [vmem:[#allocation62_spill] sm:$0xff] %v6729_v60  ;;  %v8369_v3 = vld [vmem:[#allocation79_spill] sm:$0xff]  ;;  %v6738_v42 = vadd.f32 %v2338_v34, %v2015_v47  ;;  %v6740_v52 = vadd.f32 %v2160_v19, %v1985_v6  ;;  %v6742_v55 = vpop.eup %4583  ;;  %v2001_v63 = vmul.f32 %v6150_v49, %v8374_v29 }
 0x593   : > { %v6736_v54 = vmul.f32 %v6134_v40, %v8369_v3  ;;  %8372 = vst [vmem:[#allocation69_spill] sm:$0xff] %v6742_v55  ;;  %8376 = vst [vmem:[#allocation79_spill] sm:$0xff] %v6752_v9  ;;  %v1996_v3 = vmul.f32 %v6150_v49, %v8377_v32  ;;  %1560 = vbcast.lane.b32.xlu0 %v5799_v30, 336  ;;  %v2116_v34 = vmul.f32 %v6729_v60, %v6632_v45  ;;  %v8381_v9 = vld [vmem:[#allocation86_spill] sm:$0xff]  ;;  %v8387_v58 = vld [vmem:[#allocation111_spill] sm:$0xff] }
 0x594   : > { %8370 = vst [vmem:[#allocation87_spill] sm:$0xff] %v6738_v42  ;;  %8371 = vst [vmem:[#allocation95_spill] sm:$0xff] %v6740_v52  ;;  %v6757_v47 = vpop.permute.xlu0 %2738  ;;  %v1993_v6 = vmul.f32 %v6140_v1, %v8379_v2  ;;  %v2205_v14 = vmul.f32 %v6742_v55, %v6740_v52  ;;  %1468 = vbcast.lane.b32.xlu1 %v5763_v24, 344  ;;  %v1727_v32 = vmul.f32 %v6111_v61, %v6262_v48  ;;  %v8384_v52 = vld [vmem:[#allocation56_spill] sm:$0xff] }
 0x595   : > { %8378 = vst [vmem:[#allocation80_spill] sm:$0xff] %v6757_v47  ;;  %2397 = vst.msk [vmem:[#allocation2 + $0x20] sm:$0xff] %vm612_vm2, %v6738_v42  ;;  %v6768_v19 = vpop.permute.xlu1 %2581  ;;  %v6770_v29 = vadd.f32 %v2245_v13, %v1996_v3  ;;  %v1830_v45 = vmul.f32 1.442695, %v1719_v0  ;;  %v6776_v59 = vmul.f32 %v6323_v7, %v8381_v9  ;;  %v8382_v42 = vld [vmem:[#allocation89_spill] sm:$0xff]  ;;  %v1978_v4 = vmul.f32 %v6131_v44, %v8384_v52  ;;  %v6784_v47 = vpop.eup %4585  ;;  %v8389_v9 = vld [vmem:[#allocation122_spill] sm:$0xff] }
 0x596   : > { %v2009_v2 = vmul.f32 %v6134_v40, %v8382_v42  ;;  %v6780_v16 = vadd.f32 %v2205_v14, %v1993_v6  ;;  %8385 = vst [vmem:[#allocation67_spill] sm:$0xff] %v6784_v47  ;;  %v8386_v13 = vld [vmem:[#allocation97_spill] sm:$0xff]  ;;  %v6790_v0 = vmul.f32 %v8387_v58, %v6108_v33  ;;  %v3333_v61 = vmul.f32 %v8389_v9, %v6108_v33  ;;  %v4588_v52 = vpop.eup %4587  ;;  %v2412_v58 = vld [vmem:[#allocation2 + $0x18] sm:$0xff] }
 0x597   : > { %8380 = vst [vmem:[#allocation83_spill] sm:$0xff] %v6770_v29  ;;  %v2017_v3 = vmul.f32 %v6323_v7, %v8386_v13  ;;  %v1735_v42 = vmul.f32 %v6174_v8, %v6262_v48  ;;  %2842 = vbcast.lane.b32.xlu0 %v5763_v24, 344  ;;  %v8391_v14 = vld [vmem:[#allocation129_spill] sm:$0xff]  ;;  %v8392_v13 = vld [vmem:[#allocation132_spill] sm:$0xff]  ;;  %v6807_v9 = vadd.f32 %v2116_v34, %v1978_v4  ;;  %v2058_v55 = vrot.slane %v6626_v10, 4 }
 0x598   : > { %8383 = vst [vmem:[#allocation84_spill] sm:$0xff] %v6780_v16  ;;  %8388 = vst [vmem:[#allocation76_spill] sm:$0xff] %v6790_v0  ;;  %v6797_v6 = vpop.permute.xlu0 %1428  ;;  %v3345_v60 = vmul.f32 %v8391_v14, %v6131_v44  ;;  %v6803_v7 = vmul.f32 %v8392_v13, %v6108_v33  ;;  %v2250_v43 = vmul.f32 %v6784_v47, %v6780_v16  ;;  %2628 = vbcast.lane.b32.xlu1 %v5775_v26, 312  ;;  %v4590_v57 = vpop.eup %4589  ;;  %v8397_v4 = vld [vmem:[#allocation136_spill] sm:$0xff] }
 0x599   : > { %8390 = vst [vmem:[#allocation86_spill] sm:$0xff] %v6797_v6  ;;  %8393 = vst [vmem:[#allocation89_spill] sm:$0xff] %v6807_v9  ;;  %v6810_v48 = vpop.permute.xlu1 %2558  ;;  %v6813_v6 = vmul.f32 %v4588_v52, %v6770_v29  ;;  %4597 = vpow2.f32 %v1830_v45  ;;  %v1846_v14 = vmul.f32 1.442695, %v1727_v32  ;;  %v6821_v16 = vmul.f32 %v8395_v46, %v6131_v44  ;;  %v6829_v52 = vpop.eup %4591  ;;  %v8400_v32 = vld [vmem:[#allocation140_spill] sm:$0xff] }
 0x59a   : > { %v6817_v13 = vadd.f32 %v6577_v18, %v3345_v60  ;;  %v6825_v34 = vmul.f32 %v8397_v4, %v6108_v33  ;;  %v6827_v47 = vadd.f32 %v2250_v43, %v2001_v63  ;;  %v2103_v45 = vrot.slane %v6691_v41, 4  ;;  %v8401_v18 = vld [vmem:[#allocation128_spill] sm:$0xff]  ;;  %v8404_v43 = vld [vmem:[#allocation61_spill] sm:$0xff] }
 0x59b   : > { %8396 = vst [vmem:[#allocation97_spill] sm:$0xff] %v6821_v16  ;;  %v3332_v0 = vmul.f32 %v8400_v32, %v6108_v33  ;;  %v3396_v60 = vmul.f32 %v8401_v18, %v2412_v58  ;;  %1412 = vbcast.lane.b32.xlu0 %v5739_v20, 360  ;;  %v8403_v16 = vld [vmem:[#allocation92_spill] sm:$0xff]  ;;  %v2161_v35 = vmul.f32 %v6829_v52, %v6807_v9  ;;  %4599 = vpow2.f32 %v1846_v14  ;;  %v4594_v18 = vpop.eup %4593  ;;  %v8411_v14 = vld [vmem:[#allocation46_spill] sm:$0xff] }
 0x59c   : > { %8394 = vst [vmem:[#allocation56_spill] sm:$0xff] %v6817_v13  ;;  %8398 = vst [vmem:[#allocation111_spill] sm:$0xff] %v6825_v34  ;;  %v2413_v29 = vld [vmem:[#allocation2 + $0x20] sm:$0xff]  ;;  %v1862_v13 = vmul.f32 1.442695, %v1735_v42  ;;  %v6836_v46 = vpop.permute.xlu0 %2770  ;;  %v2295_v63 = vmul.f32 %v4590_v57, %v6827_v47  ;;  %v1986_v34 = vmul.f32 %v6137_v11, %v8404_v43  ;;  %2682 = vbcast.lane.b32.xlu1 %v5799_v30, 280  ;;  %v6858_v9 = vpop.eup %4595 }
 0x59d   : > { %8399 = vst [vmem:[#allocation122_spill] sm:$0xff] %v6827_v47  ;;  %8402 = vst [vmem:[#allocation129_spill] sm:$0xff] %v6836_v46  ;;  %v3397_v4 = vmul.f32 %v8403_v16, %v2413_v29  ;;  %v6845_v32 = vpop.permute.xlu1 %2612  ;;  %v2059_v42 = vadd.f32 %v2058_v55, %v6626_v10  ;;  %v1729_v58 = vmul.f32 %v6174_v8, %v6202_v15  ;;  %v8408_v29 = vld [vmem:[#allocation53_spill] sm:$0xff]  ;;  %v8410_v46 = vld [vmem:[#allocation66_spill] sm:$0xff] }
 0x59e   : > { %8405 = vst [vmem:[#allocation132_spill] sm:$0xff] %v6845_v32  ;;  %v6852_v57 = vadd.f32 %v2295_v63, %v2009_v2  ;;  %v3341_v43 = vmul.f32 %v8408_v29, %v6118_v23  ;;  %v6856_v47 = vadd.f32 %v2161_v35, %v1986_v34  ;;  %v2104_v32 = vadd.f32 %v2103_v45, %v6691_v41  ;;  %v6863_v55 = vld [vmem:[#allocation25 + $0x8] sm:$0xff] }
 0x59f   : > { %v6850_v16 = vadd.f32 %v3397_v4, %v3333_v61  ;;  %v1994_v10 = vmul.f32 %v6140_v1, %v8410_v46  ;;  %v1850_v15 = vmul.f32 1.442695, %v1729_v58  ;;  %1532 = vbcast.lane.b32.xlu0 %v5787_v28, 344  ;;  %4601 = vpow2.f32 %v1862_v13  ;;  %v8414_v46 = vld [vmem:[#allocation49_spill] sm:$0xff]  ;;  %v8418_v13 = vld [vmem:[#allocation99_spill] sm:$0xff] }
 0x5a0   : > { %8407 = vst [vmem:[#allocation136_spill] sm:$0xff] %v6852_v57  ;;  %8409 = vst [vmem:[#allocation140_spill] sm:$0xff] %v6856_v47  ;;  %v2340_v61 = vmul.f32 %v4594_v18, %v6852_v57  ;;  %v2206_v35 = vmul.f32 %v6858_v9, %v6856_v47  ;;  %2750 = vbcast.lane.b32.xlu1 %v8411_v14, 352  ;;  %v6872_v41 = vpop.permute.xlu0 %1460  ;;  %v2060_v45 = vrot.slane %v2059_v42, 2  ;;  %v2105_v57 = vrot.slane %v2104_v32, 2 }
 0x5a1   : > { %8406 = vst [vmem:[#allocation135_spill] sm:$0xff] %v6850_v16  ;;  %v3443_v2 = vmul.f32 %v6553_v62, %v6850_v16  ;;  %8412 = vst [vmem:[#allocation128_spill] sm:$0xff] %v6872_v41  ;;  %v6874_v34 = vpop.permute.xlu1 %2639  ;;  %v3349_v4 = vmul.f32 %v8414_v46, %v6131_v44  ;;  %4603 = vpow2.f32 %v1850_v15  ;;  %v3047_v18 = vmul.f32 %v6863_v55, %v8418_v13  ;;  %v8420_v16 = vld [vmem:[#allocation143_spill] sm:$0xff] }
 0x5a2   : > { %8413 = vst [vmem:[#allocation92_spill] sm:$0xff] %v6874_v34  ;;  %v6878_v63 = vadd.f32 %v2340_v61, %v2017_v3  ;;  %v6882_v62 = vadd.f32 %v2206_v35, %v1994_v10  ;;  %v6886_v47 = vadd.f32 %v3396_v60, %v3332_v0  ;;  %v6890_v34 = vmul.f32 %v8420_v16, %v6118_v23  ;;  %v8421_v3 = vld [vmem:[#allocation142_spill] sm:$0xff]  ;;  %v8425_v46 = vld [vmem:[#allocation147_spill] sm:$0xff] }
 0x5a3   : > { %v6880_v58 = vadd.f32 %v3443_v2, %v3341_v43  ;;  %v4598_v29 = vpop.eup %4597  ;;  %2686 = vbcast.lane.b32.xlu0 %v5799_v30, 288  ;;  %v6895_v15 = vmul.f32 %v8421_v3, %v6137_v11  ;;  %v8422_v43 = vld [vmem:[#allocation72_spill] sm:$0xff]  ;;  %v2061_v35 = vadd.f32 %v2060_v45, %v2059_v42  ;;  %v6913_v3 = vmul.f32 %v8425_v46, %v6118_v23  ;;  %v8431_v46 = vld [vmem:[#allocation102_spill] sm:$0xff] }
 0x5a4   : > { %8415 = vst [vmem:[#allocation61_spill] sm:$0xff] %v6878_v63  ;;  %8417 = vst [vmem:[#allocation66_spill] sm:$0xff] %v6882_v62  ;;  %v2002_v10 = vmul.f32 %v6150_v49, %v8422_v43  ;;  %v2251_v61 = vmul.f32 %v4598_v29, %v6882_v62  ;;  %2870 = vbcast.lane.b32.xlu1 %v5775_v26, 336  ;;  %v6905_v60 = vpop.permute.xlu0 %2620  ;;  %v6909_v2 = vld [vmem:[#allocation25 + $0x10] sm:$0xff]  ;;  %v2106_v45 = vadd.f32 %v2105_v57, %v2104_v32  ;;  %v6941_v32 = vld [vmem:[#allocation25] sm:$0xff] }
 0x5a5   : > { %8416 = vst [vmem:[#allocation53_spill] sm:$0xff] %v6880_v58  ;;  %8419 = vst [vmem:[#allocation49_spill] sm:$0xff] %v6886_v47  ;;  %v3488_v0 = vmul.f32 %v6579_v27, %v6880_v58  ;;  %v6907_v16 = vpop.permute.xlu1 %2616  ;;  %v8426_v43 = vld [vmem:[#allocation148_spill] sm:$0xff]  ;;  %v3357_v27 = vmul.f32 %v6649_v17, %v6137_v11  ;;  %v4600_v42 = vpop.eup %4599  ;;  %v6929_v41 = vmul.f32 %v8431_v46, %v6137_v11  ;;  %v8438_v47 = vld [vmem:[#allocation121_spill] sm:$0xff] }
 0x5a6   : > { %2399 = vst.msk [vmem:[#allocation2 + $0x30] sm:$0xff] %vm612_vm2, %v6878_v63  ;;  %8423 = vst [vmem:[#allocation143_spill] sm:$0xff] %v6905_v60  ;;  %v6917_v63 = vmul.f32 %v8426_v43, %v6118_v23  ;;  %v6921_v29 = vadd.f32 %v2251_v61, %v2002_v10  ;;  %v8430_v60 = vld [vmem:[#allocation73_spill] sm:$0xff]  ;;  %v3048_v43 = vmul.f32 %v6909_v2, %v8418_v13  ;;  %v8434_v61 = vld [vmem:[#allocation100_spill] sm:$0xff] }
 0x5a7   : > { %8424 = vst [vmem:[#allocation142_spill] sm:$0xff] %v6907_v16  ;;  %v6923_v62 = vadd.f32 %v3488_v0, %v3349_v4  ;;  %v2004_v58 = vmul.f32 %v6134_v40, %v8430_v60  ;;  %v3112_v16 = vmul.f32 1.442695, %v3047_v18  ;;  %8432 = vst [vmem:[#allocation73_spill] sm:$0xff] %v6929_v41  ;;  %2754 = vbcast.lane.b32.xlu0 %v8411_v14, 360  ;;  %v2062_v18 = vrot.slane %v2061_v35, 1 }
 0x5a8   : > { %8427 = vst [vmem:[#allocation72_spill] sm:$0xff] %v6917_v63  ;;  %8428 = vst [vmem:[#allocation147_spill] sm:$0xff] %v6921_v29  ;;  %v2296_v17 = vmul.f32 %v4600_v42, %v6921_v29  ;;  %2930 = vbcast.lane.b32.xlu1 %v5799_v30, 328  ;;  %v3070_v57 = vmul.f32 %v6941_v32, %v8305_v37  ;;  %v3055_v0 = vmul.f32 %v6863_v55, %v8434_v61  ;;  %v6949_v42 = vpop.permute.xlu0 %2670 }
 0x5a9   : > { %8429 = vst [vmem:[#allocation148_spill] sm:$0xff] %v6923_v62  ;;  %v3533_v4 = vmul.f32 %v6603_v51, %v6923_v62  ;;  %v6938_v10 = vadd.f32 %v6813_v6, %v2004_v58  ;;  %v3365_v60 = vmul.f32 %v6768_v19, %v6140_v1  ;;  %8435 = vst [vmem:[#allocation152_spill] sm:$0xff] %v6949_v42  ;;  %v6951_v51 = vpop.permute.xlu1 %2702  ;;  %v3114_v6 = vmul.f32 1.442695, %v3048_v43  ;;  %v4602_v58 = vpop.eup %4601 }
 0x5aa   : > { %v6954_v46 = vadd.f32 %v2296_v17, %v6736_v54  ;;  %4605 = vpow2.f32 %v3112_v16  ;;  %v3158_v62 = vmul.f32 1.442695, %v3070_v57  ;;  %v2107_v41 = vrot.slane %v2106_v45, 1 }
 0x5ab   : > { %8433 = vst [vmem:[#allocation102_spill] sm:$0xff] %v6938_v10  ;;  %v6956_v29 = vadd.f32 %v3533_v4, %v3357_v27  ;;  %v4604_v13 = vpop.eup %4603  ;;  %v6960_v63 = vmul.f32 %v8438_v47, %v6118_v23  ;;  %2874 = vbcast.lane.b32.xlu0 %v5775_v26, 344  ;;  %4607 = vpow2.f32 %v3114_v6  ;;  %v3078_v19 = vmul.f32 %v6941_v32, %v6080_v39  ;;  %v8439_v47 = vld [vmem:[#allocation103_spill] sm:$0xff] }
 0x5ac   : > { %8436 = vst [vmem:[#allocation153_spill] sm:$0xff] %v6954_v46  ;;  %v2341_v27 = vmul.f32 %v4602_v58, %v6954_v46  ;;  %v2335_v16 = vmul.f32 %v4604_v13, %v6938_v10  ;;  %1500 = vbcast.lane.b32.xlu1 %v5775_v26, 344  ;;  %v3128_v17 = vmul.f32 1.442695, %v3055_v0  ;;  %v3063_v4 = vmul.f32 %v6863_v55, %v8439_v47  ;;  %v6973_v57 = vpop.permute.xlu0 %2710  ;;  %v8445_v0 = vld [vmem:[#allocation88_spill] sm:$0xff]  ;;  %v8446_v46 = vld [vmem:[#allocation85_spill] sm:$0xff] }
 0x5ad   : > { %8437 = vst [vmem:[#allocation154_spill] sm:$0xff] %v6956_v29  ;;  %v2415_v8 = vld [vmem:[#allocation2 + $0x30] sm:$0xff]  ;;  %v3578_v43 = vmul.f32 %v6639_v36, %v6956_v29  ;;  %v2735_v6 = vpop.permute.xlu1 %2734  ;;  %4609 = vpow2.f32 %v3158_v62  ;;  %v6986_v13 = vadd.f32 %v2062_v18, %v2061_v35  ;;  %v6990_v58 = vmul.f32 %v8445_v0, %v6131_v44  ;;  %v8449_v18 = vld [vmem:[#allocation96_spill] sm:$0xff] }
 0x5ae   : > { %v3399_v54 = vmul.f32 %v6546_v12, %v2415_v8  ;;  %v6979_v8 = vadd.f32 %v2341_v27, %v6776_v59  ;;  %v6982_v12 = vadd.f32 %v2335_v16, %v6746_v31  ;;  %v6994_v62 = vmul.f32 %v8446_v46, %v6140_v1  ;;  %v8448_v59 = vld [vmem:[#allocation91_spill] sm:$0xff] }
 0x5af   : > { %v6984_v36 = vadd.f32 %v3578_v43, %v3365_v60  ;;  %8444 = vst [vmem:[#allocation157_spill] sm:$0xff] %v6986_v13  ;;  %1444 = vbcast.lane.b32.xlu0 %v5751_v22, 360  ;;  %v3336_v35 = vmul.f32 %v8448_v59, %v6108_v33  ;;  %v7007_v60 = vmul.f32 %v8449_v18, %v6140_v1  ;;  %v3174_v46 = vmul.f32 1.442695, %v3078_v19  ;;  %v8453_v59 = vld [vmem:[#allocation90_spill] sm:$0xff]  ;;  %v8454_v19 = vld [vmem:[#allocation112_spill] sm:$0xff] }
 0x5b0   : > { %v6976_v42 = vadd.f32 %v3399_v54, %v6803_v7  ;;  %8441 = vst [vmem:[#allocation103_spill] sm:$0xff] %v6979_v8  ;;  %8442 = vst [vmem:[#allocation155_spill] sm:$0xff] %v6982_v12  ;;  %v8447_v7 = vld [vmem:[#allocation94_spill] sm:$0xff]  ;;  %2782 = vbcast.lane.b32.xlu1 %v5739_v20, 352  ;;  %4611 = vpow2.f32 %v3128_v17  ;;  %v3144_v27 = vmul.f32 1.442695, %v3063_v4  ;;  %v7012_v16 = vpop.permute.xlu0 %2798  ;;  %v3056_v43 = vmul.f32 %v6909_v2, %v8434_v61 }
 0x5b1   : > { %8443 = vst [vmem:[#allocation156_spill] sm:$0xff] %v6984_v36  ;;  %v3351_v54 = vmul.f32 %v8447_v7, %v6131_v44  ;;  %2400 = vst.msk [vmem:[#allocation2 + $0x38] sm:$0xff] %vm612_vm2, %v6979_v8  ;;  %v7018_v0 = vadd.f32 %v2107_v41, %v2106_v45  ;;  %v7025_v18 = vmul.f32 %v8453_v59, %v6131_v44  ;;  %v8455_v4 = vld [vmem:[#allocation107_spill] sm:$0xff]  ;;  %4613 = vpow2.f32 %v3174_v46 }
 0x5b2   : > { %8440 = vst [vmem:[#allocation121_spill] sm:$0xff] %v6976_v42  ;;  %v3445_v31 = vmul.f32 %v6621_v56, %v6976_v42  ;;  %8450 = vst [vmem:[#allocation88_spill] sm:$0xff] %v7007_v60  ;;  %v7014_v56 = vpop.permute.xlu1 %1424  ;;  %v7029_v17 = vmul.f32 %v8454_v19, %v6137_v11  ;;  %v3359_v8 = vmul.f32 %v8455_v4, %v6137_v11  ;;  %v8456_v42 = vld [vmem:[#allocation104_spill] sm:$0xff]  ;;  %v2411_v45 = vld [vmem:[#allocation2 + $0x10] sm:$0xff]  ;;  %4615 = vpow2.f32 %v3144_v27 }
 0x5b3   : > { %2394 = vst.msk [vmem:[#allocation2 + $0x8] sm:$0xff] %vm612_vm2, %v6982_v12  ;;  %8451 = vst [vmem:[#allocation85_spill] sm:$0xff] %v7018_v0  ;;  %v3344_v29 = vmul.f32 %v8456_v42, %v6118_v23  ;;  %v7037_v41 = vmul.f32 %v6588_v50, %v6137_v11  ;;  %1564 = vbcast.lane.b32.xlu0 %v5799_v30, 344  ;;  %v3367_v19 = vmul.f32 %v6672_v5, %v6140_v1  ;;  %v8460_v12 = vld [vmem:[#allocation149_spill] sm:$0xff]  ;;  %v8462_v60 = vld [vmem:[#allocation76_spill] sm:$0xff] }
 0x5b4   : > { %v7021_v7 = vadd.f32 %v3445_v31, %v6913_v3  ;;  %v7041_v3 = vmul.f32 %v6612_v53, %v6140_v1  ;;  %v4606_v31 = vpop.eup %4605  ;;  %2902 = vbcast.lane.b32.xlu1 %v5787_v28, 336  ;;  %v7049_v50 = vpop.permute.xlu0 %1432  ;;  %v3130_v53 = vmul.f32 1.442695, %v3056_v43  ;;  %v3071_v23 = vmul.f32 %v6863_v55, %v8305_v37 }
 0x5b5   : > { %v4608_v42 = vpop.eup %4607  ;;  %v7061_v5 = vmul.f32 %v6698_v38, %v6140_v1  ;;  %v7065_v43 = vmul.f32 %v6810_v48, %v6137_v11  ;;  %v8463_v48 = vld [vmem:[#allocation51_spill] sm:$0xff] }
 0x5b6   : > { %8452 = vst [vmem:[#allocation94_spill] sm:$0xff] %v7021_v7  ;;  %v3490_v59 = vmul.f32 %v6666_v25, %v7021_v7  ;;  %v2767_v4 = vpop.permute.xlu1 %2766  ;;  %v7057_v25 = vmul.f32 %v6674_v21, %v6131_v44  ;;  %v3395_v46 = vmul.f32 %v4608_v42, %v2411_v45  ;;  %v7070_v21 = vld [vmem:[#allocation25 + $0x18] sm:$0xff]  ;;  %v8461_v42 = vld [vmem:[#allocation127_spill] sm:$0xff]  ;;  %4617 = vpow2.f32 %v3130_v53 }
 0x5b7   : > { %8458 = vst [vmem:[#allocation96_spill] sm:$0xff] %v7061_v5  ;;  %v4610_v7 = vpop.eup %4609  ;;  %2846 = vbcast.lane.b32.xlu0 %v5763_v24, 352  ;;  %v3057_v38 = vmul.f32 %v7070_v21, %v8434_v61  ;;  %v3160_v61 = vmul.f32 1.442695, %v3071_v23  ;;  %v8469_v53 = vld [vmem:[#allocation110_spill] sm:$0xff] }
 0x5b8   : > { %v7053_v36 = vadd.f32 %v3490_v59, %v3351_v54  ;;  %v2416_v27 = vld [vmem:[#allocation2 + $0x38] sm:$0xff]  ;;  %v8459_v54 = vld [vmem:[#allocation50_spill] sm:$0xff]  ;;  %v7078_v44 = vadd.f32 %v3395_v46, %v8462_v60  ;;  %1472 = vbcast.lane.b32.xlu1 %v5763_v24, 352  ;;  %v7083_v10 = vpop.permute.xlu0 %1492  ;;  %v3086_v23 = vmul.f32 %v6941_v32, %v8469_v53 }
 0x5b9   : > { %v3409_v59 = vmul.f32 %v8459_v54, %v6951_v51  ;;  %v3400_v45 = vmul.f32 %v8460_v12, %v2416_v27  ;;  %v3455_v51 = vmul.f32 %v8463_v48, %v2735_v6  ;;  %v8464_v54 = vld [vmem:[#allocation56_spill] sm:$0xff]  ;;  %4619 = vpow2.f32 %v3160_v61 }
 0x5ba   : > { %8457 = vst [vmem:[#allocation91_spill] sm:$0xff] %v7053_v36  ;;  %v2410_v33 = vld [vmem:[#allocation2 + $0x8] sm:$0xff]  ;;  %v3535_v13 = vmul.f32 %v8461_v42, %v7053_v36  ;;  %v3529_v11 = vmul.f32 %v4610_v7, %v8464_v54  ;;  %v7085_v5 = vpop.permute.xlu1 %1456  ;;  %v3411_v60 = vmul.f32 %v7078_v44, %v6973_v57  ;;  %v4612_v46 = vpop.eup %4611  ;;  %v3132_v42 = vmul.f32 1.442695, %v3057_v38 }
 0x5bb   : > { %v3394_v0 = vmul.f32 %v4606_v31, %v2410_v33  ;;  %8465 = vst [vmem:[#allocation90_spill] sm:$0xff] %v7085_v5  ;;  %v7087_v12 = vadd.f32 %v3400_v45, %v3336_v35  ;;  %v8468_v33 = vld [vmem:[#allocation111_spill] sm:$0xff]  ;;  %v3418_v6 = vsel %vm3417_vm10, %v3409_v59, 0.0  ;;  %1416 = vbcast.lane.b32.xlu0 %v5739_v20, 368  ;;  %v8471_v35 = vld [vmem:[#allocation69_spill] sm:$0xff]  ;;  %v3065_v61 = vmul.f32 %v7070_v21, %v8439_v47 }
 0x5bc   : > { %v7089_v27 = vadd.f32 %v3535_v13, %v3359_v8  ;;  %v7096_v7 = vadd.f32 %v3529_v11, %v6895_v15  ;;  %v8470_v8 = vld [vmem:[#allocation117_spill] sm:$0xff]  ;;  %2659 = vbcast.lane.b32.xlu1 %v5787_v28, 304  ;;  %v3421_v11 = vsel %vm3417_vm10, %v3411_v60, 0.0  ;;  %v3463_v15 = vsel %vm3417_vm10, %v3455_v51, 0.0  ;;  %v7109_v59 = vpop.permute.xlu0 %2830 }
 0x5bd   : > { %8466 = vst [vmem:[#allocation112_spill] sm:$0xff] %v7087_v12  ;;  %v3402_v31 = vadd.f32 %v3394_v0, %v8468_v33  ;;  %v3446_v13 = vmul.f32 %v8470_v8, %v7087_v12  ;;  %v8472_v45 = vld [vmem:[#allocation81_spill] sm:$0xff]  ;;  %v3064_v33 = vmul.f32 %v6909_v2, %v8439_v47  ;;  %v4614_v8 = vpop.eup %4613  ;;  %4621 = vpow2.f32 %v3132_v42  ;;  %v8475_v12 = vld [vmem:[#allocation62_spill] sm:$0xff] }
 0x5be   : > { %8467 = vst [vmem:[#allocation107_spill] sm:$0xff] %v7089_v27  ;;  %v3580_v0 = vmul.f32 %v8471_v35, %v7089_v27  ;;  %v2594_v38 = vpop.permute.xlu1 %2593  ;;  %v3574_v51 = vmul.f32 %v4614_v8, %v7096_v7  ;;  %v8477_v27 = vld [vmem:[#allocation45_spill] sm:$0xff]  ;;  %v8479_v8 = vld [vmem:[#allocation67_spill] sm:$0xff] }
 0x5bf   : > { %v3410_v57 = vmul.f32 %v3402_v31, %v8472_v45  ;;  %v3440_v48 = vmul.f32 %v4612_v46, %v3402_v31  ;;  %v7113_v36 = vadd.f32 %v3446_v13, %v3344_v29  ;;  %v4616_v45 = vpop.eup %4615  ;;  %1536 = vbcast.lane.b32.xlu0 %v5787_v28, 352  ;;  %v8476_v13 = vld [vmem:[#allocation80_spill] sm:$0xff] }
 0x5c0   : > { %v7115_v35 = vadd.f32 %v3580_v0, %v3367_v19  ;;  %2722 = vbcast.lane.b32.xlu1 %v8477_v27, 360 }
 0x5c1   : > { %8473 = vst [vmem:[#allocation104_spill] sm:$0xff] %v7113_v36  ;;  %v3419_v31 = vsel %vm3417_vm10, %v3410_v57, 0.0  ;;  %v3448_v46 = vadd.f32 %v3440_v48, %v6890_v34  ;;  %v3491_v29 = vmul.f32 %v8475_v12, %v7113_v36  ;;  %v3500_v57 = vmul.f32 %v8464_v54, %v2767_v4  ;;  %v7133_v48 = vpop.permute.xlu0 %1404 }
 0x5c2   : > { %8474 = vst [vmem:[#allocation50_spill] sm:$0xff] %v7115_v35  ;;  %v3420_v60 = vadd.f32 %v3419_v31, %v3418_v6  ;;  %v7131_v6 = vadd.f32 %v3574_v51, %v6994_v62  ;;  %v7135_v42 = vpop.permute.xlu1 %2647  ;;  %v3625_v31 = vmul.f32 %v8479_v8, %v7115_v35  ;;  %v3190_v12 = vmul.f32 1.442695, %v3086_v23  ;;  %v8481_v23 = vld [vmem:[#allocation129_spill] sm:$0xff]  ;;  %v8487_v35 = vld [vmem:[#allocation54_spill] sm:$0xff] }
 0x5c3   : > { %v3456_v19 = vmul.f32 %v3448_v46, %v8476_v13  ;;  %v3485_v0 = vmul.f32 %v4616_v45, %v3448_v46  ;;  %8478 = vst [vmem:[#allocation149_spill] sm:$0xff] %v7135_v42  ;;  %v7140_v13 = vadd.f32 %v3491_v29, %v7057_v25  ;;  %v4618_v46 = vpop.eup %4617  ;;  %2690 = vbcast.lane.b32.xlu0 %v5799_v30, 296  ;;  %v3508_v25 = vsel %vm3417_vm10, %v3500_v57, 0.0  ;;  %v8483_v29 = vld [vmem:[#allocation86_spill] sm:$0xff] }
 0x5c4   : > { %v7128_v34 = vadd.f32 %v3421_v11, %v3420_v60  ;;  %v3146_v11 = vmul.f32 1.442695, %v3064_v33  ;;  %v3079_v62 = vmul.f32 %v6863_v55, %v6080_v39  ;;  %v3148_v60 = vmul.f32 1.442695, %v3065_v61  ;;  %2814 = vbcast.lane.b32.xlu1 %v5751_v22, 352  ;;  %v8482_v33 = vld [vmem:[#allocation52_spill] sm:$0xff] }
 0x5c5   : > { %8480 = vst [vmem:[#allocation127_spill] sm:$0xff] %v7140_v13  ;;  %v3464_v4 = vsel %vm3417_vm10, %v3456_v19, 0.0  ;;  %v3493_v54 = vadd.f32 %v3485_v0, %v6990_v58  ;;  %v3536_v51 = vmul.f32 %v6829_v52, %v7140_v13  ;;  %v3441_v58 = vmul.f32 %v4618_v46, %v7078_v44  ;;  %v8484_v19 = vld [vmem:[#allocation108_spill] sm:$0xff]  ;;  %v8485_v52 = vld [vmem:[#allocation114_spill] sm:$0xff] }
 0x5c6   : > { %v3465_v45 = vadd.f32 %v3464_v4, %v3463_v15  ;;  %v7155_v15 = vmul.f32 %v8482_v33, %v6150_v49  ;;  %v2171_v0 = vmul.f32 %v8484_v19, %v8483_v29  ;;  %v7159_v4 = vpop.permute.xlu0 %1520  ;;  %v7161_v61 = vpop.permute.xlu1 %2674  ;;  %4623 = vpow2.f32 %v3190_v12  ;;  %v8489_v19 = vld [vmem:[#allocation63_spill] sm:$0xff] }
 0x5c7   : > { %v3501_v8 = vmul.f32 %v3493_v54, %v8481_v23  ;;  %v3094_v23 = vmul.f32 %v6941_v32, %v8485_v52  ;;  %v7166_v57 = vadd.f32 %v3536_v51, %v7065_v43  ;;  %v3368_v46 = vmul.f32 %v2594_v38, %v6140_v1  ;;  %v4620_v33 = vpop.eup %4619  ;;  %2758 = vbcast.lane.b32.xlu0 %v8411_v14, 368  ;;  %v8490_v38 = vld [vmem:[#allocation72_spill] sm:$0xff] }
 0x5c8   : > { %4625 = vpow2.f32 %v3146_v11  ;;  %v7172_v29 = vmul.f32 %v8487_v35, %v6150_v49  ;;  %v7176_v36 = vmul.f32 %v8489_v19, %v6134_v40  ;;  %v3176_v43 = vmul.f32 1.442695, %v3079_v62  ;;  %2934 = vbcast.lane.b32.xlu1 %v5799_v30, 336  ;;  %v8491_v19 = vld [vmem:[#allocation57_spill] sm:$0xff] }
 0x5c9   : > { %8486 = vst [vmem:[#allocation76_spill] sm:$0xff] %v7166_v57  ;;  %v3509_v44 = vsel %vm3417_vm10, %v3501_v8, 0.0  ;;  %v3581_v51 = vmul.f32 %v6858_v9, %v7166_v57  ;;  %v3449_v11 = vadd.f32 %v3441_v58, %v8490_v38  ;;  %4627 = vpow2.f32 %v3148_v60  ;;  %v4622_v8 = vpop.eup %4621  ;;  %v8493_v9 = vld [vmem:[#allocation75_spill] sm:$0xff] }
 0x5ca   : > { %8488 = vst [vmem:[#allocation51_spill] sm:$0xff] %v7172_v29  ;;  %v7178_v12 = vadd.f32 %v3509_v44, %v3508_v25  ;;  %v3073_v35 = vmul.f32 %v7070_v21, %v8305_v37  ;;  %v7189_v13 = vmul.f32 %v8491_v19, %v6134_v40  ;;  %v2179_v25 = vsel %vm612_vm2, %v2171_v0, 0.0  ;;  %v2625_v44 = vpop.permute.xlu0 %2624  ;;  %v2743_v62 = vpop.permute.xlu1 %2742  ;;  %v8494_v38 = vld [vmem:[#allocation131_spill] sm:$0xff] }
 0x5cb   : > { %v3206_v42 = vmul.f32 1.442695, %v3094_v23  ;;  %v2170_v57 = vmul.f32 %v8493_v9, %v7014_v56  ;;  %v7194_v14 = vadd.f32 %v3581_v51, %v3368_v46  ;;  %v3375_v60 = vmul.f32 %v2625_v44, %v6150_v49  ;;  %2878 = vbcast.lane.b32.xlu0 %v5775_v26, 352 }
 0x5cc   : > { %8492 = vst [vmem:[#allocation56_spill] sm:$0xff] %v7189_v13  ;;  %v3457_v58 = vmul.f32 %v3449_v11, %v2743_v62  ;;  %v2172_v5 = vmul.f32 %v8494_v38, %v7049_v50  ;;  %v3530_v19 = vmul.f32 %v4620_v33, %v3493_v54  ;;  %v8495_v13 = vld [vmem:[#allocation49_spill] sm:$0xff]  ;;  %4629 = vpow2.f32 %v3176_v43  ;;  %1504 = vbcast.lane.b32.xlu1 %v5775_v26, 352 }
 0x5cd   : > { %v3442_v29 = vmul.f32 %v4622_v8, %v8495_v13  ;;  %v3545_v0 = vmul.f32 %v7096_v7, %v7012_v16  ;;  %v7203_v23 = vadd.f32 %v3625_v31, %v3375_v60  ;;  %v3164_v46 = vmul.f32 1.442695, %v3073_v35  ;;  %v8497_v35 = vld [vmem:[#allocation124_spill] sm:$0xff] }
 0x5ce   : > { %v3466_v56 = vsel %vm3417_vm10, %v3457_v58, 0.0  ;;  %v7207_v44 = vpop.permute.xlu0 %2678  ;;  %v3538_v50 = vadd.f32 %v3530_v19, %v7029_v17  ;;  %4631 = vpow2.f32 %v3206_v42  ;;  %v2803_v54 = vpop.permute.xlu1 %2802  ;;  %v3072_v33 = vmul.f32 %v6909_v2, %v8305_v37 }
 0x5cf   : > { %8496 = vst [vmem:[#allocation111_spill] sm:$0xff] %v7203_v23  ;;  %v3467_v51 = vadd.f32 %v3466_v56, %v3465_v45  ;;  %4633 = vpow2.f32 %v3164_v46  ;;  %v3081_v16 = vmul.f32 %v7070_v21, %v6080_v39  ;;  %1448 = vbcast.lane.b32.xlu0 %v5751_v22, 368  ;;  %v3450_v43 = vadd.f32 %v3442_v29, %v6960_v63 }
 0x5d0   : > { %v4624_v7 = vpop.eup %4623  ;;  %v3546_v31 = vmul.f32 %v3538_v50, %v2803_v54  ;;  %v3087_v45 = vmul.f32 %v6863_v55, %v8469_v53  ;;  %v3102_v17 = vmul.f32 %v6941_v32, %v8497_v35  ;;  %v3553_v8 = vsel %vm3417_vm10, %v3545_v0, 0.0  ;;  %2786 = vbcast.lane.b32.xlu1 %v5739_v20, 360 }
 0x5d1   : > { %v2178_v62 = vsel %vm612_vm2, %v2170_v57, 0.0  ;;  %v2181_v9 = vsel %vm612_vm2, %v2172_v5, 0.0  ;;  %v3180_v60 = vmul.f32 1.442695, %v3081_v16  ;;  %v3619_v63 = vmul.f32 %v4624_v7, %v7131_v6  ;;  %v7230_v57 = vld [vmem:[#allocation25 + $0x28] sm:$0xff] }
 0x5d2   : > { %v4626_v42 = vpop.eup %4625  ;;  %v3554_v58 = vsel %vm3417_vm10, %v3546_v31, 0.0  ;;  %v2747_v38 = vpop.permute.xlu0 %2746  ;;  %v3222_v19 = vmul.f32 1.442695, %v3102_v17  ;;  %v3162_v0 = vmul.f32 1.442695, %v3072_v33  ;;  %v1693_v5 = vmul.f32 %v7230_v57, %v8439_v47 }
 0x5d3   : > { %v3486_v29 = vmul.f32 %v4626_v42, %v3449_v11  ;;  %v4628_v56 = vpop.eup %4627  ;;  %v7226_v46 = vadd.f32 %v3554_v58, %v3553_v8  ;;  %v3458_v32 = vmul.f32 %v3450_v43, %v2747_v38  ;;  %v7228_v54 = vpop.permute.xlu1 %1488  ;;  %v2180_v16 = vadd.f32 %v2179_v25, %v2178_v62  ;;  %1568 = vbcast.lane.b32.xlu0 %v5799_v30, 352  ;;  %v8499_v62 = vld [vmem:[#allocation97_spill] sm:$0xff] }
 0x5d4   : > { %v3487_v31 = vmul.f32 %v4628_v56, %v3450_v43  ;;  %v3192_v23 = vmul.f32 1.442695, %v3087_v45  ;;  %4635 = vpow2.f32 %v3222_v19  ;;  %2906 = vbcast.lane.b32.xlu1 %v5787_v28, 344  ;;  %v3627_v7 = vadd.f32 %v3619_v63, %v7155_v15 }
 0x5d5   : > { %v3468_v11 = vsel %vm3417_vm10, %v3458_v32, 0.0  ;;  %4637 = vpow2.f32 %v3180_v60  ;;  %v1701_v33 = vmul.f32 %v7230_v57, %v8305_v37  ;;  %v2182_v42 = vadd.f32 %v2181_v9, %v2180_v16 }
 0x5d6   : > { %v4630_v17 = vpop.eup %4629  ;;  %v7240_v8 = vadd.f32 %v3468_v11, %v3467_v51  ;;  %v2863_v25 = vpop.permute.xlu0 %2862  ;;  %v7243_v58 = vadd.f32 %v3486_v29, %v8499_v62  ;;  %v7246_v43 = vadd.f32 %v3487_v31, %v7025_v18  ;;  %4639 = vpow2.f32 %v3162_v0  ;;  %v8500_v11 = vld [vmem:[#allocation138_spill] sm:$0xff] }
 0x5d7   : > { %v7248_v45 = vmul.f32 %v3627_v7, %v2863_v25  ;;  %v2775_v38 = vpop.permute.xlu1 %2774  ;;  %v3080_v15 = vmul.f32 %v6909_v2, %v6080_v39  ;;  %v1778_v60 = vmul.f32 1.442695, %v1693_v5  ;;  %2850 = vbcast.lane.b32.xlu0 %v5763_v24, 360  ;;  %v3575_v51 = vmul.f32 %v4630_v17, %v3538_v50 }
 0x5d8   : > { %8498 = vst [vmem:[#allocation110_spill] sm:$0xff] %v7240_v8  ;;  %v4632_v63 = vpop.eup %4631  ;;  %v3502_v9 = vmul.f32 %v7243_v58, %v2775_v38  ;;  %4641 = vpow2.f32 %v3192_v23  ;;  %v3095_v29 = vmul.f32 %v6863_v55, %v8485_v52  ;;  %1476 = vbcast.lane.b32.xlu1 %v5763_v24, 360  ;;  %v1709_v56 = vmul.f32 %v7230_v57, %v6080_v39  ;;  %v8501_v38 = vld [vmem:[#allocation144_spill] sm:$0xff] }
 0x5d9   : > { %v4634_v18 = vpop.eup %4633  ;;  %v3664_v19 = vmul.f32 %v4632_v63, %v3627_v7  ;;  %4643 = vpow2.f32 %v1778_v60  ;;  %v1794_v32 = vmul.f32 1.442695, %v1701_v33  ;;  %v3590_v0 = vmul.f32 %v7131_v6, %v7109_v59  ;;  %v8502_v60 = vld [vmem:[#allocation152_spill] sm:$0xff] }
 0x5da   : > { %v3511_v5 = vsel %vm3417_vm10, %v3502_v9, 0.0  ;;  %v1437_v16 = vpop.permute.xlu0 %1436  ;;  %v3583_v23 = vadd.f32 %v3575_v51, %v7041_v3  ;;  %v3532_v50 = vmul.f32 %v4634_v18, %v7246_v43  ;;  %v3178_v62 = vmul.f32 1.442695, %v3080_v15  ;;  %v8503_v9 = vld [vmem:[#allocation64_spill] sm:$0xff] }
 0x5db   : > { %v3512_v31 = vadd.f32 %v3511_v5, %v7178_v12  ;;  %v2173_v17 = vmul.f32 %v8500_v11, %v1437_v16  ;;  %v2835_v7 = vpop.permute.xlu1 %2834  ;;  %v7267_v25 = vadd.f32 %v3664_v19, %v7176_v36  ;;  %1420 = vbcast.lane.b32.xlu0 %v5739_v20, 376  ;;  %v3208_v6 = vmul.f32 1.442695, %v3095_v29  ;;  %v8504_v16 = vld [vmem:[#allocation128_spill] sm:$0xff] }
 0x5dc   : > { %v3591_v33 = vmul.f32 %v3583_v23, %v2835_v7  ;;  %v7271_v59 = vadd.f32 %v3532_v50, %v7037_v41  ;;  %v1717_v3 = vmul.f32 %v7230_v57, %v8469_v53  ;;  %v3385_v12 = vmul.f32 %v8502_v60, %v8501_v38  ;;  %2663 = vbcast.lane.b32.xlu1 %v5787_v28, 312  ;;  %v8505_v50 = vld [vmem:[#allocation74_spill] sm:$0xff] }
 0x5dd   : > { %v2183_v63 = vsel %vm612_vm2, %v2173_v17, 0.0  ;;  %4645 = vpow2.f32 %v1794_v32  ;;  %v1810_v36 = vmul.f32 1.442695, %v1709_v56  ;;  %v3370_v51 = vmul.f32 %v8503_v9, %v6150_v49 }
 0x5de   : > { %v4636_v15 = vpop.eup %4635  ;;  %v3598_v41 = vsel %vm3417_vm10, %v3590_v0, 0.0  ;;  %v7282_v18 = vadd.f32 %v2183_v63, %v2182_v42  ;;  %v3599_v29 = vsel %vm3417_vm10, %v3591_v33, 0.0  ;;  %v7285_v19 = vpop.permute.xlu0 %1552  ;;  %v7289_v11 = vmul.f32 %v8505_v50, %v8504_v16  ;;  %v8506_v0 = vld [vmem:[#allocation92_spill] sm:$0xff]  ;;  %v8507_v63 = vld [vmem:[#allocation83_spill] sm:$0xff] }
 0x5df   : > { %v4638_v5 = vpop.eup %4637  ;;  %v7291_v17 = vadd.f32 %v3599_v29, %v3598_v41  ;;  %v7293_v56 = vpop.permute.xlu1 %1464  ;;  %v3709_v32 = vmul.f32 %v4636_v15, %v7267_v25  ;;  %4647 = vpow2.f32 %v3178_v62  ;;  %v7298_v42 = vmul.f32 %v8506_v0, %v6134_v40  ;;  %1540 = vbcast.lane.b32.xlu0 %v5787_v28, 360  ;;  %v8508_v29 = vld [vmem:[#allocation134_spill] sm:$0xff]  ;;  %v8510_v0 = vld [vmem:[#allocation96_spill] sm:$0xff] }
 0x5e0   : > { %4649 = vpow2.f32 %v3208_v6  ;;  %v3577_v7 = vmul.f32 %v4638_v5, %v7271_v59  ;;  %v1826_v33 = vmul.f32 1.442695, %v1717_v3  ;;  %v4640_v60 = vpop.eup %4639  ;;  %v2261_v9 = vmul.f32 %v8507_v63, %v7083_v10  ;;  %2726 = vbcast.lane.b32.xlu1 %v8477_v27, 368  ;;  %v8509_v6 = vld [vmem:[#allocation151_spill] sm:$0xff] }
 0x5e1   : > { %v7305_v41 = vadd.f32 %v3709_v32, %v3385_v12  ;;  %v1725_v62 = vmul.f32 %v7230_v57, %v8485_v52  ;;  %4651 = vpow2.f32 %v1810_v36  ;;  %v2128_v16 = vmul.f32 %v8508_v29, %v7133_v48  ;;  %v8511_v36 = vld [vmem:[#allocation102_spill] sm:$0xff] }
 0x5e2   : > { %v4642_v15 = vpop.eup %4641  ;;  %v2305_v5 = vmul.f32 %v8509_v6, %v7159_v4  ;;  %v2779_v3 = vpop.permute.xlu0 %2778  ;;  %v3531_v50 = vmul.f32 %v4640_v60, %v7243_v58  ;;  %v7315_v10 = vadd.f32 %v3577_v7, %v8510_v0  ;;  %v1733_v48 = vmul.f32 %v7230_v57, %v8497_v35  ;;  %v8512_v58 = vld [vmem:[#allocation55_spill] sm:$0xff]  ;;  %v8513_v7 = vld [vmem:[#allocation118_spill] sm:$0xff] }
 0x5e3   : > { %v4644_v63 = vpop.eup %4643  ;;  %v3503_v12 = vmul.f32 %v7246_v43, %v2779_v3  ;;  %v1525_v32 = vpop.permute.xlu1 %1524  ;;  %v3620_v8 = vmul.f32 %v4642_v15, %v3583_v23  ;;  %3762 = vst.msk [vmem:[#allocation2] sm:$0xff] %vm3417_vm10, %v7305_v41  ;;  %v3088_v4 = vmul.f32 %v6909_v2, %v8469_v53  ;;  %2730 = vbcast.lane.b32.xlu0 %v8477_v27, 376  ;;  %4653 = vpow2.f32 %v1826_v33  ;;  %v8514_v43 = vld [vmem:[#allocation125_spill] sm:$0xff] }
 0x5e4   : > { %v2306_v29 = vmul.f32 %v8511_v36, %v1525_v32  ;;  %v1976_v60 = vmul.f32 %v8513_v7, %v8512_v58  ;;  %v2114_v6 = vmul.f32 %v4644_v63, %v8514_v43  ;;  %2818 = vbcast.lane.b32.xlu1 %v5751_v22, 360  ;;  %v1842_v15 = vmul.f32 1.442695, %v1725_v62  ;;  %v8516_v33 = vld [vmem:[#allocation73_spill] sm:$0xff] }
 0x5e5   : > { %v3513_v23 = vsel %vm3417_vm10, %v3503_v12, 0.0  ;;  %v3194_v3 = vmul.f32 1.442695, %v3088_v4  ;;  %v3103_v57 = vmul.f32 %v6863_v55, %v8497_v35  ;;  %v2138_v0 = vsel %vm612_vm2, %v2128_v16, 0.0  ;;  %v8518_v16 = vld [vmem:[#allocation119_spill] sm:$0xff] }
 0x5e6   : > { %v7334_v32 = vadd.f32 %v3513_v23, %v3512_v31  ;;  %v2895_v27 = vpop.permute.xlu0 %2894  ;;  %v3539_v36 = vadd.f32 %v3531_v50, %v8516_v33  ;;  %v7337_v39 = vadd.f32 %v2114_v6, %v1976_v60  ;;  %v7340_v63 = vsel %vm612_vm2, %v2261_v9, 0.0  ;;  %v8517_v31 = vld [vmem:[#allocation60_spill] sm:$0xff] }
 0x5e7   : > { %v4646_v58 = vpop.eup %4645  ;;  %v7343_v12 = vmul.f32 %v7267_v25, %v2895_v27  ;;  %v7345_v62 = vpop.permute.xlu1 %2651  ;;  %v7347_v4 = vadd.f32 %v3620_v8, %v3370_v51  ;;  %4655 = vpow2.f32 %v3194_v3  ;;  %2822 = vbcast.lane.b32.xlu0 %v5751_v22, 368  ;;  %v1858_v55 = vmul.f32 1.442695, %v1733_v48  ;;  %v8519_v9 = vld [vmem:[#allocation116_spill] sm:$0xff] }
 0x5e8   : > { %8515 = vst [vmem:[#allocation117_spill] sm:$0xff] %v7334_v32  ;;  %v1984_v50 = vmul.f32 %v8518_v16, %v8517_v31  ;;  %v2159_v60 = vmul.f32 %v4646_v58, %v7337_v39  ;;  %v3224_v43 = vmul.f32 1.442695, %v3103_v57  ;;  %v2139_v23 = vadd.f32 %v2138_v0, %v8519_v9  ;;  %2938 = vbcast.lane.b32.xlu1 %v5799_v30, 344  ;;  %v8521_v58 = vld [vmem:[#allocation58_spill] sm:$0xff] }
 0x5e9   : > { %v4648_v6 = vpop.eup %4647  ;;  %v2313_v25 = vsel %vm612_vm2, %v2305_v5, 0.0  ;;  %4657 = vpow2.f32 %v1842_v15  ;;  %v3096_v8 = vmul.f32 %v6909_v2, %v8485_v52  ;;  %v3104_v57 = vmul.f32 %v6909_v2, %v8497_v35  ;;  %v7364_v9 = vld [vmem:[#allocation25 + $0x38] sm:$0xff] }
 0x5ea   : > { %v4650_v51 = vpop.eup %4649  ;;  %v1409_v3 = vpop.permute.xlu0 %1408  ;;  %v3576_v48 = vmul.f32 %v4648_v6, %v3539_v36  ;;  %v7358_v27 = vadd.f32 %v2159_v60, %v1984_v50  ;;  %4659 = vpow2.f32 %v3224_v43  ;;  %8522 = vst [vmem:[#allocation81_spill] sm:$0xff] %v7364_v9  ;;  %v3093_v15 = vmul.f32 %v7364_v9, %v8469_v53  ;;  %v8523_v50 = vld [vmem:[#allocation65_spill] sm:$0xff] }
 0x5eb   : > { %v4652_v33 = vpop.eup %4651  ;;  %v2129_v0 = vmul.f32 %v8521_v58, %v1409_v3  ;;  %v2715_v31 = vpop.permute.xlu1 %2714  ;;  %v3665_v5 = vmul.f32 %v4650_v51, %v7347_v4  ;;  %v3210_v32 = vmul.f32 1.442695, %v3096_v8  ;;  %2942 = vbcast.lane.b32.xlu0 %v5799_v30, 352  ;;  %4661 = vpow2.f32 %v1858_v55  ;;  %v8524_v55 = vld [vmem:[#allocation88_spill] sm:$0xff] }
 0x5ec   : > { %8520 = vst [vmem:[#allocation69_spill] sm:$0xff] %v7358_v27  ;;  %v3412_v6 = vmul.f32 %v8495_v13, %v2715_v31  ;;  %v1992_v2 = vmul.f32 %v6140_v1, %v8523_v50  ;;  %v2204_v60 = vmul.f32 %v4652_v33, %v7358_v27  ;;  %v2314_v43 = vsel %vm612_vm2, %v2306_v29, 0.0  ;;  %1508 = vbcast.lane.b32.xlu1 %v5775_v26, 360  ;;  %v8526_v33 = vld [vmem:[#allocation150_spill] sm:$0xff]  ;;  %v8527_v27 = vld [vmem:[#allocation145_spill] sm:$0xff] }
 0x5ed   : > { %v2140_v51 = vsel %vm612_vm2, %v2129_v0, 0.0  ;;  %4663 = vpow2.f32 %v3210_v32  ;;  %v3226_v3 = vmul.f32 1.442695, %v3104_v57  ;;  %v4654_v58 = vpop.eup %4653  ;;  %v7380_v9 = vadd.f32 %v3576_v48, %v8524_v55  ;;  %v8530_v55 = vld [vmem:[#allocation77_spill] sm:$0xff] }
 0x5ee   : > { %v7376_v8 = vadd.f32 %v2140_v51, %v2139_v23  ;;  %v3423_v13 = vsel %vm3417_vm10, %v3412_v6, 0.0  ;;  %v1529_v31 = vpop.permute.xlu0 %1528  ;;  %v7382_v50 = vadd.f32 %v2204_v60, %v1992_v2  ;;  %v2260_v29 = vmul.f32 %v8526_v33, %v7228_v54  ;;  %v8528_v6 = vld [vmem:[#allocation70_spill] sm:$0xff] }
 0x5ef   : > { %v3424_v0 = vadd.f32 %v3423_v13, %v7128_v34  ;;  %v2307_v1 = vmul.f32 %v8527_v27, %v1529_v31  ;;  %v2807_v32 = vpop.permute.xlu1 %2806  ;;  %v7389_v57 = vadd.f32 %v3665_v5, %v7298_v42  ;;  %v2315_v23 = vadd.f32 %v2314_v43, %v2313_v25  ;;  %1512 = vbcast.lane.b32.xlu0 %v5775_v26, 368  ;;  %v7397_v34 = vld [vmem:[#allocation25 + $0x28] sm:$0xff] }
 0x5f0   : > { %8525 = vst [vmem:[#allocation62_spill] sm:$0xff] %v7382_v50  ;;  %v3547_v51 = vmul.f32 %v3539_v36, %v2807_v32  ;;  %v2000_v48 = vmul.f32 %v6150_v49, %v8528_v6  ;;  %v2249_v2 = vmul.f32 %v4654_v58, %v7382_v50  ;;  %2790 = vbcast.lane.b32.xlu1 %v5739_v20, 368  ;;  %4665 = vpow2.f32 %v3226_v3  ;;  %v8531_v6 = vld [vmem:[#allocation51_spill] sm:$0xff] }
 0x5f1   : > { %v4656_v60 = vpop.eup %4655  ;;  %v2316_v54 = vsel %vm612_vm2, %v2307_v1, 0.0  ;;  %v3089_v42 = vmul.f32 %v7070_v21, %v8469_v53  ;;  %v3386_v58 = vmul.f32 %v7161_v61, %v8501_v38  ;;  %v7413_v13 = vmul.f32 %v7207_v44, %v8501_v38  ;;  %v8532_v61 = vld [vmem:[#allocation99_spill] sm:$0xff] }
 0x5f2   : > { %v7401_v36 = vadd.f32 %v2316_v54, %v2315_v23  ;;  %v3556_v25 = vsel %vm3417_vm10, %v3547_v51, 0.0  ;;  %v7404_v27 = vpop.permute.xlu0 %2655  ;;  %v7406_v5 = vadd.f32 %v2249_v2, %v2000_v48  ;;  %v3621_v43 = vmul.f32 %v4656_v60, %v7380_v9  ;;  %v8533_v54 = vld [vmem:[#allocation85_spill] sm:$0xff] }
 0x5f3   : > { %v4658_v1 = vpop.eup %4657  ;;  %v3557_v3 = vadd.f32 %v3556_v25, %v7226_v46  ;;  %v2867_v31 = vpop.permute.xlu1 %2866  ;;  %v2008_v33 = vmul.f32 %v6134_v40, %v8530_v55  ;;  %2794 = vbcast.lane.b32.xlu0 %v5739_v20, 376  ;;  %v3051_v44 = vmul.f32 %v7397_v34, %v8532_v61  ;;  %v3204_v46 = vmul.f32 1.442695, %v3093_v15  ;;  %v8534_v25 = vld [vmem:[#allocation157_spill] sm:$0xff] }
 0x5f4   : > { %8529 = vst [vmem:[#allocation80_spill] sm:$0xff] %v7406_v5  ;;  %v4660_v32 = vpop.eup %4659  ;;  %v3636_v23 = vmul.f32 %v7347_v4, %v2867_v31  ;;  %v2294_v51 = vmul.f32 %v4658_v1, %v7406_v5  ;;  %v7422_v48 = vadd.f32 %v3621_v43, %v8531_v6  ;;  %2910 = vbcast.lane.b32.xlu1 %v5787_v28, 352  ;;  %v3196_v60 = vmul.f32 1.442695, %v3089_v42  ;;  %v8535_v42 = vld [vmem:[#allocation135_spill] sm:$0xff] }
 0x5f5   : > { %v3710_v2 = vmul.f32 %v4660_v32, %v7389_v57  ;;  %v7431_v4 = vsel %vm2379_vm11, %v8534_v25, %v8533_v54  ;;  %v4662_v20 = vpop.eup %4661  ;;  %v2268_v1 = vsel %vm612_vm2, %v2260_v29, 0.0  ;;  %v3643_v43 = vsel %vm3417_vm10, %v7248_v45, 0.0  ;;  %v8536_v29 = vld [vmem:[#allocation137_spill] sm:$0xff] }
 0x5f6   : > { %v3644_v31 = vsel %vm3417_vm10, %v3636_v23, 0.0  ;;  %v2719_v55 = vpop.permute.xlu0 %2718  ;;  %v7437_v6 = vadd.f32 %v2294_v51, %v2008_v33  ;;  %v3097_v54 = vmul.f32 %v7070_v21, %v8485_v52  ;;  %v3120_v23 = vmul.f32 1.442695, %v3051_v44 }
 0x5f7   : > { %v4664_v15 = vpop.eup %4663  ;;  %v7439_v61 = vadd.f32 %v3644_v31, %v3643_v43  ;;  %v3413_v32 = vmul.f32 %v8535_v42, %v2719_v55  ;;  %v1497_v5 = vpop.permute.xlu1 %1496  ;;  %v7442_v50 = vadd.f32 %v3710_v2, %v3386_v58  ;;  %2914 = vbcast.lane.b32.xlu0 %v5787_v28, 360  ;;  %v2270_v51 = vadd.f32 %v7340_v63, %v2268_v1  ;;  %v8537_v43 = vld [vmem:[#allocation47_spill] sm:$0xff]  ;;  %v8539_v63 = vld [vmem:[#allocation56_spill] sm:$0xff] }
 0x5f8   : > { %v2262_v25 = vmul.f32 %v8536_v29, %v1497_v5  ;;  %v2339_v45 = vmul.f32 %v4662_v20, %v7437_v6  ;;  %v3666_v33 = vmul.f32 %v4664_v15, %v7422_v48  ;;  %v2350_v31 = vmul.f32 %v8537_v43, %v7285_v19  ;;  %1480 = vbcast.lane.b32.xlu1 %v5763_v24, 368  ;;  %v8538_v20 = vld [vmem:[#allocation79_spill] sm:$0xff] }
 0x5f9   : > { %v3425_v58 = vsel %vm3417_vm10, %v3413_v32, 0.0  ;;  %3763 = vst.msk [vmem:[#allocation2 + $0x8] sm:$0xff] %vm3417_vm10, %v7442_v50  ;;  %4667 = vpow2.f32 %v3196_v60  ;;  %v4711_v15 = vld [vmem:[#allocation25 + $0x20] sm:$0xff] }
 0x5fa   : > { %v7457_v5 = vadd.f32 %v3425_v58, %v3424_v0  ;;  %v2271_v2 = vsel %vm612_vm2, %v2262_v25, 0.0  ;;  %v2811_v44 = vpop.permute.xlu0 %2810  ;;  %v7461_v55 = vadd.f32 %v2339_v45, %v8538_v20  ;;  %v7464_v1 = vadd.f32 %v3666_v33, %v8539_v63  ;;  %v4666_v19 = vpop.eup %4665  ;;  %v8540_v43 = vld [vmem:[#allocation155_spill] sm:$0xff]  ;;  %v8541_v25 = vld [vmem:[#allocation100_spill] sm:$0xff]  ;;  %v8542_v20 = vld [vmem:[#allocation90_spill] sm:$0xff] }
 0x5fb   : > { %v3098_v42 = vmul.f32 %v4711_v15, %v8485_v52  ;;  %v7467_v32 = vadd.f32 %v2271_v2, %v2270_v51  ;;  %v3548_v29 = vmul.f32 %v7271_v59, %v2811_v44  ;;  %v1557_v60 = vpop.permute.xlu1 %1556  ;;  %v3212_v0 = vmul.f32 1.442695, %v3097_v54  ;;  %1544 = vbcast.lane.b32.xlu0 %v5787_v28, 368  ;;  %v8543_v51 = vld [vmem:[#allocation93_spill] sm:$0xff] }
 0x5fc   : > { %v2351_v58 = vmul.f32 %v8540_v43, %v1557_v60  ;;  %2398 = vst.msk [vmem:[#allocation2 + $0x28] sm:$0xff] %vm612_vm2, %v7461_v55  ;;  %v3059_v45 = vmul.f32 %v7397_v34, %v8541_v25  ;;  %4669 = vpow2.f32 %v3120_v23  ;;  %v3711_v33 = vmul.f32 %v4666_v19, %v7464_v1  ;;  %2694 = vbcast.lane.b32.xlu1 %v5799_v30, 304 }
 0x5fd   : > { %v2215_v2 = vmul.f32 %v8543_v51, %v8542_v20  ;;  %v3558_v59 = vsel %vm3417_vm10, %v3548_v29, 0.0  ;;  %4671 = vpow2.f32 %v3204_v46  ;;  %v3105_v54 = vmul.f32 %v7070_v21, %v8497_v35 }
 0x5fe   : > { %v2358_v44 = vsel %vm612_vm2, %v2350_v31, 0.0  ;;  %v7484_v63 = vadd.f32 %v3558_v59, %v3557_v3  ;;  %v2359_v60 = vsel %vm612_vm2, %v2351_v58, 0.0  ;;  %v2927_v23 = vpop.permute.xlu0 %2926  ;;  %v7488_v19 = vadd.f32 %v3711_v33, %v7413_v13  ;;  %v8544_v3 = vld [vmem:[#allocation133_spill] sm:$0xff]  ;;  %v8545_v13 = vld [vmem:[#allocation46_spill] sm:$0xff]  ;;  %v8546_v58 = vld [vmem:[#allocation132_spill] sm:$0xff] }
 0x5ff   : > { %v3214_v43 = vmul.f32 1.442695, %v3098_v42  ;;  %v2360_v25 = vadd.f32 %v2359_v60, %v2358_v44  ;;  %v7491_v29 = vmul.f32 %v7305_v41, %v2927_v23  ;;  %v2839_v20 = vpop.permute.xlu1 %2838  ;;  %4673 = vpow2.f32 %v3212_v0  ;;  %2826 = vbcast.lane.b32.xlu0 %v5751_v22, 376  ;;  %v8547_v44 = vld [vmem:[#allocation105_spill] sm:$0xff] }
 0x600   : > { %v3592_v46 = vmul.f32 %v7380_v9, %v2839_v20  ;;  %v3136_v21 = vmul.f32 1.442695, %v3059_v45  ;;  %3764 = vst.msk [vmem:[#allocation2 + $0x10] sm:$0xff] %vm3417_vm10, %v7488_v19  ;;  %v2217_v31 = vmul.f32 %v8544_v3, %v7293_v56  ;;  %2762 = vbcast.lane.b32.xlu1 %v8545_v13, 376  ;;  %v3228_v42 = vmul.f32 1.442695, %v3105_v54 }
 0x601   : > { %v3372_v41 = vmul.f32 %v8546_v58, %v6150_v49  ;;  %v2224_v0 = vsel %vm612_vm2, %v7289_v11, 0.0  ;;  %v2223_v9 = vsel %vm612_vm2, %v2215_v2, 0.0  ;;  %4675 = vpow2.f32 %v3214_v43 }
 0x602   : > { %v3601_v33 = vsel %vm3417_vm10, %v3592_v46, 0.0  ;;  %v1441_v45 = vpop.permute.xlu0 %1440  ;;  %v3067_v54 = vmul.f32 %v7397_v34, %v8439_v47  ;;  %4677 = vpow2.f32 %v3136_v21  ;;  %v3106_v20 = vmul.f32 %v4711_v15, %v8497_v35 }
 0x603   : > { %v4668_v51 = vpop.eup %4667  ;;  %v3602_v59 = vadd.f32 %v3601_v33, %v7291_v17  ;;  %v2174_v56 = vmul.f32 %v8547_v44, %v1441_v45  ;;  %v2899_v60 = vpop.permute.xlu1 %2898  ;;  %2946 = vbcast.lane.b32.xlu0 %v5799_v30, 360  ;;  %v2414_v11 = vld [vmem:[#allocation2 + $0x28] sm:$0xff]  ;;  %v2225_v46 = vadd.f32 %v2224_v0, %v2223_v9  ;;  %v2226_v43 = vsel %vm612_vm2, %v2217_v31, 0.0 }
 0x604   : > { %v3681_v23 = vmul.f32 %v7389_v57, %v2899_v60  ;;  %v3622_v2 = vmul.f32 %v4668_v51, %v7315_v10  ;;  %2882 = vbcast.lane.b32.xlu1 %v5775_v26, 360  ;;  %4679 = vpow2.f32 %v3228_v42  ;;  %v3688_v47 = vsel %vm3417_vm10, %v7343_v12, 0.0  ;;  %v8548_v31 = vld [vmem:[#allocation82_spill] sm:$0xff]  ;;  %v8549_v51 = vld [vmem:[#allocation113_spill] sm:$0xff] }
 0x605   : > { %v2185_v17 = vsel %vm612_vm2, %v2174_v56, 0.0  ;;  %v3152_v42 = vmul.f32 1.442695, %v3067_v54  ;;  %v8550_v44 = vld [vmem:[#allocation126_spill] sm:$0xff]  ;;  %v8551_v12 = vld [vmem:[#allocation149_spill] sm:$0xff] }
 0x606   : > { %v4670_v3 = vpop.eup %4669  ;;  %v7520_v57 = vadd.f32 %v2185_v17, %v7282_v18  ;;  %v3689_v21 = vsel %vm3417_vm10, %v3681_v23, 0.0  ;;  %v1561_v13 = vpop.permute.xlu0 %1560  ;;  %v7523_v58 = vadd.f32 %v3622_v2, %v3372_v41  ;;  %v3334_v56 = vmul.f32 %v8550_v44, %v8549_v51  ;;  %v8552_v60 = vld [vmem:[#allocation141_spill] sm:$0xff]  ;;  %v8553_v2 = vld [vmem:[#allocation142_spill] sm:$0xff] }
 0x607   : > { %v4672_v15 = vpop.eup %4671  ;;  %v7525_v0 = vadd.f32 %v3689_v21, %v3688_v47  ;;  %v2352_v9 = vmul.f32 %v8548_v31, %v1561_v13  ;;  %v1469_v33 = vpop.permute.xlu1 %1468  ;;  %v3398_v45 = vmul.f32 %v4670_v3, %v2414_v11  ;;  %v3380_v18 = vmul.f32 %v8551_v12, %v6134_v40  ;;  %1576 = vbcast.lane.b32.xlu0 %v5799_v30, 368  ;;  %v8554_v21 = vld [vmem:[#allocation156_spill] sm:$0xff]  ;;  %v8555_v13 = vld [vmem:[#allocation123_spill] sm:$0xff] }
 0x608   : > { %v2218_v17 = vmul.f32 %v8552_v60, %v1469_v33  ;;  %v3230_v41 = vmul.f32 1.442695, %v3106_v20  ;;  %v3373_v47 = vmul.f32 %v8553_v2, %v6150_v49  ;;  %v3623_v31 = vmul.f32 %v8555_v13, %v8554_v21  ;;  %1452 = vbcast.lane.b32.xlu1 %v5751_v22, 376 }
 0x609   : > { %v4674_v23 = vpop.eup %4673  ;;  %v2227_v11 = vadd.f32 %v2226_v43, %v2225_v46  ;;  %v2361_v54 = vsel %vm612_vm2, %v2352_v9, 0.0  ;;  %v3626_v44 = vmul.f32 %v4672_v15, %v7194_v14  ;;  %v7548_v13 = vadd.f32 %v3398_v45, %v3334_v56 }
 0x60a   : > { %v7540_v3 = vadd.f32 %v2361_v54, %v2360_v25  ;;  %v2228_v51 = vsel %vm612_vm2, %v2218_v17, 0.0  ;;  %v2843_v33 = vpop.permute.xlu0 %2842  ;;  %v3667_v20 = vmul.f32 %v4674_v23, %v7523_v58  ;;  %4681 = vpow2.f32 %v3152_v42  ;;  %v8557_v54 = vld [vmem:[#allocation139_spill] sm:$0xff] }
 0x60b   : > { %v7545_v12 = vadd.f32 %v2228_v51, %v2227_v11  ;;  %v3593_v60 = vmul.f32 %v7315_v10, %v2843_v33  ;;  %v2629_v2 = vpop.permute.xlu1 %2628  ;;  %2918 = vbcast.lane.b32.xlu0 %v5787_v28, 368  ;;  %v3075_v22 = vmul.f32 %v7397_v34, %v8305_v37  ;;  %4683 = vpow2.f32 %v3230_v41  ;;  %v4676_v43 = vpop.eup %4675  ;;  %v8556_v11 = vld [vmem:[#allocation115_spill] sm:$0xff] }
 0x60c   : > { %v3376_v46 = vmul.f32 %v2629_v2, %v6150_v49  ;;  %v7554_v25 = vadd.f32 %v3667_v20, %v3380_v18  ;;  %v7556_v15 = vadd.f32 %v3623_v31, %v3373_v47  ;;  %1572 = vbcast.lane.b32.xlu1 %v5799_v30, 360  ;;  %v4678_v10 = vpop.eup %4677  ;;  %v3381_v37 = vmul.f32 %v7345_v62, %v6134_v40  ;;  %v8558_v20 = vld [vmem:[#allocation109_spill] sm:$0xff] }
 0x60d   : > { %v3603_v9 = vsel %vm3417_vm10, %v3593_v60, 0.0  ;;  %v3444_v23 = vmul.f32 %v4678_v10, %v7548_v13  ;;  %v3168_v31 = vmul.f32 1.442695, %v3075_v22  ;;  %v3342_v51 = vmul.f32 %v8557_v54, %v8556_v11  ;;  %v8559_v22 = vld [vmem:[#allocation71_spill] sm:$0xff]  ;;  %v8561_v11 = vld [vmem:[#allocation110_spill] sm:$0xff] }
 0x60e   : > { %v7560_v45 = vadd.f32 %v3603_v9, %v3602_v59  ;;  %v7562_v42 = vadd.f32 %v3626_v44, %v3376_v46  ;;  %v1413_v56 = vpop.permute.xlu0 %1412  ;;  %v4680_v17 = vpop.eup %4679  ;;  %v3668_v33 = vmul.f32 %v4676_v43, %v7556_v15  ;;  %v3083_v60 = vmul.f32 %v7397_v34, %v8558_v20  ;;  %v8560_v43 = vld [vmem:[#allocation53_spill] sm:$0xff]  ;;  %v8562_v20 = vld [vmem:[#allocation48_spill] sm:$0xff] }
 0x60f   : > { %v2130_v18 = vmul.f32 %v7337_v39, %v1413_v56  ;;  %v2683_v41 = vpop.permute.xlu1 %2682  ;;  %2890 = vbcast.lane.b32.xlu0 %v5775_v26, 376  ;;  %v3712_v59 = vmul.f32 %v4680_v17, %v7554_v25  ;;  %v3452_v56 = vadd.f32 %v3444_v23, %v3342_v51  ;;  %4685 = vpow2.f32 %v3168_v31 }
 0x610   : > { %v3388_v47 = vmul.f32 %v2683_v41, %v8501_v38  ;;  %2854 = vbcast.lane.b32.xlu1 %v5763_v24, 368  ;;  %v7583_v46 = vadd.f32 %v3668_v33, %v3381_v37 }
 0x611   : > { %v2142_v44 = vsel %vm612_vm2, %v2130_v18, 0.0 }
 0x612   : > { %v7577_v39 = vadd.f32 %v2142_v44, %v7376_v8  ;;  %v1533_v62 = vpop.permute.xlu0 %1532  ;;  %v7581_v2 = vadd.f32 %v3712_v59, %v3388_v47  ;;  %v3184_v59 = vmul.f32 1.442695, %v3083_v60 }
 0x613   : > { %v2308_v9 = vmul.f32 %v8559_v22, %v1533_v62  ;;  %v2751_v10 = vpop.permute.xlu1 %2750  ;;  %1580 = vbcast.lane.b32.xlu0 %v5799_v30, 376  ;;  %v3350_v22 = vmul.f32 %v8562_v20, %v8513_v7 }
 0x614   : > { %v3459_v17 = vmul.f32 %v8560_v43, %v2751_v10  ;;  %3765 = vst.msk [vmem:[#allocation2 + $0x18] sm:$0xff] %vm3417_vm10, %v7581_v2  ;;  %v4682_v8 = vpop.eup %4681  ;;  %1484 = vbcast.lane.b32.xlu1 %v5763_v24, 376  ;;  %4687 = vpow2.f32 %v3184_v59  ;;  %v3733_v59 = vsel %vm3417_vm10, %v7491_v29, 0.0 }
 0x615   : > { %v2318_v18 = vsel %vm612_vm2, %v2308_v9, 0.0  ;;  %v4684_v41 = vpop.eup %4683  ;;  %v3489_v33 = vmul.f32 %v4682_v8, %v3452_v56 }
 0x616   : > { %v7593_v37 = vadd.f32 %v2318_v18, %v7401_v36  ;;  %v3470_v47 = vsel %vm3417_vm10, %v3459_v17, 0.0  ;;  %v2687_v23 = vpop.permute.xlu0 %2686  ;;  %v3713_v44 = vmul.f32 %v4684_v41, %v7583_v46  ;;  %v3091_v36 = vmul.f32 %v7397_v34, %v8469_v53  ;;  %v8563_v18 = vld [vmem:[#allocation106_spill] sm:$0xff] }
 0x617   : > { %v3471_v54 = vadd.f32 %v3470_v47, %v8561_v11  ;;  %v3389_v31 = vmul.f32 %v2687_v23, %v8501_v38  ;;  %v2871_v51 = vpop.permute.xlu1 %2870  ;;  %2954 = vbcast.lane.b32.xlu0 %v5799_v30, 376  ;;  %v7610_v8 = vadd.f32 %v3489_v33, %v3350_v22  ;;  %v3358_v41 = vmul.f32 %v8563_v18, %v8518_v16  ;;  %v4712_v23 = vld [vmem:[#allocation25 + $0x30] sm:$0xff]  ;;  %v8566_v18 = vld [vmem:[#allocation130_spill] sm:$0xff] }
 0x618   : > { %v3637_v62 = vmul.f32 %v7422_v48, %v2871_v51  ;;  %2698 = vbcast.lane.b32.xlu1 %v5799_v30, 312  ;;  %v3200_v7 = vmul.f32 1.442695, %v3091_v36  ;;  %v3099_v51 = vmul.f32 %v7397_v34, %v8485_v52  ;;  %v8564_v36 = vld [vmem:[#allocation146_spill] sm:$0xff] }
 0x619   : > { %v7606_v60 = vadd.f32 %v3713_v44, %v3389_v31 }
 0x61a   : > { %v3646_v9 = vsel %vm3417_vm10, %v3637_v62, 0.0  ;;  %v2755_v10 = vpop.permute.xlu0 %2754  ;;  %4689 = vpow2.f32 %v3200_v7 }
 0x61b   : > { %v3647_v43 = vadd.f32 %v3646_v9, %v7439_v61  ;;  %v3460_v17 = vmul.f32 %v3452_v56, %v2755_v10  ;;  %v2931_v48 = vpop.permute.xlu1 %2930  ;;  %3766 = vst.msk [vmem:[#allocation2 + $0x20] sm:$0xff] %vm3417_vm10, %v7606_v60  ;;  %v3100_v61 = vmul.f32 %v4712_v23, %v8485_v52  ;;  %v4686_v56 = vpop.eup %4685  ;;  %v3108_v9 = vmul.f32 %v4712_v23, %v8497_v35 }
 0x61c   : > { %v3726_v53 = vmul.f32 %v7442_v50, %v2931_v48  ;;  %2886 = vbcast.lane.b32.xlu1 %v5775_v26, 368  ;;  %v3534_v62 = vmul.f32 %v4686_v56, %v7610_v8  ;;  %v3216_v48 = vmul.f32 1.442695, %v3099_v51  ;;  %v8567_v56 = vld [vmem:[#allocation69_spill] sm:$0xff] }
 0x61d   : > { %v3472_v47 = vsel %vm3417_vm10, %v3460_v17, 0.0  ;;  %v3218_v22 = vmul.f32 1.442695, %v3100_v61  ;;  %v3234_v51 = vmul.f32 1.442695, %v3108_v9 }
 0x61e   : > { %v7622_v11 = vadd.f32 %v3472_v47, %v3471_v54  ;;  %v3734_v31 = vsel %vm3417_vm10, %v3726_v53, 0.0  ;;  %v2875_v50 = vpop.permute.xlu0 %2874  ;;  %v7634_v54 = vadd.f32 %v3534_v62, %v3358_v41  ;;  %v8565_v53 = vld [vmem:[#allocation120_spill] sm:$0xff]  ;;  %v4688_v41 = vpop.eup %4687  ;;  %v8569_v62 = vld [vmem:[#allocation117_spill] sm:$0xff] }
 0x61f   : > { %v7627_v16 = vadd.f32 %v3734_v31, %v3733_v59  ;;  %v3638_v33 = vmul.f32 %v7523_v58, %v2875_v50  ;;  %v1501_v44 = vpop.permute.xlu1 %1500  ;;  %v3366_v47 = vmul.f32 %v8566_v18, %v8565_v53  ;;  %v8568_v31 = vld [vmem:[#allocation148_spill] sm:$0xff]  ;;  %4691 = vpow2.f32 %v3218_v22  ;;  %v8571_v22 = vld [vmem:[#allocation143_spill] sm:$0xff] }
 0x620   : > { %v2263_v20 = vmul.f32 %v8564_v36, %v1501_v44  ;;  %1516 = vbcast.lane.b32.xlu1 %v5775_v26, 376  ;;  %v3579_v50 = vmul.f32 %v4688_v41, %v7634_v54  ;;  %4693 = vpow2.f32 %v3216_v48  ;;  %v3374_v9 = vmul.f32 %v8571_v22, %v6150_v49  ;;  %v8575_v22 = vld [vmem:[#allocation101_spill] sm:$0xff] }
 0x621   : > { %v3648_v29 = vsel %vm3417_vm10, %v3638_v33, 0.0  ;;  %4695 = vpow2.f32 %v3234_v51  ;;  %v8573_v51 = vld [vmem:[#allocation59_spill] sm:$0xff] }
 0x622   : > { %v7637_v10 = vadd.f32 %v3648_v29, %v3647_v43  ;;  %v2273_v17 = vsel %vm612_vm2, %v2263_v20, 0.0  ;;  %v1445_v58 = vpop.permute.xlu0 %1444  ;;  %v3107_v43 = vmul.f32 %v7397_v34, %v8497_v35  ;;  %v8570_v20 = vld [vmem:[#allocation78_spill] sm:$0xff] }
 0x623   : > { %v7643_v7 = vadd.f32 %v2273_v17, %v7467_v32  ;;  %v2175_v59 = vmul.f32 %v8567_v56, %v1445_v58  ;;  %v2783_v26 = vpop.permute.xlu1 %2782  ;;  %v7660_v17 = vadd.f32 %v3579_v50, %v3366_v47 }
 0x624   : > { %v3504_v61 = vmul.f32 %v8568_v31, %v2783_v26  ;;  %2858 = vbcast.lane.b32.xlu1 %v5763_v24, 376  ;;  %v3232_v58 = vmul.f32 1.442695, %v3107_v43  ;;  %v4690_v48 = vpop.eup %4689  ;;  %v8572_v26 = vld [vmem:[#allocation98_spill] sm:$0xff] }
 0x625   : > { %v2187_v23 = vsel %vm612_vm2, %v2175_v59, 0.0  ;;  %v3624_v49 = vmul.f32 %v4690_v48, %v7660_v17 }
 0x626   : > { %v7653_v32 = vadd.f32 %v2187_v23, %v7520_v57  ;;  %v3515_v33 = vsel %vm3417_vm10, %v3504_v61, 0.0  ;;  %v1565_v44 = vpop.permute.xlu0 %1564  ;;  %4697 = vpow2.f32 %v3232_v58 }
 0x627   : > { %v7657_v36 = vadd.f32 %v3515_v33, %v8569_v62  ;;  %v2353_v34 = vmul.f32 %v8570_v20, %v1565_v44  ;;  %v2903_v29 = vpop.permute.xlu1 %2902  ;;  %v8574_v20 = vld [vmem:[#allocation111_spill] sm:$0xff] }
 0x628   : > { %v3682_v24 = vmul.f32 %v7464_v1, %v2903_v29  ;;  %1548 = vbcast.lane.b32.xlu1 %v5787_v28, 376 }
 0x629   : > { %v2363_v57 = vsel %vm612_vm2, %v2353_v34, 0.0  ;;  %v4692_v23 = vpop.eup %4691 }
 0x62a   : > { %v7668_v53 = vadd.f32 %v2363_v57, %v7540_v3  ;;  %v3691_v18 = vsel %vm3417_vm10, %v3682_v24, 0.0  ;;  %v2847_v56 = vpop.permute.xlu0 %2846  ;;  %v7679_v3 = vadd.f32 %v3624_v49, %v3374_v9  ;;  %v4694_v62 = vpop.eup %4693  ;;  %v3670_v34 = vmul.f32 %v4692_v23, %v8574_v20  ;;  %v3792_v23 = vld [vmem:[#allocation28 + $0x10] sm:$0xff] }
 0x62b   : > { %v7672_v47 = vadd.f32 %v3691_v18, %v7525_v0  ;;  %v3594_v1 = vmul.f32 %v8554_v21, %v2847_v56  ;;  %v1473_v59 = vpop.permute.xlu1 %1472  ;;  %v3382_v21 = vmul.f32 %v7404_v27, %v6134_v40  ;;  %v4696_v58 = vpop.eup %4695 }
 0x62c   : > { %v2219_v41 = vmul.f32 %v8572_v26, %v1473_v59  ;;  %2950 = vbcast.lane.b32.xlu1 %v5799_v30, 368  ;;  %v3669_v29 = vmul.f32 %v4694_v62, %v7679_v3 }
 0x62d   : > { %v3605_v31 = vsel %vm3417_vm10, %v3594_v1, 0.0 }
 0x62e   : > { %v7682_v61 = vadd.f32 %v3605_v31, %v7560_v45  ;;  %v2230_v0 = vsel %vm612_vm2, %v2219_v41, 0.0  ;;  %v1417_v43 = vpop.permute.xlu0 %1416  ;;  %v7702_v48 = vadd.f32 %v3669_v29, %v3382_v21  ;;  %v8576_v21 = vld [vmem:[#allocation154_spill] sm:$0xff] }
 0x62f   : > { %v7688_v50 = vadd.f32 %v2230_v0, %v7545_v12  ;;  %v2131_v33 = vmul.f32 %v8573_v51, %v1417_v43  ;;  %v2660_v44 = vpop.permute.xlu1 %2659  ;;  %v3790_v0 = vld [vmem:[#allocation28] sm:$0xff]  ;;  %v3791_v43 = vld [vmem:[#allocation28 + $0x8] sm:$0xff] }
 0x630   : > { %v3383_v30 = vmul.f32 %v2660_v44, %v6134_v40  ;;  %2922 = vbcast.lane.b32.xlu1 %v5787_v28, 376  ;;  %v4698_v1 = vpop.eup %4697  ;;  %v3793_v44 = vld [vmem:[#allocation28 + $0x18] sm:$0xff] }
 0x631   : > { %v2144_v45 = vsel %vm612_vm2, %v2131_v33, 0.0  ;;  %v4270_v33 = vpack.c.bf16 %v3791_v43, %v3790_v0  ;;  %v3797_v43 = vld [vmem:[#allocation28 + $0x38] sm:$0xff] }
 0x632   : > { %v7697_v24 = vadd.f32 %v2144_v45, %v7577_v39  ;;  %v1537_v27 = vpop.permute.xlu0 %1536  ;;  %v7699_v12 = vadd.f32 %v3670_v34, %v3383_v30  ;;  %v8577_v45 = vld [vmem:[#allocation94_spill] sm:$0xff] }
 0x633   : > { %v2309_v9 = vmul.f32 %v8575_v22, %v1537_v27  ;;  %v2723_v57 = vpop.permute.xlu1 %2722  ;;  %4271 = vmatpush3.bf16.msra.mxu1 %v4270_v33  ;;  %v3794_v22 = vld [vmem:[#allocation28 + $0x20] sm:$0xff] }
 0x634   : > { %v3414_v18 = vmul.f32 %v7548_v13, %v2723_v57  ;;  %v7706_v56 = vmul.f32 %v4696_v58, %v7699_v12  ;;  %v3714_v13 = vmul.f32 %v4698_v1, %v7702_v48  ;;  %v8578_v58 = vmov 0.0|0.0  }
 0x635   : > { %v2320_v28 = vsel %vm612_vm2, %v2309_v9, 0.0  ;;  %4272 = vmatprep.subr.bf16.mxu1 %v8578_v58  ;;  %v3795_v9 = vld [vmem:[#allocation28 + $0x28] sm:$0xff] }
 0x636   : > { %v7710_v39 = vadd.f32 %v2320_v28, %v7593_v37  ;;  %v3427_v59 = vsel %vm3417_vm10, %v3414_v18, 0.0  ;;  %v2691_v49 = vpop.permute.xlu0 %2690  ;;  %v8579_v28 = vld [vmem:[#allocation81_spill] sm:$0xff] }
 0x637   : > { %v7714_v26 = vadd.f32 %v3427_v59, %v7457_v5  ;;  %v3390_v41 = vmul.f32 %v2691_v49, %v8501_v38  ;;  %v2815_v31 = vpop.permute.xlu1 %2814  ;;  %v4273_v5 = vpack.c.bf16 %v3793_v44, %v3792_v23  ;;  %v3101_v1 = vmul.f32 %v8579_v28, %v8485_v52  ;;  %v8580_v23 = vld [vmem:[#allocation68_spill] sm:$0xff] }
 0x638   : > { %v3549_v51 = vmul.f32 %v8576_v21, %v2815_v31 }
 0x639   : > { %v7719_v37 = vadd.f32 %v3714_v13, %v3390_v41  ;;  %4274 = vmatpush3.bf16.msra.mxu1 %v4273_v5  ;;  %v4276_v41 = vpack.c.bf16 %v3795_v9, %v3794_v22  ;;  %v3220_v21 = vmul.f32 1.442695, %v3101_v1 }
 0x63a   : > { %v3560_v62 = vsel %vm3417_vm10, %v3549_v51, 0.0  ;;  %v2759_v30 = vpop.permute.xlu0 %2758  ;;  %4275 = vmatprep.subr.bf16.mxu1 %v8578_v58  ;;  %v3109_v51 = vmul.f32 %v8579_v28, %v8497_v35 }
 0x63b   : > { %v7723_v34 = vadd.f32 %v3560_v62, %v7484_v63  ;;  %v3461_v29 = vmul.f32 %v8577_v45, %v2759_v30  ;;  %v2935_v27 = vpop.permute.xlu1 %2934  ;;  %3767 = vst.msk [vmem:[#allocation2 + $0x28] sm:$0xff] %vm3417_vm10, %v7719_v37  ;;  %4699 = vpow2.f32 %v3220_v21 }
 0x63c   : > { %v3727_v57 = vmul.f32 %v7488_v19, %v2935_v27  ;;  %v3796_v19 = vld [vmem:[#allocation28 + $0x30] sm:$0xff]  ;;  %v3236_v45 = vmul.f32 1.442695, %v3109_v51 }
 0x63d   : > { %v3474_v18 = vsel %vm3417_vm10, %v3461_v29, 0.0  ;;  %4277 = vmatpush3.bf16.msra.mxu1 %v4276_v41 }
 0x63e   : > { %v7734_v63 = vadd.f32 %v3474_v18, %v7622_v11  ;;  %v3736_v59 = vsel %vm3417_vm10, %v3727_v57, 0.0  ;;  %v2879_v49 = vpop.permute.xlu0 %2878  ;;  %4278 = vmatprep.subr.bf16.mxu1 %v8578_v58  ;;  %4701 = vpow2.f32 %v3236_v45  ;;  %v8581_v18 = vld [vmem:[#allocation62_spill] sm:$0xff] }
 0x63f   : > { %v7738_v31 = vadd.f32 %v3736_v59, %v7627_v16  ;;  %v3639_v13 = vmul.f32 %v7556_v15, %v2879_v49  ;;  %v1505_v0 = vpop.permute.xlu1 %1504  ;;  %v4279_v15 = vpack.c.bf16 %v3797_v43, %v3796_v19 }
 0x640   : > { %v2264_v52 = vmul.f32 %v8580_v23, %v1505_v0 }
 0x641   : > { %v3650_v11 = vsel %vm3417_vm10, %v3639_v13, 0.0  ;;  %4280 = vmatpush3.bf16.msra.mxu1 %v4279_v15  ;;  %v8582_v13 = vld [vmem:[#allocation89_spill] sm:$0xff] }
 0x642   : > { %v7747_v33 = vadd.f32 %v3650_v11, %v7637_v10  ;;  %v2275_v16 = vsel %vm612_vm2, %v2264_v52, 0.0  ;;  %v7750_v44 = vpop.permute.xlu0 %1448 }
 0x643   : > { %v7753_v62 = vadd.f32 %v2275_v16, %v7643_v7  ;;  %v2787_v30 = vpop.permute.xlu1 %2786 }
 0x644   : > { %v3505_v5 = vmul.f32 %v7610_v8, %v2787_v30 }
 0x645   : > { %v4700_v49 = vpop.eup %4699 }
 0x646   : > { %v3517_v35 = vsel %vm3417_vm10, %v3505_v5, 0.0  ;;  %v7758_v10 = vpop.permute.xlu0 %1568  ;;  %v3671_v19 = vmul.f32 %v4700_v49, %v7562_v42 }
 0x647   : > { %v3518_v29 = vadd.f32 %v3517_v35, %v7657_v36  ;;  %v2907_v27 = vpop.permute.xlu1 %2906 }
 0x648   : > { %v3683_v22 = vmul.f32 %v7554_v25, %v2907_v27  ;;  %v4702_v11 = vpop.eup %4701 }
 0x64a   : > { %v3693_v7 = vsel %vm3417_vm10, %v3683_v22, 0.0  ;;  %v2851_v9 = vpop.permute.xlu0 %2850 }
 0x64b   : > { %v7764_v58 = vadd.f32 %v3693_v7, %v7672_v47  ;;  %v3595_v8 = vmul.f32 %v7660_v17, %v2851_v9  ;;  %v1477_v57 = vpop.permute.xlu1 %1476 }
 0x64c   : > { %v2220_v28 = vmul.f32 %v8581_v18, %v1477_v57  ;;  %v8584_v57 = vld [vmem:[#allocation107_spill] sm:$0xff] }
 0x64d   : > { %v3607_v1 = vsel %vm3417_vm10, %v3595_v8, 0.0 }
 0x64e   : > { %v7770_v59 = vadd.f32 %v3607_v1, %v7682_v61  ;;  %v2232_v36 = vsel %vm612_vm2, %v2220_v28, 0.0  ;;  %v1421_v25 = vpop.permute.xlu0 %1420 }
 0x64f   : > { %v7774_v41 = vadd.f32 %v2232_v36, %v7688_v50  ;;  %v2132_v47 = vmul.f32 %v8582_v13, %v1421_v25  ;;  %v2664_v0 = vpop.permute.xlu1 %2663  ;;  %v8583_v50 = vld [vmem:[#allocation121_spill] sm:$0xff] }
 0x650   : > { %v3384_v17 = vmul.f32 %v2664_v0, %v6134_v40 }
 0x651   : > { %v2146_v43 = vsel %vm612_vm2, %v2132_v47, 0.0 }
 0x652   : > { %v2147_v23 = vadd.f32 %v2146_v43, %v7697_v24  ;;  %v7781_v61 = vadd.f32 %v3671_v19, %v3384_v17  ;;  %v7783_v52 = vpop.permute.xlu0 %1540  ;;  %v8585_v43 = vld [vmem:[#allocation112_spill] sm:$0xff] }
 0x653   : > { %v2727_v21 = vpop.permute.xlu1 %2726 }
 0x654   : > { %v2148_v51 = vrot.slane %v2147_v23, 4  ;;  %v3415_v16 = vmul.f32 %v8583_v50, %v2727_v21  ;;  %v7787_v15 = vmul.f32 %v4702_v11, %v7781_v61 }
 0x656   : > { %v2149_v30 = vadd.f32 %v2148_v51, %v2147_v23  ;;  %v3429_v40 = vsel %vm3417_vm10, %v3415_v16, 0.0  ;;  %v2731_v5 = vpop.permute.xlu0 %2730  ;;  %v8586_v23 = vld [vmem:[#allocation91_spill] sm:$0xff] }
 0x657   : > { %v3430_v45 = vadd.f32 %v3429_v40, %v7714_v26  ;;  %v2819_v35 = vpop.permute.xlu1 %2818  ;;  %v8587_v16 = vld [vmem:[#allocation127_spill] sm:$0xff] }
 0x658   : > { %v2150_v24 = vrot.slane %v2149_v30, 2  ;;  %v3550_v27 = vmul.f32 %v7634_v54, %v2819_v35 }
 0x65a   : > { %v2151_v22 = vadd.f32 %v2150_v24, %v2149_v30  ;;  %v3562_v7 = vsel %vm3417_vm10, %v3550_v27, 0.0  ;;  %v2823_v9 = vpop.permute.xlu0 %2822 }
 0x65b   : > { %v3563_v8 = vadd.f32 %v3562_v7, %v7723_v34  ;;  %v3551_v18 = vmul.f32 %v8584_v57, %v2823_v9  ;;  %v2939_v28 = vpop.permute.xlu1 %2938 }
 0x65c   : > { %v2152_v1 = vrot.slane %v2151_v22, 1  ;;  %v3728_v36 = vmul.f32 %v7581_v2, %v2939_v28  ;;  %v3416_v2 = vmul.f32 %v8585_v43, %v2731_v5 }
 0x65d   : > { %v3564_v25 = vsel %vm3417_vm10, %v3551_v18, 0.0 }
 0x65e   : > { %v2153_v49 = vadd.f32 %v2152_v1, %v2151_v22  ;;  %v3565_v26 = vadd.f32 %v3564_v25, %v3563_v8  ;;  %v3738_v13 = vsel %vm3417_vm10, %v3728_v36, 0.0  ;;  %v2943_v47 = vpop.permute.xlu0 %2942  ;;  %v3431_v40 = vsel %vm3417_vm10, %v3416_v2, 0.0  ;;  %v8588_v36 = vld [vmem:[#allocation76_spill] sm:$0xff] }
 0x65f   : > { %v3739_v54 = vadd.f32 %v3738_v13, %v7738_v31  ;;  %v7799_v0 = vpop.permute.xlu1 %1508  ;;  %v3432_v24 = vadd.f32 %v3431_v40, %v3430_v45  ;;  %v8589_v13 = vld [vmem:[#allocation104_spill] sm:$0xff] }
 0x660   : > { %v7803_v34 = vsel %vm939_vm6, %v7431_v4, %v2153_v49 }
 0x661   : > { %v3433_v5 = vrot.slane %v3432_v24, 4 }
 0x662   : > { %v7805_v17 = vpop.permute.xlu0 %1512 }
 0x663   : > { %v2791_v19 = vpop.permute.xlu1 %2790  ;;  %v3434_v1 = vadd.f32 %v3433_v5, %v3432_v24 }
 0x664   : > { %v3506_v11 = vmul.f32 %v8586_v23, %v2791_v19 }
 0x666   : > { %v3519_v21 = vsel %vm3417_vm10, %v3506_v11, 0.0  ;;  %v2795_v51 = vpop.permute.xlu0 %2794 }
 0x667   : > { %v3520_v50 = vadd.f32 %v3519_v21, %v3518_v29  ;;  %v3507_v30 = vmul.f32 %v8587_v16, %v2795_v51  ;;  %v2911_v31 = vpop.permute.xlu1 %2910  ;;  %v3729_v29 = vmul.f32 %v7606_v60, %v2943_v47  ;;  %v8590_v60 = vld [vmem:[#allocation95_spill] sm:$0xff]  ;;  %v3435_v21 = vrot.slane %v3434_v1, 2 }
 0x668   : > { %v2176_v47 = vmul.f32 %v8590_v60, %v7750_v44  ;;  %v3684_v51 = vmul.f32 %v7583_v46, %v2911_v31 }
 0x669   : > { %v3521_v35 = vsel %vm3417_vm10, %v3507_v30, 0.0  ;;  %v3740_v43 = vsel %vm3417_vm10, %v3729_v29, 0.0  ;;  %v3436_v46 = vadd.f32 %v3435_v21, %v3434_v1 }
 0x66a   : > { %v2915_v4 = vpop.permute.xlu0 %2914  ;;  %v3522_v22 = vadd.f32 %v3521_v35, %v3520_v50  ;;  %v3741_v40 = vadd.f32 %v3740_v43, %v3739_v54 }
 0x66b   : > { %v1481_v27 = vpop.permute.xlu1 %1480  ;;  %v3437_v1 = vrot.slane %v3436_v46, 1 }
 0x66c   : > { %v3523_v8 = vrot.slane %v3522_v22, 4 }
 0x66e   : > { %v7813_v7 = vpop.permute.xlu0 %1544  ;;  %v3524_v45 = vadd.f32 %v3523_v8, %v3522_v22  ;;  %v3685_v22 = vmul.f32 %v7702_v48, %v2915_v4 }
 0x66f   : > { %v2695_v9 = vpop.permute.xlu1 %2694 }
 0x670   : > { %v3391_v57 = vmul.f32 %v2695_v9, %v8501_v38  ;;  %v3525_v35 = vrot.slane %v3524_v45, 2  ;;  %v3697_v4 = vsel %vm3417_vm10, %v3685_v22, 0.0 }
 0x672   : > { %v2827_v18 = vpop.permute.xlu0 %2826  ;;  %v7818_v28 = vadd.f32 %v7706_v56, %v3391_v57  ;;  %v3526_v29 = vadd.f32 %v3525_v35, %v3524_v45 }
 0x673   : > { %v3552_v25 = vmul.f32 %v8588_v36, %v2827_v18  ;;  %v2763_v49 = vpop.permute.xlu1 %2762  ;;  %v8591_v18 = vld [vmem:[#allocation140_spill] sm:$0xff] }
 0x674   : > { %v3462_v19 = vmul.f32 %v8589_v13, %v2763_v49  ;;  %3768 = vst.msk [vmem:[#allocation2 + $0x30] sm:$0xff] %vm3417_vm10, %v7818_v28 }
 0x675   : > { %v3566_v2 = vsel %vm3417_vm10, %v3552_v25, 0.0 }
 0x676   : > { %v3567_v23 = vadd.f32 %v3566_v2, %v3565_v26  ;;  %v3476_v56 = vsel %vm3417_vm10, %v3462_v19, 0.0  ;;  %v2947_v11 = vpop.permute.xlu0 %2946  ;;  %v2189_v26 = vsel %vm612_vm2, %v2176_v47, 0.0 }
 0x677   : > { %v3477_v50 = vadd.f32 %v3476_v56, %v7734_v63  ;;  %v3730_v16 = vmul.f32 %v7719_v37, %v2947_v11  ;;  %v2883_v30 = vpop.permute.xlu1 %2882  ;;  %v3695_v63 = vsel %vm3417_vm10, %v3684_v51, 0.0  ;;  %v2190_v48 = vadd.f32 %v2189_v26, %v7653_v32 }
 0x678   : > { %v3568_v24 = vrot.slane %v3567_v23, 4  ;;  %v3696_v49 = vadd.f32 %v3695_v63, %v7764_v58 }
 0x679   : > { %v3478_v5 = vrot.slane %v3477_v50, 4  ;;  %v3742_v44 = vsel %vm3417_vm10, %v3730_v16, 0.0 }
 0x67a   : > { %v3569_v9 = vadd.f32 %v3568_v24, %v3567_v23  ;;  %v7835_v8 = vadd.f32 %v3742_v44, %v3741_v40  ;;  %v1577_v57 = vpop.permute.xlu0 %1576  ;;  %v3527_v23 = vrot.slane %v3526_v29, 1  ;;  %v3698_v56 = vadd.f32 %v3697_v4, %v3696_v49 }
 0x67b   : > { %v3479_v31 = vadd.f32 %v3478_v5, %v3477_v50  ;;  %v1453_v37 = vpop.permute.xlu1 %1452  ;;  %v8592_v50 = vld [vmem:[#allocation84_spill] sm:$0xff]  ;;  %v3438_v40 = vadd.f32 %v3437_v1, %v3436_v46  ;;  %v3640_v1 = vmul.f32 %v7679_v3, %v2883_v30  ;;  %v8598_v30 = vld [vmem:[#allocation103_spill] sm:$0xff] }
 0x67c   : > { %v3570_v54 = vrot.slane %v3569_v9, 2  ;;  %v2177_v36 = vmul.f32 %v8591_v18, %v1453_v37  ;;  %v2221_v16 = vmul.f32 %v8592_v50, %v1481_v27  ;;  %v3528_v5 = vadd.f32 %v3527_v23, %v3526_v29 }
 0x67d   : > { %v3480_v25 = vrot.slane %v3479_v31, 2 }
 0x67e   : > { %v3571_v13 = vadd.f32 %v3570_v54, %v3569_v9  ;;  %v2191_v19 = vsel %vm612_vm2, %v2177_v36, 0.0  ;;  %v2919_v43 = vpop.permute.xlu0 %2918  ;;  %v8594_v9 = vld [vmem:[#allocation87_spill] sm:$0xff]  ;;  %v2234_v27 = vsel %vm612_vm2, %v2221_v16, 0.0  ;;  %v8599_v16 = vld [vmem:[#allocation122_spill] sm:$0xff] }
 0x67f   : > { %v3481_v2 = vadd.f32 %v3480_v25, %v3479_v31  ;;  %v2192_v60 = vadd.f32 %v2191_v19, %v2190_v48  ;;  %v3686_v47 = vmul.f32 %v7699_v12, %v2919_v43  ;;  %v1573_v45 = vpop.permute.xlu1 %1572  ;;  %v8593_v12 = vld [vmem:[#allocation50_spill] sm:$0xff]  ;;  %v2354_v63 = vmul.f32 %v8594_v9, %v7758_v10 }
 0x680   : > { %v3572_v11 = vrot.slane %v3571_v13, 1  ;;  %v2355_v29 = vmul.f32 %v7461_v55, %v1573_v45  ;;  %v8595_v10 = vld [vmem:[#allocation66_spill] sm:$0xff]  ;;  %v2235_v19 = vadd.f32 %v2234_v27, %v7774_v41  ;;  %v8600_v27 = vld [vmem:[#allocation147_spill] sm:$0xff] }
 0x681   : > { %v3482_v21 = vrot.slane %v3481_v2, 1  ;;  %v2193_v32 = vrot.slane %v2192_v60, 4  ;;  %v3699_v51 = vsel %vm3417_vm10, %v3686_v47, 0.0 }
 0x682   : > { %v7846_v58 = vadd.f32 %v3699_v51, %v3698_v56  ;;  %v2891_v44 = vpop.permute.xlu0 %2890  ;;  %v3573_v31 = vadd.f32 %v3572_v11, %v3571_v13  ;;  %v2365_v13 = vsel %vm612_vm2, %v2354_v63, 0.0  ;;  %v8596_v56 = vld [vmem:[#allocation80_spill] sm:$0xff] }
 0x683   : > { %v3483_v35 = vadd.f32 %v3482_v21, %v3481_v2  ;;  %v2194_v24 = vadd.f32 %v2193_v32, %v2192_v60  ;;  %v2855_v22 = vpop.permute.xlu1 %2854  ;;  %v2366_v23 = vadd.f32 %v2365_v13, %v7668_v53  ;;  %v2265_v11 = vmul.f32 %v8596_v56, %v7799_v0  ;;  %v8597_v32 = vld [vmem:[#allocation61_spill] sm:$0xff] }
 0x684   : > { %v3596_v26 = vmul.f32 %v8593_v12, %v2855_v22  ;;  %v2356_v41 = vmul.f32 %v8597_v32, %v1577_v57  ;;  %v3642_v57 = vmul.f32 %v7562_v42, %v2891_v44 }
 0x685   : > { %v3754_v37 = vsel %vm2379_vm11, %v3438_v40, %v3483_v35  ;;  %v2195_v54 = vrot.slane %v2194_v24, 2  ;;  %v2266_v40 = vmul.f32 %v8599_v16, %v7805_v17  ;;  %v3652_v35 = vsel %vm3417_vm10, %v3640_v1, 0.0 }
 0x686   : > { %v3755_v18 = vsel %vm939_vm6, %v3754_v37, %v3528_v5  ;;  %v3609_v46 = vsel %vm3417_vm10, %v3596_v26, 0.0  ;;  %v1581_v2 = vpop.permute.xlu0 %1580  ;;  %v3653_v5 = vadd.f32 %v3652_v35, %v7747_v33  ;;  %v2369_v12 = vsel %vm612_vm2, %v2356_v41, 0.0  ;;  %v8602_v41 = vld [vmem:[#allocation153_spill] sm:$0xff] }
 0x687   : > { %v2196_v36 = vadd.f32 %v2195_v54, %v2194_v24  ;;  %v7857_v48 = vadd.f32 %v3609_v46, %v7770_v59  ;;  %v1485_v4 = vpop.permute.xlu1 %1484  ;;  %v7860_v25 = vsel %vm2382_vm12, %v3755_v18, %v3573_v31  ;;  %v2367_v59 = vsel %vm612_vm2, %v2355_v29, 0.0 }
 0x688   : > { %v2222_v49 = vmul.f32 %v8595_v10, %v1485_v4  ;;  %v2357_v51 = vmul.f32 %v8598_v30, %v1581_v2  ;;  %v2368_v24 = vadd.f32 %v2367_v59, %v2366_v23  ;;  %v2279_v9 = vsel %vm612_vm2, %v2266_v40, 0.0  ;;  %v8601_v4 = vld [vmem:[#allocation136_spill] sm:$0xff] }
 0x689   : > { %v2197_v43 = vrot.slane %v2196_v36, 1  ;;  %v3656_v33 = vsel %vm3417_vm10, %v3642_v57, 0.0  ;;  %v2311_v10 = vmul.f32 %v8601_v4, %v7813_v7 }
 0x68a   : > { %v2236_v60 = vsel %vm612_vm2, %v2222_v49, 0.0  ;;  %v2371_v17 = vsel %vm612_vm2, %v2357_v51, 0.0  ;;  %v2955_v40 = vpop.permute.xlu0 %2954 }
 0x68b   : > { %v2198_v55 = vadd.f32 %v2197_v43, %v2196_v36  ;;  %v2237_v47 = vadd.f32 %v2236_v60, %v2235_v19  ;;  %v2699_v45 = vpop.permute.xlu1 %2698  ;;  %v2324_v59 = vsel %vm612_vm2, %v2311_v10, 0.0 }
 0x68c   : > { %v3392_v21 = vmul.f32 %v2699_v45, %v8501_v38  ;;  %v2277_v38 = vsel %vm612_vm2, %v2265_v11, 0.0 }
 0x68d   : > { %v2383_v3 = vsel %vm2382_vm12, %v7803_v34, %v2198_v55  ;;  %v2238_v50 = vrot.slane %v2237_v47, 4  ;;  %v2278_v31 = vadd.f32 %v2277_v38, %v7753_v62 }
 0x68e   : > { %v3724_v53 = vadd.f32 %v7787_v15, %v3392_v21  ;;  %v2370_v15 = vadd.f32 %v2369_v12, %v2368_v24 }
 0x68f   : > { %v2239_v22 = vadd.f32 %v2238_v50, %v2237_v47  ;;  %v2887_v0 = vpop.permute.xlu1 %2886  ;;  %v2280_v46 = vadd.f32 %v2279_v9, %v2278_v31  ;;  %v7902_v47 = vld [vmem:[#allocation6] sm:$0xff] }
 0x690   : > { %3769 = vst.msk [vmem:[#allocation2 + $0x38] sm:$0xff] %vm3417_vm10, %v3724_v53  ;;  %v3641_v34 = vmul.f32 %v8574_v20, %v2887_v0  ;;  %v2310_v20 = vmul.f32 %v7437_v6, %v7783_v52  ;;  %v2372_v54 = vadd.f32 %v2371_v17, %v2370_v15  ;;  %v4125_v50 = vmul.f32 -1.442695, %v7902_v47 }
 0x691   : > { %v2240_v26 = vrot.slane %v2239_v22, 2  ;;  %v3732_v38 = vmul.f32 %v3724_v53, %v2955_v40 }
 0x692   : > { %v3654_v63 = vsel %vm3417_vm10, %v3641_v34, 0.0  ;;  %v2322_v6 = vsel %vm612_vm2, %v2310_v20, 0.0  ;;  %v2373_v52 = vrot.slane %v2372_v54, 4  ;;  %4703 = vpow2.f32 %v4125_v50 }
 0x693   : > { %v2241_v37 = vadd.f32 %v2240_v26, %v2239_v22  ;;  %v3655_v42 = vadd.f32 %v3654_v63, %v3653_v5  ;;  %v1517_v44 = vpop.permute.xlu1 %1516  ;;  %v2323_v45 = vadd.f32 %v2322_v6, %v7710_v39  ;;  %v3746_v53 = vsel %vm3417_vm10, %v3732_v38, 0.0 }
 0x694   : > { %v2267_v18 = vmul.f32 %v8600_v27, %v1517_v44  ;;  %v2374_v21 = vadd.f32 %v2373_v52, %v2372_v54 }
 0x695   : > { %v2242_v36 = vrot.slane %v2241_v37, 1  ;;  %v3657_v29 = vadd.f32 %v3656_v33, %v3655_v42  ;;  %v2325_v30 = vadd.f32 %v2324_v59, %v2323_v45 }
 0x696   : > { %v2281_v62 = vsel %vm612_vm2, %v2267_v18, 0.0  ;;  %v2375_v0 = vrot.slane %v2374_v21, 2 }
 0x697   : > { %v2243_v49 = vadd.f32 %v2242_v36, %v2241_v37  ;;  %v3658_v13 = vrot.slane %v3657_v29, 4  ;;  %v2282_v19 = vadd.f32 %v2281_v62, %v2280_v46  ;;  %v2859_v43 = vpop.permute.xlu1 %2858 }
 0x698   : > { %v3597_v1 = vmul.f32 %v7194_v14, %v2859_v43  ;;  %v2376_v37 = vadd.f32 %v2375_v0, %v2374_v21 }
 0x699   : > { %v2385_v2 = vsel %vm2384_vm13, %v2383_v3, %v2243_v49  ;;  %v3659_v60 = vadd.f32 %v3658_v13, %v3657_v29  ;;  %v2283_v55 = vrot.slane %v2282_v19, 4 }
 0x69a   : > { %v3611_v7 = vsel %vm3417_vm10, %v3597_v1, 0.0 }
 0x69b   : > { %v2284_v23 = vadd.f32 %v2283_v55, %v2282_v19  ;;  %v3612_v56 = vadd.f32 %v3611_v7, %v7857_v48  ;;  %v1549_v11 = vpop.permute.xlu1 %1548  ;;  %v3660_v32 = vrot.slane %v3659_v60, 2 }
 0x69c   : > { %v2312_v14 = vmul.f32 %v8602_v41, %v1549_v11  ;;  %v4704_v19 = vpop.eup %4703  ;;  %v4124_v41 = vld [vmem:[#allocation27] ss:$0 sm:$0xff] }
 0x69d   : > { %v2285_v3 = vrot.slane %v2284_v23, 2  ;;  %v3613_v51 = vrot.slane %v3612_v56, 4  ;;  %v3661_v48 = vadd.f32 %v3660_v32, %v3659_v60  ;;  %v3785_v59 = vadd.f32 1.0, %v4704_v19  ;;  %v3771_v32 = vld [vmem:[#allocation5] sm:$0xff] }
 0x69e   : > { %v2326_v16 = vsel %vm612_vm2, %v2312_v14, 0.0 }
 0x69f   : > { %v2286_v35 = vadd.f32 %v2285_v3, %v2284_v23  ;;  %v3614_v24 = vadd.f32 %v3613_v51, %v3612_v56  ;;  %v2327_v22 = vadd.f32 %v2326_v16, %v2325_v30  ;;  %v2951_v39 = vpop.permute.xlu1 %2950  ;;  %v3662_v42 = vrot.slane %v3661_v48, 1 }
 0x6a0   : > { %v3731_v57 = vmul.f32 %v7818_v28, %v2951_v39  ;;  %4705 = vrcp.f32 %v3785_v59  ;;  %v3779_v30 = vmul.f32 %v4124_v41, %v3771_v32 }
 0x6a1   : > { %v2287_v34 = vrot.slane %v2286_v35, 1  ;;  %v3615_v5 = vrot.slane %v3614_v24, 2  ;;  %v2328_v12 = vrot.slane %v2327_v22, 4  ;;  %v3663_v4 = vadd.f32 %v3662_v42, %v3661_v48 }
 0x6a2   : > { %v3744_v17 = vsel %vm3417_vm10, %v3731_v57, 0.0 }
 0x6a3   : > { %v2288_v26 = vadd.f32 %v2287_v34, %v2286_v35  ;;  %v3616_v9 = vadd.f32 %v3615_v5, %v3614_v24  ;;  %v2329_v15 = vadd.f32 %v2328_v12, %v2327_v22  ;;  %v3745_v63 = vadd.f32 %v3744_v17, %v7835_v8  ;;  %v2923_v31 = vpop.permute.xlu1 %2922  ;;  %v4713_v35 = vld [vmem:[%s5642_s12] sm:$0xff]  ;;  %s5196_s12 = smov [#allocation30]  }
 0x6a4   : > { %v3687_v44 = vmul.f32 %v7781_v61, %v2923_v31  ;;  %v2377_v8 = vrot.slane %v2376_v37, 1  ;;  %s5056_s21 = sshll.u32 %s5196_s12, 4  ;;  %s5057_s21 = int_to_ptr.vmem [resolvable:$false] %s5056_s21 }
 0x6a5   : > { %v2387_v28 = vsel %vm2386_vm14, %v2385_v2, %v2288_v26  ;;  %v3617_v20 = vrot.slane %v3616_v9, 1  ;;  %v2330_v33 = vrot.slane %v2329_v15, 2  ;;  %v3747_v54 = vadd.f32 %v3746_v53, %v3745_v63  ;;  %s5058_s30 = scalar_lea.vmem %s5057_s21, 256  ;;  %p5059_p2 = scmp.lt.s32.totalorder %s7937_s18, %s5057_s21 }
 0x6a6   : > { %v3701_v27 = vsel %vm3417_vm10, %v3687_v44, 0.0  ;;  %v2378_v1 = vadd.f32 %v2377_v8, %v2376_v37  ;;  %p5060_p4 = scmp.lt.s32.totalorder %s5058_s30, %s5052_s0 }
 0x6a7   : > { %v3618_v18 = vadd.f32 %v3617_v20, %v3616_v9  ;;  %v2331_v46 = vadd.f32 %v2330_v33, %v2329_v15  ;;  %v3748_v36 = vrot.slane %v3747_v54, 4  ;;  %v3702_v29 = vadd.f32 %v3701_v27, %v7846_v58 }
 0x6a8   : > { %p5061_p6 = por %p5060_p4, %p5059_p2 }
 0x6a9   : > { %v3757_v10 = vsel %vm2384_vm13, %v7860_v25, %v3618_v18  ;;  %v2332_v62 = vrot.slane %v2331_v46, 1  ;;  %v3749_v49 = vadd.f32 %v3748_v36, %v3747_v54  ;;  %v3703_v61 = vrot.slane %v3702_v29, 4 }
 0x6aa   : > { %v3758_v13 = vsel %vm2386_vm14, %v3757_v10, %v3663_v4  ;;  %v4706_v14 = vpop.eup %4705  ;;  %p5062_p5 = pnand %p5061_p6, %p5055_p11 }
 0x6ab   : > { %v2333_v43 = vadd.f32 %v2332_v62, %v2331_v46  ;;  %v3750_v6 = vrot.slane %v3749_v49, 2  ;;  %v3704_v52 = vadd.f32 %v3703_v61, %v3702_v29  ;;  %v3788_v50 = vmul.f32 %v4706_v14, %v7902_v47 }
 0x6ad   : > { %v2389_v2 = vsel %vm2388_vm15, %v2387_v28, %v2333_v43  ;;  %v3751_v58 = vadd.f32 %v3750_v6, %v3749_v49  ;;  %v3705_v60 = vrot.slane %v3704_v52, 2 }
 0x6ae   : > { %v2391_v55 = vsel %vm2390_vm0, %v2389_v2, %v2378_v1 }
 0x6af   : > { %2392 = vst.msk [vmem:[#allocation9] sm:$0xff] %vm612_vm2, %v2391_v55  ;;  %v3706_v25 = vadd.f32 %v3705_v60, %v3704_v52  ;;  %v3752_v7 = vrot.slane %v3751_v58, 1 }
 0x6b1   : > { %v3707_v45 = vrot.slane %v3706_v25, 1  ;;  %v3753_v56 = vadd.f32 %v3752_v7, %v3751_v58 }
 0x6b3   : > { %v3708_v23 = vadd.f32 %v3707_v45, %v3706_v25 }
 0x6b5   : > { %v3759_v11 = vsel %vm2388_vm15, %v3758_v13, %v3708_v23 }
 0x6b6   : > { %v3760_v21 = vsel %vm2390_vm0, %v3759_v11, %v3753_v56 }
 0x6b7   : > { %3761 = vst.msk [vmem:[#allocation9] sm:$0xff] %vm3417_vm10, %v3760_v21 }
 0x6be   : > { %v3770_v3 = vld [vmem:[#allocation9] sm:$0xff] }
 0x6bf   : > { %v3780_v51 = vadd.f32 %v3779_v30, %v3770_v3 }
 0x6c1   : > { %v3789_v16 = vmul.f32 %v3788_v50, %v3780_v51 }
 0x6c3   : > { %4237 = vmatmul.mubr.msk.f32.vlgmr.msra.gmra.mrb[2].mxu1 %vm710_vm5, %v3789_v16 }
 0x796   : > { %v3867_v40 = vpop.f32.mrb[2].mxu1 }
 0x797   : > { %v3868_v24 = vadd.f32 %v4713_v35, %v3867_v40  ;;  %v4238_v22 = vpop.f32.mrb[3].mxu1 }
 0x799   : > { %3871 = vst.msk [vmem:[%s5672_s6] sm:$0xff] %vm612_vm2, %v3868_v24 }
 0x79a   : > { %5065 = shalt.err (!%p5062_p5)
}
 0x79b   : > { %s5066_s2 = scalar_lea.hbm %s7935_s25, 128  ;;  %s5070_s15 = scalar_lea.hbm %s8605_s4, 512 }
 0x79c   : > { %p5067_p9 = scmp.ne.s32.totalorder %s7935_s25, %s5066_s2  ;;  %p5071_p1 = scmp.lt.u32.totalorder %s7935_s25, %s8605_s4 }
 0x79d   : > { %p5072_p13 = scmp.lt.u32.totalorder %s5070_s15, %s5066_s2  ;;  %p5074_p0 = scmp.lt.u32.totalorder %s5066_s2, %s7935_s25 }
 0x79e   : > { %p5068_p3 = pnand %p5067_p9, %p8606_p7 }
 0x79f   : > { %p5073_p12 = por %p5072_p13, %p5071_p1 }
 0x7a0   : > { %p5069_p10 = pneg %p5068_p3 }
 0x7a1   : > { %p5075_p8 = por %p5074_p0, %p5073_p12 }
 0x7a3   : > { %p5076_p11 = pnand %p5075_p8, %p5069_p10 }
 0x7a5   : > { %5079 = shalt.err (!%p5076_p11)
}
 0x7a6   : > { %4327 = dma.vmem_to_hbm [thread:$0]  (%p8606_p7), %s7937_s18, 128, %s7935_s25, %s3873_s22  }
 0x7a7 PF: > { %s8607_s17 = sld [smem:[#allocation39_spill]]  ;;  %p4394_p2 = scmp.ge.s32.totalorder %s5174_s28, 2 }
 0x7a8   : > { %p8608_p4 = scmp.ne.s32.totalorder %s8157_s14, 0 }
 0x7aa   : > { %p4368_p6 = pnand %p4394_p2, %p8608_p4 }
 0x7ad   : > { %s3900_s29 = sand.u32 1, %s8607_s17  }
 0x7ae   : > { %s3901_s0 = scalar_lea.sflag [#allocation12], %s3900_s29 }
 0x7af   : > { %5141 = dma.done.wait (!%p4368_p6), %s3901_s0, 128  }
 0x7b0   : > { %5143 = vsyncadd (!%p4368_p6), %s3901_s0, 4294967168  ;;  %s34_s28 = sadd.s32 1, %s5174_s28   ;;  %s8609_s21 = sld [smem:[#allocation40_spill]] }
 0x7b1   : > { %p31_p5 = scmp.ge.s32.totalorder %s34_s28, 6   ;;  %s8610_s20 = smov %s8618_s24 }
 0x7b2   : > { %s8611_s22 = smov %s5154_s23  ;;  %s8612_s23 = smov %s5593_s3 }
 0x7b3   : > { %s8613_s24 = smov %s5166_s26  ;;  %s8614_s25 = smov %s5170_s27 }
 0x7b4   : > { %s8615_s26 = smov %s8610_s20  ;;  %s8616_s27 = smov %s8622_s13 }
 0x7b5   :  { %33 = sbr.rel (!%p31_p5) target bundleno = 22 (0x16), region = 161 }
 0x7bc   :  { %3906 = vsyncpa [#allocation11], 1 }
 0x7bd   :  { %3908 = vsyncpa [#allocation11 + $0x1], 1 }
 0x7be   :  { %3909 = vsyncpa [#allocation14], 1 }
 0x7bf   :  { %3910 = vsyncpa [#allocation17], 1 }
 0x7c0   :  { %3911 = vsyncpa [#allocation20], 1 }
 0x7c1   :  { %3912 = vsyncpa [#allocation23], 1 }
 0x7c2   :  { %3913 = vsyncpa [#allocation26], 1 }
 0x7c3   :  { %3914 = vsyncpa [#allocation29], 1 }
 0x7c4   :  { %3915 = vsyncpa [#allocation12], 1 }
 0x7c5   :  { %3917 = vsyncpa [#allocation12 + $0x1], 1 }

</bundles_post_ra>
